<compile_context>
chip_gen: v5e
topology: v5e:2x2
jax: 0.10.0
libtpu: 0.0.40
codegen_flags: <defaults>
</compile_context>

<pallas_src>
import functools

import jax
import jax.numpy as jnp
from jax.experimental import pallas as pl
from jax.experimental.pallas import tpu as pltpu

COMPUTE_DTYPE = jnp.bfloat16   # bf16 MXU operands, f32 accumulation + f32 epilogue


# ------------------------------ fused kernel ---------------------------------

def _lenet_fused_kernel(p1_ref, w1_ref, b1_ref, m2_ref, b2_ref,
                        wf1_ref, bf1_ref, wf2_ref, bf2_ref, wf3_ref, bf3_ref,
                        o_ref, *, compute_dtype):
    """Whole Net forward for one batch tile.

    p1_ref : (4, B, 75, 196) conv1 pool-offset im2col patches (bf16)
    w1_ref : (6, 75)         conv1 weights, flattened (C,KH,KW)
    b1_ref : (1, 6, 1)       conv1 bias (f32)
    m2_ref : (24, 196, 400)  densified conv2(+pool-offset) operator per (q, c_in)
    b2_ref : (1, 400)        conv2 bias expanded to torch-flatten order (f32)
    wf*_ref/bf*_ref          pre-transposed fc weights (IN, OUT) / (1, OUT) biases
    o_ref  : (B, 10)         softmax probabilities (f32)
    """
    b = p1_ref.shape[1]

    # ---- conv1 + bias + ReLU + 2x2 max-pool (pool folded over the 4 offsets) ----
    w1 = jnp.broadcast_to(w1_ref[...][None], (b,) + w1_ref.shape)   # (B, 6, 75)
    acc = None
    for q in range(4):
        zq = jnp.einsum("bok,bks->bos", w1, p1_ref[q],
                        preferred_element_type=jnp.float32)          # (B, 6, 196)
        acc = zq if acc is None else jnp.maximum(acc, zq)
    a1 = jnp.maximum(acc + b1_ref[...], 0.0).astype(compute_dtype)   # (B, 6, 196)

    # ---- conv2 + bias + ReLU + 2x2 max-pool via densified operator -------------
    # h[b, oc*25 + ph*5 + pw]  ==  torch.flatten(pool(relu(conv2(.))), 1)
    h = None
    for q in range(4):
        t = jnp.dot(a1[:, 0, :], m2_ref[q * 6 + 0],
                    preferred_element_type=jnp.float32)              # (B, 400)
        for c in range(1, 6):
            t = t + jnp.dot(a1[:, c, :], m2_ref[q * 6 + c],
                            preferred_element_type=jnp.float32)
        h = t if h is None else jnp.maximum(h, t)
    h = jnp.maximum(h + b2_ref[...], 0.0).astype(compute_dtype)      # (B, 400)

    # ---- fc1 -> fc2 -> fc3 -> softmax (f32 epilogue, exact reciprocal) ---------
    z = jnp.dot(h, wf1_ref[...], preferred_element_type=jnp.float32) + bf1_ref[...]
    z = jnp.maximum(z, 0.0).astype(compute_dtype)
    z = jnp.dot(z, wf2_ref[...], preferred_element_type=jnp.float32) + bf2_ref[...]
    z = jnp.maximum(z, 0.0).astype(compute_dtype)
    z = jnp.dot(z, wf3_ref[...], preferred_element_type=jnp.float32) + bf3_ref[...]
    z = z - jnp.max(z, axis=-1, keepdims=True)
    e = jnp.exp(z)
    o_ref[...] = (e / jnp.sum(e, axis=-1, keepdims=True)).astype(o_ref.dtype)


# ------------------------------ wrappers --------------------------------------

def _build_pool_patches(x, kh, kw):
    """(N,C,H,W) -> (4, N, C*kh*kw, (OH//2)*(OW//2)) pool-offset im2col patches.

    Offset q = di*2 + dj selects conv-output positions (2*ph+di, 2*pw+dj), so the
    four patch matrices partition the conv output exactly into 2x2 pool windows.
    """
    n, c, h, w = x.shape
    oh, ow = h - kh + 1, w - kw + 1
    poh, pow_ = oh // 2, ow // 2
    offs = []
    for di in range(2):
        for dj in range(2):
            taps = []
            for i in range(kh):
                for j in range(kw):
                    r0, c0 = di + i, dj + j
                    taps.append(x[:, :, r0:r0 + 2 * poh - 1:2,
                                        c0:c0 + 2 * pow_ - 1:2])
            p = jnp.stack(taps, axis=2)                  # (N, C, kh*kw, POH, POW)
            offs.append(p.reshape(n, c * kh * kw, poh * pow_))
    return jnp.stack(offs, axis=0)                       # (4, N, K, S)


def _batch_tile(n):
    # Bounded tile (multiple of 8 for n >= 16); ragged batches are padded by caller.
    return 16 if n > 16 else n


def net_forward(params, x):
    """x: (N, 3, 32, 32) f32 -> softmax probs (N, 10) f32, single fused pallas_call."""
    n = x.shape[0]
    bt = _batch_tile(n)
    n_pad = ((n + bt - 1) // bt) * bt

    xb = x.astype(COMPUTE_DTYPE)
    if n_pad != n:
        xb = jnp.pad(xb, ((0, n_pad - n), (0, 0), (0, 0), (0, 0)))

    # TODO(synk): build the conv1 patches inside the kernel from the VMEM-resident
    # image to remove the remaining ~19x conv1 activation-read inflation.
    p1 = _build_pool_patches(xb, 5, 5)                    # (4, n_pad, 75, 196) bf16

    def full(a):
        nd = a.ndim
        return pl.BlockSpec(a.shape, lambda i, _nd=nd: (0,) * _nd)

    out = pl.pallas_call(
        functools.partial(_lenet_fused_kernel, compute_dtype=COMPUTE_DTYPE),
        out_shape=jax.ShapeDtypeStruct((n_pad, 10), jnp.float32),
        grid=(n_pad // bt,),
        in_specs=[
            pl.BlockSpec((4, bt, 75, 196), lambda i: (0, i, 0, 0)),
            full(params["conv1_w"]), full(params["conv1_b"]),
            full(params["conv2_m"]), full(params["conv2_b"]),
            full(params["fc1_w"]), full(params["fc1_b"]),
            full(params["fc2_w"]), full(params["fc2_b"]),
            full(params["fc3_w"]), full(params["fc3_b"]),
        ],
        out_specs=pl.BlockSpec((bt, 10), lambda i: (i, 0)),
        compiler_params=pltpu.CompilerParams(
            dimension_semantics=("parallel",),
            vmem_limit_bytes=32 * 1024 * 1024),
    )(p1, params["conv1_w"], params["conv1_b"],
      params["conv2_m"], params["conv2_b"],
      params["fc1_w"], params["fc1_b"],
      params["fc2_w"], params["fc2_b"],
      params["fc3_w"], params["fc3_b"])
    return out[:n]


# ------------------------------ Net parameters --------------------------------

def init_params(key):
    """Deterministic PyTorch-style (uniform +/- 1/sqrt(fan_in)) init, PyTorch layouts."""
    ks = jax.random.split(key, 10)

    def u(k, shape, fan_in):
        bound = 1.0 / (fan_in ** 0.5)
        return jax.random.uniform(k, shape, jnp.float32, -bound, bound)

    return {
        "conv1_w": u(ks[0], (6, 3, 5, 5), 3 * 5 * 5),
        "conv1_b": u(ks[1], (6,), 3 * 5 * 5),
        "conv2_w": u(ks[2], (16, 6, 5, 5), 6 * 5 * 5),
        "conv2_b": u(ks[3], (16,), 6 * 5 * 5),
        "fc1_w": u(ks[4], (120, 16 * 5 * 5), 16 * 5 * 5),
        "fc1_b": u(ks[5], (120,), 16 * 5 * 5),
        "fc2_w": u(ks[6], (84, 120), 120),
        "fc2_b": u(ks[7], (84,), 120),
        "fc3_w": u(ks[8], (10, 84), 84),
        "fc3_b": u(ks[9], (10,), 84),
    }


def prepare_params(raw, compute_dtype):
    """One-time layout prep OUTSIDE the jitted forward.

    conv2 (+ its 2x2 pool offsets) is densified into M2 so the fused kernel can apply
    it to the VMEM-resident conv1 output with plain 2D dots:
        M2[q*6 + c, y*14 + x, oc*25 + ph*5 + pw] = W2[oc, c, i, j]
        with q = di*2 + dj, y = 2*ph + di + i, x = 2*pw + dj + j.
    Its column order equals torch.flatten(x, 1) order, so fc1 applies directly.
    """
    cd = compute_dtype
    d2, y14, p5, i5 = (jnp.arange(2), jnp.arange(14), jnp.arange(5), jnp.arange(5))
    # sel[d, y, h, i] = 1.0 iff y == 2*h + d + i
    sel = (y14[None, :, None, None]
           == 2 * p5[None, None, :, None]
           + d2[:, None, None, None]
           + i5[None, None, None, :]).astype(jnp.float32)          # (2, 14, 5, 5)
    m2 = jnp.einsum("dyhi,exwj,ocij->decyxohw", sel, sel, raw["conv2_w"])
    m2 = m2.reshape(4 * 6, 14 * 14, 16 * 5 * 5)                    # (24, 196, 400)

    return {
        "conv1_w": raw["conv1_w"].reshape(6, -1).astype(cd),            # (6, 75)
        "conv1_b": raw["conv1_b"].reshape(1, 6, 1).astype(jnp.float32),
        "conv2_m": m2.astype(cd),                                        # (24,196,400)
        "conv2_b": jnp.repeat(raw["conv2_b"], 25).reshape(1, 400).astype(jnp.float32),
        "fc1_w": raw["fc1_w"].T.astype(cd),                              # (400, 120)
        "fc1_b": raw["fc1_b"].reshape(1, -1).astype(jnp.float32),
        "fc2_w": raw["fc2_w"].T.astype(cd),                              # (120, 84)
        "fc2_b": raw["fc2_b"].reshape(1, -1).astype(jnp.float32),
        "fc3_w": raw["fc3_w"].T.astype(cd),                              # (84, 10)
        "fc3_b": raw["fc3_b"].reshape(1, -1).astype(jnp.float32),
    }


# ------------------------------ pure-JAX reference ----------------------------

def net_forward_reference(raw, x):
    def conv(x, w, b):
        y = jax.lax.conv_general_dilated(
            x, w, window_strides=(1, 1), padding="VALID",
            dimension_numbers=("NCHW", "OIHW", "NCHW"))
        return jax.nn.relu(y + b[None, :, None, None])

    def pool(x):
        n, c, h, w = x.shape
        return jnp.max(x.reshape(n, c, h // 2, 2, w // 2, 2), axis=(3, 5))

    x = pool(conv(x, raw["conv1_w"], raw["conv1_b"]))
    x = pool(conv(x, raw["conv2_w"], raw["conv2_b"]))
    x = x.reshape(x.shape[0], -1)
    x = jax.nn.relu(x @ raw["fc1_w"].T + raw["fc1_b"])
    x = jax.nn.relu(x @ raw["fc2_w"].T + raw["fc2_b"])
    x = x @ raw["fc3_w"].T + raw["fc3_b"]
    return jax.nn.softmax(x, axis=-1)


# ---------------------------------- main ---------------------------------------

if __name__ == "__main__":
    key = jax.random.PRNGKey(0)
    pkey, xkey = jax.random.split(key)
    raw_params = init_params(pkey)
    params = prepare_params(raw_params, COMPUTE_DTYPE)   # one-time, outside jit

    # Small batch (single grid step).
    x = jax.random.normal(xkey, (2, 3, 32, 32), dtype=jnp.float32)
    out = jax.block_until_ready(jax.jit(net_forward)(params, x))
    assert out.shape == (2, 10), out.shape
    assert out.dtype == jnp.float32
    assert bool(jnp.all(jnp.abs(jnp.sum(out, axis=1) - 1.0) < 1e-3))
    ref = net_forward_reference(raw_params, x)
    max_err = float(jnp.max(jnp.abs(out - ref)))
    assert max_err < 5e-2, max_err

    # Ragged batch: exercises padding + multi-step "parallel" grid (B_TILE=16).
    x2 = jax.random.normal(jax.random.PRNGKey(1), (20, 3, 32, 32), dtype=jnp.float32)
    out2 = jax.block_until_ready(jax.jit(net_forward)(params, x2))
    assert out2.shape == (20, 10), out2.shape
    ref2 = net_forward_reference(raw_params, x2)
    max_err2 = float(jnp.max(jnp.abs(out2 - ref2)))
    assert max_err2 < 5e-2, max_err2

    print("KERNEL_OK")
</pallas_src>

<mosaic_0001>
module attributes {stable_mosaic.version = 11 : i64} {
  func.func @_lenet_fused_kernel(%arg0: i32, %arg1: memref<4x2x75x196xbf16, #tpu.memory_space<vmem>>, %arg2: memref<6x75xbf16, #tpu.memory_space<vmem>>, %arg3: memref<1x6x1xf32, #tpu.memory_space<vmem>>, %arg4: memref<24x196x400xbf16, #tpu.memory_space<vmem>>, %arg5: memref<1x400xf32, #tpu.memory_space<vmem>>, %arg6: memref<400x120xbf16, #tpu.memory_space<vmem>>, %arg7: memref<1x120xf32, #tpu.memory_space<vmem>>, %arg8: memref<120x84xbf16, #tpu.memory_space<vmem>>, %arg9: memref<1x84xf32, #tpu.memory_space<vmem>>, %arg10: memref<84x10xbf16, #tpu.memory_space<vmem>>, %arg11: memref<1x10xf32, #tpu.memory_space<vmem>>, %arg12: memref<2x10xf32, #tpu.memory_space<vmem>>) attributes {dimension_semantics = [#tpu.dimension_semantics<parallel>], iteration_bounds = array<i64: 1>, scalar_prefetch = 0 : i64, scratch_operands = 0 : i64, tpu.core_type = #tpu.core_type<tc>, window_params = [{transform_indices = @transform_0, window_bounds = array<i64: 4, 2, 75, 196>}, {pipeline_mode = #tpu.pipeline_mode<synchronous>, transform_indices = @transform_1, window_bounds = array<i64: 6, 75>}, {pipeline_mode = #tpu.pipeline_mode<synchronous>, transform_indices = @transform_2, window_bounds = array<i64: 1, 6, 1>}, {pipeline_mode = #tpu.pipeline_mode<synchronous>, transform_indices = @transform_3, window_bounds = array<i64: 24, 196, 400>}, {pipeline_mode = #tpu.pipeline_mode<synchronous>, transform_indices = @transform_4, window_bounds = array<i64: 1, 400>}, {pipeline_mode = #tpu.pipeline_mode<synchronous>, transform_indices = @transform_5, window_bounds = array<i64: 400, 120>}, {pipeline_mode = #tpu.pipeline_mode<synchronous>, transform_indices = @transform_6, window_bounds = array<i64: 1, 120>}, {pipeline_mode = #tpu.pipeline_mode<synchronous>, transform_indices = @transform_7, window_bounds = array<i64: 120, 84>}, {pipeline_mode = #tpu.pipeline_mode<synchronous>, transform_indices = @transform_8, window_bounds = array<i64: 1, 84>}, {pipeline_mode = #tpu.pipeline_mode<synchronous>, transform_indices = @transform_9, window_bounds = array<i64: 84, 10>}, {pipeline_mode = #tpu.pipeline_mode<synchronous>, transform_indices = @transform_10, window_bounds = array<i64: 1, 10>}, {transform_indices = @transform_11, window_bounds = array<i64: 2, 10>}]} {
    %c0 = arith.constant 0 : index
    %c0_0 = arith.constant 0 : index
    %0 = vector.load %arg2[%c0, %c0_0] : memref<6x75xbf16, #tpu.memory_space<vmem>>, vector<6x75xbf16>
    %1 = vector.shape_cast %0 : vector<6x75xbf16> to vector<1x6x75xbf16>
    %2 = vector.shape_cast %1 : vector<1x6x75xbf16> to vector<1x6x75xbf16>
    %3 = vector.broadcast %2 : vector<1x6x75xbf16> to vector<2x6x75xbf16>
    %c0_1 = arith.constant 0 : index
    %c0_2 = arith.constant 0 : index
    %c0_3 = arith.constant 0 : index
    %c0_4 = arith.constant 0 : index
    %4 = vector.load %arg1[%c0_1, %c0_2, %c0_3, %c0_4] : memref<4x2x75x196xbf16, #tpu.memory_space<vmem>>, vector<1x2x75x196xbf16>
    %5 = vector.shape_cast %4 : vector<1x2x75x196xbf16> to vector<2x75x196xbf16>
    "tpu.trace_start"() <{level = 10 : i32, message = "bok,bks->bos"}> : () -> ()
    %cst = arith.constant dense<0.000000e+00> : vector<2x6x196xf32>
    %6 = tpu.matmul %3, %5, %cst {dimension_numbers = #tpu.dot_dimension_numbers<[2], [1], [1], [2], [0, 0, 0, 1, 1, 2], [0], [0]>} : vector<2x6x75xbf16>, vector<2x75x196xbf16>, vector<2x6x196xf32> -> vector<2x6x196xf32>
    "tpu.trace_stop"() : () -> ()
    %c1 = arith.constant 1 : index
    %c0_5 = arith.constant 0 : index
    %c0_6 = arith.constant 0 : index
    %c0_7 = arith.constant 0 : index
    %7 = vector.load %arg1[%c1, %c0_5, %c0_6, %c0_7] : memref<4x2x75x196xbf16, #tpu.memory_space<vmem>>, vector<1x2x75x196xbf16>
    %8 = vector.shape_cast %7 : vector<1x2x75x196xbf16> to vector<2x75x196xbf16>
    "tpu.trace_start"() <{level = 10 : i32, message = "bok,bks->bos"}> : () -> ()
    %cst_8 = arith.constant dense<0.000000e+00> : vector<2x6x196xf32>
    %9 = tpu.matmul %3, %8, %cst_8 {dimension_numbers = #tpu.dot_dimension_numbers<[2], [1], [1], [2], [0, 0, 0, 1, 1, 2], [0], [0]>} : vector<2x6x75xbf16>, vector<2x75x196xbf16>, vector<2x6x196xf32> -> vector<2x6x196xf32>
    "tpu.trace_stop"() : () -> ()
    %10 = arith.maximumf %6, %9 : vector<2x6x196xf32>
    %c2 = arith.constant 2 : index
    %c0_9 = arith.constant 0 : index
    %c0_10 = arith.constant 0 : index
    %c0_11 = arith.constant 0 : index
    %11 = vector.load %arg1[%c2, %c0_9, %c0_10, %c0_11] : memref<4x2x75x196xbf16, #tpu.memory_space<vmem>>, vector<1x2x75x196xbf16>
    %12 = vector.shape_cast %11 : vector<1x2x75x196xbf16> to vector<2x75x196xbf16>
    "tpu.trace_start"() <{level = 10 : i32, message = "bok,bks->bos"}> : () -> ()
    %cst_12 = arith.constant dense<0.000000e+00> : vector<2x6x196xf32>
    %13 = tpu.matmul %3, %12, %cst_12 {dimension_numbers = #tpu.dot_dimension_numbers<[2], [1], [1], [2], [0, 0, 0, 1, 1, 2], [0], [0]>} : vector<2x6x75xbf16>, vector<2x75x196xbf16>, vector<2x6x196xf32> -> vector<2x6x196xf32>
    "tpu.trace_stop"() : () -> ()
    %14 = arith.maximumf %10, %13 : vector<2x6x196xf32>
    %c3 = arith.constant 3 : index
    %c0_13 = arith.constant 0 : index
    %c0_14 = arith.constant 0 : index
    %c0_15 = arith.constant 0 : index
    %15 = vector.load %arg1[%c3, %c0_13, %c0_14, %c0_15] : memref<4x2x75x196xbf16, #tpu.memory_space<vmem>>, vector<1x2x75x196xbf16>
    %16 = vector.shape_cast %15 : vector<1x2x75x196xbf16> to vector<2x75x196xbf16>
    "tpu.trace_start"() <{level = 10 : i32, message = "bok,bks->bos"}> : () -> ()
    %cst_16 = arith.constant dense<0.000000e+00> : vector<2x6x196xf32>
    %17 = tpu.matmul %3, %16, %cst_16 {dimension_numbers = #tpu.dot_dimension_numbers<[2], [1], [1], [2], [0, 0, 0, 1, 1, 2], [0], [0]>} : vector<2x6x75xbf16>, vector<2x75x196xbf16>, vector<2x6x196xf32> -> vector<2x6x196xf32>
    "tpu.trace_stop"() : () -> ()
    %18 = arith.maximumf %14, %17 : vector<2x6x196xf32>
    %c0_17 = arith.constant 0 : index
    %c0_18 = arith.constant 0 : index
    %c0_19 = arith.constant 0 : index
    %19 = vector.load %arg3[%c0_17, %c0_18, %c0_19] : memref<1x6x1xf32, #tpu.memory_space<vmem>>, vector<1x6x1xf32>
    %20 = vector.broadcast %19 : vector<1x6x1xf32> to vector<2x6x196xf32>
    %21 = arith.addf %18, %20 : vector<2x6x196xf32>
    %cst_20 = arith.constant 0.000000e+00 : f32
    %22 = vector.broadcast %cst_20 : f32 to vector<2x6x196xf32>
    %23 = arith.maximumf %21, %22 : vector<2x6x196xf32>
    %24 = arith.truncf %23 : vector<2x6x196xf32> to vector<2x6x196xbf16>
    %25 = vector.extract_strided_slice %24 {offsets = [0, 0, 0], sizes = [2, 1, 196], strides = [1, 1, 1]} : vector<2x6x196xbf16> to vector<2x1x196xbf16>
    %26 = vector.shape_cast %25 : vector<2x1x196xbf16> to vector<2x196xbf16>
    %c0_21 = arith.constant 0 : index
    %c0_22 = arith.constant 0 : index
    %c0_23 = arith.constant 0 : index
    %27 = vector.load %arg4[%c0_21, %c0_22, %c0_23] : memref<24x196x400xbf16, #tpu.memory_space<vmem>>, vector<1x196x400xbf16>
    %28 = vector.shape_cast %27 : vector<1x196x400xbf16> to vector<196x400xbf16>
    %cst_24 = arith.constant dense<0.000000e+00> : vector<2x400xf32>
    %29 = tpu.matmul %26, %28, %cst_24 {dimension_numbers = #tpu.dot_dimension_numbers<[1], [0], [0], [1], [0, 0, 1, 1], [], []>} : vector<2x196xbf16>, vector<196x400xbf16>, vector<2x400xf32> -> vector<2x400xf32>
    %30 = vector.extract_strided_slice %24 {offsets = [0, 1, 0], sizes = [2, 1, 196], strides = [1, 1, 1]} : vector<2x6x196xbf16> to vector<2x1x196xbf16>
    %31 = vector.shape_cast %30 : vector<2x1x196xbf16> to vector<2x196xbf16>
    %c1_25 = arith.constant 1 : index
    %c0_26 = arith.constant 0 : index
    %c0_27 = arith.constant 0 : index
    %32 = vector.load %arg4[%c1_25, %c0_26, %c0_27] : memref<24x196x400xbf16, #tpu.memory_space<vmem>>, vector<1x196x400xbf16>
    %33 = vector.shape_cast %32 : vector<1x196x400xbf16> to vector<196x400xbf16>
    %cst_28 = arith.constant dense<0.000000e+00> : vector<2x400xf32>
    %34 = tpu.matmul %31, %33, %cst_28 {dimension_numbers = #tpu.dot_dimension_numbers<[1], [0], [0], [1], [0, 0, 1, 1], [], []>} : vector<2x196xbf16>, vector<196x400xbf16>, vector<2x400xf32> -> vector<2x400xf32>
    %35 = arith.addf %29, %34 : vector<2x400xf32>
    %36 = vector.extract_strided_slice %24 {offsets = [0, 2, 0], sizes = [2, 1, 196], strides = [1, 1, 1]} : vector<2x6x196xbf16> to vector<2x1x196xbf16>
    %37 = vector.shape_cast %36 : vector<2x1x196xbf16> to vector<2x196xbf16>
    %c2_29 = arith.constant 2 : index
    %c0_30 = arith.constant 0 : index
    %c0_31 = arith.constant 0 : index
    %38 = vector.load %arg4[%c2_29, %c0_30, %c0_31] : memref<24x196x400xbf16, #tpu.memory_space<vmem>>, vector<1x196x400xbf16>
    %39 = vector.shape_cast %38 : vector<1x196x400xbf16> to vector<196x400xbf16>
    %cst_32 = arith.constant dense<0.000000e+00> : vector<2x400xf32>
    %40 = tpu.matmul %37, %39, %cst_32 {dimension_numbers = #tpu.dot_dimension_numbers<[1], [0], [0], [1], [0, 0, 1, 1], [], []>} : vector<2x196xbf16>, vector<196x400xbf16>, vector<2x400xf32> -> vector<2x400xf32>
    %41 = arith.addf %35, %40 : vector<2x400xf32>
    %42 = vector.extract_strided_slice %24 {offsets = [0, 3, 0], sizes = [2, 1, 196], strides = [1, 1, 1]} : vector<2x6x196xbf16> to vector<2x1x196xbf16>
    %43 = vector.shape_cast %42 : vector<2x1x196xbf16> to vector<2x196xbf16>
    %c3_33 = arith.constant 3 : index
    %c0_34 = arith.constant 0 : index
    %c0_35 = arith.constant 0 : index
    %44 = vector.load %arg4[%c3_33, %c0_34, %c0_35] : memref<24x196x400xbf16, #tpu.memory_space<vmem>>, vector<1x196x400xbf16>
    %45 = vector.shape_cast %44 : vector<1x196x400xbf16> to vector<196x400xbf16>
    %cst_36 = arith.constant dense<0.000000e+00> : vector<2x400xf32>
    %46 = tpu.matmul %43, %45, %cst_36 {dimension_numbers = #tpu.dot_dimension_numbers<[1], [0], [0], [1], [0, 0, 1, 1], [], []>} : vector<2x196xbf16>, vector<196x400xbf16>, vector<2x400xf32> -> vector<2x400xf32>
    %47 = arith.addf %41, %46 : vector<2x400xf32>
    %48 = vector.extract_strided_slice %24 {offsets = [0, 4, 0], sizes = [2, 1, 196], strides = [1, 1, 1]} : vector<2x6x196xbf16> to vector<2x1x196xbf16>
    %49 = vector.shape_cast %48 : vector<2x1x196xbf16> to vector<2x196xbf16>
    %c4 = arith.constant 4 : index
    %c0_37 = arith.constant 0 : index
    %c0_38 = arith.constant 0 : index
    %50 = vector.load %arg4[%c4, %c0_37, %c0_38] : memref<24x196x400xbf16, #tpu.memory_space<vmem>>, vector<1x196x400xbf16>
    %51 = vector.shape_cast %50 : vector<1x196x400xbf16> to vector<196x400xbf16>
    %cst_39 = arith.constant dense<0.000000e+00> : vector<2x400xf32>
    %52 = tpu.matmul %49, %51, %cst_39 {dimension_numbers = #tpu.dot_dimension_numbers<[1], [0], [0], [1], [0, 0, 1, 1], [], []>} : vector<2x196xbf16>, vector<196x400xbf16>, vector<2x400xf32> -> vector<2x400xf32>
    %53 = arith.addf %47, %52 : vector<2x400xf32>
    %54 = vector.extract_strided_slice %24 {offsets = [0, 5, 0], sizes = [2, 1, 196], strides = [1, 1, 1]} : vector<2x6x196xbf16> to vector<2x1x196xbf16>
    %55 = vector.shape_cast %54 : vector<2x1x196xbf16> to vector<2x196xbf16>
    %c5 = arith.constant 5 : index
    %c0_40 = arith.constant 0 : index
    %c0_41 = arith.constant 0 : index
    %56 = vector.load %arg4[%c5, %c0_40, %c0_41] : memref<24x196x400xbf16, #tpu.memory_space<vmem>>, vector<1x196x400xbf16>
    %57 = vector.shape_cast %56 : vector<1x196x400xbf16> to vector<196x400xbf16>
    %cst_42 = arith.constant dense<0.000000e+00> : vector<2x400xf32>
    %58 = tpu.matmul %55, %57, %cst_42 {dimension_numbers = #tpu.dot_dimension_numbers<[1], [0], [0], [1], [0, 0, 1, 1], [], []>} : vector<2x196xbf16>, vector<196x400xbf16>, vector<2x400xf32> -> vector<2x400xf32>
    %59 = arith.addf %53, %58 : vector<2x400xf32>
    %60 = vector.extract_strided_slice %24 {offsets = [0, 0, 0], sizes = [2, 1, 196], strides = [1, 1, 1]} : vector<2x6x196xbf16> to vector<2x1x196xbf16>
    %61 = vector.shape_cast %60 : vector<2x1x196xbf16> to vector<2x196xbf16>
    %c6 = arith.constant 6 : index
    %c0_43 = arith.constant 0 : index
    %c0_44 = arith.constant 0 : index
    %62 = vector.load %arg4[%c6, %c0_43, %c0_44] : memref<24x196x400xbf16, #tpu.memory_space<vmem>>, vector<1x196x400xbf16>
    %63 = vector.shape_cast %62 : vector<1x196x400xbf16> to vector<196x400xbf16>
    %cst_45 = arith.constant dense<0.000000e+00> : vector<2x400xf32>
    %64 = tpu.matmul %61, %63, %cst_45 {dimension_numbers = #tpu.dot_dimension_numbers<[1], [0], [0], [1], [0, 0, 1, 1], [], []>} : vector<2x196xbf16>, vector<196x400xbf16>, vector<2x400xf32> -> vector<2x400xf32>
    %65 = vector.extract_strided_slice %24 {offsets = [0, 1, 0], sizes = [2, 1, 196], strides = [1, 1, 1]} : vector<2x6x196xbf16> to vector<2x1x196xbf16>
    %66 = vector.shape_cast %65 : vector<2x1x196xbf16> to vector<2x196xbf16>
    %c7 = arith.constant 7 : index
    %c0_46 = arith.constant 0 : index
    %c0_47 = arith.constant 0 : index
    %67 = vector.load %arg4[%c7, %c0_46, %c0_47] : memref<24x196x400xbf16, #tpu.memory_space<vmem>>, vector<1x196x400xbf16>
    %68 = vector.shape_cast %67 : vector<1x196x400xbf16> to vector<196x400xbf16>
    %cst_48 = arith.constant dense<0.000000e+00> : vector<2x400xf32>
    %69 = tpu.matmul %66, %68, %cst_48 {dimension_numbers = #tpu.dot_dimension_numbers<[1], [0], [0], [1], [0, 0, 1, 1], [], []>} : vector<2x196xbf16>, vector<196x400xbf16>, vector<2x400xf32> -> vector<2x400xf32>
    %70 = arith.addf %64, %69 : vector<2x400xf32>
    %71 = vector.extract_strided_slice %24 {offsets = [0, 2, 0], sizes = [2, 1, 196], strides = [1, 1, 1]} : vector<2x6x196xbf16> to vector<2x1x196xbf16>
    %72 = vector.shape_cast %71 : vector<2x1x196xbf16> to vector<2x196xbf16>
    %c8 = arith.constant 8 : index
    %c0_49 = arith.constant 0 : index
    %c0_50 = arith.constant 0 : index
    %73 = vector.load %arg4[%c8, %c0_49, %c0_50] : memref<24x196x400xbf16, #tpu.memory_space<vmem>>, vector<1x196x400xbf16>
    %74 = vector.shape_cast %73 : vector<1x196x400xbf16> to vector<196x400xbf16>
    %cst_51 = arith.constant dense<0.000000e+00> : vector<2x400xf32>
    %75 = tpu.matmul %72, %74, %cst_51 {dimension_numbers = #tpu.dot_dimension_numbers<[1], [0], [0], [1], [0, 0, 1, 1], [], []>} : vector<2x196xbf16>, vector<196x400xbf16>, vector<2x400xf32> -> vector<2x400xf32>
    %76 = arith.addf %70, %75 : vector<2x400xf32>
    %77 = vector.extract_strided_slice %24 {offsets = [0, 3, 0], sizes = [2, 1, 196], strides = [1, 1, 1]} : vector<2x6x196xbf16> to vector<2x1x196xbf16>
    %78 = vector.shape_cast %77 : vector<2x1x196xbf16> to vector<2x196xbf16>
    %c9 = arith.constant 9 : index
    %c0_52 = arith.constant 0 : index
    %c0_53 = arith.constant 0 : index
    %79 = vector.load %arg4[%c9, %c0_52, %c0_53] : memref<24x196x400xbf16, #tpu.memory_space<vmem>>, vector<1x196x400xbf16>
    %80 = vector.shape_cast %79 : vector<1x196x400xbf16> to vector<196x400xbf16>
    %cst_54 = arith.constant dense<0.000000e+00> : vector<2x400xf32>
    %81 = tpu.matmul %78, %80, %cst_54 {dimension_numbers = #tpu.dot_dimension_numbers<[1], [0], [0], [1], [0, 0, 1, 1], [], []>} : vector<2x196xbf16>, vector<196x400xbf16>, vector<2x400xf32> -> vector<2x400xf32>
    %82 = arith.addf %76, %81 : vector<2x400xf32>
    %83 = vector.extract_strided_slice %24 {offsets = [0, 4, 0], sizes = [2, 1, 196], strides = [1, 1, 1]} : vector<2x6x196xbf16> to vector<2x1x196xbf16>
    %84 = vector.shape_cast %83 : vector<2x1x196xbf16> to vector<2x196xbf16>
    %c10 = arith.constant 10 : index
    %c0_55 = arith.constant 0 : index
    %c0_56 = arith.constant 0 : index
    %85 = vector.load %arg4[%c10, %c0_55, %c0_56] : memref<24x196x400xbf16, #tpu.memory_space<vmem>>, vector<1x196x400xbf16>
    %86 = vector.shape_cast %85 : vector<1x196x400xbf16> to vector<196x400xbf16>
    %cst_57 = arith.constant dense<0.000000e+00> : vector<2x400xf32>
    %87 = tpu.matmul %84, %86, %cst_57 {dimension_numbers = #tpu.dot_dimension_numbers<[1], [0], [0], [1], [0, 0, 1, 1], [], []>} : vector<2x196xbf16>, vector<196x400xbf16>, vector<2x400xf32> -> vector<2x400xf32>
    %88 = arith.addf %82, %87 : vector<2x400xf32>
    %89 = vector.extract_strided_slice %24 {offsets = [0, 5, 0], sizes = [2, 1, 196], strides = [1, 1, 1]} : vector<2x6x196xbf16> to vector<2x1x196xbf16>
    %90 = vector.shape_cast %89 : vector<2x1x196xbf16> to vector<2x196xbf16>
    %c11 = arith.constant 11 : index
    %c0_58 = arith.constant 0 : index
    %c0_59 = arith.constant 0 : index
    %91 = vector.load %arg4[%c11, %c0_58, %c0_59] : memref<24x196x400xbf16, #tpu.memory_space<vmem>>, vector<1x196x400xbf16>
    %92 = vector.shape_cast %91 : vector<1x196x400xbf16> to vector<196x400xbf16>
    %cst_60 = arith.constant dense<0.000000e+00> : vector<2x400xf32>
    %93 = tpu.matmul %90, %92, %cst_60 {dimension_numbers = #tpu.dot_dimension_numbers<[1], [0], [0], [1], [0, 0, 1, 1], [], []>} : vector<2x196xbf16>, vector<196x400xbf16>, vector<2x400xf32> -> vector<2x400xf32>
    %94 = arith.addf %88, %93 : vector<2x400xf32>
    %95 = arith.maximumf %59, %94 : vector<2x400xf32>
    %96 = vector.extract_strided_slice %24 {offsets = [0, 0, 0], sizes = [2, 1, 196], strides = [1, 1, 1]} : vector<2x6x196xbf16> to vector<2x1x196xbf16>
    %97 = vector.shape_cast %96 : vector<2x1x196xbf16> to vector<2x196xbf16>
    %c12 = arith.constant 12 : index
    %c0_61 = arith.constant 0 : index
    %c0_62 = arith.constant 0 : index
    %98 = vector.load %arg4[%c12, %c0_61, %c0_62] : memref<24x196x400xbf16, #tpu.memory_space<vmem>>, vector<1x196x400xbf16>
    %99 = vector.shape_cast %98 : vector<1x196x400xbf16> to vector<196x400xbf16>
    %cst_63 = arith.constant dense<0.000000e+00> : vector<2x400xf32>
    %100 = tpu.matmul %97, %99, %cst_63 {dimension_numbers = #tpu.dot_dimension_numbers<[1], [0], [0], [1], [0, 0, 1, 1], [], []>} : vector<2x196xbf16>, vector<196x400xbf16>, vector<2x400xf32> -> vector<2x400xf32>
    %101 = vector.extract_strided_slice %24 {offsets = [0, 1, 0], sizes = [2, 1, 196], strides = [1, 1, 1]} : vector<2x6x196xbf16> to vector<2x1x196xbf16>
    %102 = vector.shape_cast %101 : vector<2x1x196xbf16> to vector<2x196xbf16>
    %c13 = arith.constant 13 : index
    %c0_64 = arith.constant 0 : index
    %c0_65 = arith.constant 0 : index
    %103 = vector.load %arg4[%c13, %c0_64, %c0_65] : memref<24x196x400xbf16, #tpu.memory_space<vmem>>, vector<1x196x400xbf16>
    %104 = vector.shape_cast %103 : vector<1x196x400xbf16> to vector<196x400xbf16>
    %cst_66 = arith.constant dense<0.000000e+00> : vector<2x400xf32>
    %105 = tpu.matmul %102, %104, %cst_66 {dimension_numbers = #tpu.dot_dimension_numbers<[1], [0], [0], [1], [0, 0, 1, 1], [], []>} : vector<2x196xbf16>, vector<196x400xbf16>, vector<2x400xf32> -> vector<2x400xf32>
    %106 = arith.addf %100, %105 : vector<2x400xf32>
    %107 = vector.extract_strided_slice %24 {offsets = [0, 2, 0], sizes = [2, 1, 196], strides = [1, 1, 1]} : vector<2x6x196xbf16> to vector<2x1x196xbf16>
    %108 = vector.shape_cast %107 : vector<2x1x196xbf16> to vector<2x196xbf16>
    %c14 = arith.constant 14 : index
    %c0_67 = arith.constant 0 : index
    %c0_68 = arith.constant 0 : index
    %109 = vector.load %arg4[%c14, %c0_67, %c0_68] : memref<24x196x400xbf16, #tpu.memory_space<vmem>>, vector<1x196x400xbf16>
    %110 = vector.shape_cast %109 : vector<1x196x400xbf16> to vector<196x400xbf16>
    %cst_69 = arith.constant dense<0.000000e+00> : vector<2x400xf32>
    %111 = tpu.matmul %108, %110, %cst_69 {dimension_numbers = #tpu.dot_dimension_numbers<[1], [0], [0], [1], [0, 0, 1, 1], [], []>} : vector<2x196xbf16>, vector<196x400xbf16>, vector<2x400xf32> -> vector<2x400xf32>
    %112 = arith.addf %106, %111 : vector<2x400xf32>
    %113 = vector.extract_strided_slice %24 {offsets = [0, 3, 0], sizes = [2, 1, 196], strides = [1, 1, 1]} : vector<2x6x196xbf16> to vector<2x1x196xbf16>
    %114 = vector.shape_cast %113 : vector<2x1x196xbf16> to vector<2x196xbf16>
    %c15 = arith.constant 15 : index
    %c0_70 = arith.constant 0 : index
    %c0_71 = arith.constant 0 : index
    %115 = vector.load %arg4[%c15, %c0_70, %c0_71] : memref<24x196x400xbf16, #tpu.memory_space<vmem>>, vector<1x196x400xbf16>
    %116 = vector.shape_cast %115 : vector<1x196x400xbf16> to vector<196x400xbf16>
    %cst_72 = arith.constant dense<0.000000e+00> : vector<2x400xf32>
    %117 = tpu.matmul %114, %116, %cst_72 {dimension_numbers = #tpu.dot_dimension_numbers<[1], [0], [0], [1], [0, 0, 1, 1], [], []>} : vector<2x196xbf16>, vector<196x400xbf16>, vector<2x400xf32> -> vector<2x400xf32>
    %118 = arith.addf %112, %117 : vector<2x400xf32>
    %119 = vector.extract_strided_slice %24 {offsets = [0, 4, 0], sizes = [2, 1, 196], strides = [1, 1, 1]} : vector<2x6x196xbf16> to vector<2x1x196xbf16>
    %120 = vector.shape_cast %119 : vector<2x1x196xbf16> to vector<2x196xbf16>
    %c16 = arith.constant 16 : index
    %c0_73 = arith.constant 0 : index
    %c0_74 = arith.constant 0 : index
    %121 = vector.load %arg4[%c16, %c0_73, %c0_74] : memref<24x196x400xbf16, #tpu.memory_space<vmem>>, vector<1x196x400xbf16>
    %122 = vector.shape_cast %121 : vector<1x196x400xbf16> to vector<196x400xbf16>
    %cst_75 = arith.constant dense<0.000000e+00> : vector<2x400xf32>
    %123 = tpu.matmul %120, %122, %cst_75 {dimension_numbers = #tpu.dot_dimension_numbers<[1], [0], [0], [1], [0, 0, 1, 1], [], []>} : vector<2x196xbf16>, vector<196x400xbf16>, vector<2x400xf32> -> vector<2x400xf32>
    %124 = arith.addf %118, %123 : vector<2x400xf32>
    %125 = vector.extract_strided_slice %24 {offsets = [0, 5, 0], sizes = [2, 1, 196], strides = [1, 1, 1]} : vector<2x6x196xbf16> to vector<2x1x196xbf16>
    %126 = vector.shape_cast %125 : vector<2x1x196xbf16> to vector<2x196xbf16>
    %c17 = arith.constant 17 : index
    %c0_76 = arith.constant 0 : index
    %c0_77 = arith.constant 0 : index
    %127 = vector.load %arg4[%c17, %c0_76, %c0_77] : memref<24x196x400xbf16, #tpu.memory_space<vmem>>, vector<1x196x400xbf16>
    %128 = vector.shape_cast %127 : vector<1x196x400xbf16> to vector<196x400xbf16>
    %cst_78 = arith.constant dense<0.000000e+00> : vector<2x400xf32>
    %129 = tpu.matmul %126, %128, %cst_78 {dimension_numbers = #tpu.dot_dimension_numbers<[1], [0], [0], [1], [0, 0, 1, 1], [], []>} : vector<2x196xbf16>, vector<196x400xbf16>, vector<2x400xf32> -> vector<2x400xf32>
    %130 = arith.addf %124, %129 : vector<2x400xf32>
    %131 = arith.maximumf %95, %130 : vector<2x400xf32>
    %132 = vector.extract_strided_slice %24 {offsets = [0, 0, 0], sizes = [2, 1, 196], strides = [1, 1, 1]} : vector<2x6x196xbf16> to vector<2x1x196xbf16>
    %133 = vector.shape_cast %132 : vector<2x1x196xbf16> to vector<2x196xbf16>
    %c18 = arith.constant 18 : index
    %c0_79 = arith.constant 0 : index
    %c0_80 = arith.constant 0 : index
    %134 = vector.load %arg4[%c18, %c0_79, %c0_80] : memref<24x196x400xbf16, #tpu.memory_space<vmem>>, vector<1x196x400xbf16>
    %135 = vector.shape_cast %134 : vector<1x196x400xbf16> to vector<196x400xbf16>
    %cst_81 = arith.constant dense<0.000000e+00> : vector<2x400xf32>
    %136 = tpu.matmul %133, %135, %cst_81 {dimension_numbers = #tpu.dot_dimension_numbers<[1], [0], [0], [1], [0, 0, 1, 1], [], []>} : vector<2x196xbf16>, vector<196x400xbf16>, vector<2x400xf32> -> vector<2x400xf32>
    %137 = vector.extract_strided_slice %24 {offsets = [0, 1, 0], sizes = [2, 1, 196], strides = [1, 1, 1]} : vector<2x6x196xbf16> to vector<2x1x196xbf16>
    %138 = vector.shape_cast %137 : vector<2x1x196xbf16> to vector<2x196xbf16>
    %c19 = arith.constant 19 : index
    %c0_82 = arith.constant 0 : index
    %c0_83 = arith.constant 0 : index
    %139 = vector.load %arg4[%c19, %c0_82, %c0_83] : memref<24x196x400xbf16, #tpu.memory_space<vmem>>, vector<1x196x400xbf16>
    %140 = vector.shape_cast %139 : vector<1x196x400xbf16> to vector<196x400xbf16>
    %cst_84 = arith.constant dense<0.000000e+00> : vector<2x400xf32>
    %141 = tpu.matmul %138, %140, %cst_84 {dimension_numbers = #tpu.dot_dimension_numbers<[1], [0], [0], [1], [0, 0, 1, 1], [], []>} : vector<2x196xbf16>, vector<196x400xbf16>, vector<2x400xf32> -> vector<2x400xf32>
    %142 = arith.addf %136, %141 : vector<2x400xf32>
    %143 = vector.extract_strided_slice %24 {offsets = [0, 2, 0], sizes = [2, 1, 196], strides = [1, 1, 1]} : vector<2x6x196xbf16> to vector<2x1x196xbf16>
    %144 = vector.shape_cast %143 : vector<2x1x196xbf16> to vector<2x196xbf16>
    %c20 = arith.constant 20 : index
    %c0_85 = arith.constant 0 : index
    %c0_86 = arith.constant 0 : index
    %145 = vector.load %arg4[%c20, %c0_85, %c0_86] : memref<24x196x400xbf16, #tpu.memory_space<vmem>>, vector<1x196x400xbf16>
    %146 = vector.shape_cast %145 : vector<1x196x400xbf16> to vector<196x400xbf16>
    %cst_87 = arith.constant dense<0.000000e+00> : vector<2x400xf32>
    %147 = tpu.matmul %144, %146, %cst_87 {dimension_numbers = #tpu.dot_dimension_numbers<[1], [0], [0], [1], [0, 0, 1, 1], [], []>} : vector<2x196xbf16>, vector<196x400xbf16>, vector<2x400xf32> -> vector<2x400xf32>
    %148 = arith.addf %142, %147 : vector<2x400xf32>
    %149 = vector.extract_strided_slice %24 {offsets = [0, 3, 0], sizes = [2, 1, 196], strides = [1, 1, 1]} : vector<2x6x196xbf16> to vector<2x1x196xbf16>
    %150 = vector.shape_cast %149 : vector<2x1x196xbf16> to vector<2x196xbf16>
    %c21 = arith.constant 21 : index
    %c0_88 = arith.constant 0 : index
    %c0_89 = arith.constant 0 : index
    %151 = vector.load %arg4[%c21, %c0_88, %c0_89] : memref<24x196x400xbf16, #tpu.memory_space<vmem>>, vector<1x196x400xbf16>
    %152 = vector.shape_cast %151 : vector<1x196x400xbf16> to vector<196x400xbf16>
    %cst_90 = arith.constant dense<0.000000e+00> : vector<2x400xf32>
    %153 = tpu.matmul %150, %152, %cst_90 {dimension_numbers = #tpu.dot_dimension_numbers<[1], [0], [0], [1], [0, 0, 1, 1], [], []>} : vector<2x196xbf16>, vector<196x400xbf16>, vector<2x400xf32> -> vector<2x400xf32>
    %154 = arith.addf %148, %153 : vector<2x400xf32>
    %155 = vector.extract_strided_slice %24 {offsets = [0, 4, 0], sizes = [2, 1, 196], strides = [1, 1, 1]} : vector<2x6x196xbf16> to vector<2x1x196xbf16>
    %156 = vector.shape_cast %155 : vector<2x1x196xbf16> to vector<2x196xbf16>
    %c22 = arith.constant 22 : index
    %c0_91 = arith.constant 0 : index
    %c0_92 = arith.constant 0 : index
    %157 = vector.load %arg4[%c22, %c0_91, %c0_92] : memref<24x196x400xbf16, #tpu.memory_space<vmem>>, vector<1x196x400xbf16>
    %158 = vector.shape_cast %157 : vector<1x196x400xbf16> to vector<196x400xbf16>
    %cst_93 = arith.constant dense<0.000000e+00> : vector<2x400xf32>
    %159 = tpu.matmul %156, %158, %cst_93 {dimension_numbers = #tpu.dot_dimension_numbers<[1], [0], [0], [1], [0, 0, 1, 1], [], []>} : vector<2x196xbf16>, vector<196x400xbf16>, vector<2x400xf32> -> vector<2x400xf32>
    %160 = arith.addf %154, %159 : vector<2x400xf32>
    %161 = vector.extract_strided_slice %24 {offsets = [0, 5, 0], sizes = [2, 1, 196], strides = [1, 1, 1]} : vector<2x6x196xbf16> to vector<2x1x196xbf16>
    %162 = vector.shape_cast %161 : vector<2x1x196xbf16> to vector<2x196xbf16>
    %c23 = arith.constant 23 : index
    %c0_94 = arith.constant 0 : index
    %c0_95 = arith.constant 0 : index
    %163 = vector.load %arg4[%c23, %c0_94, %c0_95] : memref<24x196x400xbf16, #tpu.memory_space<vmem>>, vector<1x196x400xbf16>
    %164 = vector.shape_cast %163 : vector<1x196x400xbf16> to vector<196x400xbf16>
    %cst_96 = arith.constant dense<0.000000e+00> : vector<2x400xf32>
    %165 = tpu.matmul %162, %164, %cst_96 {dimension_numbers = #tpu.dot_dimension_numbers<[1], [0], [0], [1], [0, 0, 1, 1], [], []>} : vector<2x196xbf16>, vector<196x400xbf16>, vector<2x400xf32> -> vector<2x400xf32>
    %166 = arith.addf %160, %165 : vector<2x400xf32>
    %167 = arith.maximumf %131, %166 : vector<2x400xf32>
    %c0_97 = arith.constant 0 : index
    %c0_98 = arith.constant 0 : index
    %168 = vector.load %arg5[%c0_97, %c0_98] : memref<1x400xf32, #tpu.memory_space<vmem>>, vector<1x400xf32>
    %169 = vector.broadcast %168 : vector<1x400xf32> to vector<2x400xf32>
    %170 = arith.addf %167, %169 : vector<2x400xf32>
    %cst_99 = arith.constant 0.000000e+00 : f32
    %171 = vector.broadcast %cst_99 : f32 to vector<2x400xf32>
    %172 = arith.maximumf %170, %171 : vector<2x400xf32>
    %173 = arith.truncf %172 : vector<2x400xf32> to vector<2x400xbf16>
    %c0_100 = arith.constant 0 : index
    %c0_101 = arith.constant 0 : index
    %174 = vector.load %arg6[%c0_100, %c0_101] : memref<400x120xbf16, #tpu.memory_space<vmem>>, vector<400x120xbf16>
    %cst_102 = arith.constant dense<0.000000e+00> : vector<2x120xf32>
    %175 = tpu.matmul %173, %174, %cst_102 {dimension_numbers = #tpu.dot_dimension_numbers<[1], [0], [0], [1], [0, 0, 1, 1], [], []>} : vector<2x400xbf16>, vector<400x120xbf16>, vector<2x120xf32> -> vector<2x120xf32>
    %c0_103 = arith.constant 0 : index
    %c0_104 = arith.constant 0 : index
    %176 = vector.load %arg7[%c0_103, %c0_104] : memref<1x120xf32, #tpu.memory_space<vmem>>, vector<1x120xf32>
    %177 = vector.broadcast %176 : vector<1x120xf32> to vector<2x120xf32>
    %178 = arith.addf %175, %177 : vector<2x120xf32>
    %cst_105 = arith.constant 0.000000e+00 : f32
    %179 = vector.broadcast %cst_105 : f32 to vector<2x120xf32>
    %180 = arith.maximumf %178, %179 : vector<2x120xf32>
    %181 = arith.truncf %180 : vector<2x120xf32> to vector<2x120xbf16>
    %c0_106 = arith.constant 0 : index
    %c0_107 = arith.constant 0 : index
    %182 = vector.load %arg8[%c0_106, %c0_107] : memref<120x84xbf16, #tpu.memory_space<vmem>>, vector<120x84xbf16>
    %cst_108 = arith.constant dense<0.000000e+00> : vector<2x84xf32>
    %183 = tpu.matmul %181, %182, %cst_108 {dimension_numbers = #tpu.dot_dimension_numbers<[1], [0], [0], [1], [0, 0, 1, 1], [], []>} : vector<2x120xbf16>, vector<120x84xbf16>, vector<2x84xf32> -> vector<2x84xf32>
    %c0_109 = arith.constant 0 : index
    %c0_110 = arith.constant 0 : index
    %184 = vector.load %arg9[%c0_109, %c0_110] : memref<1x84xf32, #tpu.memory_space<vmem>>, vector<1x84xf32>
    %185 = vector.broadcast %184 : vector<1x84xf32> to vector<2x84xf32>
    %186 = arith.addf %183, %185 : vector<2x84xf32>
    %cst_111 = arith.constant 0.000000e+00 : f32
    %187 = vector.broadcast %cst_111 : f32 to vector<2x84xf32>
    %188 = arith.maximumf %186, %187 : vector<2x84xf32>
    %189 = arith.truncf %188 : vector<2x84xf32> to vector<2x84xbf16>
    %c0_112 = arith.constant 0 : index
    %c0_113 = arith.constant 0 : index
    %190 = vector.load %arg10[%c0_112, %c0_113] : memref<84x10xbf16, #tpu.memory_space<vmem>>, vector<84x10xbf16>
    %cst_114 = arith.constant dense<0.000000e+00> : vector<2x10xf32>
    %191 = tpu.matmul %189, %190, %cst_114 {dimension_numbers = #tpu.dot_dimension_numbers<[1], [0], [0], [1], [0, 0, 1, 1], [], []>} : vector<2x84xbf16>, vector<84x10xbf16>, vector<2x10xf32> -> vector<2x10xf32>
    %c0_115 = arith.constant 0 : index
    %c0_116 = arith.constant 0 : index
    %192 = vector.load %arg11[%c0_115, %c0_116] : memref<1x10xf32, #tpu.memory_space<vmem>>, vector<1x10xf32>
    %193 = vector.broadcast %192 : vector<1x10xf32> to vector<2x10xf32>
    %194 = arith.addf %191, %193 : vector<2x10xf32>
    %cst_117 = arith.constant dense<0xFF800000> : vector<2xf32>
    %195 = vector.multi_reduction <maximumf>, %194, %cst_117 [1] : vector<2x10xf32> to vector<2xf32>
    %196 = vector.shape_cast %195 : vector<2xf32> to vector<2x1xf32>
    %197 = vector.broadcast %196 : vector<2x1xf32> to vector<2x10xf32>
    %198 = arith.subf %194, %197 : vector<2x10xf32>
    %199 = math.exp %198 : vector<2x10xf32>
    %cst_118 = arith.constant dense<0.000000e+00> : vector<2xf32>
    %200 = vector.multi_reduction <add>, %199, %cst_118 [1] : vector<2x10xf32> to vector<2xf32>
    %201 = vector.shape_cast %200 : vector<2xf32> to vector<2x1xf32>
    %202 = vector.broadcast %201 : vector<2x1xf32> to vector<2x10xf32>
    %203 = arith.divf %199, %202 : vector<2x10xf32>
    %c0_119 = arith.constant 0 : index
    %c0_120 = arith.constant 0 : index
    %204 = vector.load %arg12[%c0_119, %c0_120] : memref<2x10xf32, #tpu.memory_space<vmem>>, vector<2x10xf32>
    tpu.vector_store %arg12[%c0_119, %c0_120], %203 {strides = array<i32>} : memref<2x10xf32, #tpu.memory_space<vmem>>, vector<2x10xf32>,
    return
  }
  func.func @transform_0(%arg0: i32) -> (i32, i32, i32, i32) {
    %c0_i32 = arith.constant 0 : i32
    %c0_i32_0 = arith.constant 0 : i32
    %c0_i32_1 = arith.constant 0 : i32
    %c0_i32_2 = arith.constant 0 : i32
    return %c0_i32, %arg0, %c0_i32_0, %c0_i32_1 : i32, i32, i32, i32
  }
  func.func @transform_1(%arg0: i32) -> (i32, i32) {
    %c0_i32 = arith.constant 0 : i32
    %c0_i32_0 = arith.constant 0 : i32
    %c0_i32_1 = arith.constant 0 : i32
    return %c0_i32, %c0_i32_0 : i32, i32
  }
  func.func @transform_2(%arg0: i32) -> (i32, i32, i32) {
    %c0_i32 = arith.constant 0 : i32
    %c0_i32_0 = arith.constant 0 : i32
    %c0_i32_1 = arith.constant 0 : i32
    %c0_i32_2 = arith.constant 0 : i32
    return %c0_i32, %c0_i32_0, %c0_i32_1 : i32, i32, i32
  }
  func.func @transform_3(%arg0: i32) -> (i32, i32, i32) {
    %c0_i32 = arith.constant 0 : i32
    %c0_i32_0 = arith.constant 0 : i32
    %c0_i32_1 = arith.constant 0 : i32
    %c0_i32_2 = arith.constant 0 : i32
    return %c0_i32, %c0_i32_0, %c0_i32_1 : i32, i32, i32
  }
  func.func @transform_4(%arg0: i32) -> (i32, i32) {
    %c0_i32 = arith.constant 0 : i32
    %c0_i32_0 = arith.constant 0 : i32
    %c0_i32_1 = arith.constant 0 : i32
    return %c0_i32, %c0_i32_0 : i32, i32
  }
  func.func @transform_5(%arg0: i32) -> (i32, i32) {
    %c0_i32 = arith.constant 0 : i32
    %c0_i32_0 = arith.constant 0 : i32
    %c0_i32_1 = arith.constant 0 : i32
    return %c0_i32, %c0_i32_0 : i32, i32
  }
  func.func @transform_6(%arg0: i32) -> (i32, i32) {
    %c0_i32 = arith.constant 0 : i32
    %c0_i32_0 = arith.constant 0 : i32
    %c0_i32_1 = arith.constant 0 : i32
    return %c0_i32, %c0_i32_0 : i32, i32
  }
  func.func @transform_7(%arg0: i32) -> (i32, i32) {
    %c0_i32 = arith.constant 0 : i32
    %c0_i32_0 = arith.constant 0 : i32
    %c0_i32_1 = arith.constant 0 : i32
    return %c0_i32, %c0_i32_0 : i32, i32
  }
  func.func @transform_8(%arg0: i32) -> (i32, i32) {
    %c0_i32 = arith.constant 0 : i32
    %c0_i32_0 = arith.constant 0 : i32
    %c0_i32_1 = arith.constant 0 : i32
    return %c0_i32, %c0_i32_0 : i32, i32
  }
  func.func @transform_9(%arg0: i32) -> (i32, i32) {
    %c0_i32 = arith.constant 0 : i32
    %c0_i32_0 = arith.constant 0 : i32
    %c0_i32_1 = arith.constant 0 : i32
    return %c0_i32, %c0_i32_0 : i32, i32
  }
  func.func @transform_10(%arg0: i32) -> (i32, i32) {
    %c0_i32 = arith.constant 0 : i32
    %c0_i32_0 = arith.constant 0 : i32
    %c0_i32_1 = arith.constant 0 : i32
    return %c0_i32, %c0_i32_0 : i32, i32
  }
  func.func @transform_11(%arg0: i32) -> (i32, i32) {
    %c0_i32 = arith.constant 0 : i32
    %c0_i32_0 = arith.constant 0 : i32
    return %arg0, %c0_i32 : i32, i32
  }
}

</mosaic_0001>

<bundles_post_ra>
// kernel: net_forward.1
= control target key start
LH: loop header
LB: loop body
LE: loop exit
PB: predicated region body
PF: predicated region fallthrough
CT: control target
= control target key end

     0   :  { %vm113_vm0 = vcmask 1044480   ;;  %vm114_vm1 = vcmask 1045504   ;;  %v19160_v5 = vmov 65535   ;;  %vm109_vm2 = vcmask 613376   ;;  %s27863_s0 = inlined_call_operand.vmem [shape: bf16[4,2,75,196], index: 0, kind: input, shape index: {}]   ;;  %s27864_s1 = inlined_call_operand.vmem [shape: bf16[6,75], index: 1, kind: input, shape index: {}]   ;;  %s27865_s2 = inlined_call_operand.vmem [shape: f32[1,6,1], index: 2, kind: input, shape index: {}]   ;;  %s27866_s3 = inlined_call_operand.vmem [shape: bf16[24,196,400], index: 3, kind: input, shape index: {}]   ;;  %s27867_s4 = inlined_call_operand.vmem [shape: f32[1,400], index: 4, kind: input, shape index: {}]   ;;  %s27868_s5 = inlined_call_operand.vmem [shape: bf16[400,120], index: 5, kind: input, shape index: {}]   ;;  %s27869_s6 = inlined_call_operand.vmem [shape: f32[1,120], index: 6, kind: input, shape index: {}]   ;;  %s27870_s7 = inlined_call_operand.vmem [shape: bf16[120,84], index: 7, kind: input, shape index: {}]   ;;  %s27871_s8 = inlined_call_operand.vmem [shape: f32[1,84], index: 8, kind: input, shape index: {}]   ;;  %s27872_s9 = inlined_call_operand.vmem [shape: bf16[84,10], index: 9, kind: input, shape index: {}]   ;;  %s27873_s10 = inlined_call_operand.vmem [shape: f32[1,10], index: 10, kind: input, shape index: {}]   ;;  %s27874_s11 = inlined_call_operand.hbm [shape: f32[2,10], index: 11, kind: output, shape index: {}]  }
   0x1   :  { %v11483_v0 = vld [vmem:[%s27863_s0 + $0x40] sm:$0xf]  ;;  %v17863_v1 = vld [vmem:[%s27863_s0 + $0x44] sm:$0x30]  ;;  %v17862_v3 = vld [vmem:[%s27863_s0 + $0x44] sm:$0xf] }
   0x2   :  { %v11484_v2 = vor.u32 %v17863_v1, %v11483_v0  ;;  %v11485_v4 = vld [vmem:[%s27863_s0 + $0x48] sm:$0x30]  ;;  %v115_v6 = vsel %vm113_vm0, 4294967295, %v19160_v5  ;;  %v11525_v8 = vld [vmem:[%s27863_s0 + $0x90] sm:$0xf] }
   0x3   :  { %v11488_v7 = vor.u32 %v17862_v3, %v11485_v4  ;;  %v17873_v9 = vld [vmem:[%s27863_s0 + $0x94] sm:$0x30]  ;;  %v19241_v10 = vsel %vm114_vm1, %v115_v6, 0  ;;  %v17872_v12 = vld [vmem:[%s27863_s0 + $0x94] sm:$0xf] }
   0x4   :  { %v11526_v11 = vor.u32 %v17873_v9, %v11525_v8  ;;  %v11527_v13 = vld [vmem:[%s27863_s0 + $0x98] sm:$0x30]  ;;  %v118_v14 = vand.u32 %v11484_v2, %v19241_v10  ;;  %v11475_v17 = vld [vmem:[%s27863_s0 + $0x30] sm:$0xf]  ;;  %v17861_v18 = vld [vmem:[%s27863_s0 + $0x34] sm:$0xf0] }
   0x5   :  { %v121_v15 = vand.u32 %v11488_v7, %v19241_v10  ;;  %v11530_v16 = vor.u32 %v17872_v12, %v11527_v13  ;;  %v17860_v19 = vld [vmem:[%s27863_s0 + $0x34] sm:$0xf]  ;;  %v11477_v21 = vld [vmem:[%s27863_s0 + $0x38] sm:$0xf0]  ;;  %v11517_v22 = vld [vmem:[%s27863_s0 + $0x80] sm:$0xf]  ;;  %v11476_v25 = vor.u32 %v17861_v18, %v11475_v17 }
   0x6   :  { %v198_v20 = vand.u32 %v11526_v11, %v19241_v10  ;;  %v17871_v23 = vld [vmem:[%s27863_s0 + $0x84] sm:$0xf0]  ;;  %126 = vmatpush.bf16.msra.mxu0 %v118_v14  ;;  %v11480_v26 = vor.u32 %v17860_v19, %v11477_v21  ;;  %v17870_v27 = vld [vmem:[%s27863_s0 + $0x84] sm:$0xf]  ;;  %v11519_v28 = vld [vmem:[%s27863_s0 + $0x88] sm:$0xf0] }
   0x7   :  { %139 = vmatpush.bf16.msra.mxu1 %v121_v15  ;;  %v201_v24 = vand.u32 %v11530_v16, %v19241_v10  ;;  %v11467_v29 = vld [vmem:[%s27863_s0 + $0x20] sm:$0xf]  ;;  %v11518_v30 = vor.u32 %v17871_v23, %v11517_v22  ;;  %v17859_v31 = vld [vmem:[%s27863_s0 + $0x24] sm:$0xf0]  ;;  %v17858_v32 = vld [vmem:[%s27863_s0 + $0x24] sm:$0xf]  ;;  %v11522_v34 = vor.u32 %v17870_v27, %v11519_v28 }
   0x8   :  { %206 = vmatpush.bf16.msra.mxu2 %v198_v20  ;;  %v11469_v33 = vld [vmem:[%s27863_s0 + $0x28] sm:$0xf0]  ;;  %v11509_v35 = vld [vmem:[%s27863_s0 + $0x70] sm:$0xf]  ;;  %v17869_v36 = vld [vmem:[%s27863_s0 + $0x74] sm:$0xf0]  ;;  %v11468_v39 = vor.u32 %v17859_v31, %v11467_v29 }
   0x9   :  { %219 = vmatpush.bf16.msra.mxu3 %v201_v24  ;;  %v17868_v37 = vld [vmem:[%s27863_s0 + $0x74] sm:$0xf]  ;;  %v11511_v38 = vld [vmem:[%s27863_s0 + $0x78] sm:$0xf0]  ;;  %v11472_v40 = vor.u32 %v17858_v32, %v11469_v33  ;;  %v11459_v41 = vld [vmem:[%s27863_s0 + $0x10] sm:$0xf]  ;;  %v11510_v43 = vor.u32 %v17869_v36, %v11509_v35 }
   0xa   :  { %127 = vmatpush.bf16.msra.mxu0 %v11476_v25  ;;  %v17857_v42 = vld [vmem:[%s27863_s0 + $0x14] sm:$0xf0]  ;;  %v17856_v44 = vld [vmem:[%s27863_s0 + $0x14] sm:$0xf]  ;;  %v11461_v45 = vld [vmem:[%s27863_s0 + $0x18] sm:$0xf0]  ;;  %v11514_v47 = vor.u32 %v17868_v37, %v11511_v38 }
   0xb   :  { %140 = vmatpush.bf16.msra.mxu1 %v11480_v26  ;;  %v11501_v46 = vld [vmem:[%s27863_s0 + $0x60] sm:$0xf]  ;;  %v17867_v48 = vld [vmem:[%s27863_s0 + $0x64] sm:$0xf0]  ;;  %v17866_v49 = vld [vmem:[%s27863_s0 + $0x64] sm:$0xf]  ;;  %v11460_v55 = vor.u32 %v17857_v42, %v11459_v41  ;;  %v11464_v56 = vor.u32 %v17856_v44, %v11461_v45 }
   0xc   :  { %207 = vmatpush.bf16.msra.mxu2 %v11518_v30  ;;  %v11503_v50 = vld [vmem:[%s27863_s0 + $0x68] sm:$0xf0]  ;;  %v11451_v51 = vld [vmem:[%s27863_s0] sm:$0xf]  ;;  %v17855_v52 = vld [vmem:[%s27863_s0 + $0x4] sm:$0xf0]  ;;  %v11502_v60 = vor.u32 %v17867_v48, %v11501_v46 }
   0xd   :  { %220 = vmatpush.bf16.msra.mxu3 %v11522_v34  ;;  %v17854_v53 = vld [vmem:[%s27863_s0 + $0x4] sm:$0xf]  ;;  %v11453_v54 = vld [vmem:[%s27863_s0 + $0x8] sm:$0xf0]  ;;  %v11493_v57 = vld [vmem:[%s27863_s0 + $0x50] sm:$0xf]  ;;  %v11506_v0 = vor.u32 %v17866_v49, %v11503_v50  ;;  %v11452_v11 = vor.u32 %v17855_v52, %v11451_v51 }
   0xe   :  { %128 = vmatpush.bf16.msra.mxu0 %v11468_v39  ;;  %v17865_v58 = vld [vmem:[%s27863_s0 + $0x54] sm:$0xf0]  ;;  %v11587_v59 = vld [vmem:[%s27863_s0 + $0xe0] sm:$0xf]  ;;  %v17883_v61 = vld [vmem:[%s27863_s0 + $0xe4] sm:$0x30]  ;;  %v11456_v12 = vor.u32 %v17854_v53, %v11453_v54 }
   0xf   :  { %141 = vmatpush.bf16.msra.mxu1 %v11472_v40  ;;  %v17882_v62 = vld [vmem:[%s27863_s0 + $0xe4] sm:$0xf]  ;;  %v11589_v63 = vld [vmem:[%s27863_s0 + $0xe8] sm:$0x30]  ;;  %v11588_v1 = vor.u32 %v17883_v61, %v11587_v59  ;;  %v11629_v3 = vld [vmem:[%s27863_s0 + $0x130] sm:$0xf]  ;;  %v11494_v14 = vor.u32 %v17865_v58, %v11493_v57 }
  0x10   :  { %208 = vmatpush.bf16.msra.mxu2 %v11510_v43  ;;  %v11592_v2 = vor.u32 %v17882_v62, %v11589_v63  ;;  %v17893_v4 = vld [vmem:[%s27863_s0 + $0x134] sm:$0x30]  ;;  %v17892_v5 = vld [vmem:[%s27863_s0 + $0x134] sm:$0xf]  ;;  %v11495_v7 = vld [vmem:[%s27863_s0 + $0x58] sm:$0xf0] }
  0x11   :  { %221 = vmatpush.bf16.msra.mxu3 %v11514_v47  ;;  %v17864_v6 = vld [vmem:[%s27863_s0 + $0x54] sm:$0xf]  ;;  %v11630_v8 = vor.u32 %v17893_v4, %v11629_v3  ;;  %v11631_v9 = vld [vmem:[%s27863_s0 + $0x138] sm:$0x30]  ;;  %v299_v15 = vand.u32 %v11588_v1, %v19241_v10  ;;  %v11579_v18 = vld [vmem:[%s27863_s0 + $0xd0] sm:$0xf] }
  0x12   :  { %129 = vmatpush.bf16.msra.mxu0 %v11460_v55  ;;  %v11634_v13 = vor.u32 %v17892_v5, %v11631_v9  ;;  %v11498_v16 = vor.u32 %v17864_v6, %v11495_v7  ;;  %v302_v17 = vand.u32 %v11592_v2, %v19241_v10  ;;  %v17881_v19 = vld [vmem:[%s27863_s0 + $0xd4] sm:$0xf0]  ;;  %v17880_v22 = vld [vmem:[%s27863_s0 + $0xd4] sm:$0xf]  ;;  %v11581_v23 = vld [vmem:[%s27863_s0 + $0xd8] sm:$0xf0] }
  0x13   :  { %142 = vmatpush.bf16.msra.mxu1 %v11464_v56  ;;  %v379_v20 = vand.u32 %v11630_v8, %v19241_v10  ;;  %v11621_v24 = vld [vmem:[%s27863_s0 + $0x120] sm:$0xf]  ;;  %v17891_v25 = vld [vmem:[%s27863_s0 + $0x124] sm:$0xf0]  ;;  %v17890_v26 = vld [vmem:[%s27863_s0 + $0x124] sm:$0xf]  ;;  %v11580_v29 = vor.u32 %v17881_v19, %v11579_v18  ;;  %v11584_v30 = vor.u32 %v17880_v22, %v11581_v23 }
  0x14   :  { %209 = vmatpush.bf16.msra.mxu2 %v11502_v60  ;;  %v382_v21 = vand.u32 %v11634_v13, %v19241_v10  ;;  %v11623_v27 = vld [vmem:[%s27863_s0 + $0x128] sm:$0xf0]  ;;  %v19404_v28 = vld [vmem:[%s27864_s1] sm:$0x7]  ;;  %v17879_v32 = vld [vmem:[%s27863_s0 + $0xc4] sm:$0xf0]  ;;  %v11622_v33 = vor.u32 %v17891_v25, %v11621_v24 }
  0x15   :  { %222 = vmatpush.bf16.msra.mxu3 %v11506_v0  ;;  %v11571_v31 = vld [vmem:[%s27863_s0 + $0xc0] sm:$0xf]  ;;  %v11626_v34 = vor.u32 %v17890_v26, %v11623_v27  ;;  %v17878_v35 = vld [vmem:[%s27863_s0 + $0xc4] sm:$0xf]  ;;  %v11573_v36 = vld [vmem:[%s27863_s0 + $0xc8] sm:$0xf0] }
  0x16   :  { %130 = vmatpush.bf16.msra.mxu0 %v11452_v11  ;;  %v11613_v37 = vld [vmem:[%s27863_s0 + $0x110] sm:$0xf]  ;;  %v17889_v38 = vld [vmem:[%s27863_s0 + $0x114] sm:$0xf0]  ;;  %v17888_v39 = vld [vmem:[%s27863_s0 + $0x114] sm:$0xf]  ;;  %v11572_v42 = vor.u32 %v17879_v32, %v11571_v31  ;;  %v11576_v43 = vor.u32 %v17878_v35, %v11573_v36 }
  0x17   :  { %143 = vmatpush.bf16.msra.mxu1 %v11456_v12  ;;  %v11615_v40 = vld [vmem:[%s27863_s0 + $0x118] sm:$0xf0]  ;;  %v11563_v41 = vld [vmem:[%s27863_s0 + $0xb0] sm:$0xf]  ;;  %v17877_v44 = vld [vmem:[%s27863_s0 + $0xb4] sm:$0xf0]  ;;  %v11614_v47 = vor.u32 %v17889_v38, %v11613_v37 }
  0x18   :  { %210 = vmatpush.bf16.msra.mxu2 %v11494_v14  ;;  %v17876_v45 = vld [vmem:[%s27863_s0 + $0xb4] sm:$0xf]  ;;  %v11565_v46 = vld [vmem:[%s27863_s0 + $0xb8] sm:$0xf0]  ;;  %v11618_v48 = vor.u32 %v17888_v39, %v11615_v40  ;;  %v11605_v49 = vld [vmem:[%s27863_s0 + $0x100] sm:$0xf]  ;;  %v11564_v60 = vor.u32 %v17877_v44, %v11563_v41 }
  0x19   :  { %223 = vmatpush.bf16.msra.mxu3 %v11498_v16  ;;  %11489 = vmatmul.msk.bf16.vlgmr.msra.gmra.mxu0 %vm109_vm2, %v19404_v28  ;;  %v17887_v50 = vld [vmem:[%s27863_s0 + $0x104] sm:$0xf0]  ;;  %v17886_v51 = vld [vmem:[%s27863_s0 + $0x104] sm:$0xf]  ;;  %v11607_v52 = vld [vmem:[%s27863_s0 + $0x108] sm:$0xf0]  ;;  %v11568_v61 = vor.u32 %v17876_v45, %v11565_v46 }
  0x1a   :  { %307 = vmatpush.bf16.msrb.mxu0 %v299_v15  ;;  %11490 = vmatmul.msk.bf16.vlgmr.msra.gmra.mxu1 %vm109_vm2, %v19404_v28  ;;  %v11691_v53 = vld [vmem:[%s27863_s0 + $0x180] sm:$0xf]  ;;  %v17903_v54 = vld [vmem:[%s27863_s0 + $0x184] sm:$0x30]  ;;  %v17902_v57 = vld [vmem:[%s27863_s0 + $0x184] sm:$0xf]  ;;  %v11606_v1 = vor.u32 %v17887_v50, %v11605_v49  ;;  %v11610_v2 = vor.u32 %v17886_v51, %v11607_v52 }
  0x1b   :  { %320 = vmatpush.bf16.msrb.mxu1 %v302_v17  ;;  %11531 = vmatmul.msk.bf16.vlgmr.msra.gmra.mxu2 %vm109_vm2, %v19404_v28  ;;  %v11555_v55 = vld [vmem:[%s27863_s0 + $0xa0] sm:$0xf]  ;;  %v17875_v56 = vld [vmem:[%s27863_s0 + $0xa4] sm:$0xf0]  ;;  %v11693_v58 = vld [vmem:[%s27863_s0 + $0x188] sm:$0x30]  ;;  %v11692_v9 = vor.u32 %v17903_v54, %v11691_v53 }
  0x1c   :  { %387 = vmatpush.bf16.msrb.mxu2 %v379_v20  ;;  %11532 = vmatmul.msk.bf16.vlgmr.msra.gmra.mxu3 %vm109_vm2, %v19404_v28  ;;  %v11733_v59 = vld [vmem:[%s27863_s0 + $0x1d0] sm:$0xf]  ;;  %v17913_v62 = vld [vmem:[%s27863_s0 + $0x1d4] sm:$0x30]  ;;  %v17912_v63 = vld [vmem:[%s27863_s0 + $0x1d4] sm:$0xf]  ;;  %v11696_v11 = vor.u32 %v17902_v57, %v11693_v58  ;;  %v11556_v14 = vor.u32 %v17875_v56, %v11555_v55 }
  0x1d   :  { %400 = vmatpush.bf16.msrb.mxu3 %v382_v21  ;;  %v11735_v0 = vld [vmem:[%s27863_s0 + $0x1d8] sm:$0x30]  ;;  %v17874_v3 = vld [vmem:[%s27863_s0 + $0xa4] sm:$0xf]  ;;  %v11557_v4 = vld [vmem:[%s27863_s0 + $0xa8] sm:$0xf0]  ;;  %v11734_v12 = vor.u32 %v17913_v62, %v11733_v59  ;;  %v484_v18 = vand.u32 %v11692_v9, %v19241_v10 }
  0x1e   :  { %308 = vmatpush.bf16.msrb.mxu0 %v11580_v29  ;;  %v11597_v5 = vld [vmem:[%s27863_s0 + $0xf0] sm:$0xf]  ;;  %v17885_v6 = vld [vmem:[%s27863_s0 + $0xf4] sm:$0xf0]  ;;  %v17884_v7 = vld [vmem:[%s27863_s0 + $0xf4] sm:$0xf]  ;;  %v11738_v13 = vor.u32 %v17912_v63, %v11735_v0  ;;  %v11560_v15 = vor.u32 %v17874_v3, %v11557_v4  ;;  %v487_v19 = vand.u32 %v11696_v11, %v19241_v10 }
  0x1f   :  { %321 = vmatpush.bf16.msrb.mxu1 %v11584_v30  ;;  %v11599_v8 = vld [vmem:[%s27863_s0 + $0xf8] sm:$0xf0]  ;;  %v11598_v16 = vor.u32 %v17885_v6, %v11597_v5  ;;  %v11683_v20 = vld [vmem:[%s27863_s0 + $0x170] sm:$0xf]  ;;  %v17901_v21 = vld [vmem:[%s27863_s0 + $0x174] sm:$0xf0]  ;;  %v564_v22 = vand.u32 %v11734_v12, %v19241_v10 }
  0x20   :  { %388 = vmatpush.bf16.msrb.mxu2 %v11622_v33  ;;  %v11602_v17 = vor.u32 %v17884_v7, %v11599_v8  ;;  %v567_v23 = vand.u32 %v11738_v13, %v19241_v10  ;;  %v17900_v24 = vld [vmem:[%s27863_s0 + $0x174] sm:$0xf]  ;;  %v11685_v25 = vld [vmem:[%s27863_s0 + $0x178] sm:$0xf0]  ;;  %v11725_v26 = vld [vmem:[%s27863_s0 + $0x1c0] sm:$0xf]  ;;  %v11684_v31 = vor.u32 %v17901_v21, %v11683_v20 }
  0x21   :  { %401 = vmatpush.bf16.msrb.mxu3 %v11626_v34  ;;  %v17911_v27 = vld [vmem:[%s27863_s0 + $0x1c4] sm:$0xf0]  ;;  %v17910_v29 = vld [vmem:[%s27863_s0 + $0x1c4] sm:$0xf]  ;;  %v11727_v30 = vld [vmem:[%s27863_s0 + $0x1c8] sm:$0xf0]  ;;  %v11688_v32 = vor.u32 %v17900_v24, %v11685_v25 }
  0x22   :  { %309 = vmatpush.bf16.msrb.mxu0 %v11572_v42  ;;  %v11675_v33 = vld [vmem:[%s27863_s0 + $0x160] sm:$0xf]  ;;  %v17899_v34 = vld [vmem:[%s27863_s0 + $0x164] sm:$0xf0]  ;;  %v11726_v35 = vor.u32 %v17911_v27, %v11725_v26  ;;  %v11730_v36 = vor.u32 %v17910_v29, %v11727_v30  ;;  %v17898_v37 = vld [vmem:[%s27863_s0 + $0x164] sm:$0xf] }
  0x23   :  { %322 = vmatpush.bf16.msrb.mxu1 %v11576_v43  ;;  %v11677_v38 = vld [vmem:[%s27863_s0 + $0x168] sm:$0xf0]  ;;  %v11717_v39 = vld [vmem:[%s27863_s0 + $0x1b0] sm:$0xf]  ;;  %v17909_v40 = vld [vmem:[%s27863_s0 + $0x1b4] sm:$0xf0]  ;;  %v11676_v44 = vor.u32 %v17899_v34, %v11675_v33 }
  0x24   :  { %389 = vmatpush.bf16.msrb.mxu2 %v11614_v47  ;;  %v17908_v41 = vld [vmem:[%s27863_s0 + $0x1b4] sm:$0xf]  ;;  %v11719_v42 = vld [vmem:[%s27863_s0 + $0x1b8] sm:$0xf0]  ;;  %v11667_v43 = vld [vmem:[%s27863_s0 + $0x150] sm:$0xf]  ;;  %v11680_v45 = vor.u32 %v17898_v37, %v11677_v38  ;;  %v11718_v49 = vor.u32 %v17909_v40, %v11717_v39 }
  0x25   :  { %402 = vmatpush.bf16.msrb.mxu3 %v11618_v48  ;;  %v17897_v46 = vld [vmem:[%s27863_s0 + $0x154] sm:$0xf0]  ;;  %v17896_v47 = vld [vmem:[%s27863_s0 + $0x154] sm:$0xf]  ;;  %v11669_v48 = vld [vmem:[%s27863_s0 + $0x158] sm:$0xf0]  ;;  %v11722_v50 = vor.u32 %v17908_v41, %v11719_v42 }
  0x26   :  { %310 = vmatpush.bf16.msrb.mxu0 %v11564_v60  ;;  %v11709_v51 = vld [vmem:[%s27863_s0 + $0x1a0] sm:$0xf]  ;;  %v17907_v52 = vld [vmem:[%s27863_s0 + $0x1a4] sm:$0xf0]  ;;  %v17906_v53 = vld [vmem:[%s27863_s0 + $0x1a4] sm:$0xf]  ;;  %v11668_v62 = vor.u32 %v17897_v46, %v11667_v43  ;;  %v11672_v63 = vor.u32 %v17896_v47, %v11669_v48 }
  0x27   :  { %323 = vmatpush.bf16.msrb.mxu1 %v11568_v61  ;;  %v11711_v54 = vld [vmem:[%s27863_s0 + $0x1a8] sm:$0xf0]  ;;  %v11795_v55 = vld [vmem:[%s27863_s0 + $0x220] sm:$0xf]  ;;  %v17923_v56 = vld [vmem:[%s27863_s0 + $0x224] sm:$0x30]  ;;  %v11710_v3 = vor.u32 %v17907_v52, %v11709_v51 }
  0x28   :  { %390 = vmatpush.bf16.msrb.mxu2 %v11606_v1  ;;  %v11659_v57 = vld [vmem:[%s27863_s0 + $0x140] sm:$0xf]  ;;  %v17895_v58 = vld [vmem:[%s27863_s0 + $0x144] sm:$0xf0]  ;;  %v17922_v59 = vld [vmem:[%s27863_s0 + $0x224] sm:$0xf]  ;;  %v11714_v4 = vor.u32 %v17906_v53, %v11711_v54  ;;  %v11796_v12 = vor.u32 %v17923_v56, %v11795_v55 }
  0x29   :  { %403 = vmatpush.bf16.msrb.mxu3 %v11610_v2  ;;  %v11797_v60 = vld [vmem:[%s27863_s0 + $0x228] sm:$0x30]  ;;  %v11837_v61 = vld [vmem:[%s27863_s0 + $0x270] sm:$0xf]  ;;  %v17933_v0 = vld [vmem:[%s27863_s0 + $0x274] sm:$0x30] }
  0x2a   :  { %311 = vmatpush.bf16.msrb.mxu0 %v11556_v14  ;;  %v17932_v1 = vld [vmem:[%s27863_s0 + $0x274] sm:$0xf]  ;;  %v11839_v2 = vld [vmem:[%s27863_s0 + $0x278] sm:$0x30]  ;;  %v17894_v5 = vld [vmem:[%s27863_s0 + $0x144] sm:$0xf]  ;;  %v11800_v13 = vor.u32 %v17922_v59, %v11797_v60  ;;  %v11838_v14 = vor.u32 %v17933_v0, %v11837_v61 }
  0x2b   :  { %324 = vmatpush.bf16.msrb.mxu1 %v11560_v15  ;;  %v11661_v6 = vld [vmem:[%s27863_s0 + $0x148] sm:$0xf0]  ;;  %v11701_v7 = vld [vmem:[%s27863_s0 + $0x190] sm:$0xf]  ;;  %v17905_v8 = vld [vmem:[%s27863_s0 + $0x194] sm:$0xf0]  ;;  %v11842_v15 = vor.u32 %v17932_v1, %v11839_v2 }
  0x2c   :  { %391 = vmatpush.bf16.msrb.mxu2 %v11598_v16  ;;  %v17904_v9 = vld [vmem:[%s27863_s0 + $0x194] sm:$0xf]  ;;  %v11703_v11 = vld [vmem:[%s27863_s0 + $0x198] sm:$0xf0]  ;;  %v11660_v16 = vor.u32 %v17895_v58, %v11659_v57  ;;  %v11787_v20 = vld [vmem:[%s27863_s0 + $0x210] sm:$0xf]  ;;  %v672_v24 = vand.u32 %v11800_v13, %v19241_v10 }
  0x2d   :  { %404 = vmatpush.bf16.msrb.mxu3 %v11602_v17  ;;  %11593 = vmatmul.msk.bf16.vlgmr.msrb.gmra.mxu0 %vm109_vm2, %v19404_v28  ;;  %v11664_v17 = vor.u32 %v17894_v5, %v11661_v6  ;;  %v17921_v21 = vld [vmem:[%s27863_s0 + $0x214] sm:$0xf0]  ;;  %v19161_v25 = vmov 0  }
  0x2e   :  { %492 = vmatpush.bf16.msra.mxu0 %v484_v18  ;;  %11594 = vmatmul.msk.bf16.vlgmr.msrb.gmra.mxu1 %vm109_vm2, %v19404_v28  ;;  %v11702_v18 = vor.u32 %v17905_v8, %v11701_v7 }
  0x2f   :  { %505 = vmatpush.bf16.msra.mxu1 %v487_v19  ;;  %11635 = vmatmul.msk.bf16.vlgmr.msrb.gmra.mxu2 %vm109_vm2, %v19404_v28  ;;  %v11706_v19 = vor.u32 %v17904_v9, %v11703_v11 }
  0x30   :  { %572 = vmatpush.bf16.msra.mxu2 %v564_v22  ;;  %11636 = vmatmul.msk.bf16.vlgmr.msrb.gmra.mxu3 %vm109_vm2, %v19404_v28  ;;  %v784_v22 = vld [vmem:[%s27865_s2] sm:$0x3f] }
  0x31   :  { %585 = vmatpush.bf16.msra.mxu3 %v567_v23  ;;  %v669_v23 = vand.u32 %v11796_v12, %v19241_v10  ;;  %19126 = vset.pattern.permute.xlu0 %v19161_v25 }
  0x32   :  { %493 = vmatpush.bf16.msra.mxu0 %v11684_v31 }
  0x33   :  { %506 = vmatpush.bf16.msra.mxu1 %v11688_v32 }
  0x34   :  { %573 = vmatpush.bf16.msra.mxu2 %v11726_v35 }
  0x35   :  { %586 = vmatpush.bf16.msra.mxu3 %v11730_v36 }
  0x36   :  { %494 = vmatpush.bf16.msra.mxu0 %v11676_v44 }
  0x37   :  { %507 = vmatpush.bf16.msra.mxu1 %v11680_v45 }
  0x38   :  { %574 = vmatpush.bf16.msra.mxu2 %v11718_v49 }
  0x39   :  { %587 = vmatpush.bf16.msra.mxu3 %v11722_v50 }
  0x3a   :  { %495 = vmatpush.bf16.msra.mxu0 %v11668_v62 }
  0x3b   :  { %508 = vmatpush.bf16.msra.mxu1 %v11672_v63 }
  0x3c   :  { %575 = vmatpush.bf16.msra.mxu2 %v11710_v3 }
  0x3d   :  { %588 = vmatpush.bf16.msra.mxu3 %v11714_v4 }
  0x3e   :  { %16 = vsyncpa [#allocation3], 0  ;;  %v749_v26 = vand.u32 %v11838_v14, %v19241_v10  ;;  %v752_v27 = vand.u32 %v11842_v15, %v19241_v10  ;;  %v17920_v29 = vld [vmem:[%s27863_s0 + $0x214] sm:$0xf]  ;;  %v11789_v30 = vld [vmem:[%s27863_s0 + $0x218] sm:$0xf0]  ;;  %787 = vperm.xlu0 %19126, %v784_v22   ;;  %496 = vmatpush.bf16.msra.mxu0 %v11660_v16  ;;  %v11788_v34 = vor.u32 %v17921_v21, %v11787_v20 }
  0x3f   :  { %v11829_v31 = vld [vmem:[%s27863_s0 + $0x260] sm:$0xf]  ;;  %509 = vmatpush.bf16.msra.mxu1 %v11664_v17  ;;  %v17931_v32 = vld [vmem:[%s27863_s0 + $0x264] sm:$0xf0]  ;;  %v17930_v10 = vld [vmem:[%s27863_s0 + $0x264] sm:$0xf]  ;;  %v11792_v35 = vor.u32 %v17920_v29, %v11789_v30 }
  0x40   :  { %v11831_v33 = vld [vmem:[%s27863_s0 + $0x268] sm:$0xf0]  ;;  %576 = vmatpush.bf16.msra.mxu2 %v11702_v18  ;;  %v11779_v36 = vld [vmem:[%s27863_s0 + $0x200] sm:$0xf]  ;;  %v17919_v37 = vld [vmem:[%s27863_s0 + $0x204] sm:$0xf0]  ;;  %v11830_v38 = vor.u32 %v17931_v32, %v11829_v31 }
  0x41   :  { %589 = vmatpush.bf16.msra.mxu3 %v11706_v19  ;;  %v11834_v39 = vor.u32 %v17930_v10, %v11831_v33  ;;  %v17918_v40 = vld [vmem:[%s27863_s0 + $0x204] sm:$0xf]  ;;  %v11781_v41 = vld [vmem:[%s27863_s0 + $0x208] sm:$0xf0]  ;;  %v11821_v42 = vld [vmem:[%s27863_s0 + $0x250] sm:$0xf]  ;;  %11697 = vmatmul.msk.bf16.vlgmr.msra.gmra.mxu0 %vm109_vm2, %v19404_v28  ;;  %v11780_v46 = vor.u32 %v17919_v37, %v11779_v36 }
  0x42   :  { %677 = vmatpush.bf16.msrb.mxu0 %v669_v23  ;;  %11698 = vmatmul.msk.bf16.vlgmr.msra.gmra.mxu1 %vm109_vm2, %v19404_v28  ;;  %v17929_v43 = vld [vmem:[%s27863_s0 + $0x254] sm:$0xf0]  ;;  %v17928_v44 = vld [vmem:[%s27863_s0 + $0x254] sm:$0xf]  ;;  %v11823_v45 = vld [vmem:[%s27863_s0 + $0x258] sm:$0xf0]  ;;  %v11784_v47 = vor.u32 %v17918_v40, %v11781_v41 }
  0x43   :  { %690 = vmatpush.bf16.msrb.mxu1 %v672_v24  ;;  %11739 = vmatmul.msk.bf16.vlgmr.msra.gmra.mxu2 %vm109_vm2, %v19404_v28  ;;  %v11771_v48 = vld [vmem:[%s27863_s0 + $0x1f0] sm:$0xf]  ;;  %v17917_v49 = vld [vmem:[%s27863_s0 + $0x1f4] sm:$0xf0]  ;;  %v11822_v50 = vor.u32 %v17929_v43, %v11821_v42  ;;  %v11826_v51 = vor.u32 %v17928_v44, %v11823_v45  ;;  %v17916_v52 = vld [vmem:[%s27863_s0 + $0x1f4] sm:$0xf] }
  0x44   :  { %757 = vmatpush.bf16.msrb.mxu2 %v749_v26  ;;  %11740 = vmatmul.msk.bf16.vlgmr.msra.gmra.mxu3 %vm109_vm2, %v19404_v28  ;;  %v11773_v53 = vld [vmem:[%s27863_s0 + $0x1f8] sm:$0xf0]  ;;  %v11813_v54 = vld [vmem:[%s27863_s0 + $0x240] sm:$0xf]  ;;  %v17927_v55 = vld [vmem:[%s27863_s0 + $0x244] sm:$0xf0]  ;;  %v11772_v58 = vor.u32 %v17917_v49, %v11771_v48 }
  0x45   :  { %770 = vmatpush.bf16.msrb.mxu3 %v752_v27  ;;  %v17926_v56 = vld [vmem:[%s27863_s0 + $0x244] sm:$0xf]  ;;  %v11815_v57 = vld [vmem:[%s27863_s0 + $0x248] sm:$0xf0]  ;;  %v11776_v59 = vor.u32 %v17916_v52, %v11773_v53  ;;  %v11763_v60 = vld [vmem:[%s27863_s0 + $0x1e0] sm:$0xf]  ;;  %v11814_v62 = vor.u32 %v17927_v55, %v11813_v54 }
  0x46   :  { %678 = vmatpush.bf16.msrb.mxu0 %v11788_v34  ;;  %v17915_v61 = vld [vmem:[%s27863_s0 + $0x1e4] sm:$0xf0]  ;;  %v11818_v63 = vor.u32 %v17926_v56, %v11815_v57  ;;  %v17914_v0 = vld [vmem:[%s27863_s0 + $0x1e4] sm:$0xf]  ;;  %v11765_v1 = vld [vmem:[%s27863_s0 + $0x1e8] sm:$0xf0] }
  0x47   :  { %691 = vmatpush.bf16.msrb.mxu1 %v11792_v35  ;;  %v11805_v2 = vld [vmem:[%s27863_s0 + $0x230] sm:$0xf]  ;;  %v17925_v3 = vld [vmem:[%s27863_s0 + $0x234] sm:$0xf0]  ;;  %v17924_v4 = vld [vmem:[%s27863_s0 + $0x234] sm:$0xf]  ;;  %v11764_v6 = vor.u32 %v17915_v61, %v11763_v60  ;;  %v11768_v7 = vor.u32 %v17914_v0, %v11765_v1 }
  0x48   :  { %758 = vmatpush.bf16.msrb.mxu2 %v11830_v38  ;;  %v11807_v5 = vld [vmem:[%s27863_s0 + $0x238] sm:$0xf0]  ;;  %v11806_v8 = vor.u32 %v17925_v3, %v11805_v2  ;;  %v12013_v11 = vld [vmem:[%s27866_s3 + $0x270] sm:$0xf]  ;;  %v18012_v12 = vld [vmem:[%s27866_s3 + $0x27c] sm:$0xf0] }
  0x49   :  { %771 = vmatpush.bf16.msrb.mxu3 %v11834_v39  ;;  %v11810_v9 = vor.u32 %v17924_v4, %v11807_v5  ;;  %v12014_v13 = vor.u32 %v18012_v12, %v12013_v11  ;;  %v11997_v14 = vld [vmem:[%s27866_s3 + $0x250] sm:$0xf]  ;;  %v18008_v15 = vld [vmem:[%s27866_s3 + $0x25c] sm:$0xf0]  ;;  %vm1177_vm3 = vcmask 1041408   ;;  %vm916_vm4 = vcmask 1041409  }
  0x4a   :  { %679 = vmatpush.bf16.msrb.mxu0 %v11780_v46  ;;  %v11998_v16 = vor.u32 %v18008_v15, %v11997_v14  ;;  %v18004_v17 = vld [vmem:[%s27866_s3 + $0x23c] sm:$0xf0]  ;;  %v11893_v19 = vld [vmem:[%s27866_s3 + $0x310] sm:$0x33]  ;;  %v12015_v26 = vld [vmem:[%s27866_s3 + $0x280] sm:$0xf0] }
  0x4b   :  { %692 = vmatpush.bf16.msrb.mxu1 %v11784_v47  ;;  %v1069_v20 = vunpack.c.l.b16 %v11893_v19  ;;  %v11965_v21 = vld [vmem:[%s27866_s3 + $0x210] sm:$0xf]  ;;  %v18000_v22 = vld [vmem:[%s27866_s3 + $0x21c] sm:$0xf0]  ;;  %v18010_v25 = vld [vmem:[%s27866_s3 + $0x274] sm:$0xf]  ;;  %v1070_v52 = vunpack.c.h.b16 %v11893_v19 }
  0x4c   :  { %759 = vmatpush.bf16.msrb.mxu2 %v11822_v50  ;;  %v11966_v23 = vor.u32 %v18000_v22, %v11965_v21  ;;  %v12018_v27 = vor.u32 %v18010_v25, %v12015_v26  ;;  %v11949_v30 = vld [vmem:[%s27866_s3 + $0x1f0] sm:$0xf]  ;;  %v17996_v31 = vld [vmem:[%s27866_s3 + $0x1fc] sm:$0xf0]  ;;  %v18006_v36 = vld [vmem:[%s27866_s3 + $0x254] sm:$0xf] }
  0x4d   :  { %772 = vmatpush.bf16.msrb.mxu3 %v11826_v51  ;;  %v1121_v24 = vpack.c.b16 %v1069_v20, %v1069_v20  ;;  %v12077_v32 = vld [vmem:[%s27866_s3 + $0x2f0] sm:$0xf]  ;;  %v11950_v34 = vor.u32 %v17996_v31, %v11949_v30  ;;  %v18028_v35 = vld [vmem:[%s27866_s3 + $0x2fc] sm:$0xf0]  ;;  %v11999_v37 = vld [vmem:[%s27866_s3 + $0x260] sm:$0xf0]  ;;  %v1122_v61 = vpack.c.b16 %v1070_v52, %v1070_v52 }
  0x4e   :  { %680 = vmatpush.bf16.msrb.mxu0 %v11772_v58  ;;  %v12078_v38 = vor.u32 %v18028_v35, %v12077_v32  ;;  %v12002_v39 = vor.u32 %v18006_v36, %v11999_v37  ;;  %v11933_v40 = vld [vmem:[%s27866_s3 + $0x1d0] sm:$0xf]  ;;  %v17992_v41 = vld [vmem:[%s27866_s3 + $0x1dc] sm:$0xf0]  ;;  %v18002_v45 = vld [vmem:[%s27866_s3 + $0x234] sm:$0xf] }
  0x4f   :  { %693 = vmatpush.bf16.msrb.mxu1 %v11776_v59  ;;  %v1179_v29 = vsel %vm1177_vm3, %v1121_v24, 0  ;;  %v12061_v42 = vld [vmem:[%s27866_s3 + $0x2d0] sm:$0xf]  ;;  %v11934_v43 = vor.u32 %v17992_v41, %v11933_v40  ;;  %v18024_v44 = vld [vmem:[%s27866_s3 + $0x2dc] sm:$0xf0]  ;;  %v1182_v0 = vsel %vm1177_vm3, %v1122_v61, 0 }
  0x50   :  { %760 = vmatpush.bf16.msrb.mxu2 %v11814_v62  ;;  %v11983_v46 = vld [vmem:[%s27866_s3 + $0x240] sm:$0xf0]  ;;  %v12062_v47 = vor.u32 %v18024_v44, %v12061_v42  ;;  %v11917_v49 = vld [vmem:[%s27866_s3 + $0x1b0] sm:$0xf]  ;;  %v17988_v50 = vld [vmem:[%s27866_s3 + $0x1bc] sm:$0xf0] }
  0x51   :  { %773 = vmatpush.bf16.msrb.mxu3 %v11818_v63  ;;  %v11986_v48 = vor.u32 %v18002_v45, %v11983_v46  ;;  %v12045_v51 = vld [vmem:[%s27866_s3 + $0x2b0] sm:$0xf]  ;;  %v11918_v53 = vor.u32 %v17988_v50, %v11917_v49  ;;  %v18020_v54 = vld [vmem:[%s27866_s3 + $0x2bc] sm:$0xf0]  ;;  %v17998_v55 = vld [vmem:[%s27866_s3 + $0x214] sm:$0xf] }
  0x52   :  { %681 = vmatpush.bf16.msrb.mxu0 %v11764_v6  ;;  %v11967_v56 = vld [vmem:[%s27866_s3 + $0x220] sm:$0xf0]  ;;  %v12046_v59 = vor.u32 %v18020_v54, %v12045_v51  ;;  %v11901_v1 = vld [vmem:[%s27866_s3 + $0x190] sm:$0xf]  ;;  %v17984_v2 = vld [vmem:[%s27866_s3 + $0x19c] sm:$0xf0] }
  0x53   :  { %694 = vmatpush.bf16.msrb.mxu1 %v11768_v7  ;;  %v11970_v60 = vor.u32 %v17998_v55, %v11967_v56  ;;  %v12029_v3 = vld [vmem:[%s27866_s3 + $0x290] sm:$0xf]  ;;  %v11902_v4 = vor.u32 %v17984_v2, %v11901_v1  ;;  %v18016_v5 = vld [vmem:[%s27866_s3 + $0x29c] sm:$0xf0]  ;;  %v17994_v6 = vld [vmem:[%s27866_s3 + $0x1f4] sm:$0xf] }
  0x54   :  { %761 = vmatpush.bf16.msrb.mxu2 %v11806_v8  ;;  %v11951_v7 = vld [vmem:[%s27866_s3 + $0x200] sm:$0xf0]  ;;  %v12030_v8 = vor.u32 %v18016_v5, %v12029_v3  ;;  %v18026_v11 = vld [vmem:[%s27866_s3 + $0x2f4] sm:$0xf]  ;;  %v18013_v15 = vld [vmem:[%s27866_s3 + $0x284] sm:$0xf0] }
  0x55   :  { %774 = vmatpush.bf16.msrb.mxu3 %v11810_v9  ;;  %11801 = vmatmul.msk.bf16.vlgmr.msrb.gmra.mxu0 %vm109_vm2, %v19404_v28  ;;  %v11954_v9 = vor.u32 %v17994_v6, %v11951_v7  ;;  %v12079_v12 = vld [vmem:[%s27866_s3 + $0x300] sm:$0xf0]  ;;  %v17990_v21 = vld [vmem:[%s27866_s3 + $0x1d4] sm:$0xf]  ;;  %v12005_v26 = vld [vmem:[%s27866_s3 + $0x258] sm:$0xf] }
  0x56   :  { %11802 = vmatmul.msk.bf16.vlgmr.msrb.gmra.mxu1 %vm109_vm2, %v19404_v28  ;;  %1190 = vmatpush.bf16.msra.mxu0 %v12014_v13  ;;  %v12021_v13 = vld [vmem:[%s27866_s3 + $0x278] sm:$0xf]  ;;  %v12082_v14 = vor.u32 %v18026_v11, %v12079_v12  ;;  %v11935_v22 = vld [vmem:[%s27866_s3 + $0x1e0] sm:$0xf0]  ;;  %v18007_v31 = vld [vmem:[%s27866_s3 + $0x25c] sm:$0xf] }
  0x57   :  { %11843 = vmatmul.msk.bf16.vlgmr.msrb.gmra.mxu2 %vm109_vm2, %v19404_v28  ;;  %1206 = vmatpush.bf16.msra.mxu1 %v1179_v29  ;;  %v12022_v19 = vor.u32 %v18013_v15, %v12021_v13  ;;  %v11938_v24 = vor.u32 %v17990_v21, %v11935_v22  ;;  %v12063_v25 = vld [vmem:[%s27866_s3 + $0x2e0] sm:$0xf0]  ;;  %v12007_v32 = vld [vmem:[%s27866_s3 + $0x268] sm:$0xf0]  ;;  %v17986_v37 = vld [vmem:[%s27866_s3 + $0x1b4] sm:$0xf] }
  0x58   :  { %11844 = vmatmul.msk.bf16.vlgmr.msrb.gmra.mxu3 %vm109_vm2, %v19404_v28  ;;  %v11981_v28 = vld [vmem:[%s27866_s3 + $0x230] sm:$0xf]  ;;  %1216 = vmatpush.bf16.msra.mxu2 %v12018_v27  ;;  %v18009_v27 = vld [vmem:[%s27866_s3 + $0x264] sm:$0xf0]  ;;  %v12010_v36 = vor.u32 %v18007_v31, %v12007_v32  ;;  %v12047_v41 = vld [vmem:[%s27866_s3 + $0x2c0] sm:$0xf0] }
  0x59   :  { %v11982_v18 = vor.u32 %v18004_v17, %v11981_v28  ;;  %1232 = vmatpush.bf16.msra.mxu3 %v1182_v0  ;;  %v12023_v28 = vld [vmem:[%s27866_s3 + $0x288] sm:$0xf0]  ;;  %v12006_v30 = vor.u32 %v18009_v27, %v12005_v26  ;;  %v11989_v42 = vld [vmem:[%s27866_s3 + $0x238] sm:$0xf]  ;;  %v18003_v46 = vld [vmem:[%s27866_s3 + $0x23c] sm:$0xf] }
  0x5a   :  { %1191 = vmatpush.bf16.msra.mxu0 %v11998_v16  ;;  %v18011_v16 = vld [vmem:[%s27866_s3 + $0x27c] sm:$0xf]  ;;  %v17982_v52 = vld [vmem:[%s27866_s3 + $0x194] sm:$0xf]  ;;  %v11973_v61 = vld [vmem:[%s27866_s3 + $0x218] sm:$0xf] }
  0x5b   :  { %1207 = vmatpush.bf16.msra.mxu1 %v12078_v38  ;;  %v12026_v20 = vor.u32 %v18011_v16, %v12023_v28  ;;  %v11919_v38 = vld [vmem:[%s27866_s3 + $0x1c0] sm:$0xf0]  ;;  %v11894_v49 = vld [vmem:[%s27866_s3 + $0x318] sm:$0x33]  ;;  %v18014_v54 = vld [vmem:[%s27866_s3 + $0x294] sm:$0xf] }
  0x5c   :  { %1217 = vmatpush.bf16.msra.mxu2 %v12002_v39  ;;  %v18018_v39 = vld [vmem:[%s27866_s3 + $0x2b4] sm:$0xf]  ;;  %v11922_v40 = vor.u32 %v17986_v37, %v11919_v38  ;;  %v1071_v50 = vunpack.c.l.b16 %v11894_v49  ;;  %v1072_v51 = vunpack.c.h.b16 %v11894_v49  ;;  %v17999_v5 = vld [vmem:[%s27866_s3 + $0x21c] sm:$0xf]  ;;  %v11975_v6 = vld [vmem:[%s27866_s3 + $0x228] sm:$0xf0] }
  0x5d   :  { %1233 = vmatpush.bf16.msra.mxu3 %v12082_v14  ;;  %v12050_v44 = vor.u32 %v18018_v39, %v12047_v41  ;;  %v11957_v13 = vld [vmem:[%s27866_s3 + $0x1f8] sm:$0xf]  ;;  %v17997_v14 = vld [vmem:[%s27866_s3 + $0x204] sm:$0xf0]  ;;  %v17991_v32 = vld [vmem:[%s27866_s3 + $0x1dc] sm:$0xf] }
  0x5e   :  { %1192 = vmatpush.bf16.msra.mxu0 %v11982_v18  ;;  %v1124_v0 = vpack.c.b16 %v1072_v51, %v1072_v51  ;;  %v12085_v15 = vld [vmem:[%s27866_s3 + $0x2f8] sm:$0xf]  ;;  %v17993_v27 = vld [vmem:[%s27866_s3 + $0x1e4] sm:$0xf0]  ;;  %v11943_v37 = vld [vmem:[%s27866_s3 + $0x1e8] sm:$0xf0] }
  0x5f   :  { %1208 = vmatpush.bf16.msra.mxu1 %v12062_v47  ;;  %v11991_v47 = vld [vmem:[%s27866_s3 + $0x248] sm:$0xf0]  ;;  %v11941_v26 = vld [vmem:[%s27866_s3 + $0x1d8] sm:$0xf]  ;;  %v18025_v31 = vld [vmem:[%s27866_s3 + $0x2e4] sm:$0xf0] }
  0x60   :  { %1218 = vmatpush.bf16.msra.mxu2 %v11986_v48  ;;  %v11994_v48 = vor.u32 %v18003_v46, %v11991_v47  ;;  %v18023_v38 = vld [vmem:[%s27866_s3 + $0x2dc] sm:$0xf]  ;;  %v12071_v39 = vld [vmem:[%s27866_s3 + $0x2e8] sm:$0xf0]  ;;  %v12053_v46 = vld [vmem:[%s27866_s3 + $0x2b8] sm:$0xf] }
  0x61   :  { %v12074_v41 = vor.u32 %v18023_v38, %v12071_v39  ;;  %v17987_v51 = vld [vmem:[%s27866_s3 + $0x1bc] sm:$0xf]  ;;  %vm1173_vm5 = vcmask 556032   ;;  %vm11194_vm6 = vcmask 130048   ;;  %vm11320_vm7 = vcmask 1043456   ;;  %s11440_s29 = sshll.u32 %s27874_s11, 4  ;;  %s11441_s29 = int_to_ptr.hbm [resolvable:$true] %s11440_s29 }
  0x62   :  { %1193 = vmatpush.bf16.msra.mxu0 %v11966_v23  ;;  %v18022_v23 = vld [vmem:[%s27866_s3 + $0x2d4] sm:$0xf]  ;;  %vm11316_vm8 = vcmask 982016   ;;  %vm11387_vm9 = vcmask 687104   ;;  %vm11407_vm10 = vcmask 74752  }
  0x63   :  { %1209 = vmatpush.bf16.msra.mxu1 %v12046_v59  ;;  %v12066_v29 = vor.u32 %v18022_v23, %v12063_v25  ;;  %v18027_v23 = vld [vmem:[%s27866_s3 + $0x2fc] sm:$0xf] }
  0x64   :  { %1219 = vmatpush.bf16.msra.mxu2 %v11970_v60  ;;  %v12031_v60 = vld [vmem:[%s27866_s3 + $0x2a0] sm:$0xf0] }
  0x65   :  { %1234 = vmatpush.bf16.msra.mxu3 %v12066_v29  ;;  %v12034_v3 = vor.u32 %v18014_v54, %v12031_v60  ;;  %v12069_v29 = vld [vmem:[%s27866_s3 + $0x2d8] sm:$0xf]  ;;  %v12055_v60 = vld [vmem:[%s27866_s3 + $0x2c8] sm:$0xf0] }
  0x66   :  { %1194 = vmatpush.bf16.msra.mxu0 %v11950_v34 }
  0x67   :  { %1210 = vmatpush.bf16.msra.mxu1 %v12030_v8  ;;  %v11978_v8 = vor.u32 %v17999_v5, %v11975_v6 }
  0x68   :  { %1220 = vmatpush.bf16.msra.mxu2 %v11954_v9  ;;  %v1188_v9 = vsel %vm1177_vm3, %v1124_v0, 0  ;;  %v12037_v0 = vld [vmem:[%s27866_s3 + $0x298] sm:$0xf] }
  0x69   :  { %1235 = vmatpush.bf16.msra.mxu3 %v12050_v44  ;;  %v11925_v44 = vld [vmem:[%s27866_s3 + $0x1b8] sm:$0xf] }
  0x6a   :  { %1195 = vmatpush.bf16.msra.mxu0 %v11934_v43  ;;  %v18005_v43 = vld [vmem:[%s27866_s3 + $0x244] sm:$0xf0] }
  0x6b   :  { %1242 = vmatpush.bf16.msrb.mxu1 %v12022_v19  ;;  %v11990_v45 = vor.u32 %v18005_v43, %v11989_v42  ;;  %v17995_v19 = vld [vmem:[%s27866_s3 + $0x1fc] sm:$0xf] }
  0x6c   :  { %1221 = vmatpush.bf16.msra.mxu2 %v11938_v24  ;;  %v12087_v24 = vld [vmem:[%s27866_s3 + $0x308] sm:$0xf0] }
  0x6d   :  { %1236 = vmatpush.bf16.msra.mxu3 %v12034_v3  ;;  %v12090_v25 = vor.u32 %v18027_v23, %v12087_v24  ;;  %v17983_v3 = vld [vmem:[%s27866_s3 + $0x19c] sm:$0xf] }
  0x6e   :  { %1196 = vmatpush.bf16.msra.mxu0 %v11918_v53  ;;  %v11903_v53 = vld [vmem:[%s27866_s3 + $0x1a0] sm:$0xf0] }
  0x6f   :  { %1243 = vmatpush.bf16.msrb.mxu1 %v12006_v30  ;;  %v11906_v59 = vor.u32 %v17982_v52, %v11903_v53  ;;  %v11942_v30 = vor.u32 %v17993_v27, %v11941_v26  ;;  %v11927_v52 = vld [vmem:[%s27866_s3 + $0x1c8] sm:$0xf0] }
  0x70   :  { %1222 = vmatpush.bf16.msra.mxu2 %v11922_v40  ;;  %v11946_v40 = vor.u32 %v17991_v32, %v11943_v37  ;;  %v11930_v54 = vor.u32 %v17987_v51, %v11927_v52  ;;  %v17964_v51 = vld [vmem:[%s27866_s3 + $0xec] sm:$0xf0] }
  0x72   :  { %1197 = vmatpush.bf16.msra.mxu0 %v11902_v4 }
  0x73   :  { %1244 = vmatpush.bf16.msrb.mxu1 %v11990_v45  ;;  %v17989_v45 = vld [vmem:[%s27866_s3 + $0x1c4] sm:$0xf0] }
  0x74   :  { %1223 = vmatpush.bf16.msra.mxu2 %v11906_v59  ;;  %v11926_v49 = vor.u32 %v17989_v45, %v11925_v44  ;;  %v18019_v59 = vld [vmem:[%s27866_s3 + $0x2bc] sm:$0xf] }
  0x76   :  { %1268 = vmatpush.bf16.msrb.mxu0 %v12026_v20  ;;  %v11959_v20 = vld [vmem:[%s27866_s3 + $0x208] sm:$0xf0] }
  0x77   :  { %v11962_v22 = vor.u32 %v17995_v19, %v11959_v20 }
  0x78   :  { %1284 = vmatpush.bf16.msrb.mxu2 %v1188_v9 }
  0x7a   :  { %1269 = vmatpush.bf16.msrb.mxu0 %v12010_v36  ;;  %v12070_v36 = vor.u32 %v18025_v31, %v12069_v29 }
  0x7c   :  { %1285 = vmatpush.bf16.msrb.mxu2 %v12090_v25 }
  0x7e   :  { %1270 = vmatpush.bf16.msrb.mxu0 %v11994_v48 }
  0x80   :  { %1286 = vmatpush.bf16.msrb.mxu2 %v12074_v41 }
  0x82   :  { %1271 = vmatpush.bf16.msrb.mxu0 %v11978_v8  ;;  %v12039_v8 = vld [vmem:[%s27866_s3 + $0x2a8] sm:$0xf0] }
  0x86   :  { %1272 = vmatpush.bf16.msrb.mxu0 %v11962_v22 }
  0x8a   :  { %1273 = vmatpush.bf16.msrb.mxu0 %v11946_v40 }
  0x8e   :  { %1274 = vmatpush.bf16.msrb.mxu0 %v11930_v54 }
  0x96   :  { %v19804_v10 = vpop.f32.mrf.mxu0 }
  0x97   :  { %v19806_v33 = vpop.f32.mrf.mxu1 }
  0x9e   :  { %v19853_v57 = vpop.f32.mrf.mxu2  ;;  %v134_v62 = vpop.f32.mrf.mxu0 }
  0x9f   :  { %v19855_v58 = vpop.f32.mrf.mxu3  ;;  %v147_v63 = vpop.f32.mrf.mxu1  ;;  %v18001_v62 = vld [vmem:[%s27866_s3 + $0x224] sm:$0xf0] }
  0xa0   :  { %v1123_v63 = vpack.c.b16 %v1071_v50, %v1071_v50  ;;  %v11974_v4 = vor.u32 %v18001_v62, %v11973_v61  ;;  %v18021_v50 = vld [vmem:[%s27866_s3 + $0x2c4] sm:$0xf0]  ;;  %v12058_v61 = vor.u32 %v18019_v59, %v12055_v60  ;;  %v11909_v62 = vld [vmem:[%s27866_s3 + $0x198] sm:$0xf]  ;;  %v17962_v60 = vld [vmem:[%s27866_s3 + $0xe4] sm:$0xf] }
  0xa1   :  { %v12054_v53 = vor.u32 %v18021_v50, %v12053_v46  ;;  %v12209_v50 = vld [vmem:[%s27866_s3 + $0xe0] sm:$0xf] }
  0xa2   :  { %v1185_v7 = vsel %vm1177_vm3, %v1123_v63, 0  ;;  %1245 = vmatpush.bf16.msrb.mxu1 %v11974_v4  ;;  %v17985_v63 = vld [vmem:[%s27866_s3 + $0x1a4] sm:$0xf0]  ;;  %1287 = vmatpush.bf16.msrb.mxu2 %v12058_v61  ;;  %v11911_v4 = vld [vmem:[%s27866_s3 + $0x1a8] sm:$0xf0] }
  0xa3   :  { %1258 = vmatpush.bf16.msrb.mxu3 %v1185_v7  ;;  %v11914_v6 = vor.u32 %v17983_v3, %v11911_v4  ;;  %v18015_v7 = vld [vmem:[%s27866_s3 + $0x29c] sm:$0xf]  ;;  %v12211_v61 = vld [vmem:[%s27866_s3 + $0xf0] sm:$0xf0] }
  0xa5   :  { %1275 = vmatpush.bf16.msrb.mxu0 %v11914_v6 }
  0xa6   :  { %v214_v17 = vpop.f32.mrf.mxu2 }
  0xa7   :  { %v227_v18 = vpop.f32.mrf.mxu3  ;;  %v11958_v17 = vor.u32 %v17997_v14, %v11957_v13 }
  0xa8   :  { %v18029_v18 = vld [vmem:[%s27866_s3 + $0x304] sm:$0xf0] }
  0xa9   :  { %v12086_v21 = vor.u32 %v18029_v18, %v12085_v15  ;;  %1246 = vmatpush.bf16.msrb.mxu1 %v11958_v17 }
  0xaa   :  { %v19918_v34 = vpop.f32.mrf.mxu0 }
  0xab   :  { %v19920_v35 = vpop.f32.mrf.mxu1  ;;  %1259 = vmatpush.bf16.msrb.mxu3 %v12086_v21  ;;  %v410_v9 = vmax.f32 %v19804_v10, %v19918_v34 }
  0xad   :  { %1247 = vmatpush.bf16.msrb.mxu1 %v11942_v30 }
  0xaf   :  { %1260 = vmatpush.bf16.msrb.mxu3 %v12070_v36  ;;  %v848_v36 = vld [vmem:[%s27866_s3 + $0x180] sm:$0x33] }
  0xb0   :  { %v788_v18 = vpop.permute.xlu0 %787  ;;  %v1447_v39 = vunpack.c.l.b16 %v848_v36  ;;  %v1448_v40 = vunpack.c.h.b16 %v848_v36 }
  0xb1   :  { %1248 = vmatpush.bf16.msrb.mxu1 %v11926_v49 }
  0xb2   :  { %v19958_v55 = vpop.f32.mrf.mxu2  ;;  %v315_v1 = vpop.f32.mrf.mxu0  ;;  %v1499_v46 = vpack.c.b16 %v1447_v39, %v1447_v39  ;;  %v17976_v39 = vld [vmem:[%s27866_s3 + $0x14c] sm:$0xf0] }
  0xb3   :  { %v19960_v56 = vpop.f32.mrf.mxu3  ;;  %v328_v2 = vpop.f32.mrf.mxu1  ;;  %1261 = vmatpush.bf16.msrb.mxu3 %v12054_v53  ;;  %v11910_v1 = vor.u32 %v17985_v63, %v11909_v62  ;;  %v12210_v62 = vor.u32 %v17964_v51, %v12209_v50  ;;  %v12161_v50 = vld [vmem:[%s27866_s3 + $0x80] sm:$0xf]  ;;  %v17952_v51 = vld [vmem:[%s27866_s3 + $0x8c] sm:$0xf0] }
  0xb4   :  { %v18017_v2 = vld [vmem:[%s27866_s3 + $0x2a4] sm:$0xf0]  ;;  %v1555_v63 = vsel %vm1177_vm3, %v1499_v46, 0  ;;  %v17974_v46 = vld [vmem:[%s27866_s3 + $0x144] sm:$0xf] }
  0xb5   :  { %v12038_v5 = vor.u32 %v18017_v2, %v12037_v0  ;;  %1249 = vmatpush.bf16.msrb.mxu1 %v11910_v1  ;;  %v12193_v1 = vld [vmem:[%s27866_s3 + $0xc0] sm:$0xf]  ;;  %v17960_v2 = vld [vmem:[%s27866_s3 + $0xcc] sm:$0xf0] }
  0xb7   :  { %1262 = vmatpush.bf16.msrb.mxu3 %v12038_v5 }
  0xba   :  { %v395_v11 = vpop.f32.mrf.mxu2 }
  0xbb   :  { %v408_v12 = vpop.f32.mrf.mxu3  ;;  %v411_v11 = vmax.f32 %v19806_v33, %v19920_v35  ;;  %v412_v33 = vmax.f32 %v19853_v57, %v19958_v55  ;;  %v413_v35 = vmax.f32 %v19855_v58, %v19960_v56 }
  0xbc   :  { %v12042_v12 = vor.u32 %v18015_v7, %v12039_v8  ;;  %v12273_v7 = vld [vmem:[%s27866_s3 + $0x160] sm:$0xf]  ;;  %v17980_v8 = vld [vmem:[%s27866_s3 + $0x16c] sm:$0xf0] }
  0xbe   :  { %v19988_v16 = vpop.f32.mrf.mxu0  ;;  %1288 = vmatpush.bf16.msrb.mxu2 %v12042_v12 }
  0xbf   :  { %v19990_v28 = vpop.f32.mrf.mxu1  ;;  %v595_v15 = vmax.f32 %v410_v9, %v19988_v16 }
  0xc0   :  { %v596_v17 = vmax.f32 %v411_v11, %v19990_v28 }
  0xc6   :  { %v578_v42 = vpop.f32.mrf.mxu2  ;;  %v500_v47 = vpop.f32.mrf.mxu0 }
  0xc7   :  { %v591_v43 = vpop.f32.mrf.mxu3  ;;  %v513_v48 = vpop.f32.mrf.mxu1  ;;  %v597_v16 = vmax.f32 %v412_v33, %v578_v42  ;;  %v1500_v47 = vpack.c.b16 %v1448_v40, %v1448_v40  ;;  %v17954_v40 = vld [vmem:[%s27866_s3 + $0xa4] sm:$0xf] }
  0xc8   :  { %v598_v25 = vmax.f32 %v413_v35, %v591_v43 }
  0xc9   :  { %v1558_v0 = vsel %vm1177_vm3, %v1500_v47, 0  ;;  %v12259_v47 = vld [vmem:[%s27866_s3 + $0x150] sm:$0xf0] }
  0xce   :  { %v580_v13 = vpop.f32.mrf.mxu2 }
  0xcf   :  { %v593_v14 = vpop.f32.mrf.mxu3 }
  0xd0   :  { %v17958_v14 = vld [vmem:[%s27866_s3 + $0xc4] sm:$0xf] }
  0xd2   :  { %v683_v19 = vpop.f32.mrf.mxu0 }
  0xd3   :  { %v696_v20 = vpop.f32.mrf.mxu1  ;;  %v780_v21 = vmax.f32 %v595_v15, %v683_v19  ;;  %v12195_v15 = vld [vmem:[%s27866_s3 + $0xd0] sm:$0xf0] }
  0xd4   :  { %v781_v22 = vmax.f32 %v596_v17, %v696_v20 }
  0xd5   :  { %v790_v10 = vadd.f32 %v788_v18, %v780_v21 }
  0xd6   :  { %v791_v34 = vadd.f32 %v788_v18, %v781_v22 }
  0xd7   :  { %v794_v23 = vmax.f32 %v790_v10, 0.0  ;;  %v12214_v10 = vor.u32 %v17962_v60, %v12211_v61  ;;  %v12241_v60 = vld [vmem:[%s27866_s3 + $0x120] sm:$0xf]  ;;  %v17972_v61 = vld [vmem:[%s27866_s3 + $0x12c] sm:$0xf0] }
  0xd8   :  { %v795_v24 = vmax.f32 %v791_v34, 0.0  ;;  %v12194_v34 = vor.u32 %v17960_v2, %v12193_v1  ;;  %v12243_v1 = vld [vmem:[%s27866_s3 + $0x130] sm:$0xf0]  ;;  %v12162_v2 = vor.u32 %v17952_v51, %v12161_v50  ;;  %v17957_v51 = vld [vmem:[%s27866_s3 + $0xb4] sm:$0xf0] }
  0xda   :  { %v798_v28 = vpack.c.bf16 %v795_v24, %v794_v23  ;;  %v763_v26 = vpop.f32.mrf.mxu2  ;;  %v685_v31 = vpop.f32.mrf.mxu0  ;;  %v12274_v23 = vor.u32 %v17980_v8, %v12273_v7  ;;  %v12198_v24 = vor.u32 %v17958_v14, %v12195_v15  ;;  %v12147_v14 = vld [vmem:[%s27866_s3 + $0x70] sm:$0xf0]  ;;  %v17966_v15 = vld [vmem:[%s27866_s3 + $0x104] sm:$0xf] }
  0xdb   :  { %v776_v27 = vpop.f32.mrf.mxu3  ;;  %v782_v29 = vmax.f32 %v597_v16, %v763_v26  ;;  %v698_v32 = vpop.f32.mrf.mxu1  ;;  %v17978_v16 = vld [vmem:[%s27866_s3 + $0x164] sm:$0xf] }
  0xdc   :  { %v783_v30 = vmax.f32 %v598_v25, %v776_v27  ;;  %v903_v55 = vunpack.c.l.b16 %v798_v28  ;;  %v904_v38 = vunpack.c.h.b16 %v798_v28  ;;  %v12275_v25 = vld [vmem:[%s27866_s3 + $0x170] sm:$0xf0] }
  0xdd   :  { %v792_v37 = vadd.f32 %v788_v18, %v782_v29 }
  0xde   :  { %v793_v57 = vadd.f32 %v788_v18, %v783_v30  ;;  %v20092_v41 = vunpack.i.l.s16 %v903_v55  ;;  %v20094_v42 = vunpack.i.l.s16 %v904_v38  ;;  %v12177_v30 = vld [vmem:[%s27866_s3 + $0xa0] sm:$0xf] }
  0xdf   :  { %v796_v58 = vmax.f32 %v792_v37, 0.0 }
  0xe0   :  { %v797_v56 = vmax.f32 %v793_v57, 0.0  ;;  %v915_v52 = vrot.slane %v20092_v41, 1  ;;  %v918_v53 = vrot.slane %v20094_v42, 1  ;;  %v1721_v3 = vrot.slane %v20092_v41, 2  ;;  %v17956_v57 = vld [vmem:[%s27866_s3 + $0xac] sm:$0xf0] }
  0xe1   :  { %v1724_v4 = vrot.slane %v20094_v42, 2  ;;  %v2154_v17 = vrot.slane %v20092_v41, 3  ;;  %v2157_v18 = vrot.slane %v20094_v42, 3  ;;  %v2587_v28 = vrot.slane %v20092_v41, 4 }
  0xe2   :  { %v799_v43 = vpack.c.bf16 %v797_v56, %v796_v58  ;;  %v765_v44 = vpop.f32.mrf.mxu2  ;;  %v2590_v26 = vrot.slane %v20094_v42, 4  ;;  %v3020_v31 = vrot.slane %v20092_v41, 5  ;;  %v3023_v32 = vrot.slane %v20094_v42, 5  ;;  %v12257_v56 = vld [vmem:[%s27866_s3 + $0x140] sm:$0xf] }
  0xe3   :  { %v778_v45 = vpop.f32.mrf.mxu3  ;;  %v12278_v58 = vor.u32 %v17978_v16, %v12275_v25  ;;  %v12129_v25 = vld [vmem:[%s27866_s3 + $0x40] sm:$0xf] }
  0xe4   :  { %v905_v48 = vunpack.c.l.b16 %v799_v43  ;;  %v906_v49 = vunpack.c.h.b16 %v799_v43  ;;  %v12179_v45 = vld [vmem:[%s27866_s3 + $0xb0] sm:$0xf0] }
  0xe6   :  { %v20104_v54 = vunpack.i.l.s16 %v905_v48  ;;  %v20106_v59 = vunpack.i.l.s16 %v906_v49  ;;  %v12178_v48 = vor.u32 %v17956_v57, %v12177_v30  ;;  %v12258_v49 = vor.u32 %v17976_v39, %v12257_v56  ;;  %v12131_v30 = vld [vmem:[%s27866_s3 + $0x50] sm:$0xf0]  ;;  %v849_v57 = vld [vmem:[%s27866_s3 + $0x188] sm:$0x33]  ;;  %v12113_v39 = vld [vmem:[%s27866_s3 + $0x20] sm:$0xf] }
  0xe7   :  { %v1449_v50 = vunpack.c.l.b16 %v849_v57 }
  0xe8   :  { %v917_v5 = vsel %vm916_vm4, %v20104_v54, %v915_v52  ;;  %v919_v6 = vsel %vm916_vm4, %v20106_v59, %v918_v53  ;;  %v1722_v12 = vrot.slane %v20104_v54, 1  ;;  %v1725_v13 = vrot.slane %v20106_v59, 1 }
  0xe9   :  { %v20134_v9 = vpack.c.b16 %v917_v5, %v917_v5  ;;  %v20136_v11 = vpack.c.b16 %v919_v6, %v919_v6  ;;  %v2155_v19 = vrot.slane %v20104_v54, 2  ;;  %v2158_v20 = vrot.slane %v20106_v59, 2  ;;  %v17948_v5 = vld [vmem:[%s27866_s3 + $0x6c] sm:$0xf0]  ;;  %v12225_v6 = vld [vmem:[%s27866_s3 + $0x100] sm:$0xf] }
  0xea   :  { %v20151_v21 = vsel %vm916_vm4, %v1722_v12, %v1721_v3  ;;  %v20154_v22 = vsel %vm916_vm4, %v1725_v13, %v1724_v4  ;;  %v2588_v27 = vrot.slane %v20104_v54, 3  ;;  %v2591_v29 = vrot.slane %v20106_v59, 3  ;;  %v12145_v4 = vld [vmem:[%s27866_s3 + $0x60] sm:$0xf]  ;;  %v17968_v12 = vld [vmem:[%s27866_s3 + $0x10c] sm:$0xf0] }
  0xeb   :  { %1198 = vmatmul.bf16.vlgmr.msra.gmra.mxu0 %v20134_v9  ;;  %v20158_v33 = vsel %vm916_vm4, %v2155_v19, %v2154_v17  ;;  %v20161_v35 = vsel %vm916_vm4, %v2158_v20, %v2157_v18  ;;  %12091 = vmatmul.msk.bf16.vlgmr.msra.gmra.mxu1 %vm1173_vm5, %v20136_v11  ;;  %v3021_v36 = vrot.slane %v20104_v54, 4  ;;  %v3024_v37 = vrot.slane %v20106_v59, 4  ;;  %v17946_v13 = vld [vmem:[%s27866_s3 + $0x64] sm:$0xf]  ;;  %v12227_v17 = vld [vmem:[%s27866_s3 + $0x110] sm:$0xf0] }
  0xec   :  { %1224 = vmatmul.bf16.vlgmr.msra.gmra.mxu2 %v20134_v9  ;;  %12092 = vmatmul.msk.bf16.vlgmr.msra.gmra.mxu3 %vm1173_vm5, %v20136_v11  ;;  %v20189_v55 = vsel %vm916_vm4, %v2588_v27, %v2587_v28  ;;  %v20192_v38 = vsel %vm916_vm4, %v2591_v29, %v2590_v26  ;;  %v12182_v52 = vor.u32 %v17954_v40, %v12179_v45  ;;  %v12217_v18 = vld [vmem:[%s27866_s3 + $0xe8] sm:$0xf]  ;;  %v17965_v19 = vld [vmem:[%s27866_s3 + $0xf4] sm:$0xf0]  ;;  %v17963_v20 = vld [vmem:[%s27866_s3 + $0xec] sm:$0xf] }
  0xed   :  { %1566 = vmatpush.bf16.msra.mxu3 %v12210_v62  ;;  %1582 = vmatpush.bf16.msra.mxu1 %v1555_v63  ;;  %v20204_v43 = vsel %vm916_vm4, %v3021_v36, %v3020_v31  ;;  %v20207_v44 = vsel %vm916_vm4, %v3024_v37, %v3023_v32  ;;  %v12262_v53 = vor.u32 %v17974_v46, %v12259_v47  ;;  %v17950_v62 = vld [vmem:[%s27866_s3 + $0x84] sm:$0xf]  ;;  %v12163_v63 = vld [vmem:[%s27866_s3 + $0x90] sm:$0xf0]  ;;  %v17944_v28 = vld [vmem:[%s27866_s3 + $0x4c] sm:$0xf0] }
  0xee   :  { %1592 = vmatpush.bf16.msra.mxu2 %v12214_v10  ;;  %1608 = vmatpush.bf16.msra.mxu0 %v1558_v0  ;;  %v17970_v0 = vld [vmem:[%s27866_s3 + $0x124] sm:$0xf]  ;;  %v12242_v3 = vor.u32 %v17972_v61, %v12241_v60  ;;  %v12166_v7 = vor.u32 %v17950_v62, %v12163_v63  ;;  %v12219_v10 = vld [vmem:[%s27866_s3 + $0xf8] sm:$0xf0]  ;;  %v12230_v16 = vor.u32 %v17966_v15, %v12227_v17  ;;  %v12201_v31 = vld [vmem:[%s27866_s3 + $0xc8] sm:$0xf]  ;;  %v1450_v61 = vunpack.c.h.b16 %v849_v57 }
  0xef   :  { %v12246_v8 = vor.u32 %v17970_v0, %v12243_v1  ;;  %v17942_v26 = vld [vmem:[%s27866_s3 + $0x44] sm:$0xf]  ;;  %v12218_v27 = vor.u32 %v17965_v19, %v12217_v18  ;;  %v12222_v29 = vor.u32 %v17963_v20, %v12219_v10  ;;  %v17961_v32 = vld [vmem:[%s27866_s3 + $0xd4] sm:$0xf0]  ;;  %v17959_v36 = vld [vmem:[%s27866_s3 + $0xcc] sm:$0xf] }
  0xf0   :  { %v12203_v37 = vld [vmem:[%s27866_s3 + $0xd8] sm:$0xf0]  ;;  %v12134_v56 = vor.u32 %v17942_v26, %v12131_v30  ;;  %v17940_v40 = vld [vmem:[%s27866_s3 + $0x2c] sm:$0xf0]  ;;  %v12202_v45 = vor.u32 %v17961_v32, %v12201_v31  ;;  %v17938_v47 = vld [vmem:[%s27866_s3 + $0x24] sm:$0xf] }
  0xf1   :  { %1567 = vmatpush.bf16.msra.mxu3 %v12194_v34  ;;  %1583 = vmatpush.bf16.msra.mxu1 %v12274_v23  ;;  %v12146_v34 = vor.u32 %v17948_v5, %v12145_v4  ;;  %v12226_v23 = vor.u32 %v17968_v12, %v12225_v6  ;;  %v12206_v46 = vor.u32 %v17959_v36, %v12203_v37  ;;  %v1294_v62 = vrot.slane %v20104_v54, 7  ;;  %v12097_v1 = vld [vmem:[%s27866_s3] sm:$0xf]  ;;  %v17934_v54 = vld [vmem:[%s27866_s3 + $0x4] sm:$0xf] }
  0xf2   :  { %1593 = vmatpush.bf16.msra.mxu2 %v12198_v24  ;;  %1609 = vmatpush.bf16.msra.mxu0 %v12278_v58  ;;  %v12150_v24 = vor.u32 %v17946_v13, %v12147_v14  ;;  %v12130_v58 = vor.u32 %v17944_v28, %v12129_v25  ;;  %v12114_v60 = vor.u32 %v17940_v40, %v12113_v39  ;;  %v1296_v63 = vrot.slane %v20106_v59, 7  ;;  %v12099_v59 = vld [vmem:[%s27866_s3 + $0x10] sm:$0xf0]  ;;  %v12169_v5 = vld [vmem:[%s27866_s3 + $0x88] sm:$0xf] }
  0xf3   :  { %v1501_v6 = vpack.c.b16 %v1449_v50, %v1449_v50  ;;  %v12171_v12 = vld [vmem:[%s27866_s3 + $0x98] sm:$0xf0]  ;;  %v1502_v14 = vpack.c.b16 %v1450_v61, %v1450_v61  ;;  %v12102_v15 = vor.u32 %v17934_v54, %v12099_v59  ;;  %v12153_v17 = vld [vmem:[%s27866_s3 + $0x68] sm:$0xf]  ;;  %v1295_v18 = vsel %vm916_vm4, %v1294_v62, %v20092_v41  ;;  %v17949_v41 = vld [vmem:[%s27866_s3 + $0x74] sm:$0xf0] }
  0xf4   :  { %v12155_v25 = vld [vmem:[%s27866_s3 + $0x78] sm:$0xf0]  ;;  %v17979_v26 = vld [vmem:[%s27866_s3 + $0x16c] sm:$0xf]  ;;  %v12154_v31 = vor.u32 %v17949_v41, %v12153_v17  ;;  %v12137_v36 = vld [vmem:[%s27866_s3 + $0x48] sm:$0xf] }
  0xf5   :  { %1568 = vmatpush.bf16.msra.mxu3 %v12178_v48  ;;  %1584 = vmatpush.bf16.msra.mxu1 %v12258_v49  ;;  %v12115_v48 = vld [vmem:[%s27866_s3 + $0x30] sm:$0xf0]  ;;  %v12185_v49 = vld [vmem:[%s27866_s3 + $0xa8] sm:$0xf]  ;;  %v1561_v20 = vsel %vm1177_vm3, %v1501_v6, 0  ;;  %v1564_v28 = vsel %vm1177_vm3, %v1502_v14, 0 }
  0xf6   :  { %1594 = vmatpush.bf16.msra.mxu2 %v12182_v52  ;;  %1610 = vmatpush.bf16.msra.mxu0 %v12262_v53  ;;  %v17955_v52 = vld [vmem:[%s27866_s3 + $0xac] sm:$0xf]  ;;  %v12187_v53 = vld [vmem:[%s27866_s3 + $0xb8] sm:$0xf0]  ;;  %v12118_v0 = vor.u32 %v17938_v47, %v12115_v48  ;;  %v12265_v37 = vld [vmem:[%s27866_s3 + $0x148] sm:$0xf] }
  0xf7   :  { %v12190_v4 = vor.u32 %v17955_v52, %v12187_v53  ;;  %v17977_v57 = vld [vmem:[%s27866_s3 + $0x154] sm:$0xf0]  ;;  %v17943_v39 = vld [vmem:[%s27866_s3 + $0x4c] sm:$0xf]  ;;  %v12139_v40 = vld [vmem:[%s27866_s3 + $0x58] sm:$0xf0] }
  0xf8   :  { %v12339_v47 = vld [vmem:[%s27866_s3 + $0x4a0] sm:$0x33]  ;;  %v12266_v48 = vor.u32 %v17977_v57, %v12265_v37  ;;  %v12142_v50 = vor.u32 %v17943_v39, %v12139_v40  ;;  %v12249_v52 = vld [vmem:[%s27866_s3 + $0x128] sm:$0xf]  ;;  %v17973_v53 = vld [vmem:[%s27866_s3 + $0x134] sm:$0xf0] }
  0xf9   :  { %1569 = vmatpush.bf16.msra.mxu3 %v12162_v2  ;;  %1585 = vmatpush.bf16.msra.mxu1 %v12242_v3  ;;  %v17936_v2 = vld [vmem:[%s27866_s3 + $0xc] sm:$0xf0]  ;;  %v12186_v3 = vor.u32 %v17957_v51, %v12185_v49  ;;  %v12121_v51 = vld [vmem:[%s27866_s3 + $0x28] sm:$0xf]  ;;  %v17941_v61 = vld [vmem:[%s27866_s3 + $0x34] sm:$0xf0] }
  0xfa   :  { %1595 = vmatpush.bf16.msra.mxu2 %v12166_v7  ;;  %1611 = vmatpush.bf16.msra.mxu0 %v12246_v8  ;;  %v17953_v7 = vld [vmem:[%s27866_s3 + $0x94] sm:$0xf0]  ;;  %v17951_v8 = vld [vmem:[%s27866_s3 + $0x8c] sm:$0xf]  ;;  %v12098_v13 = vor.u32 %v17936_v2, %v12097_v1  ;;  %v12251_v2 = vld [vmem:[%s27866_s3 + $0x138] sm:$0xf0]  ;;  %v12122_v54 = vor.u32 %v17941_v61, %v12121_v51 }
  0xfb   :  { %1250 = vmatmul.bf16.vlgmr.msrb.gmra.mxu1 %v20134_v9  ;;  %1276 = vmatmul.bf16.vlgmr.msrb.gmra.mxu0 %v20134_v9  ;;  %v12170_v19 = vor.u32 %v17953_v7, %v12169_v5  ;;  %v12174_v10 = vor.u32 %v17951_v8, %v12171_v12  ;;  %v17939_v62 = vld [vmem:[%s27866_s3 + $0x2c] sm:$0xf]  ;;  %v17937_v5 = vld [vmem:[%s27866_s3 + $0x14] sm:$0xf0]  ;;  %v12233_v6 = vld [vmem:[%s27866_s3 + $0x108] sm:$0xf]  ;;  %v1877_v8 = vunpack.c.h.b16 %v12339_v47 }
  0xfc   :  { %12093 = vmatmul.msk.bf16.vlgmr.msrb.gmra.mxu3 %vm1173_vm5, %v20136_v11  ;;  %12094 = vmatmul.msk.bf16.vlgmr.msrb.gmra.mxu2 %vm1173_vm5, %v20136_v11  ;;  %v17971_v1 = vld [vmem:[%s27866_s3 + $0x12c] sm:$0xf]  ;;  %v17969_v7 = vld [vmem:[%s27866_s3 + $0x114] sm:$0xf0]  ;;  %v12107_v14 = vld [vmem:[%s27866_s3 + $0x18] sm:$0xf0] }
  0xfd   :  { %1570 = vmatpush.bf16.msra.mxu3 %v12146_v34  ;;  %1586 = vmatpush.bf16.msra.mxu1 %v12226_v23  ;;  %v12281_v34 = vld [vmem:[%s27866_s3 + $0x168] sm:$0xf]  ;;  %v17981_v23 = vld [vmem:[%s27866_s3 + $0x174] sm:$0xf0]  ;;  %v12254_v12 = vor.u32 %v17971_v1, %v12251_v2  ;;  %v18054_v37 = vld [vmem:[%s27866_s3 + $0x3e4] sm:$0xf] }
  0xfe   :  { %1596 = vmatpush.bf16.msra.mxu2 %v12150_v24  ;;  %1612 = vmatpush.bf16.msra.mxu0 %v12230_v16  ;;  %v1297_v24 = vsel %vm916_vm4, %v1296_v63, %v20094_v42  ;;  %v17947_v16 = vld [vmem:[%s27866_s3 + $0x6c] sm:$0xf]  ;;  %v12283_v42 = vld [vmem:[%s27866_s3 + $0x178] sm:$0xf0]  ;;  %v12441_v57 = vld [vmem:[%s27866_s3 + $0x3f0] sm:$0xf0] }
  0xff   :  { %v20393_v30 = vpack.c.b16 %v1297_v24, %v1297_v24  ;;  %v12158_v32 = vor.u32 %v17947_v16, %v12155_v25  ;;  %v12123_v63 = vld [vmem:[%s27866_s3 + $0x38] sm:$0xf0]  ;;  %v1929_v16 = vpack.c.b16 %v1877_v8, %v1877_v8  ;;  %v12521_v39 = vld [vmem:[%s27866_s3 + $0x490] sm:$0xf0]  ;;  %v18072_v51 = vld [vmem:[%s27866_s3 + $0x46c] sm:$0xf0] }
 0x100   :  { %v12126_v59 = vor.u32 %v17939_v62, %v12123_v63  ;;  %v12505_v61 = vld [vmem:[%s27866_s3 + $0x470] sm:$0xf0]  ;;  %v12407_v1 = vld [vmem:[%s27866_s3 + $0x3a0] sm:$0xf]  ;;  %v18048_v2 = vld [vmem:[%s27866_s3 + $0x3ac] sm:$0xf0] }
 0x101   :  { %1618 = vmatpush.bf16.msrb.mxu1 %v12218_v27  ;;  %1571 = vmatpush.bf16.msra.mxu3 %v12130_v58  ;;  %v20391_v27 = vpack.c.b16 %v1295_v18, %v1295_v18  ;;  %v12286_v58 = vor.u32 %v17979_v26, %v12283_v42  ;;  %v12235_v18 = vld [vmem:[%s27866_s3 + $0x118] sm:$0xf0]  ;;  %v12408_v8 = vor.u32 %v18048_v2, %v12407_v1  ;;  %v18051_v2 = vld [vmem:[%s27866_s3 + $0x3cc] sm:$0xf] }
 0x102   :  { %1644 = vmatpush.bf16.msrb.mxu0 %v12222_v29  ;;  %1597 = vmatpush.bf16.msra.mxu2 %v12134_v56  ;;  %v12282_v29 = vor.u32 %v17981_v23, %v12281_v34  ;;  %v17945_v56 = vld [vmem:[%s27866_s3 + $0x54] sm:$0xf0]  ;;  %v18058_v34 = vld [vmem:[%s27866_s3 + $0x404] sm:$0xf]  ;;  %v12457_v23 = vld [vmem:[%s27866_s3 + $0x410] sm:$0xf0] }
 0x103   :  { %v12138_v49 = vor.u32 %v17945_v56, %v12137_v36  ;;  %v12460_v42 = vor.u32 %v18058_v34, %v12457_v23  ;;  %v18076_v36 = vld [vmem:[%s27866_s3 + $0x48c] sm:$0xf0]  ;;  %v18074_v56 = vld [vmem:[%s27866_s3 + $0x484] sm:$0xf]  ;;  %v12473_v23 = vld [vmem:[%s27866_s3 + $0x430] sm:$0xf0] }
 0x104   :  { %v18062_v34 = vld [vmem:[%s27866_s3 + $0x424] sm:$0xf] }
 0x105   :  { %1619 = vmatpush.bf16.msrb.mxu1 %v12202_v45  ;;  %1572 = vmatpush.bf16.msra.mxu3 %v12114_v60  ;;  %v17975_v45 = vld [vmem:[%s27866_s3 + $0x14c] sm:$0xf] }
 0x106   :  { %1645 = vmatpush.bf16.msrb.mxu0 %v12206_v46  ;;  %1598 = vmatpush.bf16.msra.mxu2 %v12118_v0  ;;  %v12267_v46 = vld [vmem:[%s27866_s3 + $0x158] sm:$0xf0]  ;;  %v1876_v0 = vunpack.c.l.b16 %v12339_v47  ;;  %v12423_v47 = vld [vmem:[%s27866_s3 + $0x3c0] sm:$0xf] }
 0x107   :  { %v12270_v60 = vor.u32 %v17975_v45, %v12267_v46  ;;  %v12444_v46 = vor.u32 %v18054_v37, %v12441_v57  ;;  %v18038_v37 = vld [vmem:[%s27866_s3 + $0x364] sm:$0xf]  ;;  %v12377_v57 = vld [vmem:[%s27866_s3 + $0x370] sm:$0xf0] }
 0x108   :  { %v1928_v17 = vpack.c.b16 %v1876_v0, %v1876_v0 }
 0x109   :  { %1620 = vmatpush.bf16.msrb.mxu1 %v12186_v3  ;;  %1573 = vmatpush.bf16.msra.mxu3 %v12098_v13  ;;  %v12250_v3 = vor.u32 %v17973_v53, %v12249_v52  ;;  %v17935_v13 = vld [vmem:[%s27866_s3 + $0xc] sm:$0xf]  ;;  %v18050_v52 = vld [vmem:[%s27866_s3 + $0x3c4] sm:$0xf]  ;;  %v12425_v53 = vld [vmem:[%s27866_s3 + $0x3d0] sm:$0xf0] }
 0x10a   :  { %1646 = vmatpush.bf16.msrb.mxu0 %v12190_v4  ;;  %1599 = vmatpush.bf16.msra.mxu2 %v12102_v15  ;;  %v12105_v4 = vld [vmem:[%s27866_s3 + $0x8] sm:$0xf]  ;;  %v17967_v15 = vld [vmem:[%s27866_s3 + $0x10c] sm:$0xf]  ;;  %v12110_v41 = vor.u32 %v17935_v13, %v12107_v14  ;;  %v1984_v26 = vsel %vm1177_vm3, %v1928_v17, 0  ;;  %v12428_v0 = vor.u32 %v18050_v52, %v12425_v53  ;;  %v20639_v53 = vpack.c.b16 %v20154_v22, %v20154_v22 }
 0x10b   :  { %12287 = vmatmul.msk.bf16.vlgmr.msra.gmra.mxu1 %vm1173_vm5, %v20393_v30  ;;  %12288 = vmatmul.msk.bf16.vlgmr.msra.gmra.mxu0 %vm1173_vm5, %v20393_v30  ;;  %v12106_v24 = vor.u32 %v17937_v5, %v12105_v4  ;;  %v12238_v25 = vor.u32 %v17967_v15, %v12235_v18  ;;  %v12409_v5 = vld [vmem:[%s27866_s3 + $0x3b0] sm:$0xf0]  ;;  %v18044_v15 = vld [vmem:[%s27866_s3 + $0x38c] sm:$0xf0]  ;;  %v12471_v17 = vld [vmem:[%s27866_s3 + $0x420] sm:$0xf] }
 0x10c   :  { %1574 = vmatmul.bf16.vlgmr.msra.gmra.mxu3 %v20391_v27  ;;  %v18064_v18 = vld [vmem:[%s27866_s3 + $0x42c] sm:$0xf0]  ;;  %v18053_v22 = vld [vmem:[%s27866_s3 + $0x3d4] sm:$0xf0] }
 0x10d   :  { %1634 = vmatpush.bf16.msrb.mxu3 %v1561_v20  ;;  %1621 = vmatpush.bf16.msrb.mxu1 %v12170_v19  ;;  %v12455_v19 = vld [vmem:[%s27866_s3 + $0x400] sm:$0xf]  ;;  %v18060_v20 = vld [vmem:[%s27866_s3 + $0x40c] sm:$0xf0] }
 0x10e   :  { %1647 = vmatpush.bf16.msrb.mxu0 %v12174_v10  ;;  %1660 = vmatpush.bf16.msrb.mxu2 %v1564_v28  ;;  %v12234_v10 = vor.u32 %v17969_v7, %v12233_v6  ;;  %v12456_v28 = vor.u32 %v18060_v20, %v12455_v19  ;;  %v18066_v6 = vld [vmem:[%s27866_s3 + $0x444] sm:$0xf]  ;;  %v12489_v7 = vld [vmem:[%s27866_s3 + $0x450] sm:$0xf0] }
 0x10f   :  { %1600 = vmatmul.bf16.vlgmr.msra.gmra.mxu2 %v20391_v27  ;;  %v12492_v19 = vor.u32 %v18066_v6, %v12489_v7  ;;  %v18042_v20 = vld [vmem:[%s27866_s3 + $0x384] sm:$0xf] }
 0x111   :  { %1635 = vmatpush.bf16.msrb.mxu3 %v12282_v29  ;;  %1622 = vmatpush.bf16.msrb.mxu1 %v12154_v31  ;;  %v12439_v29 = vld [vmem:[%s27866_s3 + $0x3e0] sm:$0xf]  ;;  %v18056_v31 = vld [vmem:[%s27866_s3 + $0x3ec] sm:$0xf0] }
 0x112   :  { %1648 = vmatpush.bf16.msrb.mxu0 %v12158_v32  ;;  %1661 = vmatpush.bf16.msrb.mxu2 %v12286_v58  ;;  %v12519_v32 = vld [vmem:[%s27866_s3 + $0x480] sm:$0xf]  ;;  %v1987_v58 = vsel %vm1177_vm3, %v1929_v16, 0  ;;  %v12440_v40 = vor.u32 %v18056_v31, %v12439_v29  ;;  %v18040_v31 = vld [vmem:[%s27866_s3 + $0x36c] sm:$0xf0] }
 0x113   :  { %v12520_v45 = vor.u32 %v18076_v36, %v12519_v32  ;;  %v12375_v29 = vld [vmem:[%s27866_s3 + $0x360] sm:$0xf]  ;;  %v12476_v32 = vor.u32 %v18062_v34, %v12473_v23 }
 0x115   :  { %1636 = vmatpush.bf16.msrb.mxu3 %v12266_v48  ;;  %1623 = vmatpush.bf16.msrb.mxu1 %v12138_v49  ;;  %v18052_v48 = vld [vmem:[%s27866_s3 + $0x3cc] sm:$0xf0]  ;;  %v12503_v49 = vld [vmem:[%s27866_s3 + $0x460] sm:$0xf] }
 0x116   :  { %1649 = vmatpush.bf16.msrb.mxu0 %v12142_v50  ;;  %1662 = vmatpush.bf16.msrb.mxu2 %v12270_v60  ;;  %v12524_v50 = vor.u32 %v18074_v56, %v12521_v39  ;;  %v18070_v60 = vld [vmem:[%s27866_s3 + $0x464] sm:$0xf]  ;;  %v12424_v62 = vor.u32 %v18052_v48, %v12423_v47  ;;  %v12504_v63 = vor.u32 %v18072_v51, %v12503_v49  ;;  %v12447_v39 = vld [vmem:[%s27866_s3 + $0x3e8] sm:$0xf]  ;;  %v12449_v47 = vld [vmem:[%s27866_s3 + $0x3f8] sm:$0xf0] }
 0x117   :  { %v12508_v4 = vor.u32 %v18070_v60, %v12505_v61  ;;  %v12380_v48 = vor.u32 %v18038_v37, %v12377_v57  ;;  %v12359_v49 = vld [vmem:[%s27866_s3 + $0x340] sm:$0xf]  ;;  %v18034_v61 = vld [vmem:[%s27866_s3 + $0x344] sm:$0xf] }
 0x119   :  { %1637 = vmatpush.bf16.msrb.mxu3 %v12250_v3  ;;  %1624 = vmatpush.bf16.msrb.mxu1 %v12122_v54  ;;  %v12487_v3 = vld [vmem:[%s27866_s3 + $0x440] sm:$0xf]  ;;  %v18068_v54 = vld [vmem:[%s27866_s3 + $0x44c] sm:$0xf0] }
 0x11a   :  { %1650 = vmatpush.bf16.msrb.mxu0 %v12126_v59  ;;  %1663 = vmatpush.bf16.msrb.mxu2 %v12254_v12  ;;  %v18046_v59 = vld [vmem:[%s27866_s3 + $0x3a4] sm:$0xf]  ;;  %v12391_v12 = vld [vmem:[%s27866_s3 + $0x380] sm:$0xf]  ;;  %v12488_v13 = vor.u32 %v18068_v54, %v12487_v3  ;;  %v12433_v3 = vld [vmem:[%s27866_s3 + $0x3d8] sm:$0xf0] }
 0x11b   :  { %v12412_v14 = vor.u32 %v18046_v59, %v12409_v5  ;;  %v12392_v16 = vor.u32 %v18044_v15, %v12391_v12  ;;  %v12343_v54 = vld [vmem:[%s27866_s3 + $0x320] sm:$0xf]  ;;  %v18032_v59 = vld [vmem:[%s27866_s3 + $0x32c] sm:$0xf0]  ;;  %v12345_v12 = vld [vmem:[%s27866_s3 + $0x330] sm:$0xf0] }
 0x11c   :  { %v18049_v15 = vld [vmem:[%s27866_s3 + $0x3b4] sm:$0xf0] }
 0x11d   :  { %1638 = vmatpush.bf16.msrb.mxu3 %v12234_v10  ;;  %1625 = vmatpush.bf16.msrb.mxu1 %v12106_v24  ;;  %v12393_v10 = vld [vmem:[%s27866_s3 + $0x390] sm:$0xf0]  ;;  %v12463_v24 = vld [vmem:[%s27866_s3 + $0x408] sm:$0xf] }
 0x11e   :  { %1651 = vmatpush.bf16.msrb.mxu0 %v12110_v41  ;;  %1664 = vmatpush.bf16.msrb.mxu2 %v12238_v25  ;;  %v18061_v41 = vld [vmem:[%s27866_s3 + $0x414] sm:$0xf0]  ;;  %v18059_v25 = vld [vmem:[%s27866_s3 + $0x40c] sm:$0xf] }
 0x11f   :  { %v12464_v36 = vor.u32 %v18061_v41, %v12463_v24  ;;  %v12399_v24 = vld [vmem:[%s27866_s3 + $0x388] sm:$0xf] }
 0x120   :  { %1626 = vmatmul.bf16.vlgmr.msrb.gmra.mxu1 %v20391_v27  ;;  %12289 = vmatmul.msk.bf16.vlgmr.msrb.gmra.mxu3 %vm1173_vm5, %v20393_v30  ;;  %v12527_v41 = vld [vmem:[%s27866_s3 + $0x488] sm:$0xf] }
 0x121   :  { %1995 = vmatpush.bf16.msra.mxu3 %v12456_v28  ;;  %2011 = vmatpush.bf16.msra.mxu1 %v1984_v26  ;;  %v12465_v28 = vld [vmem:[%s27866_s3 + $0x418] sm:$0xf0]  ;;  %v12472_v26 = vor.u32 %v18064_v18, %v12471_v17  ;;  %v12344_v17 = vor.u32 %v18032_v59, %v12343_v54  ;;  %v18047_v18 = vld [vmem:[%s27866_s3 + $0x3ac] sm:$0xf]  ;;  %v12351_v59 = vld [vmem:[%s27866_s3 + $0x328] sm:$0xf] }
 0x122   :  { %2021 = vmatpush.bf16.msra.mxu2 %v12460_v42  ;;  %2037 = vmatpush.bf16.msra.mxu0 %v1987_v58  ;;  %v12396_v42 = vor.u32 %v18042_v20, %v12393_v10  ;;  %v12340_v58 = vld [vmem:[%s27866_s3 + $0x4a8] sm:$0x33]  ;;  %v12468_v56 = vor.u32 %v18059_v25, %v12465_v28  ;;  %v18045_v28 = vld [vmem:[%s27866_s3 + $0x394] sm:$0xf0] }
 0x123   :  { %1652 = vmatmul.bf16.vlgmr.msrb.gmra.mxu0 %v20391_v27  ;;  %12290 = vmatmul.msk.bf16.vlgmr.msrb.gmra.mxu2 %vm1173_vm5, %v20393_v30  ;;  %v1878_v51 = vunpack.c.l.b16 %v12340_v58  ;;  %v1879_v52 = vunpack.c.h.b16 %v12340_v58  ;;  %v12400_v37 = vor.u32 %v18045_v28, %v12399_v24  ;;  %v12383_v58 = vld [vmem:[%s27866_s3 + $0x368] sm:$0xf]  ;;  %v18106_v24 = vld [vmem:[%s27866_s3 + $0x594] sm:$0xf] }
 0x125   :  { %1996 = vmatpush.bf16.msra.mxu3 %v12440_v40  ;;  %2012 = vmatpush.bf16.msra.mxu1 %v12520_v45  ;;  %v18057_v40 = vld [vmem:[%s27866_s3 + $0x3f4] sm:$0xf0]  ;;  %v12376_v45 = vor.u32 %v18040_v31, %v12375_v29  ;;  %v1930_v5 = vpack.c.b16 %v1878_v51, %v1878_v51  ;;  %v1931_v6 = vpack.c.b16 %v1879_v52, %v1879_v52  ;;  %v18043_v29 = vld [vmem:[%s27866_s3 + $0x38c] sm:$0xf]  ;;  %v12401_v31 = vld [vmem:[%s27866_s3 + $0x398] sm:$0xf0] }
 0x126   :  { %2022 = vmatpush.bf16.msra.mxu2 %v12444_v46  ;;  %2038 = vmatpush.bf16.msra.mxu0 %v12524_v50  ;;  %v18055_v46 = vld [vmem:[%s27866_s3 + $0x3ec] sm:$0xf]  ;;  %v18036_v50 = vld [vmem:[%s27866_s3 + $0x34c] sm:$0xf0]  ;;  %v12448_v60 = vor.u32 %v18057_v40, %v12447_v39  ;;  %v12404_v39 = vor.u32 %v18043_v29, %v12401_v31  ;;  %v18041_v40 = vld [vmem:[%s27866_s3 + $0x374] sm:$0xf0] }
 0x127   :  { %v12360_v1 = vor.u32 %v18036_v50, %v12359_v49  ;;  %v1990_v10 = vsel %vm1177_vm3, %v1930_v5, 0  ;;  %v1993_v34 = vsel %vm1177_vm3, %v1931_v6, 0  ;;  %v12585_v49 = vld [vmem:[%s27866_s3 + $0x630] sm:$0x33]  ;;  %v12384_v51 = vor.u32 %v18041_v40, %v12383_v58  ;;  %v18124_v58 = vld [vmem:[%s27866_s3 + $0x61c] sm:$0xf0] }
 0x128   :  { %v18122_v40 = vld [vmem:[%s27866_s3 + $0x614] sm:$0xf] }
 0x129   :  { %1997 = vmatpush.bf16.msra.mxu3 %v12424_v62  ;;  %2013 = vmatpush.bf16.msra.mxu1 %v12504_v63  ;;  %v12361_v62 = vld [vmem:[%s27866_s3 + $0x350] sm:$0xf0]  ;;  %v12452_v63 = vor.u32 %v18055_v46, %v12449_v47  ;;  %v12513_v46 = vld [vmem:[%s27866_s3 + $0x478] sm:$0xf0]  ;;  %v18039_v47 = vld [vmem:[%s27866_s3 + $0x36c] sm:$0xf] }
 0x12a   :  { %2023 = vmatpush.bf16.msra.mxu2 %v12428_v0  ;;  %2039 = vmatpush.bf16.msra.mxu0 %v12508_v4  ;;  %v12431_v0 = vld [vmem:[%s27866_s3 + $0x3c8] sm:$0xf]  ;;  %v12364_v4 = vor.u32 %v18034_v61, %v12361_v62  ;;  %v18069_v62 = vld [vmem:[%s27866_s3 + $0x454] sm:$0xf0] }
 0x12b   :  { %v12432_v7 = vor.u32 %v18053_v22, %v12431_v0  ;;  %v12495_v61 = vld [vmem:[%s27866_s3 + $0x448] sm:$0xf]  ;;  %v18037_v0 = vld [vmem:[%s27866_s3 + $0x354] sm:$0xf0]  ;;  %v18067_v22 = vld [vmem:[%s27866_s3 + $0x44c] sm:$0xf] }
 0x12c   :  { %v12496_v54 = vor.u32 %v18069_v62, %v12495_v61  ;;  %v18098_v61 = vld [vmem:[%s27866_s3 + $0x554] sm:$0xf]  ;;  %v12671_v62 = vld [vmem:[%s27866_s3 + $0x560] sm:$0xf0] }
 0x12d   :  { %1998 = vmatpush.bf16.msra.mxu3 %v12408_v8  ;;  %2014 = vmatpush.bf16.msra.mxu1 %v12488_v13  ;;  %v18030_v8 = vld [vmem:[%s27866_s3 + $0x324] sm:$0xf]  ;;  %v12436_v13 = vor.u32 %v18051_v2, %v12433_v3  ;;  %v2309_v2 = vunpack.c.l.b16 %v12585_v49  ;;  %v18035_v3 = vld [vmem:[%s27866_s3 + $0x34c] sm:$0xf] }
 0x12e   :  { %2024 = vmatpush.bf16.msra.mxu2 %v12412_v14  ;;  %2040 = vmatpush.bf16.msra.mxu0 %v12492_v19  ;;  %v12415_v14 = vld [vmem:[%s27866_s3 + $0x3a8] sm:$0xf]  ;;  %v12417_v19 = vld [vmem:[%s27866_s3 + $0x3b8] sm:$0xf0]  ;;  %v12348_v20 = vor.u32 %v18030_v8, %v12345_v12  ;;  %v18065_v12 = vld [vmem:[%s27866_s3 + $0x434] sm:$0xf0] }
 0x12f   :  { %v12416_v23 = vor.u32 %v18049_v15, %v12415_v14  ;;  %v12420_v25 = vor.u32 %v18047_v18, %v12417_v19  ;;  %v12479_v8 = vld [vmem:[%s27866_s3 + $0x428] sm:$0xf]  ;;  %v18031_v15 = vld [vmem:[%s27866_s3 + $0x32c] sm:$0xf]  ;;  %v12481_v18 = vld [vmem:[%s27866_s3 + $0x438] sm:$0xf0]  ;;  %v2361_v19 = vpack.c.b16 %v2309_v2, %v2309_v2  ;;  %v12674_v2 = vor.u32 %v18098_v61, %v12671_v62 }
 0x130   :  { %v20957_v62 = vpack.c.b16 %v20161_v35, %v20161_v35  ;;  %v18101_v35 = vld [vmem:[%s27866_s3 + $0x564] sm:$0xf0] }
 0x131   :  { %1999 = vmatpush.bf16.msra.mxu3 %v12392_v16  ;;  %2015 = vmatpush.bf16.msra.mxu1 %v12472_v26  ;;  %v18077_v16 = vld [vmem:[%s27866_s3 + $0x494] sm:$0xf0]  ;;  %v18075_v26 = vld [vmem:[%s27866_s3 + $0x48c] sm:$0xf]  ;;  %v2417_v29 = vsel %vm1177_vm3, %v2361_v19, 0 }
 0x132   :  { %2025 = vmatpush.bf16.msra.mxu2 %v12396_v42  ;;  %2041 = vmatpush.bf16.msra.mxu0 %v12476_v32  ;;  %v12529_v42 = vld [vmem:[%s27866_s3 + $0x498] sm:$0xf0]  ;;  %v20715_v32 = vpack.c.b16 %v20151_v21, %v20151_v21  ;;  %v18073_v21 = vld [vmem:[%s27866_s3 + $0x474] sm:$0xf0]  ;;  %v12717_v19 = vld [vmem:[%s27866_s3 + $0x5b0] sm:$0xf] }
 0x133   :  { %v12532_v57 = vor.u32 %v18075_v26, %v12529_v42 }
 0x134   :  { %12533 = vmatmul.msk.bf16.vlgmr.msra.gmra.mxu1 %vm1173_vm5, %v20639_v53 }
 0x135   :  { %2047 = vmatpush.bf16.msrb.mxu1 %v12464_v36  ;;  %2000 = vmatpush.bf16.msra.mxu3 %v12376_v45  ;;  %v12528_v36 = vor.u32 %v18077_v16, %v12527_v41  ;;  %v18071_v45 = vld [vmem:[%s27866_s3 + $0x46c] sm:$0xf]  ;;  %v12703_v41 = vld [vmem:[%s27866_s3 + $0x5a0] sm:$0xf0] }
 0x136   :  { %2073 = vmatpush.bf16.msrb.mxu0 %v12468_v56  ;;  %2026 = vmatpush.bf16.msra.mxu2 %v12380_v48  ;;  %v12511_v56 = vld [vmem:[%s27866_s3 + $0x468] sm:$0xf]  ;;  %v12385_v48 = vld [vmem:[%s27866_s3 + $0x378] sm:$0xf0]  ;;  %v12516_v52 = vor.u32 %v18071_v45, %v12513_v46  ;;  %v12706_v31 = vor.u32 %v18106_v24, %v12703_v41  ;;  %v12767_v45 = vld [vmem:[%s27866_s3 + $0x620] sm:$0xf0] }
 0x137   :  { %12534 = vmatmul.msk.bf16.vlgmr.msra.gmra.mxu0 %vm1173_vm5, %v20639_v53  ;;  %v12512_v50 = vor.u32 %v18073_v21, %v12511_v56  ;;  %v18102_v56 = vld [vmem:[%s27866_s3 + $0x574] sm:$0xf]  ;;  %v12687_v21 = vld [vmem:[%s27866_s3 + $0x580] sm:$0xf0] }
 0x138   :  { %v18110_v24 = vld [vmem:[%s27866_s3 + $0x5b4] sm:$0xf]  ;;  %v12719_v41 = vld [vmem:[%s27866_s3 + $0x5c0] sm:$0xf0] }
 0x139   :  { %2048 = vmatpush.bf16.msrb.mxu1 %v12448_v60  ;;  %2001 = vmatpush.bf16.msra.mxu3 %v12360_v1  ;;  %v12367_v60 = vld [vmem:[%s27866_s3 + $0x348] sm:$0xf]  ;;  %v12497_v1 = vld [vmem:[%s27866_s3 + $0x458] sm:$0xf0] }
 0x13a   :  { %2074 = vmatpush.bf16.msrb.mxu0 %v12452_v63  ;;  %2027 = vmatpush.bf16.msra.mxu2 %v12364_v4  ;;  %v12388_v63 = vor.u32 %v18039_v47, %v12385_v48  ;;  %v12369_v4 = vld [vmem:[%s27866_s3 + $0x358] sm:$0xf0]  ;;  %v12368_v5 = vor.u32 %v18037_v0, %v12367_v60  ;;  %v12500_v6 = vor.u32 %v18067_v22, %v12497_v1  ;;  %v18120_v60 = vld [vmem:[%s27866_s3 + $0x5fc] sm:$0xf0]  ;;  %v12751_v0 = vld [vmem:[%s27866_s3 + $0x600] sm:$0xf0] }
 0x13b   :  { %v12372_v14 = vor.u32 %v18035_v3, %v12369_v4  ;;  %v12690_v48 = vor.u32 %v18102_v56, %v12687_v21  ;;  %v12653_v3 = vld [vmem:[%s27866_s3 + $0x530] sm:$0xf]  ;;  %v18096_v4 = vld [vmem:[%s27866_s3 + $0x53c] sm:$0xf0]  ;;  %v18086_v56 = vld [vmem:[%s27866_s3 + $0x4f4] sm:$0xf] }
 0x13c   :  { %v12623_v21 = vld [vmem:[%s27866_s3 + $0x500] sm:$0xf0] }
 0x13d   :  { %2049 = vmatpush.bf16.msrb.mxu1 %v12432_v7  ;;  %2002 = vmatpush.bf16.msra.mxu3 %v12344_v17  ;;  %v18033_v7 = vld [vmem:[%s27866_s3 + $0x334] sm:$0xf0]  ;;  %v18063_v17 = vld [vmem:[%s27866_s3 + $0x42c] sm:$0xf] }
 0x13e   :  { %2075 = vmatpush.bf16.msrb.mxu0 %v12436_v13  ;;  %2028 = vmatpush.bf16.msra.mxu2 %v12348_v20  ;;  %v2310_v13 = vunpack.c.h.b16 %v12585_v49  ;;  %v12353_v20 = vld [vmem:[%s27866_s3 + $0x338] sm:$0xf0]  ;;  %v12352_v16 = vor.u32 %v18033_v7, %v12351_v59  ;;  %v12669_v49 = vld [vmem:[%s27866_s3 + $0x550] sm:$0xf]  ;;  %v12655_v7 = vld [vmem:[%s27866_s3 + $0x540] sm:$0xf0] }
 0x13f   :  { %v12356_v26 = vor.u32 %v18031_v15, %v12353_v20  ;;  %v18112_v20 = vld [vmem:[%s27866_s3 + $0x5bc] sm:$0xf0] }
 0x140   :  { %2003 = vmatmul.bf16.vlgmr.msra.gmra.mxu3 %v20715_v32  ;;  %v2362_v28 = vpack.c.b16 %v2310_v13, %v2310_v13  ;;  %v12654_v13 = vor.u32 %v18096_v4, %v12653_v3  ;;  %v18099_v4 = vld [vmem:[%s27866_s3 + $0x55c] sm:$0xf] }
 0x141   :  { %2063 = vmatpush.bf16.msrb.mxu3 %v1990_v10  ;;  %2050 = vmatpush.bf16.msrb.mxu1 %v12416_v23  ;;  %v12701_v10 = vld [vmem:[%s27866_s3 + $0x590] sm:$0xf]  ;;  %v12480_v23 = vor.u32 %v18065_v12, %v12479_v8  ;;  %v18114_v8 = vld [vmem:[%s27866_s3 + $0x5d4] sm:$0xf]  ;;  %v12735_v12 = vld [vmem:[%s27866_s3 + $0x5e0] sm:$0xf0] }
 0x142   :  { %2089 = vmatpush.bf16.msrb.mxu2 %v1993_v34  ;;  %2076 = vmatpush.bf16.msrb.mxu0 %v12420_v25  ;;  %v18108_v34 = vld [vmem:[%s27866_s3 + $0x59c] sm:$0xf0]  ;;  %v12484_v25 = vor.u32 %v18063_v17, %v12481_v18 }
 0x143   :  { %2029 = vmatmul.bf16.vlgmr.msra.gmra.mxu2 %v20715_v32  ;;  %v12702_v42 = vor.u32 %v18108_v34, %v12701_v10  ;;  %v18092_v18 = vld [vmem:[%s27866_s3 + $0x51c] sm:$0xf0]  ;;  %v12738_v10 = vor.u32 %v18114_v8, %v12735_v12  ;;  %v18090_v34 = vld [vmem:[%s27866_s3 + $0x514] sm:$0xf] }
 0x145   :  { %2064 = vmatpush.bf16.msrb.mxu3 %v12528_v36  ;;  %2051 = vmatpush.bf16.msrb.mxu1 %v12400_v37  ;;  %v12685_v36 = vld [vmem:[%s27866_s3 + $0x570] sm:$0xf]  ;;  %v18104_v37 = vld [vmem:[%s27866_s3 + $0x57c] sm:$0xf0] }
 0x146   :  { %2090 = vmatpush.bf16.msrb.mxu2 %v12532_v57  ;;  %2077 = vmatpush.bf16.msrb.mxu0 %v12404_v39  ;;  %v12765_v57 = vld [vmem:[%s27866_s3 + $0x610] sm:$0xf]  ;;  %v2420_v39 = vsel %vm1177_vm3, %v2362_v28, 0  ;;  %v12686_v46 = vor.u32 %v18104_v37, %v12685_v36  ;;  %v18088_v37 = vld [vmem:[%s27866_s3 + $0x4fc] sm:$0xf0] }
 0x147   :  { %v12766_v47 = vor.u32 %v18124_v58, %v12765_v57  ;;  %v12621_v36 = vld [vmem:[%s27866_s3 + $0x4f0] sm:$0xf]  ;;  %v12722_v57 = vor.u32 %v18110_v24, %v12719_v41 }
 0x149   :  { %2065 = vmatpush.bf16.msrb.mxu3 %v12512_v50  ;;  %2052 = vmatpush.bf16.msrb.mxu1 %v12384_v51  ;;  %v18100_v50 = vld [vmem:[%s27866_s3 + $0x55c] sm:$0xf0]  ;;  %v12749_v51 = vld [vmem:[%s27866_s3 + $0x5f0] sm:$0xf] }
 0x14a   :  { %2091 = vmatpush.bf16.msrb.mxu2 %v12516_v52  ;;  %2078 = vmatpush.bf16.msrb.mxu0 %v12388_v63  ;;  %v12770_v52 = vor.u32 %v18122_v40, %v12767_v45  ;;  %v18118_v63 = vld [vmem:[%s27866_s3 + $0x5f4] sm:$0xf]  ;;  %v12670_v22 = vor.u32 %v18100_v50, %v12669_v49  ;;  %v12750_v1 = vor.u32 %v18120_v60, %v12749_v51  ;;  %v12693_v45 = vld [vmem:[%s27866_s3 + $0x578] sm:$0xf]  ;;  %v12695_v49 = vld [vmem:[%s27866_s3 + $0x588] sm:$0xf0] }
 0x14b   :  { %v12754_v59 = vor.u32 %v18118_v63, %v12751_v0  ;;  %v12626_v50 = vor.u32 %v18086_v56, %v12623_v21  ;;  %v12605_v51 = vld [vmem:[%s27866_s3 + $0x4d0] sm:$0xf]  ;;  %v18082_v0 = vld [vmem:[%s27866_s3 + $0x4d4] sm:$0xf] }
 0x14d   :  { %2066 = vmatpush.bf16.msrb.mxu3 %v12496_v54  ;;  %2053 = vmatpush.bf16.msrb.mxu1 %v12368_v5  ;;  %v12733_v54 = vld [vmem:[%s27866_s3 + $0x5d0] sm:$0xf]  ;;  %v18116_v5 = vld [vmem:[%s27866_s3 + $0x5dc] sm:$0xf0] }
 0x14e   :  { %2092 = vmatpush.bf16.msrb.mxu2 %v12500_v6  ;;  %2079 = vmatpush.bf16.msrb.mxu0 %v12372_v14  ;;  %v18094_v6 = vld [vmem:[%s27866_s3 + $0x534] sm:$0xf]  ;;  %v12637_v14 = vld [vmem:[%s27866_s3 + $0x510] sm:$0xf]  ;;  %v12734_v15 = vor.u32 %v18116_v5, %v12733_v54  ;;  %v12679_v54 = vld [vmem:[%s27866_s3 + $0x568] sm:$0xf0] }
 0x14f   :  { %v12658_v17 = vor.u32 %v18094_v6, %v12655_v7  ;;  %v12638_v28 = vor.u32 %v18092_v18, %v12637_v14  ;;  %v12589_v5 = vld [vmem:[%s27866_s3 + $0x4b0] sm:$0xf]  ;;  %v18080_v6 = vld [vmem:[%s27866_s3 + $0x4bc] sm:$0xf0]  ;;  %v12591_v14 = vld [vmem:[%s27866_s3 + $0x4c0] sm:$0xf0] }
 0x150   :  { %v18097_v18 = vld [vmem:[%s27866_s3 + $0x544] sm:$0xf0] }
 0x151   :  { %2067 = vmatpush.bf16.msrb.mxu3 %v12480_v23  ;;  %2054 = vmatpush.bf16.msrb.mxu1 %v12352_v16  ;;  %v12639_v23 = vld [vmem:[%s27866_s3 + $0x520] sm:$0xf0]  ;;  %v12709_v16 = vld [vmem:[%s27866_s3 + $0x598] sm:$0xf] }
 0x152   :  { %2093 = vmatpush.bf16.msrb.mxu2 %v12484_v25  ;;  %2080 = vmatpush.bf16.msrb.mxu0 %v12356_v26  ;;  %v18109_v25 = vld [vmem:[%s27866_s3 + $0x5a4] sm:$0xf0]  ;;  %v18107_v26 = vld [vmem:[%s27866_s3 + $0x59c] sm:$0xf] }
 0x153   :  { %v12710_v58 = vor.u32 %v18109_v25, %v12709_v16  ;;  %v12645_v16 = vld [vmem:[%s27866_s3 + $0x518] sm:$0xf] }
 0x154   :  { %2055 = vmatmul.bf16.vlgmr.msrb.gmra.mxu1 %v20715_v32  ;;  %12535 = vmatmul.msk.bf16.vlgmr.msrb.gmra.mxu3 %vm1173_vm5, %v20639_v53  ;;  %v12773_v25 = vld [vmem:[%s27866_s3 + $0x618] sm:$0xf] }
 0x155   :  { %2428 = vmatpush.bf16.msra.mxu3 %v12702_v42  ;;  %2444 = vmatpush.bf16.msra.mxu1 %v2417_v29  ;;  %v12711_v42 = vld [vmem:[%s27866_s3 + $0x5a8] sm:$0xf0]  ;;  %v12718_v29 = vor.u32 %v18112_v20, %v12717_v19  ;;  %v12590_v19 = vor.u32 %v18080_v6, %v12589_v5  ;;  %v18095_v20 = vld [vmem:[%s27866_s3 + $0x53c] sm:$0xf] }
 0x156   :  { %2454 = vmatpush.bf16.msra.mxu2 %v12706_v31  ;;  %2470 = vmatpush.bf16.msra.mxu0 %v2420_v39  ;;  %v12642_v31 = vor.u32 %v18090_v34, %v12639_v23  ;;  %v12586_v39 = vld [vmem:[%s27866_s3 + $0x638] sm:$0x33]  ;;  %v12714_v40 = vor.u32 %v18107_v26, %v12711_v42  ;;  %v18093_v42 = vld [vmem:[%s27866_s3 + $0x524] sm:$0xf0] }
 0x157   :  { %2081 = vmatmul.bf16.vlgmr.msrb.gmra.mxu0 %v20715_v32  ;;  %12536 = vmatmul.msk.bf16.vlgmr.msrb.gmra.mxu2 %vm1173_vm5, %v20639_v53  ;;  %v2311_v60 = vunpack.c.l.b16 %v12586_v39  ;;  %v2312_v61 = vunpack.c.h.b16 %v12586_v39 }
 0x159   :  { %2429 = vmatpush.bf16.msra.mxu3 %v12686_v46  ;;  %2445 = vmatpush.bf16.msra.mxu1 %v12766_v47  ;;  %v18105_v46 = vld [vmem:[%s27866_s3 + $0x584] sm:$0xf0]  ;;  %v12622_v47 = vor.u32 %v18088_v37, %v12621_v36  ;;  %v2363_v7 = vpack.c.b16 %v2311_v60, %v2311_v60  ;;  %v2364_v8 = vpack.c.b16 %v2312_v61, %v2312_v61  ;;  %v18091_v37 = vld [vmem:[%s27866_s3 + $0x51c] sm:$0xf]  ;;  %v12631_v60 = vld [vmem:[%s27866_s3 + $0x508] sm:$0xf0] }
 0x15a   :  { %2455 = vmatpush.bf16.msra.mxu2 %v12690_v48  ;;  %2471 = vmatpush.bf16.msra.mxu0 %v12770_v52  ;;  %v18103_v48 = vld [vmem:[%s27866_s3 + $0x57c] sm:$0xf]  ;;  %v18084_v52 = vld [vmem:[%s27866_s3 + $0x4dc] sm:$0xf0]  ;;  %v12694_v63 = vor.u32 %v18105_v46, %v12693_v45  ;;  %v12629_v46 = vld [vmem:[%s27866_s3 + $0x4f8] sm:$0xf] }
 0x15b   :  { %v12606_v3 = vor.u32 %v18084_v52, %v12605_v51  ;;  %v2423_v23 = vsel %vm1177_vm3, %v2363_v7, 0  ;;  %v2426_v24 = vsel %vm1177_vm3, %v2364_v8, 0  ;;  %v12759_v51 = vld [vmem:[%s27866_s3 + $0x608] sm:$0xf0]  ;;  %v18087_v52 = vld [vmem:[%s27866_s3 + $0x4fc] sm:$0xf] }
 0x15c   :  { %v12831_v61 = vld [vmem:[%s27866_s3 + $0x7c0] sm:$0x33]  ;;  %v18083_v8 = vld [vmem:[%s27866_s3 + $0x4dc] sm:$0xf] }
 0x15d   :  { %2430 = vmatpush.bf16.msra.mxu3 %v12670_v22  ;;  %2446 = vmatpush.bf16.msra.mxu1 %v12750_v1  ;;  %v12607_v22 = vld [vmem:[%s27866_s3 + $0x4e0] sm:$0xf0]  ;;  %v12698_v1 = vor.u32 %v18103_v48, %v12695_v49  ;;  %v18089_v49 = vld [vmem:[%s27866_s3 + $0x504] sm:$0xf0]  ;;  %v2742_v5 = vunpack.c.l.b16 %v12831_v61 }
 0x15e   :  { %2456 = vmatpush.bf16.msra.mxu2 %v12674_v2  ;;  %2472 = vmatpush.bf16.msra.mxu0 %v12754_v59  ;;  %v12677_v2 = vld [vmem:[%s27866_s3 + $0x558] sm:$0xf]  ;;  %v12610_v59 = vor.u32 %v18082_v0, %v12607_v22  ;;  %v12630_v0 = vor.u32 %v18089_v49, %v12629_v46 }
 0x15f   :  { %v12678_v12 = vor.u32 %v18101_v35, %v12677_v2  ;;  %v12741_v2 = vld [vmem:[%s27866_s3 + $0x5d8] sm:$0xf]  ;;  %v18117_v35 = vld [vmem:[%s27866_s3 + $0x5e4] sm:$0xf0] }
 0x161   :  { %2431 = vmatpush.bf16.msra.mxu3 %v12654_v13  ;;  %2447 = vmatpush.bf16.msra.mxu1 %v12734_v15  ;;  %v18078_v13 = vld [vmem:[%s27866_s3 + $0x4b4] sm:$0xf]  ;;  %v12682_v15 = vor.u32 %v18099_v4, %v12679_v54  ;;  %v18085_v4 = vld [vmem:[%s27866_s3 + $0x4e4] sm:$0xf0]  ;;  %v18115_v54 = vld [vmem:[%s27866_s3 + $0x5dc] sm:$0xf] }
 0x162   :  { %2457 = vmatpush.bf16.msra.mxu2 %v12658_v17  ;;  %2473 = vmatpush.bf16.msra.mxu0 %v12738_v10  ;;  %v12661_v17 = vld [vmem:[%s27866_s3 + $0x538] sm:$0xf]  ;;  %v12663_v10 = vld [vmem:[%s27866_s3 + $0x548] sm:$0xf0]  ;;  %v12594_v34 = vor.u32 %v18078_v13, %v12591_v14 }
 0x163   :  { %v12662_v41 = vor.u32 %v18097_v18, %v12661_v17  ;;  %v12666_v26 = vor.u32 %v18095_v20, %v12663_v10  ;;  %v12742_v17 = vor.u32 %v18117_v35, %v12741_v2  ;;  %v12597_v18 = vld [vmem:[%s27866_s3 + $0x4b8] sm:$0xf]  ;;  %v18081_v10 = vld [vmem:[%s27866_s3 + $0x4c4] sm:$0xf0]  ;;  %v18170_v2 = vld [vmem:[%s27866_s3 + $0x7a4] sm:$0xf] }
 0x164   :  { %v13013_v35 = vld [vmem:[%s27866_s3 + $0x7b0] sm:$0xf0] }
 0x165   :  { %2432 = vmatpush.bf16.msra.mxu3 %v12638_v28  ;;  %2448 = vmatpush.bf16.msra.mxu1 %v12718_v29  ;;  %v18125_v28 = vld [vmem:[%s27866_s3 + $0x624] sm:$0xf0]  ;;  %v18123_v29 = vld [vmem:[%s27866_s3 + $0x61c] sm:$0xf] }
 0x166   :  { %2458 = vmatpush.bf16.msra.mxu2 %v12642_v31  ;;  %2474 = vmatpush.bf16.msra.mxu0 %v12722_v57  ;;  %v12775_v31 = vld [vmem:[%s27866_s3 + $0x628] sm:$0xf0]  ;;  %v12774_v21 = vor.u32 %v18125_v28, %v12773_v25  ;;  %v18111_v25 = vld [vmem:[%s27866_s3 + $0x5bc] sm:$0xf] }
 0x167   :  { %v12647_v57 = vld [vmem:[%s27866_s3 + $0x528] sm:$0xf0]  ;;  %v12778_v45 = vor.u32 %v18123_v29, %v12775_v31  ;;  %v12947_v29 = vld [vmem:[%s27866_s3 + $0x720] sm:$0xf]  ;;  %v18156_v31 = vld [vmem:[%s27866_s3 + $0x72c] sm:$0xf0] }
 0x168   :  { %12779 = vmatmul.msk.bf16.vlgmr.msra.gmra.mxu1 %vm1173_vm5, %v20957_v62  ;;  %v1199_v36 = vpop.f32.mrf.mxu0  ;;  %v1212_v56 = vpop.f32.mrf.mxu1  ;;  %v12650_v48 = vor.u32 %v18091_v37, %v12647_v57  ;;  %v12727_v28 = vld [vmem:[%s27866_s3 + $0x5c8] sm:$0xf0]  ;;  %v18154_v37 = vld [vmem:[%s27866_s3 + $0x724] sm:$0xf]  ;;  %v12949_v57 = vld [vmem:[%s27866_s3 + $0x730] sm:$0xf0]  ;;  %v12948_v46 = vor.u32 %v18156_v31, %v12947_v29 }
 0x169   :  { %2480 = vmatpush.bf16.msrb.mxu1 %v12710_v58  ;;  %2433 = vmatpush.bf16.msra.mxu3 %v12622_v47  ;;  %v21033_v58 = vpack.c.b16 %v20158_v33, %v20158_v33  ;;  %v21035_v39 = vadd.f32 %v1212_v56, %v1199_v36  ;;  %v12757_v47 = vld [vmem:[%s27866_s3 + $0x5f8] sm:$0xf]  ;;  %v18121_v33 = vld [vmem:[%s27866_s3 + $0x604] sm:$0xf0]  ;;  %v12598_v56 = vor.u32 %v18081_v10, %v12597_v18  ;;  %v18164_v29 = vld [vmem:[%s27866_s3 + $0x76c] sm:$0xf0] }
 0x16a   :  { %2506 = vmatpush.bf16.msrb.mxu0 %v12714_v40  ;;  %2459 = vmatpush.bf16.msra.mxu2 %v12626_v50  ;;  %v12646_v40 = vor.u32 %v18093_v42, %v12645_v16  ;;  %v18119_v50 = vld [vmem:[%s27866_s3 + $0x5fc] sm:$0xf]  ;;  %v12599_v42 = vld [vmem:[%s27866_s3 + $0x4c8] sm:$0xf0]  ;;  %v18142_v31 = vld [vmem:[%s27866_s3 + $0x6c4] sm:$0xf] }
 0x16b   :  { %12780 = vmatmul.msk.bf16.vlgmr.msra.gmra.mxu0 %vm1173_vm5, %v20957_v62  ;;  %v12762_v22 = vor.u32 %v18119_v50, %v12759_v51  ;;  %v18079_v16 = vld [vmem:[%s27866_s3 + $0x4bc] sm:$0xf]  ;;  %v12931_v50 = vld [vmem:[%s27866_s3 + $0x700] sm:$0xf]  ;;  %v18152_v51 = vld [vmem:[%s27866_s3 + $0x70c] sm:$0xf0] }
 0x16d   :  { %2481 = vmatpush.bf16.msrb.mxu1 %v12694_v63  ;;  %2434 = vmatpush.bf16.msra.mxu3 %v12606_v3  ;;  %v12758_v63 = vor.u32 %v18121_v33, %v12757_v47  ;;  %v12634_v3 = vor.u32 %v18087_v52, %v12631_v60  ;;  %v12952_v33 = vor.u32 %v18154_v37, %v12949_v57  ;;  %v13011_v52 = vld [vmem:[%s27866_s3 + $0x7a0] sm:$0xf]  ;;  %v18162_v37 = vld [vmem:[%s27866_s3 + $0x764] sm:$0xf]  ;;  %v12981_v57 = vld [vmem:[%s27866_s3 + $0x770] sm:$0xf0] }
 0x16e   :  { %2507 = vmatpush.bf16.msrb.mxu0 %v12698_v1  ;;  %2460 = vmatpush.bf16.msra.mxu2 %v12610_v59  ;;  %v12613_v1 = vld [vmem:[%s27866_s3 + $0x4d8] sm:$0xf]  ;;  %v12743_v59 = vld [vmem:[%s27866_s3 + $0x5e8] sm:$0xf0] }
 0x16f   :  { %v1225_v6 = vpop.f32.mrf.mxu2  ;;  %v1238_v7 = vpop.f32.mrf.mxu3  ;;  %v12746_v20 = vor.u32 %v18115_v54, %v12743_v59  ;;  %v12915_v59 = vld [vmem:[%s27866_s3 + $0x6e0] sm:$0xf] }
 0x170   :  { %v21090_v13 = vadd.f32 %v1238_v7, %v1225_v6  ;;  %v1201_v14 = vpop.f32.mrf.mxu0  ;;  %v12995_v6 = vld [vmem:[%s27866_s3 + $0x780] sm:$0xf]  ;;  %v13016_v7 = vor.u32 %v18170_v2, %v13013_v35 }
 0x171   :  { %2482 = vmatpush.bf16.msrb.mxu1 %v12678_v12  ;;  %2435 = vmatpush.bf16.msra.mxu3 %v12590_v19  ;;  %v12615_v12 = vld [vmem:[%s27866_s3 + $0x4e8] sm:$0xf0]  ;;  %v12614_v19 = vor.u32 %v18085_v4, %v12613_v1  ;;  %v12917_v14 = vld [vmem:[%s27866_s3 + $0x6f0] sm:$0xf0] }
 0x172   :  { %2508 = vmatpush.bf16.msrb.mxu0 %v12682_v15  ;;  %2461 = vmatpush.bf16.msra.mxu2 %v12594_v34  ;;  %v1214_v15 = vpop.f32.mrf.mxu1  ;;  %v12725_v34 = vld [vmem:[%s27866_s3 + $0x5b8] sm:$0xf] }
 0x173   :  { %v18166_v15 = vld [vmem:[%s27866_s3 + $0x784] sm:$0xf] }
 0x174   :  { %2436 = vmatmul.bf16.vlgmr.msra.gmra.mxu3 %v21033_v58 }
 0x175   :  { %2496 = vmatpush.bf16.msrb.mxu3 %v2423_v23  ;;  %2483 = vmatpush.bf16.msrb.mxu1 %v12662_v41  ;;  %v18113_v23 = vld [vmem:[%s27866_s3 + $0x5c4] sm:$0xf0]  ;;  %v12618_v41 = vor.u32 %v18083_v8, %v12615_v12  ;;  %v18168_v8 = vld [vmem:[%s27866_s3 + $0x78c] sm:$0xf0]  ;;  %v18146_v12 = vld [vmem:[%s27866_s3 + $0x6e4] sm:$0xf] }
 0x176   :  { %2522 = vmatpush.bf16.msrb.mxu2 %v2426_v24  ;;  %2509 = vmatpush.bf16.msrb.mxu0 %v12666_v26  ;;  %v2743_v24 = vunpack.c.h.b16 %v12831_v61  ;;  %v2794_v26 = vpack.c.b16 %v2742_v5, %v2742_v5  ;;  %v12726_v36 = vor.u32 %v18113_v23, %v12725_v34  ;;  %v18148_v5 = vld [vmem:[%s27866_s3 + $0x6ec] sm:$0xf0]  ;;  %v12899_v23 = vld [vmem:[%s27866_s3 + $0x6c0] sm:$0xf] }
 0x177   :  { %2462 = vmatmul.bf16.vlgmr.msra.gmra.mxu2 %v21033_v58  ;;  %v1240_v49 = vpop.f32.mrf.mxu3  ;;  %v12916_v18 = vor.u32 %v18148_v5, %v12915_v59 }
 0x178   :  { %v2850_v47 = vsel %vm1177_vm3, %v2794_v26, 0  ;;  %v1277_v61 = vpop.f32.mrf.mxu0  ;;  %v18138_v49 = vld [vmem:[%s27866_s3 + $0x6a4] sm:$0xf] }
 0x179   :  { %2497 = vmatpush.bf16.msrb.mxu3 %v12774_v21  ;;  %2484 = vmatpush.bf16.msrb.mxu1 %v12646_v40  ;;  %v12730_v21 = vor.u32 %v18111_v25, %v12727_v28  ;;  %v2795_v40 = vpack.c.b16 %v2743_v24, %v2743_v24  ;;  %v18144_v24 = vld [vmem:[%s27866_s3 + $0x6cc] sm:$0xf0] }
 0x17a   :  { %2523 = vmatpush.bf16.msrb.mxu2 %v12778_v45  ;;  %2510 = vmatpush.bf16.msrb.mxu0 %v12650_v48  ;;  %v12602_v45 = vor.u32 %v18079_v16, %v12599_v42  ;;  %v1227_v48 = vpop.f32.mrf.mxu2  ;;  %v1251_v60 = vpop.f32.mrf.mxu1 }
 0x17b   :  { %v2853_v1 = vsel %vm1177_vm3, %v2795_v40, 0  ;;  %v12984_v48 = vor.u32 %v18162_v37, %v12981_v57  ;;  %v12923_v37 = vld [vmem:[%s27866_s3 + $0x6e8] sm:$0xf] }
 0x17d   :  { %2498 = vmatpush.bf16.msrb.mxu3 %v12758_v63  ;;  %2485 = vmatpush.bf16.msrb.mxu1 %v12630_v0  ;;  %v18172_v63 = vld [vmem:[%s27866_s3 + $0x7ac] sm:$0xf0]  ;;  %v18150_v0 = vld [vmem:[%s27866_s3 + $0x704] sm:$0xf] }
 0x17e   :  { %2524 = vmatpush.bf16.msrb.mxu2 %v12762_v22  ;;  %2511 = vmatpush.bf16.msrb.mxu0 %v12634_v3  ;;  %v12933_v22 = vld [vmem:[%s27866_s3 + $0x710] sm:$0xf0]  ;;  %v12932_v3 = vor.u32 %v18152_v51, %v12931_v50  ;;  %v13012_v4 = vor.u32 %v18172_v63, %v13011_v52  ;;  %v18158_v51 = vld [vmem:[%s27866_s3 + $0x744] sm:$0xf] }
 0x17f   :  { %v12936_v54 = vor.u32 %v18150_v0, %v12933_v22  ;;  %v1264_v10 = vpop.f32.mrf.mxu3  ;;  %v12885_v50 = vld [vmem:[%s27866_s3 + $0x6b0] sm:$0xf0]  ;;  %v18155_v0 = vld [vmem:[%s27866_s3 + $0x72c] sm:$0xf]  ;;  %v12957_v22 = vld [vmem:[%s27866_s3 + $0x738] sm:$0xf0] }
 0x180   :  { %v21193_v25 = vadd.f32 %v1264_v10, %v1251_v60  ;;  %v1279_v42 = vpop.f32.mrf.mxu0  ;;  %v12965_v52 = vld [vmem:[%s27866_s3 + $0x750] sm:$0xf0]  ;;  %v12955_v60 = vld [vmem:[%s27866_s3 + $0x728] sm:$0xf]  ;;  %v12888_v2 = vor.u32 %v18138_v49, %v12885_v50 }
 0x181   :  { %2499 = vmatpush.bf16.msrb.mxu3 %v12742_v17  ;;  %2486 = vmatpush.bf16.msrb.mxu1 %v12614_v19  ;;  %v12997_v17 = vld [vmem:[%s27866_s3 + $0x790] sm:$0xf0]  ;;  %v12996_v19 = vor.u32 %v18168_v8, %v12995_v6  ;;  %v12968_v59 = vor.u32 %v18158_v51, %v12965_v52  ;;  %v18134_v6 = vld [vmem:[%s27866_s3 + $0x684] sm:$0xf]  ;;  %v12832_v8 = vld [vmem:[%s27866_s3 + $0x7c8] sm:$0x33] }
 0x182   :  { %2525 = vmatpush.bf16.msrb.mxu2 %v12746_v20  ;;  %2512 = vmatpush.bf16.msrb.mxu0 %v12618_v41  ;;  %v12920_v20 = vor.u32 %v18146_v12, %v12917_v14  ;;  %v1290_v34 = vpop.f32.mrf.mxu2  ;;  %v12979_v41 = vld [vmem:[%s27866_s3 + $0x760] sm:$0xf]  ;;  %v13000_v16 = vor.u32 %v18166_v15, %v12997_v17  ;;  %v1253_v26 = vpop.f32.mrf.mxu1  ;;  %v12960_v12 = vor.u32 %v18155_v0, %v12957_v22  ;;  %v12939_v14 = vld [vmem:[%s27866_s3 + $0x708] sm:$0xf]  ;;  %v18153_v15 = vld [vmem:[%s27866_s3 + $0x714] sm:$0xf0] }
 0x183   :  { %v21195_v28 = vadd.f32 %v1290_v34, %v1277_v61  ;;  %v12980_v40 = vor.u32 %v18164_v29, %v12979_v41  ;;  %v18157_v61 = vld [vmem:[%s27866_s3 + $0x734] sm:$0xf0]  ;;  %v2744_v41 = vunpack.c.l.b16 %v12832_v8  ;;  %v21283_v26 = vpack.c.b16 %v20192_v38, %v20192_v38  ;;  %v18130_v29 = vld [vmem:[%s27866_s3 + $0x664] sm:$0xf]  ;;  %v12907_v0 = vld [vmem:[%s27866_s3 + $0x6c8] sm:$0xf] }
 0x184   :  { %v12956_v5 = vor.u32 %v18157_v61, %v12955_v60  ;;  %v12940_v42 = vor.u32 %v18153_v15, %v12939_v14  ;;  %v18149_v38 = vld [vmem:[%s27866_s3 + $0x6f4] sm:$0xf0]  ;;  %v18126_v52 = vld [vmem:[%s27866_s3 + $0x644] sm:$0xf]  ;;  %v12837_v60 = vld [vmem:[%s27866_s3 + $0x650] sm:$0xf0] }
 0x185   :  { %2500 = vmatpush.bf16.msrb.mxu3 %v12726_v36  ;;  %2487 = vmatpush.bf16.msrb.mxu1 %v12598_v56  ;;  %v12901_v36 = vld [vmem:[%s27866_s3 + $0x6d0] sm:$0xf0]  ;;  %v12900_v56 = vor.u32 %v18144_v24, %v12899_v23  ;;  %v12851_v23 = vld [vmem:[%s27866_s3 + $0x660] sm:$0xf]  ;;  %v18132_v24 = vld [vmem:[%s27866_s3 + $0x66c] sm:$0xf0]  ;;  %v12924_v51 = vor.u32 %v18149_v38, %v12923_v37 }
 0x186   :  { %2526 = vmatpush.bf16.msrb.mxu2 %v12730_v21  ;;  %2513 = vmatpush.bf16.msrb.mxu0 %v12602_v45  ;;  %v12883_v21 = vld [vmem:[%s27866_s3 + $0x6a0] sm:$0xf]  ;;  %v12904_v45 = vor.u32 %v18142_v31, %v12901_v36  ;;  %v12853_v31 = vld [vmem:[%s27866_s3 + $0x670] sm:$0xf0]  ;;  %v12852_v57 = vor.u32 %v18132_v24, %v12851_v23  ;;  %v18141_v15 = vld [vmem:[%s27866_s3 + $0x6b4] sm:$0xf0] }
 0x187   :  { %v1266_v35 = vpop.f32.mrf.mxu3  ;;  %v18167_v37 = vld [vmem:[%s27866_s3 + $0x78c] sm:$0xf]  ;;  %v13005_v38 = vld [vmem:[%s27866_s3 + $0x798] sm:$0xf0] }
 0x188   :  { %2488 = vmatmul.bf16.vlgmr.msrb.gmra.mxu1 %v21033_v58  ;;  %12781 = vmatmul.msk.bf16.vlgmr.msrb.gmra.mxu3 %vm1173_vm5, %v20957_v62  ;;  %v1614_v10 = vpop.f32.mrf.mxu0  ;;  %v18143_v35 = vld [vmem:[%s27866_s3 + $0x6cc] sm:$0xf] }
 0x189   :  { %2861 = vmatpush.bf16.msra.mxu3 %v12948_v46  ;;  %2877 = vmatpush.bf16.msra.mxu1 %v2850_v47  ;;  %v18140_v46 = vld [vmem:[%s27866_s3 + $0x6ac] sm:$0xf0]  ;;  %v12963_v47 = vld [vmem:[%s27866_s3 + $0x740] sm:$0xf] }
 0x18a   :  { %2887 = vmatpush.bf16.msra.mxu2 %v12952_v33  ;;  %2903 = vmatpush.bf16.msra.mxu0 %v2853_v1  ;;  %v18160_v33 = vld [vmem:[%s27866_s3 + $0x74c] sm:$0xf0]  ;;  %v12884_v63 = vor.u32 %v18140_v46, %v12883_v21  ;;  %v1588_v17 = vpop.f32.mrf.mxu1  ;;  %v12925_v21 = vld [vmem:[%s27866_s3 + $0x6f8] sm:$0xf0]  ;;  %v12835_v46 = vld [vmem:[%s27866_s3 + $0x640] sm:$0xf] }
 0x18b   :  { %2514 = vmatmul.bf16.vlgmr.msrb.gmra.mxu0 %v21033_v58  ;;  %12782 = vmatmul.msk.bf16.vlgmr.msrb.gmra.mxu2 %vm1173_vm5, %v20957_v62  ;;  %v12964_v1 = vor.u32 %v18160_v33, %v12963_v47  ;;  %v18128_v47 = vld [vmem:[%s27866_s3 + $0x64c] sm:$0xf0]  ;;  %v2796_v33 = vpack.c.b16 %v2744_v41, %v2744_v41 }
 0x18d   :  { %2862 = vmatpush.bf16.msra.mxu3 %v12932_v3  ;;  %2878 = vmatpush.bf16.msra.mxu1 %v13012_v4  ;;  %v1292_v3 = vpop.f32.mrf.mxu2  ;;  %v12867_v4 = vld [vmem:[%s27866_s3 + $0x680] sm:$0xf] }
 0x18e   :  { %2888 = vmatpush.bf16.msra.mxu2 %v12936_v54  ;;  %2904 = vmatpush.bf16.msra.mxu0 %v13016_v7  ;;  %v18136_v54 = vld [vmem:[%s27866_s3 + $0x68c] sm:$0xf0]  ;;  %v12869_v7 = vld [vmem:[%s27866_s3 + $0x690] sm:$0xf0] }
 0x18f   :  { %v12872_v34 = vor.u32 %v18134_v6, %v12869_v7  ;;  %v12891_v7 = vld [vmem:[%s27866_s3 + $0x6a8] sm:$0xf] }
 0x190   :  { %v12892_v41 = vor.u32 %v18141_v15, %v12891_v7  ;;  %v18127_v7 = vld [vmem:[%s27866_s3 + $0x64c] sm:$0xf] }
 0x191   :  { %2863 = vmatpush.bf16.msra.mxu3 %v12916_v18  ;;  %2879 = vmatpush.bf16.msra.mxu1 %v12996_v19  ;;  %v12868_v18 = vor.u32 %v18136_v54, %v12867_v4  ;;  %v18151_v19 = vld [vmem:[%s27866_s3 + $0x70c] sm:$0xf]  ;;  %v1616_v4 = vpop.f32.mrf.mxu0  ;;  %v12840_v54 = vor.u32 %v18126_v52, %v12837_v60 }
 0x192   :  { %2889 = vmatpush.bf16.msra.mxu2 %v12920_v20  ;;  %2905 = vmatpush.bf16.msra.mxu0 %v13000_v16  ;;  %v12941_v20 = vld [vmem:[%s27866_s3 + $0x718] sm:$0xf0]  ;;  %v2745_v16 = vunpack.c.h.b16 %v12832_v8  ;;  %v13019_v8 = vld [vmem:[%s27866_s3 + $0x7a8] sm:$0xf]  ;;  %v18129_v4 = vld [vmem:[%s27866_s3 + $0x654] sm:$0xf0] }
 0x193   :  { %v12944_v36 = vor.u32 %v18151_v19, %v12941_v20  ;;  %v18139_v19 = vld [vmem:[%s27866_s3 + $0x6ac] sm:$0xf]  ;;  %v12893_v20 = vld [vmem:[%s27866_s3 + $0x6b8] sm:$0xf0] }
 0x195   :  { %2864 = vmatpush.bf16.msra.mxu3 %v12900_v56  ;;  %2880 = vmatpush.bf16.msra.mxu1 %v12980_v40  ;;  %v18147_v56 = vld [vmem:[%s27866_s3 + $0x6ec] sm:$0xf]  ;;  %v12856_v40 = vor.u32 %v18130_v29, %v12853_v31  ;;  %v1601_v50 = vpop.f32.mrf.mxu2  ;;  %v13003_v29 = vld [vmem:[%s27866_s3 + $0x788] sm:$0xf]  ;;  %v12896_v31 = vor.u32 %v18139_v19, %v12893_v20  ;;  %v18204_v19 = vld [vmem:[%s27866_s3 + $0x8bc] sm:$0xf0] }
 0x196   :  { %2890 = vmatpush.bf16.msra.mxu2 %v12904_v45  ;;  %2906 = vmatpush.bf16.msra.mxu0 %v12984_v48  ;;  %v1575_v45 = vpop.f32.mrf.mxu3  ;;  %v2797_v48 = vpack.c.b16 %v2745_v16, %v2745_v16  ;;  %v1602_v61 = vadd.f32 %v1601_v50, %v21090_v13  ;;  %v12909_v13 = vld [vmem:[%s27866_s3 + $0x6d8] sm:$0xf0]  ;;  %v12987_v50 = vld [vmem:[%s27866_s3 + $0x768] sm:$0xf] }
 0x197   :  { %v1576_v49 = vadd.f32 %v1575_v45, %v21035_v39  ;;  %v18145_v39 = vld [vmem:[%s27866_s3 + $0x6d4] sm:$0xf0]  ;;  %v12912_v14 = vor.u32 %v18143_v35, %v12909_v13 }
 0x198   :  { %v21335_v3 = vadd.f32 %v1614_v10, %v1602_v61  ;;  %v12908_v6 = vor.u32 %v18145_v39, %v12907_v0  ;;  %v21365_v10 = vpack.c.b16 %v20189_v55, %v20189_v55  ;;  %v18169_v55 = vld [vmem:[%s27866_s3 + $0x794] sm:$0xf0]  ;;  %v18163_v61 = vld [vmem:[%s27866_s3 + $0x76c] sm:$0xf] }
 0x199   :  { %2865 = vmatpush.bf16.msra.mxu3 %v12884_v63  ;;  %2881 = vmatpush.bf16.msra.mxu1 %v12964_v1  ;;  %v12928_v63 = vor.u32 %v18147_v56, %v12925_v21  ;;  %v21327_v22 = vadd.f32 %v1588_v17, %v1576_v49  ;;  %v1590_v1 = vpop.f32.mrf.mxu1  ;;  %v18171_v17 = vld [vmem:[%s27866_s3 + $0x7ac] sm:$0xf]  ;;  %v12877_v56 = vld [vmem:[%s27866_s3 + $0x698] sm:$0xf0]  ;;  %v13077_v21 = vld [vmem:[%s27866_s3 + $0x950] sm:$0x33]  ;;  %v13004_v45 = vor.u32 %v18169_v55, %v13003_v29 }
 0x19a   :  { %2891 = vmatpush.bf16.msra.mxu2 %v12888_v2  ;;  %2907 = vmatpush.bf16.msra.mxu0 %v12968_v59  ;;  %v12836_v2 = vor.u32 %v18128_v47, %v12835_v46  ;;  %v2856_v59 = vsel %vm1177_vm3, %v2796_v33, 0  ;;  %v12859_v49 = vld [vmem:[%s27866_s3 + $0x668] sm:$0xf]  ;;  %v3175_v0 = vunpack.c.l.b16 %v13077_v21  ;;  %v18131_v39 = vld [vmem:[%s27866_s3 + $0x66c] sm:$0xf] }
 0x19c   :  { %13025 = vmatmul.msk.bf16.vlgmr.msra.gmra.mxu1 %vm1173_vm5, %v21283_v26 }
 0x19d   :  { %2913 = vmatpush.bf16.msrb.mxu1 %v12956_v5  ;;  %2866 = vmatpush.bf16.msra.mxu3 %v12868_v18  ;;  %v2859_v5 = vsel %vm1177_vm3, %v2797_v48, 0  ;;  %v13021_v18 = vld [vmem:[%s27866_s3 + $0x7b8] sm:$0xf0]  ;;  %v1603_v24 = vpop.f32.mrf.mxu2  ;;  %v13008_v48 = vor.u32 %v18167_v37, %v13005_v38 }
 0x19e   :  { %2939 = vmatpush.bf16.msrb.mxu0 %v12960_v12  ;;  %2892 = vmatpush.bf16.msra.mxu2 %v12872_v34  ;;  %v18173_v12 = vld [vmem:[%s27866_s3 + $0x7b4] sm:$0xf0]  ;;  %v1577_v34 = vpop.f32.mrf.mxu3  ;;  %v13024_v16 = vor.u32 %v18171_v17, %v13021_v18  ;;  %v12845_v17 = vld [vmem:[%s27866_s3 + $0x658] sm:$0xf0]  ;;  %v13193_v18 = vld [vmem:[%s27866_s3 + $0x8b0] sm:$0xf] }
 0x19f   :  { %13026 = vmatmul.msk.bf16.vlgmr.msra.gmra.mxu0 %vm1173_vm5, %v21283_v26  ;;  %v13020_v23 = vor.u32 %v18173_v12, %v13019_v8  ;;  %v18159_v8 = vld [vmem:[%s27866_s3 + $0x74c] sm:$0xf]  ;;  %v12973_v12 = vld [vmem:[%s27866_s3 + $0x758] sm:$0xf0]  ;;  %v12848_v37 = vor.u32 %v18127_v7, %v12845_v17  ;;  %v13194_v38 = vor.u32 %v18204_v19, %v13193_v18  ;;  %v18212_v17 = vld [vmem:[%s27866_s3 + $0x8fc] sm:$0xf0] }
 0x1a0   :  { %v1653_v47 = vpop.f32.mrf.mxu0  ;;  %v18190_v18 = vld [vmem:[%s27866_s3 + $0x854] sm:$0xf]  ;;  %v13147_v19 = vld [vmem:[%s27866_s3 + $0x860] sm:$0xf0] }
 0x1a1   :  { %2914 = vmatpush.bf16.msrb.mxu1 %v12940_v42  ;;  %2867 = vmatpush.bf16.msra.mxu3 %v12852_v57  ;;  %v12875_v42 = vld [vmem:[%s27866_s3 + $0x688] sm:$0xf]  ;;  %v18135_v57 = vld [vmem:[%s27866_s3 + $0x68c] sm:$0xf]  ;;  %v1654_v52 = vadd.f32 %v1653_v47, %v21195_v28  ;;  %v12861_v28 = vld [vmem:[%s27866_s3 + $0x678] sm:$0xf0] }
 0x1a2   :  { %2940 = vmatpush.bf16.msrb.mxu0 %v12944_v36  ;;  %2893 = vmatpush.bf16.msra.mxu2 %v12856_v40  ;;  %v18137_v36 = vld [vmem:[%s27866_s3 + $0x694] sm:$0xf0]  ;;  %v1627_v40 = vpop.f32.mrf.mxu1  ;;  %v12880_v60 = vor.u32 %v18135_v57, %v12877_v56  ;;  %v18198_v47 = vld [vmem:[%s27866_s3 + $0x894] sm:$0xf] }
 0x1a3   :  { %v1628_v46 = vadd.f32 %v1627_v40, %v21193_v25  ;;  %v12876_v33 = vor.u32 %v18137_v36, %v12875_v42  ;;  %v18133_v25 = vld [vmem:[%s27866_s3 + $0x674] sm:$0xf0]  ;;  %v13195_v42 = vld [vmem:[%s27866_s3 + $0x8c0] sm:$0xf0]  ;;  %v18200_v40 = vld [vmem:[%s27866_s3 + $0x89c] sm:$0xf0] }
 0x1a4   :  { %v12860_v35 = vor.u32 %v18133_v25, %v12859_v49  ;;  %v18218_v49 = vld [vmem:[%s27866_s3 + $0x934] sm:$0xf] }
 0x1a5   :  { %2915 = vmatpush.bf16.msrb.mxu1 %v12924_v51  ;;  %2868 = vmatpush.bf16.msra.mxu3 %v12836_v2  ;;  %v18165_v51 = vld [vmem:[%s27866_s3 + $0x774] sm:$0xf0]  ;;  %v12843_v2 = vld [vmem:[%s27866_s3 + $0x648] sm:$0xf] }
 0x1a6   :  { %2941 = vmatpush.bf16.msrb.mxu0 %v12928_v63  ;;  %2894 = vmatpush.bf16.msra.mxu2 %v12840_v54  ;;  %v12989_v63 = vld [vmem:[%s27866_s3 + $0x778] sm:$0xf0]  ;;  %v12988_v1 = vor.u32 %v18165_v51, %v12987_v50  ;;  %v12971_v54 = vld [vmem:[%s27866_s3 + $0x748] sm:$0xf]  ;;  %v1640_v15 = vpop.f32.mrf.mxu3  ;;  %v1666_v34 = vpop.f32.mrf.mxu2  ;;  %v12844_v24 = vor.u32 %v18129_v4, %v12843_v2  ;;  %v13259_v50 = vld [vmem:[%s27866_s3 + $0x940] sm:$0xf0] }
 0x1a7   :  { %v12992_v13 = vor.u32 %v18163_v61, %v12989_v63  ;;  %v21452_v20 = vadd.f32 %v1640_v15, %v1628_v46  ;;  %v21460_v29 = vadd.f32 %v1666_v34, %v1654_v52  ;;  %v18220_v46 = vld [vmem:[%s27866_s3 + $0x93c] sm:$0xf0]  ;;  %v13161_v61 = vld [vmem:[%s27866_s3 + $0x870] sm:$0xf]  ;;  %v18194_v2 = vld [vmem:[%s27866_s3 + $0x874] sm:$0xf] }
 0x1a8   :  { %2869 = vmatmul.bf16.vlgmr.msra.gmra.mxu3 %v21365_v10  ;;  %v1655_v55 = vpop.f32.mrf.mxu0  ;;  %v18196_v63 = vld [vmem:[%s27866_s3 + $0x87c] sm:$0xf0]  ;;  %v13243_v4 = vld [vmem:[%s27866_s3 + $0x920] sm:$0xf0]  ;;  %v18210_v34 = vld [vmem:[%s27866_s3 + $0x8f4] sm:$0xf] }
 0x1a9   :  { %2929 = vmatpush.bf16.msrb.mxu3 %v2856_v59  ;;  %2916 = vmatpush.bf16.msrb.mxu1 %v12908_v6  ;;  %v18161_v59 = vld [vmem:[%s27866_s3 + $0x754] sm:$0xf0]  ;;  %v12864_v6 = vor.u32 %v18131_v39, %v12861_v28  ;;  %v13262_v28 = vor.u32 %v18218_v49, %v13259_v50  ;;  %v18188_v55 = vld [vmem:[%s27866_s3 + $0x83c] sm:$0xf0] }
 0x1aa   :  { %2955 = vmatpush.bf16.msrb.mxu2 %v2859_v5  ;;  %2942 = vmatpush.bf16.msrb.mxu0 %v12912_v14  ;;  %v3176_v5 = vunpack.c.h.b16 %v13077_v21  ;;  %v3227_v14 = vpack.c.b16 %v3175_v0, %v3175_v0  ;;  %v13177_v21 = vld [vmem:[%s27866_s3 + $0x890] sm:$0xf] }
 0x1ab   :  { %2895 = vmatmul.bf16.vlgmr.msra.gmra.mxu2 %v21365_v10  ;;  %v13178_v51 = vor.u32 %v18200_v40, %v13177_v21  ;;  %v13241_v0 = vld [vmem:[%s27866_s3 + $0x910] sm:$0xf]  ;;  %v13211_v21 = vld [vmem:[%s27866_s3 + $0x8e0] sm:$0xf0]  ;;  %v13201_v40 = vld [vmem:[%s27866_s3 + $0x8b8] sm:$0xf] }
 0x1ac   :  { %v3228_v36 = vpack.c.b16 %v3176_v5, %v3176_v5  ;;  %v3283_v57 = vsel %vm1177_vm3, %v3227_v14, 0  ;;  %v13225_v14 = vld [vmem:[%s27866_s3 + $0x8f0] sm:$0xf] }
 0x1ad   :  { %2930 = vmatpush.bf16.msrb.mxu3 %v13020_v23  ;;  %2917 = vmatpush.bf16.msrb.mxu1 %v12892_v41  ;;  %v1629_v23 = vpop.f32.mrf.mxu1  ;;  %v12972_v41 = vor.u32 %v18161_v59, %v12971_v54  ;;  %v13162_v59 = vor.u32 %v18196_v63, %v13161_v61  ;;  %v18182_v63 = vld [vmem:[%s27866_s3 + $0x814] sm:$0xf] }
 0x1ae   :  { %2956 = vmatpush.bf16.msrb.mxu2 %v13024_v16  ;;  %2943 = vmatpush.bf16.msrb.mxu0 %v12896_v31  ;;  %v18202_v16 = vld [vmem:[%s27866_s3 + $0x8b4] sm:$0xf]  ;;  %v12976_v31 = vor.u32 %v18159_v8, %v12973_v12  ;;  %v1642_v52 = vpop.f32.mrf.mxu3  ;;  %v1668_v39 = vpop.f32.mrf.mxu2  ;;  %v13145_v8 = vld [vmem:[%s27866_s3 + $0x850] sm:$0xf]  ;;  %v18192_v12 = vld [vmem:[%s27866_s3 + $0x85c] sm:$0xf0] }
 0x1af   :  { %v13198_v56 = vor.u32 %v18202_v16, %v13195_v42  ;;  %v13227_v23 = vld [vmem:[%s27866_s3 + $0x900] sm:$0xf0]  ;;  %v13226_v16 = vor.u32 %v18212_v17, %v13225_v14  ;;  %v13150_v42 = vor.u32 %v18190_v18, %v13147_v19  ;;  %v13113_v52 = vld [vmem:[%s27866_s3 + $0x810] sm:$0xf]  ;;  %v13078_v39 = vld [vmem:[%s27866_s3 + $0x958] sm:$0x33]  ;;  %v21617_v14 = vpack.c.b16 %v20207_v44, %v20207_v44 }
 0x1b0   :  { %v18178_v17 = vld [vmem:[%s27866_s3 + $0x7f4] sm:$0xf]  ;;  %v13099_v18 = vld [vmem:[%s27866_s3 + $0x800] sm:$0xf0]  ;;  %v18197_v44 = vld [vmem:[%s27866_s3 + $0x884] sm:$0xf0] }
 0x1b1   :  { %2931 = vmatpush.bf16.msrb.mxu3 %v13004_v45  ;;  %2918 = vmatpush.bf16.msrb.mxu1 %v12876_v33  ;;  %v13257_v45 = vld [vmem:[%s27866_s3 + $0x930] sm:$0xf]  ;;  %v13179_v33 = vld [vmem:[%s27866_s3 + $0x8a0] sm:$0xf0] }
 0x1b2   :  { %2957 = vmatpush.bf16.msrb.mxu2 %v13008_v48  ;;  %2944 = vmatpush.bf16.msrb.mxu0 %v12880_v60  ;;  %v3286_v48 = vsel %vm1177_vm3, %v3228_v36, 0  ;;  %v13258_v60 = vor.u32 %v18220_v46, %v13257_v45  ;;  %v13182_v25 = vor.u32 %v18198_v47, %v13179_v33  ;;  %v18208_v36 = vld [vmem:[%s27866_s3 + $0x8dc] sm:$0xf0]  ;;  %v18205_v45 = vld [vmem:[%s27866_s3 + $0x8c4] sm:$0xf0] }
 0x1b3   :  { %v18203_v33 = vld [vmem:[%s27866_s3 + $0x8bc] sm:$0xf]  ;;  %v13202_v61 = vor.u32 %v18205_v45, %v13201_v40  ;;  %v13083_v40 = vld [vmem:[%s27866_s3 + $0x7e0] sm:$0xf0] }
 0x1b4   :  { %v21520_v5 = vpop.f32.mrf.mxu0 }
 0x1b5   :  { %2932 = vmatpush.bf16.msrb.mxu3 %v12988_v1  ;;  %2919 = vmatpush.bf16.msrb.mxu1 %v12860_v35  ;;  %v18216_v1 = vld [vmem:[%s27866_s3 + $0x91c] sm:$0xf0]  ;;  %v13163_v35 = vld [vmem:[%s27866_s3 + $0x880] sm:$0xf0]  ;;  %v21518_v54 = vpop.f32.mrf.mxu1 }
 0x1b6   :  { %2958 = vmatpush.bf16.msrb.mxu2 %v12992_v13  ;;  %2945 = vmatpush.bf16.msrb.mxu0 %v12864_v6  ;;  %v18214_v13 = vld [vmem:[%s27866_s3 + $0x914] sm:$0xf]  ;;  %v13242_v6 = vor.u32 %v18216_v1, %v13241_v0  ;;  %v13166_v7 = vor.u32 %v18194_v2, %v13163_v35  ;;  %v13115_v0 = vld [vmem:[%s27866_s3 + $0x820] sm:$0xf0]  ;;  %v13185_v1 = vld [vmem:[%s27866_s3 + $0x898] sm:$0xf] }
 0x1b7   :  { %v13246_v15 = vor.u32 %v18214_v13, %v13243_v4  ;;  %v18201_v2 = vld [vmem:[%s27866_s3 + $0x8a4] sm:$0xf0]  ;;  %v18199_v13 = vld [vmem:[%s27866_s3 + $0x89c] sm:$0xf]  ;;  %v13187_v4 = vld [vmem:[%s27866_s3 + $0x8a8] sm:$0xf0] }
 0x1b8   :  { %v13190_v19 = vor.u32 %v18199_v13, %v13187_v4 }
 0x1b9   :  { %2933 = vmatpush.bf16.msrb.mxu3 %v12972_v41  ;;  %2920 = vmatpush.bf16.msrb.mxu1 %v12844_v24  ;;  %v13146_v24 = vor.u32 %v18192_v12, %v13145_v8  ;;  %v13129_v41 = vld [vmem:[%s27866_s3 + $0x830] sm:$0xf]  ;;  %v3177_v8 = vunpack.c.l.b16 %v13078_v39  ;;  %v3178_v12 = vunpack.c.h.b16 %v13078_v39  ;;  %v18219_v39 = vld [vmem:[%s27866_s3 + $0x93c] sm:$0xf] }
 0x1ba   :  { %2959 = vmatpush.bf16.msrb.mxu2 %v12976_v31  ;;  %2946 = vmatpush.bf16.msrb.mxu0 %v12848_v37  ;;  %v13209_v31 = vld [vmem:[%s27866_s3 + $0x8d0] sm:$0xf]  ;;  %v13230_v37 = vor.u32 %v18210_v34, %v13227_v23  ;;  %v13130_v47 = vor.u32 %v18188_v55, %v13129_v41  ;;  %v13169_v34 = vld [vmem:[%s27866_s3 + $0x878] sm:$0xf]  ;;  %v13171_v41 = vld [vmem:[%s27866_s3 + $0x888] sm:$0xf0] }
 0x1bb   :  { %v13210_v50 = vor.u32 %v18208_v36, %v13209_v31  ;;  %v13081_v55 = vld [vmem:[%s27866_s3 + $0x7d0] sm:$0xf]  ;;  %v18176_v31 = vld [vmem:[%s27866_s3 + $0x7dc] sm:$0xf0]  ;;  %v3229_v36 = vpack.c.b16 %v3177_v8, %v3177_v8  ;;  %v13121_v8 = vld [vmem:[%s27866_s3 + $0x818] sm:$0xf] }
 0x1bc   :  { %2921 = vmatmul.bf16.vlgmr.msrb.gmra.mxu1 %v21365_v10  ;;  %13027 = vmatmul.msk.bf16.vlgmr.msrb.gmra.mxu3 %vm1173_vm5, %v21283_v26  ;;  %v2045_v49 = vpop.f32.mrf.mxu0 }
 0x1bd   :  { %3294 = vmatpush.bf16.msra.mxu3 %v13194_v38  ;;  %3310 = vmatpush.bf16.msra.mxu1 %v3283_v57  ;;  %v18186_v38 = vld [vmem:[%s27866_s3 + $0x834] sm:$0xf]  ;;  %v13131_v57 = vld [vmem:[%s27866_s3 + $0x840] sm:$0xf0]  ;;  %v2019_v46 = vpop.f32.mrf.mxu1  ;;  %v18191_v49 = vld [vmem:[%s27866_s3 + $0x85c] sm:$0xf] }
 0x1be   :  { %3320 = vmatpush.bf16.msra.mxu2 %v13198_v56  ;;  %3336 = vmatpush.bf16.msra.mxu0 %v3286_v48  ;;  %v18206_v56 = vld [vmem:[%s27866_s3 + $0x8d4] sm:$0xf]  ;;  %v13203_v48 = vld [vmem:[%s27866_s3 + $0x8c8] sm:$0xf0] }
 0x1bf   :  { %2947 = vmatmul.bf16.vlgmr.msrb.gmra.mxu0 %v21365_v10  ;;  %13028 = vmatmul.msk.bf16.vlgmr.msrb.gmra.mxu2 %vm1173_vm5, %v21283_v26 }
 0x1c1   :  { %3295 = vmatpush.bf16.msra.mxu3 %v13178_v51  ;;  %3311 = vmatpush.bf16.msra.mxu1 %v13258_v60  ;;  %v13134_v51 = vor.u32 %v18186_v38, %v13131_v57  ;;  %v18184_v60 = vld [vmem:[%s27866_s3 + $0x81c] sm:$0xf0] }
 0x1c2   :  { %3321 = vmatpush.bf16.msra.mxu2 %v13182_v25  ;;  %3337 = vmatpush.bf16.msra.mxu0 %v13262_v28  ;;  %v13214_v25 = vor.u32 %v18206_v56, %v13211_v21  ;;  %v13206_v28 = vor.u32 %v18203_v33, %v13203_v48  ;;  %v13114_v35 = vor.u32 %v18184_v60, %v13113_v52  ;;  %v18174_v21 = vld [vmem:[%s27866_s3 + $0x7d4] sm:$0xf]  ;;  %v3289_v52 = vsel %vm1177_vm3, %v3229_v36, 0  ;;  %v13233_v36 = vld [vmem:[%s27866_s3 + $0x8f8] sm:$0xf] }
 0x1c3   :  { %v13170_v56 = vor.u32 %v18197_v44, %v13169_v34  ;;  %v13082_v48 = vor.u32 %v18176_v31, %v13081_v55  ;;  %v18183_v34 = vld [vmem:[%s27866_s3 + $0x81c] sm:$0xf]  ;;  %v13123_v44 = vld [vmem:[%s27866_s3 + $0x828] sm:$0xf0]  ;;  %v13105_v31 = vld [vmem:[%s27866_s3 + $0x7f8] sm:$0xf] }
 0x1c5   :  { %3296 = vmatpush.bf16.msra.mxu3 %v13162_v59  ;;  %3312 = vmatpush.bf16.msra.mxu1 %v13242_v6  ;;  %v13118_v59 = vor.u32 %v18182_v63, %v13115_v0  ;;  %v13097_v6 = vld [vmem:[%s27866_s3 + $0x7f0] sm:$0xf]  ;;  %v18189_v0 = vld [vmem:[%s27866_s3 + $0x844] sm:$0xf0] }
 0x1c6   :  { %3322 = vmatpush.bf16.msra.mxu2 %v13166_v7  ;;  %3338 = vmatpush.bf16.msra.mxu0 %v13246_v15  ;;  %v18180_v7 = vld [vmem:[%s27866_s3 + $0x7fc] sm:$0xf0]  ;;  %v13186_v15 = vor.u32 %v18201_v2, %v13185_v1  ;;  %v2030_v57 = vpop.f32.mrf.mxu2  ;;  %v18187_v1 = vld [vmem:[%s27866_s3 + $0x83c] sm:$0xf]  ;;  %v13139_v2 = vld [vmem:[%s27866_s3 + $0x848] sm:$0xf0] }
 0x1c7   :  { %v13098_v23 = vor.u32 %v18180_v7, %v13097_v6  ;;  %v2044_v45 = vadd.f32 %v21520_v5, %v2030_v57  ;;  %v13155_v5 = vld [vmem:[%s27866_s3 + $0x868] sm:$0xf0]  ;;  %v18181_v57 = vld [vmem:[%s27866_s3 + $0x804] sm:$0xf0] }
 0x1c8   :  { %v13158_v63 = vor.u32 %v18191_v49, %v13155_v5  ;;  %v18177_v5 = vld [vmem:[%s27866_s3 + $0x7e4] sm:$0xf0] }
 0x1c9   :  { %3297 = vmatpush.bf16.msra.mxu3 %v13146_v24  ;;  %3313 = vmatpush.bf16.msra.mxu1 %v13226_v16  ;;  %v18195_v24 = vld [vmem:[%s27866_s3 + $0x87c] sm:$0xf]  ;;  %v2004_v16 = vpop.f32.mrf.mxu3 }
 0x1ca   :  { %3323 = vmatpush.bf16.msra.mxu2 %v13150_v42  ;;  %3339 = vmatpush.bf16.msra.mxu0 %v13230_v37  ;;  %v13102_v42 = vor.u32 %v18178_v17, %v13099_v18  ;;  %v3230_v37 = vpack.c.b16 %v3178_v12, %v3178_v12  ;;  %v2018_v38 = vadd.f32 %v21518_v54, %v2004_v16  ;;  %v18193_v54 = vld [vmem:[%s27866_s3 + $0x864] sm:$0xf0]  ;;  %v13249_v12 = vld [vmem:[%s27866_s3 + $0x918] sm:$0xf]  ;;  %v18215_v18 = vld [vmem:[%s27866_s3 + $0x91c] sm:$0xf] }
 0x1cb   :  { %v13174_v46 = vor.u32 %v18195_v24, %v13171_v41  ;;  %v18185_v17 = vld [vmem:[%s27866_s3 + $0x824] sm:$0xf0] }
 0x1cc   :  { %v21662_v33 = vadd.f32 %v2018_v38, %v21327_v22  ;;  %v3292_v22 = vsel %vm1177_vm3, %v3230_v37, 0  ;;  %v18213_v37 = vld [vmem:[%s27866_s3 + $0x904] sm:$0xf0]  ;;  %v13126_v38 = vor.u32 %v18183_v34, %v13123_v44 }
 0x1cd   :  { %3298 = vmatpush.bf16.msra.mxu3 %v13130_v47  ;;  %3314 = vmatpush.bf16.msra.mxu1 %v13210_v50  ;;  %v13153_v47 = vld [vmem:[%s27866_s3 + $0x858] sm:$0xf]  ;;  %v21671_v50 = vadd.f32 %v2044_v45, %v21335_v3  ;;  %v18221_v3 = vld [vmem:[%s27866_s3 + $0x944] sm:$0xf0]  ;;  %v18179_v45 = vld [vmem:[%s27866_s3 + $0x7fc] sm:$0xf] }
 0x1ce   :  { %3324 = vmatpush.bf16.msra.mxu2 %v13134_v51  ;;  %3340 = vmatpush.bf16.msra.mxu0 %v13214_v25  ;;  %v13086_v51 = vor.u32 %v18174_v21, %v13083_v40  ;;  %v13154_v60 = vor.u32 %v18193_v54, %v13153_v47  ;;  %v13137_v25 = vld [vmem:[%s27866_s3 + $0x838] sm:$0xf]  ;;  %v13235_v21 = vld [vmem:[%s27866_s3 + $0x908] sm:$0xf0]  ;;  %v13234_v47 = vor.u32 %v18213_v37, %v13233_v36  ;;  %v18314_v36 = vld [vmem:[%s27866_s3 + $0xc54] sm:$0xf] }
 0x1cf   :  { %v13138_v6 = vor.u32 %v18189_v0, %v13137_v25  ;;  %v13089_v54 = vld [vmem:[%s27866_s3 + $0x7d8] sm:$0xf]  ;;  %v18175_v25 = vld [vmem:[%s27866_s3 + $0x7dc] sm:$0xf]  ;;  %v13555_v37 = vld [vmem:[%s27866_s3 + $0xc60] sm:$0xf0] }
 0x1d0   :  { %13271 = vmatmul.msk.bf16.vlgmr.msra.gmra.mxu1 %vm1173_vm5, %v21617_v14 }
 0x1d1   :  { %3346 = vmatpush.bf16.msrb.mxu1 %v13202_v61  ;;  %3299 = vmatpush.bf16.msra.mxu3 %v13114_v35  ;;  %v13265_v61 = vld [vmem:[%s27866_s3 + $0x938] sm:$0xf]  ;;  %v21701_v35 = vpack.c.b16 %v20204_v43, %v20204_v43  ;;  %v2006_v13 = vpop.f32.mrf.mxu3  ;;  %v18217_v43 = vld [vmem:[%s27866_s3 + $0x924] sm:$0xf0]  ;;  %v2056_v24 = vpop.f32.mrf.mxu1 }
 0x1d2   :  { %3372 = vmatpush.bf16.msrb.mxu0 %v13206_v28  ;;  %3325 = vmatpush.bf16.msra.mxu2 %v13118_v59  ;;  %v13267_v28 = vld [vmem:[%s27866_s3 + $0x948] sm:$0xf0]  ;;  %v13266_v4 = vor.u32 %v18221_v3, %v13265_v61  ;;  %v2032_v59 = vpop.f32.mrf.mxu2  ;;  %v13250_v41 = vor.u32 %v18217_v43, %v13249_v12  ;;  %v18207_v61 = vld [vmem:[%s27866_s3 + $0x8dc] sm:$0xf] }
 0x1d3   :  { %13272 = vmatmul.msk.bf16.vlgmr.msra.gmra.mxu0 %vm1173_vm5, %v21617_v14  ;;  %v13270_v7 = vor.u32 %v18219_v39, %v13267_v28  ;;  %v13219_v3 = vld [vmem:[%s27866_s3 + $0x8e8] sm:$0xf0]  ;;  %v13489_v28 = vld [vmem:[%s27866_s3 + $0xbd0] sm:$0xf]  ;;  %v13090_v59 = vor.u32 %v18177_v5, %v13089_v54  ;;  %v13558_v54 = vor.u32 %v18314_v36, %v13555_v37  ;;  %v13459_v5 = vld [vmem:[%s27866_s3 + $0xba0] sm:$0xf0] }
 0x1d4   :  { %v2082_v16 = vpop.f32.mrf.mxu0  ;;  %v13091_v39 = vld [vmem:[%s27866_s3 + $0x7e8] sm:$0xf0] }
 0x1d5   :  { %3347 = vmatpush.bf16.msrb.mxu1 %v13186_v15  ;;  %3300 = vmatpush.bf16.msra.mxu3 %v13098_v23  ;;  %v13142_v15 = vor.u32 %v18187_v1, %v13139_v2  ;;  %v13373_v23 = vld [vmem:[%s27866_s3 + $0xc70] sm:$0x33]  ;;  %v18300_v1 = vld [vmem:[%s27866_s3 + $0xbdc] sm:$0xf0] }
 0x1d6   :  { %3373 = vmatpush.bf16.msrb.mxu0 %v13190_v19  ;;  %3326 = vmatpush.bf16.msra.mxu2 %v13102_v42  ;;  %v13251_v19 = vld [vmem:[%s27866_s3 + $0x928] sm:$0xf0]  ;;  %v13122_v42 = vor.u32 %v18185_v17, %v13121_v8  ;;  %v3650_v40 = vunpack.c.l.b16 %v13373_v23  ;;  %v13491_v8 = vld [vmem:[%s27866_s3 + $0xbe0] sm:$0xf0]  ;;  %v13490_v34 = vor.u32 %v18300_v1, %v13489_v28  ;;  %v18308_v1 = vld [vmem:[%s27866_s3 + $0xc1c] sm:$0xf0] }
 0x1d7   :  { %v13254_v55 = vor.u32 %v18215_v18, %v13251_v19  ;;  %v13094_v19 = vor.u32 %v18175_v25, %v13091_v39  ;;  %v13521_v39 = vld [vmem:[%s27866_s3 + $0xc10] sm:$0xf] }
 0x1d9   :  { %3348 = vmatpush.bf16.msrb.mxu1 %v13170_v56  ;;  %3301 = vmatpush.bf16.msra.mxu3 %v13082_v48  ;;  %v18211_v56 = vld [vmem:[%s27866_s3 + $0x8fc] sm:$0xf]  ;;  %v13106_v48 = vor.u32 %v18181_v57, %v13105_v31  ;;  %v2069_v0 = vpop.f32.mrf.mxu3 }
 0x1da   :  { %3374 = vmatpush.bf16.msrb.mxu0 %v13174_v46  ;;  %3327 = vmatpush.bf16.msra.mxu2 %v13086_v51  ;;  %v13107_v46 = vld [vmem:[%s27866_s3 + $0x808] sm:$0xf0]  ;;  %v13238_v49 = vor.u32 %v18211_v56, %v13235_v21  ;;  %v13217_v51 = vld [vmem:[%s27866_s3 + $0x8d8] sm:$0xf]  ;;  %v2070_v2 = vadd.f32 %v2069_v0, %v2056_v24  ;;  %v2095_v13 = vpop.f32.mrf.mxu2  ;;  %v18288_v0 = vld [vmem:[%s27866_s3 + $0xb7c] sm:$0xf0] }
 0x1db   :  { %v2096_v12 = vadd.f32 %v2095_v13, %v2082_v16  ;;  %v18296_v16 = vld [vmem:[%s27866_s3 + $0xbbc] sm:$0xf0]  ;;  %v13443_v13 = vld [vmem:[%s27866_s3 + $0xb80] sm:$0xf0] }
 0x1dc   :  { %3302 = vmatmul.bf16.vlgmr.msra.gmra.mxu3 %v21701_v35  ;;  %v2084_v43 = vpop.f32.mrf.mxu0  ;;  %v21793_v18 = vadd.f32 %v2070_v2, %v21452_v20  ;;  %v13553_v20 = vld [vmem:[%s27866_s3 + $0xc50] sm:$0xf]  ;;  %v18286_v2 = vld [vmem:[%s27866_s3 + $0xb74] sm:$0xf] }
 0x1dd   :  { %3362 = vmatpush.bf16.msrb.mxu3 %v3289_v52  ;;  %3349 = vmatpush.bf16.msrb.mxu1 %v13154_v60  ;;  %v18209_v52 = vld [vmem:[%s27866_s3 + $0x8e4] sm:$0xf0]  ;;  %v13110_v60 = vor.u32 %v18179_v45, %v13107_v46  ;;  %v18292_v45 = vld [vmem:[%s27866_s3 + $0xb9c] sm:$0xf0]  ;;  %v13537_v46 = vld [vmem:[%s27866_s3 + $0xc30] sm:$0xf] }
 0x1de   :  { %3388 = vmatpush.bf16.msrb.mxu2 %v3292_v22  ;;  %3375 = vmatpush.bf16.msrb.mxu0 %v13158_v63  ;;  %v3651_v22 = vunpack.c.h.b16 %v13373_v23  ;;  %v3702_v63 = vpack.c.b16 %v3650_v40, %v3650_v40  ;;  %v21797_v23 = vadd.f32 %v2096_v12, %v21460_v29  ;;  %v18294_v29 = vld [vmem:[%s27866_s3 + $0xbb4] sm:$0xf]  ;;  %v13457_v40 = vld [vmem:[%s27866_s3 + $0xb90] sm:$0xf]  ;;  %v13446_v12 = vor.u32 %v18286_v2, %v13443_v13  ;;  %v18284_v43 = vld [vmem:[%s27866_s3 + $0xb5c] sm:$0xf0] }
 0x1df   :  { %3328 = vmatmul.bf16.vlgmr.msra.gmra.mxu2 %v21701_v35  ;;  %v13465_v13 = vld [vmem:[%s27866_s3 + $0xb98] sm:$0xf] }
 0x1e0   :  { %v3703_v17 = vpack.c.b16 %v3651_v22, %v3651_v22  ;;  %v3755_v44 = vsel %vm1177_vm3, %v3702_v63, 0  ;;  %v13441_v63 = vld [vmem:[%s27866_s3 + $0xb70] sm:$0xf] }
 0x1e1   :  { %3363 = vmatpush.bf16.msrb.mxu3 %v13266_v4  ;;  %3350 = vmatpush.bf16.msrb.mxu1 %v13138_v6  ;;  %v2058_v4 = vpop.f32.mrf.mxu1  ;;  %v13218_v6 = vor.u32 %v18209_v52, %v13217_v51  ;;  %v2071_v57 = vpop.f32.mrf.mxu3  ;;  %v18310_v51 = vld [vmem:[%s27866_s3 + $0xc34] sm:$0xf]  ;;  %v13539_v52 = vld [vmem:[%s27866_s3 + $0xc40] sm:$0xf0] }
 0x1e2   :  { %3389 = vmatpush.bf16.msrb.mxu2 %v13270_v7  ;;  %3376 = vmatpush.bf16.msrb.mxu0 %v13142_v15  ;;  %v18298_v7 = vld [vmem:[%s27866_s3 + $0xbd4] sm:$0xf]  ;;  %v13222_v15 = vor.u32 %v18207_v61, %v13219_v3  ;;  %v3758_v31 = vsel %vm1177_vm3, %v3703_v17, 0  ;;  %v13542_v28 = vor.u32 %v18310_v51, %v13539_v52  ;;  %v18304_v17 = vld [vmem:[%s27866_s3 + $0xbfc] sm:$0xf0] }
 0x1e3   :  { %v13494_v24 = vor.u32 %v18298_v7, %v13491_v8  ;;  %v18306_v4 = vld [vmem:[%s27866_s3 + $0xc14] sm:$0xf]  ;;  %v13425_v7 = vld [vmem:[%s27866_s3 + $0xb50] sm:$0xf]  ;;  %v13522_v8 = vor.u32 %v18308_v1, %v13521_v39  ;;  %v18295_v51 = vld [vmem:[%s27866_s3 + $0xbbc] sm:$0xf] }
 0x1e4   :  { %v13409_v57 = vld [vmem:[%s27866_s3 + $0xb30] sm:$0xf]  ;;  %v13483_v52 = vld [vmem:[%s27866_s3 + $0xbc8] sm:$0xf0]  ;;  %v13395_v1 = vld [vmem:[%s27866_s3 + $0xb20] sm:$0xf0] }
 0x1e5   :  { %3364 = vmatpush.bf16.msrb.mxu3 %v13250_v41  ;;  %3351 = vmatpush.bf16.msrb.mxu1 %v13122_v42  ;;  %v13473_v41 = vld [vmem:[%s27866_s3 + $0xbb0] sm:$0xf]  ;;  %v18316_v42 = vld [vmem:[%s27866_s3 + $0xc5c] sm:$0xf0]  ;;  %v13486_v2 = vor.u32 %v18295_v51, %v13483_v52 }
 0x1e6   :  { %3390 = vmatpush.bf16.msrb.mxu2 %v13254_v55  ;;  %3377 = vmatpush.bf16.msrb.mxu0 %v13126_v38  ;;  %v13475_v55 = vld [vmem:[%s27866_s3 + $0xbc0] sm:$0xf0]  ;;  %v13474_v38 = vor.u32 %v18296_v16, %v13473_v41  ;;  %v13554_v56 = vor.u32 %v18316_v42, %v13553_v20  ;;  %v13497_v16 = vld [vmem:[%s27866_s3 + $0xbd8] sm:$0xf]  ;;  %v18301_v20 = vld [vmem:[%s27866_s3 + $0xbe4] sm:$0xf0] }
 0x1e7   :  { %v13478_v21 = vor.u32 %v18294_v29, %v13475_v55  ;;  %v13507_v41 = vld [vmem:[%s27866_s3 + $0xc00] sm:$0xf0]  ;;  %v13426_v29 = vor.u32 %v18284_v43, %v13425_v7  ;;  %v18299_v55 = vld [vmem:[%s27866_s3 + $0xbdc] sm:$0xf]  ;;  %v13467_v7 = vld [vmem:[%s27866_s3 + $0xba8] sm:$0xf0] }
 0x1e8   :  { %v21856_v25 = vpop.f32.mrf.mxu0  ;;  %v13377_v43 = vld [vmem:[%s27866_s3 + $0xaf0] sm:$0xf] }
 0x1e9   :  { %3365 = vmatpush.bf16.msrb.mxu3 %v13234_v47  ;;  %3352 = vmatpush.bf16.msrb.mxu1 %v13106_v48  ;;  %v2097_v47 = vpop.f32.mrf.mxu2  ;;  %v18312_v48 = vld [vmem:[%s27866_s3 + $0xc3c] sm:$0xf0]  ;;  %v21854_v22 = vpop.f32.mrf.mxu1 }
 0x1ea   :  { %3391 = vmatpush.bf16.msrb.mxu2 %v13238_v49  ;;  %3378 = vmatpush.bf16.msrb.mxu0 %v13110_v60  ;;  %v18290_v49 = vld [vmem:[%s27866_s3 + $0xb94] sm:$0xf]  ;;  %v13458_v60 = vor.u32 %v18292_v45, %v13457_v40  ;;  %v13538_v61 = vor.u32 %v18312_v48, %v13537_v46  ;;  %v13498_v40 = vor.u32 %v18301_v20, %v13497_v16  ;;  %v13411_v46 = vld [vmem:[%s27866_s3 + $0xb40] sm:$0xf0]  ;;  %v13374_v47 = vld [vmem:[%s27866_s3 + $0xc78] sm:$0x33] }
 0x1eb   :  { %v13462_v3 = vor.u32 %v18290_v49, %v13459_v5  ;;  %v18278_v45 = vld [vmem:[%s27866_s3 + $0xb34] sm:$0xf]  ;;  %v13481_v48 = vld [vmem:[%s27866_s3 + $0xbb8] sm:$0xf]  ;;  %v18297_v49 = vld [vmem:[%s27866_s3 + $0xbc4] sm:$0xf0] }
 0x1ec   :  { %v13482_v39 = vor.u32 %v18297_v49, %v13481_v48  ;;  %v13379_v16 = vld [vmem:[%s27866_s3 + $0xb00] sm:$0xf0]  ;;  %v18283_v48 = vld [vmem:[%s27866_s3 + $0xb5c] sm:$0xf]  ;;  %v13435_v49 = vld [vmem:[%s27866_s3 + $0xb68] sm:$0xf0] }
 0x1ed   :  { %3366 = vmatpush.bf16.msrb.mxu3 %v13218_v6  ;;  %3353 = vmatpush.bf16.msrb.mxu1 %v13090_v59  ;;  %v13523_v59 = vld [vmem:[%s27866_s3 + $0xc20] sm:$0xf0]  ;;  %v13442_v6 = vor.u32 %v18288_v0, %v13441_v63  ;;  %v3652_v63 = vunpack.c.l.b16 %v13374_v47  ;;  %v3653_v0 = vunpack.c.h.b16 %v13374_v47  ;;  %v18315_v47 = vld [vmem:[%s27866_s3 + $0xc5c] sm:$0xf] }
 0x1ee   :  { %3392 = vmatpush.bf16.msrb.mxu2 %v13222_v15  ;;  %3379 = vmatpush.bf16.msrb.mxu0 %v13094_v19  ;;  %v13505_v15 = vld [vmem:[%s27866_s3 + $0xbf0] sm:$0xf]  ;;  %v13526_v19 = vor.u32 %v18306_v4, %v13523_v59  ;;  %v18293_v4 = vld [vmem:[%s27866_s3 + $0xba4] sm:$0xf0] }
 0x1ef   :  { %v13506_v37 = vor.u32 %v18304_v17, %v13505_v15  ;;  %v18272_v15 = vld [vmem:[%s27866_s3 + $0xafc] sm:$0xf0]  ;;  %v3704_v17 = vpack.c.b16 %v3652_v63, %v3652_v63  ;;  %v13545_v63 = vld [vmem:[%s27866_s3 + $0xc38] sm:$0xf] }
 0x1f0   :  { %3354 = vmatmul.bf16.vlgmr.msrb.gmra.mxu1 %v21701_v35  ;;  %13273 = vmatmul.msk.bf16.vlgmr.msrb.gmra.mxu3 %vm1173_vm5, %v21617_v14  ;;  %v2478_v36 = vpop.f32.mrf.mxu0 }
 0x1f1   :  { %3766 = vmatpush.bf16.msra.mxu3 %v13490_v34  ;;  %3782 = vmatpush.bf16.msra.mxu1 %v3755_v44  ;;  %v18282_v34 = vld [vmem:[%s27866_s3 + $0xb54] sm:$0xf]  ;;  %v13427_v44 = vld [vmem:[%s27866_s3 + $0xb60] sm:$0xf0]  ;;  %v2452_v42 = vpop.f32.mrf.mxu1  ;;  %v18287_v36 = vld [vmem:[%s27866_s3 + $0xb7c] sm:$0xf] }
 0x1f2   :  { %3792 = vmatpush.bf16.msra.mxu2 %v13494_v24  ;;  %3808 = vmatpush.bf16.msra.mxu0 %v3758_v31  ;;  %v18302_v24 = vld [vmem:[%s27866_s3 + $0xbf4] sm:$0xf]  ;;  %v13499_v31 = vld [vmem:[%s27866_s3 + $0xbe8] sm:$0xf0] }
 0x1f3   :  { %3380 = vmatmul.bf16.vlgmr.msrb.gmra.mxu0 %v21701_v35  ;;  %13274 = vmatmul.msk.bf16.vlgmr.msrb.gmra.mxu2 %vm1173_vm5, %v21617_v14 }
 0x1f5   :  { %3767 = vmatpush.bf16.msra.mxu3 %v13474_v38  ;;  %3783 = vmatpush.bf16.msra.mxu1 %v13554_v56  ;;  %v13430_v38 = vor.u32 %v18282_v34, %v13427_v44  ;;  %v18280_v56 = vld [vmem:[%s27866_s3 + $0xb3c] sm:$0xf0] }
 0x1f6   :  { %3793 = vmatpush.bf16.msra.mxu2 %v13478_v21  ;;  %3809 = vmatpush.bf16.msra.mxu0 %v13558_v54  ;;  %v13510_v21 = vor.u32 %v18302_v24, %v13507_v41  ;;  %v13502_v54 = vor.u32 %v18299_v55, %v13499_v31  ;;  %v13410_v5 = vor.u32 %v18280_v56, %v13409_v57  ;;  %v18270_v41 = vld [vmem:[%s27866_s3 + $0xaf4] sm:$0xf]  ;;  %v3761_v57 = vsel %vm1177_vm3, %v3704_v17, 0  ;;  %v13529_v17 = vld [vmem:[%s27866_s3 + $0xc18] sm:$0xf] }
 0x1f7   :  { %v13466_v24 = vor.u32 %v18293_v4, %v13465_v13  ;;  %v13378_v31 = vor.u32 %v18272_v15, %v13377_v43  ;;  %v18279_v13 = vld [vmem:[%s27866_s3 + $0xb3c] sm:$0xf]  ;;  %v13419_v4 = vld [vmem:[%s27866_s3 + $0xb48] sm:$0xf0]  ;;  %v13401_v15 = vld [vmem:[%s27866_s3 + $0xb18] sm:$0xf] }
 0x1f9   :  { %3768 = vmatpush.bf16.msra.mxu3 %v13458_v60  ;;  %3784 = vmatpush.bf16.msra.mxu1 %v13538_v61  ;;  %v13414_v60 = vor.u32 %v18278_v45, %v13411_v46  ;;  %v13393_v61 = vld [vmem:[%s27866_s3 + $0xb10] sm:$0xf]  ;;  %v18285_v46 = vld [vmem:[%s27866_s3 + $0xb64] sm:$0xf0] }
 0x1fa   :  { %3794 = vmatpush.bf16.msra.mxu2 %v13462_v3  ;;  %3810 = vmatpush.bf16.msra.mxu0 %v13542_v28  ;;  %v18276_v3 = vld [vmem:[%s27866_s3 + $0xb1c] sm:$0xf0]  ;;  %v18274_v28 = vld [vmem:[%s27866_s3 + $0xb14] sm:$0xf]  ;;  %v2463_v44 = vpop.f32.mrf.mxu2 }
 0x1fb   :  { %v13394_v59 = vor.u32 %v18276_v3, %v13393_v61  ;;  %v2477_v20 = vadd.f32 %v21856_v25, %v2463_v44  ;;  %v13451_v25 = vld [vmem:[%s27866_s3 + $0xb88] sm:$0xf0]  ;;  %v13417_v3 = vld [vmem:[%s27866_s3 + $0xb38] sm:$0xf]  ;;  %v18277_v44 = vld [vmem:[%s27866_s3 + $0xb24] sm:$0xf0] }
 0x1fc   :  { %v13454_v45 = vor.u32 %v18287_v36, %v13451_v25  ;;  %v18273_v25 = vld [vmem:[%s27866_s3 + $0xb04] sm:$0xf0] }
 0x1fd   :  { %3769 = vmatpush.bf16.msra.mxu3 %v13442_v6  ;;  %3785 = vmatpush.bf16.msra.mxu1 %v13522_v8  ;;  %v18291_v6 = vld [vmem:[%s27866_s3 + $0xb9c] sm:$0xf]  ;;  %v2437_v8 = vpop.f32.mrf.mxu3 }
 0x1fe   :  { %3795 = vmatpush.bf16.msra.mxu2 %v13446_v12  ;;  %3811 = vmatpush.bf16.msra.mxu0 %v13526_v19  ;;  %v13398_v12 = vor.u32 %v18274_v28, %v13395_v1  ;;  %v3705_v19 = vpack.c.b16 %v3653_v0, %v3653_v0  ;;  %v2451_v34 = vadd.f32 %v21854_v22, %v2437_v8  ;;  %v18289_v22 = vld [vmem:[%s27866_s3 + $0xb84] sm:$0xf0]  ;;  %v18311_v1 = vld [vmem:[%s27866_s3 + $0xc3c] sm:$0xf] }
 0x1ff   :  { %v13470_v42 = vor.u32 %v18291_v6, %v13467_v7  ;;  %v18313_v0 = vld [vmem:[%s27866_s3 + $0xc44] sm:$0xf0] }
 0x200   :  { %v21994_v55 = vadd.f32 %v2451_v34, %v21662_v33  ;;  %v3764_v33 = vsel %vm1177_vm3, %v3705_v19, 0  ;;  %v18281_v28 = vld [vmem:[%s27866_s3 + $0xb44] sm:$0xf0]  ;;  %v13546_v7 = vor.u32 %v18313_v0, %v13545_v63  ;;  %v13422_v34 = vor.u32 %v18279_v13, %v13419_v4 }
 0x201   :  { %3770 = vmatpush.bf16.msra.mxu3 %v13426_v29  ;;  %3786 = vmatpush.bf16.msra.mxu1 %v13506_v37  ;;  %v13449_v29 = vld [vmem:[%s27866_s3 + $0xb78] sm:$0xf]  ;;  %v22003_v37 = vadd.f32 %v2477_v20, %v21671_v50  ;;  %v18317_v50 = vld [vmem:[%s27866_s3 + $0xc64] sm:$0xf0]  ;;  %v18275_v20 = vld [vmem:[%s27866_s3 + $0xb1c] sm:$0xf] }
 0x202   :  { %3796 = vmatpush.bf16.msra.mxu2 %v13430_v38  ;;  %3812 = vmatpush.bf16.msra.mxu0 %v13510_v21  ;;  %v13382_v38 = vor.u32 %v18270_v41, %v13379_v16  ;;  %v13450_v56 = vor.u32 %v18289_v22, %v13449_v29  ;;  %v13433_v21 = vld [vmem:[%s27866_s3 + $0xb58] sm:$0xf]  ;;  %v2465_v52 = vpop.f32.mrf.mxu2  ;;  %v18309_v19 = vld [vmem:[%s27866_s3 + $0xc24] sm:$0xf0]  ;;  %v13531_v41 = vld [vmem:[%s27866_s3 + $0xc28] sm:$0xf0] }
 0x203   :  { %v13530_v29 = vor.u32 %v18309_v19, %v13529_v17  ;;  %v13385_v22 = vld [vmem:[%s27866_s3 + $0xaf8] sm:$0xf]  ;;  %v18266_v17 = vld [vmem:[%s27866_s3 + $0xac4] sm:$0xf]  ;;  %v13751_v19 = vld [vmem:[%s27866_s3 + $0xad0] sm:$0xf0] }
 0x204   :  { %13567 = vmatmul.msk.bf16.vlgmr.msra.gmra.mxu1 %vm1173_vm5, %v20136_v11  ;;  %v13386_v52 = vor.u32 %v18273_v25, %v13385_v22  ;;  %v13754_v22 = vor.u32 %v18266_v17, %v13751_v19  ;;  %v13655_v25 = vld [vmem:[%s27866_s3 + $0xa10] sm:$0xf0] }
 0x205   :  { %3818 = vmatpush.bf16.msrb.mxu1 %v13498_v40  ;;  %3771 = vmatpush.bf16.msra.mxu3 %v13410_v5  ;;  %v13561_v40 = vld [vmem:[%s27866_s3 + $0xc58] sm:$0xf]  ;;  %v2439_v5 = vpop.f32.mrf.mxu3  ;;  %v2489_v6 = vpop.f32.mrf.mxu1 }
 0x206   :  { %3844 = vmatpush.bf16.msrb.mxu0 %v13502_v54  ;;  %3797 = vmatpush.bf16.msra.mxu2 %v13414_v60  ;;  %v13563_v54 = vld [vmem:[%s27866_s3 + $0xc68] sm:$0xf0]  ;;  %v13562_v51 = vor.u32 %v18317_v50, %v13561_v40  ;;  %v13434_v60 = vor.u32 %v18285_v46, %v13433_v21  ;;  %v18271_v21 = vld [vmem:[%s27866_s3 + $0xafc] sm:$0xf] }
 0x207   :  { %13568 = vmatmul.msk.bf16.vlgmr.msra.gmra.mxu0 %vm1173_vm5, %v20136_v11  ;;  %v13566_v61 = vor.u32 %v18315_v47, %v13563_v54  ;;  %v18303_v40 = vld [vmem:[%s27866_s3 + $0xbfc] sm:$0xf]  ;;  %v13515_v50 = vld [vmem:[%s27866_s3 + $0xc08] sm:$0xf0]  ;;  %v13685_v54 = vld [vmem:[%s27866_s3 + $0xa40] sm:$0xf] }
 0x208   :  { %v2515_v8 = vpop.f32.mrf.mxu0  ;;  %v13387_v47 = vld [vmem:[%s27866_s3 + $0xb08] sm:$0xf0] }
 0x209   :  { %3819 = vmatpush.bf16.msrb.mxu1 %v13482_v39  ;;  %3772 = vmatpush.bf16.msra.mxu3 %v13394_v59  ;;  %v13438_v39 = vor.u32 %v18283_v48, %v13435_v49  ;;  %v13323_v59 = vld [vmem:[%s27866_s3 + $0xae0] sm:$0x33]  ;;  %v18252_v48 = vld [vmem:[%s27866_s3 + $0xa4c] sm:$0xf0] }
 0x20a   :  { %3845 = vmatpush.bf16.msrb.mxu0 %v13486_v2  ;;  %3798 = vmatpush.bf16.msra.mxu2 %v13398_v12  ;;  %v13547_v2 = vld [vmem:[%s27866_s3 + $0xc48] sm:$0xf0]  ;;  %v13418_v12 = vor.u32 %v18281_v28, %v13417_v3  ;;  %v4016_v16 = vunpack.c.l.b16 %v13323_v59  ;;  %v13687_v3 = vld [vmem:[%s27866_s3 + $0xa50] sm:$0xf0]  ;;  %v13686_v13 = vor.u32 %v18252_v48, %v13685_v54  ;;  %v18260_v48 = vld [vmem:[%s27866_s3 + $0xa8c] sm:$0xf0] }
 0x20b   :  { %v13550_v43 = vor.u32 %v18311_v1, %v13547_v2  ;;  %v13390_v2 = vor.u32 %v18271_v21, %v13387_v47  ;;  %v13717_v47 = vld [vmem:[%s27866_s3 + $0xa80] sm:$0xf] }
 0x20d   :  { %3820 = vmatpush.bf16.msrb.mxu1 %v13466_v24  ;;  %3773 = vmatpush.bf16.msra.mxu3 %v13378_v31  ;;  %v18307_v24 = vld [vmem:[%s27866_s3 + $0xc1c] sm:$0xf]  ;;  %v13402_v31 = vor.u32 %v18277_v44, %v13401_v15  ;;  %v2502_v46 = vpop.f32.mrf.mxu3 }
 0x20e   :  { %3846 = vmatpush.bf16.msrb.mxu0 %v13470_v42  ;;  %3799 = vmatpush.bf16.msra.mxu2 %v13382_v38  ;;  %v13403_v42 = vld [vmem:[%s27866_s3 + $0xb28] sm:$0xf0]  ;;  %v13534_v36 = vor.u32 %v18307_v24, %v13531_v41  ;;  %v13513_v38 = vld [vmem:[%s27866_s3 + $0xbf8] sm:$0xf]  ;;  %v2503_v49 = vadd.f32 %v2502_v46, %v2489_v6  ;;  %v2528_v5 = vpop.f32.mrf.mxu2  ;;  %v18240_v46 = vld [vmem:[%s27866_s3 + $0x9ec] sm:$0xf0] }
 0x20f   :  { %v2529_v63 = vadd.f32 %v2528_v5, %v2515_v8  ;;  %v18248_v8 = vld [vmem:[%s27866_s3 + $0xa2c] sm:$0xf0]  ;;  %v13639_v5 = vld [vmem:[%s27866_s3 + $0x9f0] sm:$0xf0] }
 0x210   :  { %3774 = vmatmul.bf16.vlgmr.msra.gmra.mxu3 %v20134_v9  ;;  %v2517_v0 = vpop.f32.mrf.mxu0  ;;  %v22121_v1 = vadd.f32 %v2503_v49, %v21793_v18  ;;  %v13749_v18 = vld [vmem:[%s27866_s3 + $0xac0] sm:$0xf]  ;;  %v18238_v49 = vld [vmem:[%s27866_s3 + $0x9e4] sm:$0xf] }
 0x211   :  { %3834 = vmatpush.bf16.msrb.mxu3 %v3761_v57  ;;  %3821 = vmatpush.bf16.msrb.mxu1 %v13450_v56  ;;  %v18305_v57 = vld [vmem:[%s27866_s3 + $0xc04] sm:$0xf0]  ;;  %v13406_v56 = vor.u32 %v18275_v20, %v13403_v42  ;;  %v18244_v20 = vld [vmem:[%s27866_s3 + $0xa0c] sm:$0xf0]  ;;  %v13733_v42 = vld [vmem:[%s27866_s3 + $0xaa0] sm:$0xf] }
 0x212   :  { %3860 = vmatpush.bf16.msrb.mxu2 %v3764_v33  ;;  %3847 = vmatpush.bf16.msrb.mxu0 %v13454_v45  ;;  %v4017_v33 = vunpack.c.h.b16 %v13323_v59  ;;  %v4068_v45 = vpack.c.b16 %v4016_v16, %v4016_v16  ;;  %v22125_v59 = vadd.f32 %v2529_v63, %v21797_v23  ;;  %v18246_v23 = vld [vmem:[%s27866_s3 + $0xa24] sm:$0xf]  ;;  %v13653_v16 = vld [vmem:[%s27866_s3 + $0xa00] sm:$0xf]  ;;  %v13642_v63 = vor.u32 %v18238_v49, %v13639_v5  ;;  %v18236_v0 = vld [vmem:[%s27866_s3 + $0x9cc] sm:$0xf0] }
 0x213   :  { %3800 = vmatmul.bf16.vlgmr.msra.gmra.mxu2 %v20134_v9  ;;  %v13661_v5 = vld [vmem:[%s27866_s3 + $0xa08] sm:$0xf] }
 0x214   :  { %v4069_v28 = vpack.c.b16 %v4017_v33, %v4017_v33  ;;  %v4121_v4 = vsel %vm1177_vm3, %v4068_v45, 0  ;;  %v13637_v45 = vld [vmem:[%s27866_s3 + $0x9e0] sm:$0xf] }
 0x215   :  { %3835 = vmatpush.bf16.msrb.mxu3 %v13562_v51  ;;  %3822 = vmatpush.bf16.msrb.mxu1 %v13434_v60  ;;  %v2491_v51 = vpop.f32.mrf.mxu1  ;;  %v13514_v60 = vor.u32 %v18305_v57, %v13513_v38  ;;  %v2504_v44 = vpop.f32.mrf.mxu3  ;;  %v18262_v38 = vld [vmem:[%s27866_s3 + $0xaa4] sm:$0xf]  ;;  %v13735_v57 = vld [vmem:[%s27866_s3 + $0xab0] sm:$0xf0] }
 0x216   :  { %3861 = vmatpush.bf16.msrb.mxu2 %v13566_v61  ;;  %3848 = vmatpush.bf16.msrb.mxu0 %v13438_v39  ;;  %v18250_v61 = vld [vmem:[%s27866_s3 + $0xa44] sm:$0xf]  ;;  %v13518_v39 = vor.u32 %v18303_v40, %v13515_v50  ;;  %v4124_v15 = vsel %vm1177_vm3, %v4069_v28, 0  ;;  %v13738_v54 = vor.u32 %v18262_v38, %v13735_v57  ;;  %v18256_v28 = vld [vmem:[%s27866_s3 + $0xa6c] sm:$0xf0] }
 0x217   :  { %v13690_v6 = vor.u32 %v18250_v61, %v13687_v3  ;;  %v18258_v51 = vld [vmem:[%s27866_s3 + $0xa84] sm:$0xf]  ;;  %v13621_v61 = vld [vmem:[%s27866_s3 + $0x9c0] sm:$0xf]  ;;  %v13718_v3 = vor.u32 %v18260_v48, %v13717_v47  ;;  %v18247_v38 = vld [vmem:[%s27866_s3 + $0xa2c] sm:$0xf] }
 0x218   :  { %v13605_v44 = vld [vmem:[%s27866_s3 + $0x9a0] sm:$0xf]  ;;  %v13679_v57 = vld [vmem:[%s27866_s3 + $0xa38] sm:$0xf0]  ;;  %v13591_v48 = vld [vmem:[%s27866_s3 + $0x990] sm:$0xf0] }
 0x219   :  { %3836 = vmatpush.bf16.msrb.mxu3 %v13546_v7  ;;  %3823 = vmatpush.bf16.msrb.mxu1 %v13418_v12  ;;  %v13669_v7 = vld [vmem:[%s27866_s3 + $0xa20] sm:$0xf]  ;;  %v18268_v12 = vld [vmem:[%s27866_s3 + $0xacc] sm:$0xf0]  ;;  %v13682_v49 = vor.u32 %v18247_v38, %v13679_v57 }
 0x21a   :  { %3862 = vmatpush.bf16.msrb.mxu2 %v13550_v43  ;;  %3849 = vmatpush.bf16.msrb.mxu0 %v13422_v34  ;;  %v13671_v43 = vld [vmem:[%s27866_s3 + $0xa30] sm:$0xf0]  ;;  %v13670_v34 = vor.u32 %v18248_v8, %v13669_v7  ;;  %v13750_v24 = vor.u32 %v18268_v12, %v13749_v18  ;;  %v13693_v8 = vld [vmem:[%s27866_s3 + $0xa48] sm:$0xf]  ;;  %v18253_v18 = vld [vmem:[%s27866_s3 + $0xa54] sm:$0xf0] }
 0x21b   :  { %v13674_v41 = vor.u32 %v18246_v23, %v13671_v43  ;;  %v13703_v7 = vld [vmem:[%s27866_s3 + $0xa70] sm:$0xf0]  ;;  %v13622_v23 = vor.u32 %v18236_v0, %v13621_v61  ;;  %v18251_v43 = vld [vmem:[%s27866_s3 + $0xa4c] sm:$0xf]  ;;  %v13663_v61 = vld [vmem:[%s27866_s3 + $0xa18] sm:$0xf0] }
 0x21c   :  { %v22184_v21 = vpop.f32.mrf.mxu0  ;;  %v13573_v0 = vld [vmem:[%s27866_s3 + $0x960] sm:$0xf] }
 0x21d   :  { %3837 = vmatpush.bf16.msrb.mxu3 %v13530_v29  ;;  %3824 = vmatpush.bf16.msrb.mxu1 %v13402_v31  ;;  %v2530_v29 = vpop.f32.mrf.mxu2  ;;  %v18264_v31 = vld [vmem:[%s27866_s3 + $0xaac] sm:$0xf0]  ;;  %v22182_v33 = vpop.f32.mrf.mxu1 }
 0x21e   :  { %3863 = vmatpush.bf16.msrb.mxu2 %v13534_v36  ;;  %3850 = vmatpush.bf16.msrb.mxu0 %v13406_v56  ;;  %v18242_v36 = vld [vmem:[%s27866_s3 + $0xa04] sm:$0xf]  ;;  %v13654_v56 = vor.u32 %v18244_v20, %v13653_v16  ;;  %v13734_v40 = vor.u32 %v18264_v31, %v13733_v42  ;;  %v13694_v16 = vor.u32 %v18253_v18, %v13693_v8  ;;  %v13607_v42 = vld [vmem:[%s27866_s3 + $0x9b0] sm:$0xf0]  ;;  %v13324_v29 = vld [vmem:[%s27866_s3 + $0xae8] sm:$0x33] }
 0x21f   :  { %v13658_v50 = vor.u32 %v18242_v36, %v13655_v25  ;;  %v18230_v20 = vld [vmem:[%s27866_s3 + $0x9a4] sm:$0xf]  ;;  %v13677_v31 = vld [vmem:[%s27866_s3 + $0xa28] sm:$0xf]  ;;  %v18249_v36 = vld [vmem:[%s27866_s3 + $0xa34] sm:$0xf0] }
 0x220   :  { %v13678_v47 = vor.u32 %v18249_v36, %v13677_v31  ;;  %v13575_v8 = vld [vmem:[%s27866_s3 + $0x970] sm:$0xf0]  ;;  %v18235_v31 = vld [vmem:[%s27866_s3 + $0x9cc] sm:$0xf]  ;;  %v13631_v36 = vld [vmem:[%s27866_s3 + $0x9d8] sm:$0xf0] }
 0x221   :  { %3838 = vmatpush.bf16.msrb.mxu3 %v13514_v60  ;;  %3825 = vmatpush.bf16.msrb.mxu1 %v13386_v52  ;;  %v13719_v52 = vld [vmem:[%s27866_s3 + $0xa90] sm:$0xf0]  ;;  %v13638_v60 = vor.u32 %v18240_v46, %v13637_v45  ;;  %v4018_v45 = vunpack.c.l.b16 %v13324_v29  ;;  %v4019_v46 = vunpack.c.h.b16 %v13324_v29  ;;  %v18267_v29 = vld [vmem:[%s27866_s3 + $0xacc] sm:$0xf] }
 0x222   :  { %3864 = vmatpush.bf16.msrb.mxu2 %v13518_v39  ;;  %3851 = vmatpush.bf16.msrb.mxu0 %v13390_v2  ;;  %v13701_v39 = vld [vmem:[%s27866_s3 + $0xa60] sm:$0xf]  ;;  %v13722_v2 = vor.u32 %v18258_v51, %v13719_v52  ;;  %v18245_v51 = vld [vmem:[%s27866_s3 + $0xa14] sm:$0xf0] }
 0x223   :  { %v13702_v19 = vor.u32 %v18256_v28, %v13701_v39  ;;  %v18224_v39 = vld [vmem:[%s27866_s3 + $0x96c] sm:$0xf0]  ;;  %v4070_v28 = vpack.c.b16 %v4018_v45, %v4018_v45  ;;  %v13741_v45 = vld [vmem:[%s27866_s3 + $0xaa8] sm:$0xf] }
 0x224   :  { %3826 = vmatmul.bf16.vlgmr.msrb.gmra.mxu1 %v20134_v9  ;;  %13569 = vmatmul.msk.bf16.vlgmr.msrb.gmra.mxu3 %vm1173_vm5, %v20136_v11  ;;  %v2911_v17 = vpop.f32.mrf.mxu0 }
 0x225   :  { %4132 = vmatpush.bf16.msra.mxu3 %v13686_v13  ;;  %4148 = vmatpush.bf16.msra.mxu1 %v4121_v4  ;;  %v18234_v13 = vld [vmem:[%s27866_s3 + $0x9c4] sm:$0xf]  ;;  %v13623_v4 = vld [vmem:[%s27866_s3 + $0x9d0] sm:$0xf0]  ;;  %v2885_v12 = vpop.f32.mrf.mxu1  ;;  %v18239_v17 = vld [vmem:[%s27866_s3 + $0x9ec] sm:$0xf] }
 0x226   :  { %4158 = vmatpush.bf16.msra.mxu2 %v13690_v6  ;;  %4174 = vmatpush.bf16.msra.mxu0 %v4124_v15  ;;  %v18254_v6 = vld [vmem:[%s27866_s3 + $0xa64] sm:$0xf]  ;;  %v13695_v15 = vld [vmem:[%s27866_s3 + $0xa58] sm:$0xf0] }
 0x227   :  { %3852 = vmatmul.bf16.vlgmr.msrb.gmra.mxu0 %v20134_v9  ;;  %13570 = vmatmul.msk.bf16.vlgmr.msrb.gmra.mxu2 %vm1173_vm5, %v20136_v11 }
 0x229   :  { %4133 = vmatpush.bf16.msra.mxu3 %v13670_v34  ;;  %4149 = vmatpush.bf16.msra.mxu1 %v13750_v24  ;;  %v13626_v34 = vor.u32 %v18234_v13, %v13623_v4  ;;  %v18232_v24 = vld [vmem:[%s27866_s3 + $0x9ac] sm:$0xf0] }
 0x22a   :  { %4159 = vmatpush.bf16.msra.mxu2 %v13674_v41  ;;  %4175 = vmatpush.bf16.msra.mxu0 %v13754_v22  ;;  %v13706_v41 = vor.u32 %v18254_v6, %v13703_v7  ;;  %v13698_v22 = vor.u32 %v18251_v43, %v13695_v15  ;;  %v13606_v25 = vor.u32 %v18232_v24, %v13605_v44  ;;  %v18222_v7 = vld [vmem:[%s27866_s3 + $0x964] sm:$0xf]  ;;  %v4127_v44 = vsel %vm1177_vm3, %v4070_v28, 0  ;;  %v13725_v28 = vld [vmem:[%s27866_s3 + $0xa88] sm:$0xf] }
 0x22b   :  { %v13662_v6 = vor.u32 %v18245_v51, %v13661_v5  ;;  %v13574_v15 = vor.u32 %v18224_v39, %v13573_v0  ;;  %v18231_v5 = vld [vmem:[%s27866_s3 + $0x9ac] sm:$0xf]  ;;  %v13615_v51 = vld [vmem:[%s27866_s3 + $0x9b8] sm:$0xf0]  ;;  %v13597_v39 = vld [vmem:[%s27866_s3 + $0x988] sm:$0xf] }
 0x22d   :  { %4134 = vmatpush.bf16.msra.mxu3 %v13654_v56  ;;  %4150 = vmatpush.bf16.msra.mxu1 %v13734_v40  ;;  %v13610_v56 = vor.u32 %v18230_v20, %v13607_v42  ;;  %v13589_v40 = vld [vmem:[%s27866_s3 + $0x980] sm:$0xf]  ;;  %v18237_v42 = vld [vmem:[%s27866_s3 + $0x9d4] sm:$0xf0] }
 0x22e   :  { %4160 = vmatpush.bf16.msra.mxu2 %v13658_v50  ;;  %4176 = vmatpush.bf16.msra.mxu0 %v13738_v54  ;;  %v18228_v50 = vld [vmem:[%s27866_s3 + $0x98c] sm:$0xf0]  ;;  %v18226_v54 = vld [vmem:[%s27866_s3 + $0x984] sm:$0xf]  ;;  %v2896_v4 = vpop.f32.mrf.mxu2 }
 0x22f   :  { %v13590_v52 = vor.u32 %v18228_v50, %v13589_v40  ;;  %v2910_v18 = vadd.f32 %v22184_v21, %v2896_v4  ;;  %v13647_v21 = vld [vmem:[%s27866_s3 + $0x9f8] sm:$0xf0]  ;;  %v13613_v50 = vld [vmem:[%s27866_s3 + $0x9a8] sm:$0xf]  ;;  %v18229_v4 = vld [vmem:[%s27866_s3 + $0x994] sm:$0xf0] }
 0x230   :  { %v13650_v20 = vor.u32 %v18239_v17, %v13647_v21  ;;  %v18225_v21 = vld [vmem:[%s27866_s3 + $0x974] sm:$0xf0] }
 0x231   :  { %4135 = vmatpush.bf16.msra.mxu3 %v13638_v60  ;;  %4151 = vmatpush.bf16.msra.mxu1 %v13718_v3  ;;  %v18243_v60 = vld [vmem:[%s27866_s3 + $0xa0c] sm:$0xf]  ;;  %v2870_v3 = vpop.f32.mrf.mxu3 }
 0x232   :  { %4161 = vmatpush.bf16.msra.mxu2 %v13642_v63  ;;  %4177 = vmatpush.bf16.msra.mxu0 %v13722_v2  ;;  %v13594_v63 = vor.u32 %v18226_v54, %v13591_v48  ;;  %v4071_v2 = vpack.c.b16 %v4019_v46, %v4019_v46  ;;  %v2884_v13 = vadd.f32 %v22182_v33, %v2870_v3  ;;  %v18241_v33 = vld [vmem:[%s27866_s3 + $0x9f4] sm:$0xf0]  ;;  %v18263_v48 = vld [vmem:[%s27866_s3 + $0xaac] sm:$0xf] }
 0x233   :  { %v13666_v12 = vor.u32 %v18243_v60, %v13663_v61  ;;  %v18265_v46 = vld [vmem:[%s27866_s3 + $0xab4] sm:$0xf0] }
 0x234   :  { %v22322_v43 = vadd.f32 %v2884_v13, %v21994_v55  ;;  %v4130_v55 = vsel %vm1177_vm3, %v4071_v2, 0  ;;  %v18233_v54 = vld [vmem:[%s27866_s3 + $0x9b4] sm:$0xf0]  ;;  %v13742_v61 = vor.u32 %v18265_v46, %v13741_v45  ;;  %v13618_v13 = vor.u32 %v18231_v5, %v13615_v51 }
 0x235   :  { %4136 = vmatpush.bf16.msra.mxu3 %v13622_v23  ;;  %4152 = vmatpush.bf16.msra.mxu1 %v13702_v19  ;;  %v13645_v23 = vld [vmem:[%s27866_s3 + $0x9e8] sm:$0xf]  ;;  %v22331_v19 = vadd.f32 %v2910_v18, %v22003_v37  ;;  %v18269_v37 = vld [vmem:[%s27866_s3 + $0xad4] sm:$0xf0]  ;;  %v18227_v18 = vld [vmem:[%s27866_s3 + $0x98c] sm:$0xf] }
 0x236   :  { %4162 = vmatpush.bf16.msra.mxu2 %v13626_v34  ;;  %4178 = vmatpush.bf16.msra.mxu0 %v13706_v41  ;;  %v13578_v34 = vor.u32 %v18222_v7, %v13575_v8  ;;  %v13646_v24 = vor.u32 %v18241_v33, %v13645_v23  ;;  %v13629_v41 = vld [vmem:[%s27866_s3 + $0x9c8] sm:$0xf]  ;;  %v2898_v57 = vpop.f32.mrf.mxu2  ;;  %v18261_v2 = vld [vmem:[%s27866_s3 + $0xa94] sm:$0xf0]  ;;  %v13727_v7 = vld [vmem:[%s27866_s3 + $0xa98] sm:$0xf0] }
 0x237   :  { %v13726_v23 = vor.u32 %v18261_v2, %v13725_v28  ;;  %v13581_v33 = vld [vmem:[%s27866_s3 + $0x968] sm:$0xf]  ;;  %v18362_v28 = vld [vmem:[%s27866_s3 + $0xde4] sm:$0xf]  ;;  %v13997_v2 = vld [vmem:[%s27866_s3 + $0xdf0] sm:$0xf0] }
 0x238   :  { %13763 = vmatmul.msk.bf16.vlgmr.msra.gmra.mxu1 %vm1173_vm5, %v20393_v30  ;;  %v13582_v57 = vor.u32 %v18225_v21, %v13581_v33  ;;  %v14000_v33 = vor.u32 %v18362_v28, %v13997_v2  ;;  %v13901_v21 = vld [vmem:[%s27866_s3 + $0xd30] sm:$0xf0] }
 0x239   :  { %4184 = vmatpush.bf16.msrb.mxu1 %v13694_v16  ;;  %4137 = vmatpush.bf16.msra.mxu3 %v13606_v25  ;;  %v13757_v16 = vld [vmem:[%s27866_s3 + $0xac8] sm:$0xf]  ;;  %v2872_v25 = vpop.f32.mrf.mxu3  ;;  %v2922_v60 = vpop.f32.mrf.mxu1 }
 0x23a   :  { %4210 = vmatpush.bf16.msrb.mxu0 %v13698_v22  ;;  %4163 = vmatpush.bf16.msra.mxu2 %v13610_v56  ;;  %v13759_v22 = vld [vmem:[%s27866_s3 + $0xad8] sm:$0xf0]  ;;  %v13758_v38 = vor.u32 %v18269_v37, %v13757_v16  ;;  %v13630_v56 = vor.u32 %v18237_v42, %v13629_v41  ;;  %v18223_v41 = vld [vmem:[%s27866_s3 + $0x96c] sm:$0xf] }
 0x23b   :  { %13764 = vmatmul.msk.bf16.vlgmr.msra.gmra.mxu0 %vm1173_vm5, %v20393_v30  ;;  %v13762_v40 = vor.u32 %v18267_v29, %v13759_v22  ;;  %v18255_v16 = vld [vmem:[%s27866_s3 + $0xa6c] sm:$0xf]  ;;  %v13711_v37 = vld [vmem:[%s27866_s3 + $0xa78] sm:$0xf0]  ;;  %v13931_v22 = vld [vmem:[%s27866_s3 + $0xd60] sm:$0xf] }
 0x23c   :  { %v2948_v3 = vpop.f32.mrf.mxu0  ;;  %v13583_v29 = vld [vmem:[%s27866_s3 + $0x978] sm:$0xf0] }
 0x23d   :  { %4185 = vmatpush.bf16.msrb.mxu1 %v13678_v47  ;;  %4138 = vmatpush.bf16.msra.mxu3 %v13590_v52  ;;  %v13634_v47 = vor.u32 %v18235_v31, %v13631_v36  ;;  %v13815_v52 = vld [vmem:[%s27866_s3 + $0xe00] sm:$0x33]  ;;  %v18348_v31 = vld [vmem:[%s27866_s3 + $0xd6c] sm:$0xf0] }
 0x23e   :  { %4211 = vmatpush.bf16.msrb.mxu0 %v13682_v49  ;;  %4164 = vmatpush.bf16.msra.mxu2 %v13594_v63  ;;  %v13743_v49 = vld [vmem:[%s27866_s3 + $0xab8] sm:$0xf0]  ;;  %v13614_v63 = vor.u32 %v18233_v54, %v13613_v50  ;;  %v4433_v8 = vunpack.c.l.b16 %v13815_v52  ;;  %v13933_v50 = vld [vmem:[%s27866_s3 + $0xd70] sm:$0xf0]  ;;  %v13932_v5 = vor.u32 %v18348_v31, %v13931_v22  ;;  %v18356_v31 = vld [vmem:[%s27866_s3 + $0xdac] sm:$0xf0] }
 0x23f   :  { %v13746_v0 = vor.u32 %v18263_v48, %v13743_v49  ;;  %v13586_v49 = vor.u32 %v18223_v41, %v13583_v29  ;;  %v13963_v29 = vld [vmem:[%s27866_s3 + $0xda0] sm:$0xf] }
 0x241   :  { %4186 = vmatpush.bf16.msrb.mxu1 %v13662_v6  ;;  %4139 = vmatpush.bf16.msra.mxu3 %v13574_v15  ;;  %v18259_v6 = vld [vmem:[%s27866_s3 + $0xa8c] sm:$0xf]  ;;  %v13598_v15 = vor.u32 %v18229_v4, %v13597_v39  ;;  %v2935_v42 = vpop.f32.mrf.mxu3 }
 0x242   :  { %4212 = vmatpush.bf16.msrb.mxu0 %v13666_v12  ;;  %4165 = vmatpush.bf16.msra.mxu2 %v13578_v34  ;;  %v13599_v12 = vld [vmem:[%s27866_s3 + $0x998] sm:$0xf0]  ;;  %v13730_v17 = vor.u32 %v18259_v6, %v13727_v7  ;;  %v13709_v34 = vld [vmem:[%s27866_s3 + $0xa68] sm:$0xf]  ;;  %v2936_v36 = vadd.f32 %v2935_v42, %v2922_v60  ;;  %v2961_v25 = vpop.f32.mrf.mxu2  ;;  %v18336_v42 = vld [vmem:[%s27866_s3 + $0xd0c] sm:$0xf0] }
 0x243   :  { %v2962_v45 = vadd.f32 %v2961_v25, %v2948_v3  ;;  %v18344_v3 = vld [vmem:[%s27866_s3 + $0xd4c] sm:$0xf0]  ;;  %v13885_v25 = vld [vmem:[%s27866_s3 + $0xd10] sm:$0xf0] }
 0x244   :  { %4140 = vmatmul.bf16.vlgmr.msra.gmra.mxu3 %v20391_v27  ;;  %v2950_v46 = vpop.f32.mrf.mxu0  ;;  %v22449_v48 = vadd.f32 %v2936_v36, %v22121_v1  ;;  %v13995_v1 = vld [vmem:[%s27866_s3 + $0xde0] sm:$0xf]  ;;  %v18334_v36 = vld [vmem:[%s27866_s3 + $0xd04] sm:$0xf] }
 0x245   :  { %4200 = vmatpush.bf16.msrb.mxu3 %v4127_v44  ;;  %4187 = vmatpush.bf16.msrb.mxu1 %v13646_v24  ;;  %v18257_v44 = vld [vmem:[%s27866_s3 + $0xa74] sm:$0xf0]  ;;  %v13602_v24 = vor.u32 %v18227_v18, %v13599_v12  ;;  %v18340_v18 = vld [vmem:[%s27866_s3 + $0xd2c] sm:$0xf0]  ;;  %v13979_v12 = vld [vmem:[%s27866_s3 + $0xdc0] sm:$0xf] }
 0x246   :  { %4226 = vmatpush.bf16.msrb.mxu2 %v4130_v55  ;;  %4213 = vmatpush.bf16.msrb.mxu0 %v13650_v20  ;;  %v4434_v55 = vunpack.c.h.b16 %v13815_v52  ;;  %v4485_v20 = vpack.c.b16 %v4433_v8, %v4433_v8  ;;  %v22453_v52 = vadd.f32 %v2962_v45, %v22125_v59  ;;  %v18342_v59 = vld [vmem:[%s27866_s3 + $0xd44] sm:$0xf]  ;;  %v13899_v8 = vld [vmem:[%s27866_s3 + $0xd20] sm:$0xf]  ;;  %v13888_v45 = vor.u32 %v18334_v36, %v13885_v25  ;;  %v18332_v46 = vld [vmem:[%s27866_s3 + $0xcec] sm:$0xf0] }
 0x247   :  { %4166 = vmatmul.bf16.vlgmr.msra.gmra.mxu2 %v20391_v27  ;;  %v13907_v25 = vld [vmem:[%s27866_s3 + $0xd28] sm:$0xf] }
 0x248   :  { %v4486_v54 = vpack.c.b16 %v4434_v55, %v4434_v55  ;;  %v4538_v51 = vsel %vm1177_vm3, %v4485_v20, 0  ;;  %v13883_v20 = vld [vmem:[%s27866_s3 + $0xd00] sm:$0xf] }
 0x249   :  { %4201 = vmatpush.bf16.msrb.mxu3 %v13758_v38  ;;  %4188 = vmatpush.bf16.msrb.mxu1 %v13630_v56  ;;  %v2924_v38 = vpop.f32.mrf.mxu1  ;;  %v13710_v56 = vor.u32 %v18257_v44, %v13709_v34  ;;  %v2937_v4 = vpop.f32.mrf.mxu3  ;;  %v18358_v34 = vld [vmem:[%s27866_s3 + $0xdc4] sm:$0xf]  ;;  %v13981_v44 = vld [vmem:[%s27866_s3 + $0xdd0] sm:$0xf0] }
 0x24a   :  { %4227 = vmatpush.bf16.msrb.mxu2 %v13762_v40  ;;  %4214 = vmatpush.bf16.msrb.mxu0 %v13634_v47  ;;  %v18346_v40 = vld [vmem:[%s27866_s3 + $0xd64] sm:$0xf]  ;;  %v13714_v47 = vor.u32 %v18255_v16, %v13711_v37  ;;  %v4541_v39 = vsel %vm1177_vm3, %v4486_v54, 0  ;;  %v13984_v22 = vor.u32 %v18358_v34, %v13981_v44  ;;  %v18352_v54 = vld [vmem:[%s27866_s3 + $0xd8c] sm:$0xf0] }
 0x24b   :  { %v13936_v60 = vor.u32 %v18346_v40, %v13933_v50  ;;  %v18354_v38 = vld [vmem:[%s27866_s3 + $0xda4] sm:$0xf]  ;;  %v13867_v40 = vld [vmem:[%s27866_s3 + $0xce0] sm:$0xf]  ;;  %v13964_v50 = vor.u32 %v18356_v31, %v13963_v29  ;;  %v18343_v34 = vld [vmem:[%s27866_s3 + $0xd4c] sm:$0xf] }
 0x24c   :  { %v13851_v4 = vld [vmem:[%s27866_s3 + $0xcc0] sm:$0xf]  ;;  %v13925_v44 = vld [vmem:[%s27866_s3 + $0xd58] sm:$0xf0]  ;;  %v13837_v31 = vld [vmem:[%s27866_s3 + $0xcb0] sm:$0xf0] }
 0x24d   :  { %4202 = vmatpush.bf16.msrb.mxu3 %v13742_v61  ;;  %4189 = vmatpush.bf16.msrb.mxu1 %v13614_v63  ;;  %v13915_v61 = vld [vmem:[%s27866_s3 + $0xd40] sm:$0xf]  ;;  %v18364_v63 = vld [vmem:[%s27866_s3 + $0xdec] sm:$0xf0]  ;;  %v13928_v36 = vor.u32 %v18343_v34, %v13925_v44 }
 0x24e   :  { %4228 = vmatpush.bf16.msrb.mxu2 %v13746_v0  ;;  %4215 = vmatpush.bf16.msrb.mxu0 %v13618_v13  ;;  %v13917_v0 = vld [vmem:[%s27866_s3 + $0xd50] sm:$0xf0]  ;;  %v13916_v13 = vor.u32 %v18344_v3, %v13915_v61  ;;  %v13996_v6 = vor.u32 %v18364_v63, %v13995_v1  ;;  %v13939_v3 = vld [vmem:[%s27866_s3 + $0xd68] sm:$0xf]  ;;  %v18349_v1 = vld [vmem:[%s27866_s3 + $0xd74] sm:$0xf0] }
 0x24f   :  { %v13920_v7 = vor.u32 %v18342_v59, %v13917_v0  ;;  %v13949_v61 = vld [vmem:[%s27866_s3 + $0xd90] sm:$0xf0]  ;;  %v13868_v59 = vor.u32 %v18332_v46, %v13867_v40  ;;  %v18347_v0 = vld [vmem:[%s27866_s3 + $0xd6c] sm:$0xf]  ;;  %v13909_v40 = vld [vmem:[%s27866_s3 + $0xd38] sm:$0xf0] }
 0x250   :  { %v22512_v41 = vpop.f32.mrf.mxu0  ;;  %v13819_v46 = vld [vmem:[%s27866_s3 + $0xc80] sm:$0xf] }
 0x251   :  { %4203 = vmatpush.bf16.msrb.mxu3 %v13726_v23  ;;  %4190 = vmatpush.bf16.msrb.mxu1 %v13598_v15  ;;  %v2963_v23 = vpop.f32.mrf.mxu2  ;;  %v18360_v15 = vld [vmem:[%s27866_s3 + $0xdcc] sm:$0xf0]  ;;  %v22510_v55 = vpop.f32.mrf.mxu1 }
 0x252   :  { %4229 = vmatpush.bf16.msrb.mxu2 %v13730_v17  ;;  %4216 = vmatpush.bf16.msrb.mxu0 %v13602_v24  ;;  %v18338_v17 = vld [vmem:[%s27866_s3 + $0xd24] sm:$0xf]  ;;  %v13900_v24 = vor.u32 %v18340_v18, %v13899_v8  ;;  %v13980_v16 = vor.u32 %v18360_v15, %v13979_v12  ;;  %v13940_v8 = vor.u32 %v18349_v1, %v13939_v3  ;;  %v13853_v12 = vld [vmem:[%s27866_s3 + $0xcd0] sm:$0xf0]  ;;  %v13816_v23 = vld [vmem:[%s27866_s3 + $0xe08] sm:$0x33] }
 0x253   :  { %v13904_v37 = vor.u32 %v18338_v17, %v13901_v21  ;;  %v18326_v18 = vld [vmem:[%s27866_s3 + $0xcc4] sm:$0xf]  ;;  %v13923_v15 = vld [vmem:[%s27866_s3 + $0xd48] sm:$0xf]  ;;  %v18345_v17 = vld [vmem:[%s27866_s3 + $0xd54] sm:$0xf0] }
 0x254   :  { %v13924_v29 = vor.u32 %v18345_v17, %v13923_v15  ;;  %v13821_v3 = vld [vmem:[%s27866_s3 + $0xc90] sm:$0xf0]  ;;  %v18331_v15 = vld [vmem:[%s27866_s3 + $0xcec] sm:$0xf]  ;;  %v13877_v17 = vld [vmem:[%s27866_s3 + $0xcf8] sm:$0xf0] }
 0x255   :  { %4204 = vmatpush.bf16.msrb.mxu3 %v13710_v56  ;;  %4191 = vmatpush.bf16.msrb.mxu1 %v13582_v57  ;;  %v13965_v57 = vld [vmem:[%s27866_s3 + $0xdb0] sm:$0xf0]  ;;  %v13884_v56 = vor.u32 %v18336_v42, %v13883_v20  ;;  %v4435_v20 = vunpack.c.l.b16 %v13816_v23  ;;  %v4436_v42 = vunpack.c.h.b16 %v13816_v23  ;;  %v18363_v23 = vld [vmem:[%s27866_s3 + $0xdec] sm:$0xf] }
 0x256   :  { %4230 = vmatpush.bf16.msrb.mxu2 %v13714_v47  ;;  %4217 = vmatpush.bf16.msrb.mxu0 %v13586_v49  ;;  %v13947_v47 = vld [vmem:[%s27866_s3 + $0xd80] sm:$0xf]  ;;  %v13968_v49 = vor.u32 %v18354_v38, %v13965_v57  ;;  %v18341_v38 = vld [vmem:[%s27866_s3 + $0xd34] sm:$0xf0] }
 0x257   :  { %v13948_v2 = vor.u32 %v18352_v54, %v13947_v47  ;;  %v18320_v47 = vld [vmem:[%s27866_s3 + $0xc8c] sm:$0xf0]  ;;  %v4487_v54 = vpack.c.b16 %v4435_v20, %v4435_v20  ;;  %v13987_v20 = vld [vmem:[%s27866_s3 + $0xdc8] sm:$0xf] }
 0x258   :  { %4192 = vmatmul.bf16.vlgmr.msrb.gmra.mxu1 %v20391_v27  ;;  %13765 = vmatmul.msk.bf16.vlgmr.msrb.gmra.mxu3 %vm1173_vm5, %v20393_v30  ;;  %v3344_v28 = vpop.f32.mrf.mxu0 }
 0x259   :  { %4549 = vmatpush.bf16.msra.mxu3 %v13932_v5  ;;  %4565 = vmatpush.bf16.msra.mxu1 %v4538_v51  ;;  %v18330_v5 = vld [vmem:[%s27866_s3 + $0xce4] sm:$0xf]  ;;  %v13869_v51 = vld [vmem:[%s27866_s3 + $0xcf0] sm:$0xf0]  ;;  %v3318_v63 = vpop.f32.mrf.mxu1  ;;  %v18335_v28 = vld [vmem:[%s27866_s3 + $0xd0c] sm:$0xf] }
 0x25a   :  { %4575 = vmatpush.bf16.msra.mxu2 %v13936_v60  ;;  %4591 = vmatpush.bf16.msra.mxu0 %v4541_v39  ;;  %v18350_v60 = vld [vmem:[%s27866_s3 + $0xd84] sm:$0xf]  ;;  %v13941_v39 = vld [vmem:[%s27866_s3 + $0xd78] sm:$0xf0] }
 0x25b   :  { %4218 = vmatmul.bf16.vlgmr.msrb.gmra.mxu0 %v20391_v27  ;;  %13766 = vmatmul.msk.bf16.vlgmr.msrb.gmra.mxu2 %vm1173_vm5, %v20393_v30 }
 0x25d   :  { %4550 = vmatpush.bf16.msra.mxu3 %v13916_v13  ;;  %4566 = vmatpush.bf16.msra.mxu1 %v13996_v6  ;;  %v13872_v13 = vor.u32 %v18330_v5, %v13869_v51  ;;  %v18328_v6 = vld [vmem:[%s27866_s3 + $0xccc] sm:$0xf0] }
 0x25e   :  { %4576 = vmatpush.bf16.msra.mxu2 %v13920_v7  ;;  %4592 = vmatpush.bf16.msra.mxu0 %v14000_v33  ;;  %v13952_v7 = vor.u32 %v18350_v60, %v13949_v61  ;;  %v13944_v33 = vor.u32 %v18347_v0, %v13941_v39  ;;  %v13852_v21 = vor.u32 %v18328_v6, %v13851_v4  ;;  %v18318_v61 = vld [vmem:[%s27866_s3 + $0xc84] sm:$0xf]  ;;  %v4544_v4 = vsel %vm1177_vm3, %v4487_v54, 0  ;;  %v13971_v54 = vld [vmem:[%s27866_s3 + $0xda8] sm:$0xf] }
 0x25f   :  { %v13908_v60 = vor.u32 %v18341_v38, %v13907_v25  ;;  %v13820_v39 = vor.u32 %v18320_v47, %v13819_v46  ;;  %v18327_v25 = vld [vmem:[%s27866_s3 + $0xccc] sm:$0xf]  ;;  %v13861_v38 = vld [vmem:[%s27866_s3 + $0xcd8] sm:$0xf0]  ;;  %v13843_v47 = vld [vmem:[%s27866_s3 + $0xca8] sm:$0xf] }
 0x261   :  { %4551 = vmatpush.bf16.msra.mxu3 %v13900_v24  ;;  %4567 = vmatpush.bf16.msra.mxu1 %v13980_v16  ;;  %v13856_v24 = vor.u32 %v18326_v18, %v13853_v12  ;;  %v13835_v16 = vld [vmem:[%s27866_s3 + $0xca0] sm:$0xf]  ;;  %v18333_v12 = vld [vmem:[%s27866_s3 + $0xcf4] sm:$0xf0] }
 0x262   :  { %4577 = vmatpush.bf16.msra.mxu2 %v13904_v37  ;;  %4593 = vmatpush.bf16.msra.mxu0 %v13984_v22  ;;  %v18324_v37 = vld [vmem:[%s27866_s3 + $0xcac] sm:$0xf0]  ;;  %v18322_v22 = vld [vmem:[%s27866_s3 + $0xca4] sm:$0xf]  ;;  %v3329_v51 = vpop.f32.mrf.mxu2 }
 0x263   :  { %v13836_v57 = vor.u32 %v18324_v37, %v13835_v16  ;;  %v3343_v1 = vadd.f32 %v22512_v41, %v3329_v51  ;;  %v13893_v41 = vld [vmem:[%s27866_s3 + $0xd18] sm:$0xf0]  ;;  %v13859_v37 = vld [vmem:[%s27866_s3 + $0xcc8] sm:$0xf]  ;;  %v18325_v51 = vld [vmem:[%s27866_s3 + $0xcb4] sm:$0xf0] }
 0x264   :  { %v13896_v18 = vor.u32 %v18335_v28, %v13893_v41  ;;  %v18321_v41 = vld [vmem:[%s27866_s3 + $0xc94] sm:$0xf0] }
 0x265   :  { %4552 = vmatpush.bf16.msra.mxu3 %v13884_v56  ;;  %4568 = vmatpush.bf16.msra.mxu1 %v13964_v50  ;;  %v18339_v56 = vld [vmem:[%s27866_s3 + $0xd2c] sm:$0xf]  ;;  %v3303_v50 = vpop.f32.mrf.mxu3 }
 0x266   :  { %4578 = vmatpush.bf16.msra.mxu2 %v13888_v45  ;;  %4594 = vmatpush.bf16.msra.mxu0 %v13968_v49  ;;  %v13840_v45 = vor.u32 %v18322_v22, %v13837_v31  ;;  %v4488_v49 = vpack.c.b16 %v4436_v42, %v4436_v42  ;;  %v3317_v5 = vadd.f32 %v22510_v55, %v3303_v50  ;;  %v18337_v55 = vld [vmem:[%s27866_s3 + $0xd14] sm:$0xf0]  ;;  %v18359_v31 = vld [vmem:[%s27866_s3 + $0xdcc] sm:$0xf] }
 0x267   :  { %v13912_v63 = vor.u32 %v18339_v56, %v13909_v40  ;;  %v18361_v42 = vld [vmem:[%s27866_s3 + $0xdd4] sm:$0xf0] }
 0x268   :  { %v22650_v0 = vadd.f32 %v3317_v5, %v22322_v43  ;;  %v4547_v43 = vsel %vm1177_vm3, %v4488_v49, 0  ;;  %v18329_v22 = vld [vmem:[%s27866_s3 + $0xcd4] sm:$0xf0]  ;;  %v13988_v40 = vor.u32 %v18361_v42, %v13987_v20  ;;  %v13864_v5 = vor.u32 %v18327_v25, %v13861_v38 }
 0x269   :  { %4553 = vmatpush.bf16.msra.mxu3 %v13868_v59  ;;  %4569 = vmatpush.bf16.msra.mxu1 %v13948_v2  ;;  %v13891_v59 = vld [vmem:[%s27866_s3 + $0xd08] sm:$0xf]  ;;  %v22659_v2 = vadd.f32 %v3343_v1, %v22331_v19  ;;  %v18365_v19 = vld [vmem:[%s27866_s3 + $0xdf4] sm:$0xf0]  ;;  %v18323_v1 = vld [vmem:[%s27866_s3 + $0xcac] sm:$0xf] }
 0x26a   :  { %4579 = vmatpush.bf16.msra.mxu2 %v13872_v13  ;;  %4595 = vmatpush.bf16.msra.mxu0 %v13952_v7  ;;  %v13824_v13 = vor.u32 %v18318_v61, %v13821_v3  ;;  %v13892_v6 = vor.u32 %v18337_v55, %v13891_v59  ;;  %v13875_v7 = vld [vmem:[%s27866_s3 + $0xce8] sm:$0xf]  ;;  %v3331_v44 = vpop.f32.mrf.mxu2  ;;  %v18357_v49 = vld [vmem:[%s27866_s3 + $0xdb4] sm:$0xf0]  ;;  %v13973_v61 = vld [vmem:[%s27866_s3 + $0xdb8] sm:$0xf0] }
 0x26b   :  { %v13972_v59 = vor.u32 %v18357_v49, %v13971_v54  ;;  %v13827_v55 = vld [vmem:[%s27866_s3 + $0xc88] sm:$0xf]  ;;  %v18410_v54 = vld [vmem:[%s27866_s3 + $0xf74] sm:$0xf]  ;;  %v14243_v49 = vld [vmem:[%s27866_s3 + $0xf80] sm:$0xf0] }
 0x26c   :  { %14009 = vmatmul.msk.bf16.vlgmr.msra.gmra.mxu1 %vm1173_vm5, %v20639_v53  ;;  %v13828_v44 = vor.u32 %v18321_v41, %v13827_v55  ;;  %v14246_v55 = vor.u32 %v18410_v54, %v14243_v49  ;;  %v14147_v41 = vld [vmem:[%s27866_s3 + $0xec0] sm:$0xf0] }
 0x26d   :  { %4601 = vmatpush.bf16.msrb.mxu1 %v13940_v8  ;;  %4554 = vmatpush.bf16.msra.mxu3 %v13852_v21  ;;  %v14003_v8 = vld [vmem:[%s27866_s3 + $0xde8] sm:$0xf]  ;;  %v3305_v21 = vpop.f32.mrf.mxu3  ;;  %v3355_v56 = vpop.f32.mrf.mxu1 }
 0x26e   :  { %4627 = vmatpush.bf16.msrb.mxu0 %v13944_v33  ;;  %4580 = vmatpush.bf16.msra.mxu2 %v13856_v24  ;;  %v14005_v33 = vld [vmem:[%s27866_s3 + $0xdf8] sm:$0xf0]  ;;  %v14004_v34 = vor.u32 %v18365_v19, %v14003_v8  ;;  %v13876_v24 = vor.u32 %v18333_v12, %v13875_v7  ;;  %v18319_v7 = vld [vmem:[%s27866_s3 + $0xc8c] sm:$0xf] }
 0x26f   :  { %14010 = vmatmul.msk.bf16.vlgmr.msra.gmra.mxu0 %vm1173_vm5, %v20639_v53  ;;  %v14008_v16 = vor.u32 %v18363_v23, %v14005_v33  ;;  %v18351_v8 = vld [vmem:[%s27866_s3 + $0xd8c] sm:$0xf]  ;;  %v13957_v19 = vld [vmem:[%s27866_s3 + $0xd98] sm:$0xf0]  ;;  %v14177_v33 = vld [vmem:[%s27866_s3 + $0xef0] sm:$0xf] }
 0x270   :  { %v3381_v50 = vpop.f32.mrf.mxu0  ;;  %v13829_v23 = vld [vmem:[%s27866_s3 + $0xc98] sm:$0xf0] }
 0x271   :  { %4602 = vmatpush.bf16.msrb.mxu1 %v13924_v29  ;;  %4555 = vmatpush.bf16.msra.mxu3 %v13836_v57  ;;  %v13880_v29 = vor.u32 %v18331_v15, %v13877_v17  ;;  %v14061_v57 = vld [vmem:[%s27866_s3 + $0xf90] sm:$0x33]  ;;  %v18396_v15 = vld [vmem:[%s27866_s3 + $0xefc] sm:$0xf0] }
 0x272   :  { %4628 = vmatpush.bf16.msrb.mxu0 %v13928_v36  ;;  %4581 = vmatpush.bf16.msra.mxu2 %v13840_v45  ;;  %v13989_v36 = vld [vmem:[%s27866_s3 + $0xdd8] sm:$0xf0]  ;;  %v13860_v45 = vor.u32 %v18329_v22, %v13859_v37  ;;  %v4854_v3 = vunpack.c.l.b16 %v14061_v57  ;;  %v14179_v37 = vld [vmem:[%s27866_s3 + $0xf00] sm:$0xf0]  ;;  %v14178_v25 = vor.u32 %v18396_v15, %v14177_v33  ;;  %v18404_v15 = vld [vmem:[%s27866_s3 + $0xf3c] sm:$0xf0] }
 0x273   :  { %v13992_v46 = vor.u32 %v18359_v31, %v13989_v36  ;;  %v13832_v36 = vor.u32 %v18319_v7, %v13829_v23  ;;  %v14209_v23 = vld [vmem:[%s27866_s3 + $0xf30] sm:$0xf] }
 0x275   :  { %4603 = vmatpush.bf16.msrb.mxu1 %v13908_v60  ;;  %4556 = vmatpush.bf16.msra.mxu3 %v13820_v39  ;;  %v18355_v60 = vld [vmem:[%s27866_s3 + $0xdac] sm:$0xf]  ;;  %v13844_v39 = vor.u32 %v18325_v51, %v13843_v47  ;;  %v3368_v12 = vpop.f32.mrf.mxu3 }
 0x276   :  { %4629 = vmatpush.bf16.msrb.mxu0 %v13912_v63  ;;  %4582 = vmatpush.bf16.msra.mxu2 %v13824_v13  ;;  %v13845_v63 = vld [vmem:[%s27866_s3 + $0xcb8] sm:$0xf0]  ;;  %v13976_v28 = vor.u32 %v18355_v60, %v13973_v61  ;;  %v13955_v13 = vld [vmem:[%s27866_s3 + $0xd88] sm:$0xf]  ;;  %v3369_v17 = vadd.f32 %v3368_v12, %v3355_v56  ;;  %v3394_v21 = vpop.f32.mrf.mxu2  ;;  %v18384_v12 = vld [vmem:[%s27866_s3 + $0xe9c] sm:$0xf0] }
 0x277   :  { %v3395_v20 = vadd.f32 %v3394_v21, %v3381_v50  ;;  %v18392_v50 = vld [vmem:[%s27866_s3 + $0xedc] sm:$0xf0]  ;;  %v14131_v21 = vld [vmem:[%s27866_s3 + $0xea0] sm:$0xf0] }
 0x278   :  { %4557 = vmatmul.bf16.vlgmr.msra.gmra.mxu3 %v20715_v32  ;;  %v3383_v42 = vpop.f32.mrf.mxu0  ;;  %v22777_v31 = vadd.f32 %v3369_v17, %v22449_v48  ;;  %v14241_v48 = vld [vmem:[%s27866_s3 + $0xf70] sm:$0xf]  ;;  %v18382_v17 = vld [vmem:[%s27866_s3 + $0xe94] sm:$0xf] }
 0x279   :  { %4617 = vmatpush.bf16.msrb.mxu3 %v4544_v4  ;;  %4604 = vmatpush.bf16.msrb.mxu1 %v13892_v6  ;;  %v18353_v4 = vld [vmem:[%s27866_s3 + $0xd94] sm:$0xf0]  ;;  %v13848_v6 = vor.u32 %v18323_v1, %v13845_v63  ;;  %v18388_v1 = vld [vmem:[%s27866_s3 + $0xebc] sm:$0xf0]  ;;  %v14225_v63 = vld [vmem:[%s27866_s3 + $0xf50] sm:$0xf] }
 0x27a   :  { %4643 = vmatpush.bf16.msrb.mxu2 %v4547_v43  ;;  %4630 = vmatpush.bf16.msrb.mxu0 %v13896_v18  ;;  %v4855_v43 = vunpack.c.h.b16 %v14061_v57  ;;  %v4906_v18 = vpack.c.b16 %v4854_v3, %v4854_v3  ;;  %v22781_v57 = vadd.f32 %v3395_v20, %v22453_v52  ;;  %v18390_v52 = vld [vmem:[%s27866_s3 + $0xed4] sm:$0xf]  ;;  %v14145_v3 = vld [vmem:[%s27866_s3 + $0xeb0] sm:$0xf]  ;;  %v14134_v20 = vor.u32 %v18382_v17, %v14131_v21  ;;  %v18380_v42 = vld [vmem:[%s27866_s3 + $0xe7c] sm:$0xf0] }
 0x27b   :  { %4583 = vmatmul.bf16.vlgmr.msra.gmra.mxu2 %v20715_v32  ;;  %v14153_v21 = vld [vmem:[%s27866_s3 + $0xeb8] sm:$0xf] }
 0x27c   :  { %v4907_v22 = vpack.c.b16 %v4855_v43, %v4855_v43  ;;  %v4959_v38 = vsel %vm1177_vm3, %v4906_v18, 0  ;;  %v14129_v18 = vld [vmem:[%s27866_s3 + $0xe90] sm:$0xf] }
 0x27d   :  { %4618 = vmatpush.bf16.msrb.mxu3 %v14004_v34  ;;  %4605 = vmatpush.bf16.msrb.mxu1 %v13876_v24  ;;  %v3357_v34 = vpop.f32.mrf.mxu1  ;;  %v13956_v24 = vor.u32 %v18353_v4, %v13955_v13  ;;  %v3370_v51 = vpop.f32.mrf.mxu3  ;;  %v18406_v13 = vld [vmem:[%s27866_s3 + $0xf54] sm:$0xf]  ;;  %v14227_v4 = vld [vmem:[%s27866_s3 + $0xf60] sm:$0xf0] }
 0x27e   :  { %4644 = vmatpush.bf16.msrb.mxu2 %v14008_v16  ;;  %4631 = vmatpush.bf16.msrb.mxu0 %v13880_v29  ;;  %v18394_v16 = vld [vmem:[%s27866_s3 + $0xef4] sm:$0xf]  ;;  %v13960_v29 = vor.u32 %v18351_v8, %v13957_v19  ;;  %v4962_v47 = vsel %vm1177_vm3, %v4907_v22, 0  ;;  %v14230_v33 = vor.u32 %v18406_v13, %v14227_v4  ;;  %v18400_v22 = vld [vmem:[%s27866_s3 + $0xf1c] sm:$0xf0] }
 0x27f   :  { %v14182_v56 = vor.u32 %v18394_v16, %v14179_v37  ;;  %v18402_v34 = vld [vmem:[%s27866_s3 + $0xf34] sm:$0xf]  ;;  %v14113_v16 = vld [vmem:[%s27866_s3 + $0xe70] sm:$0xf]  ;;  %v14210_v37 = vor.u32 %v18404_v15, %v14209_v23  ;;  %v18391_v13 = vld [vmem:[%s27866_s3 + $0xedc] sm:$0xf] }
 0x280   :  { %v14097_v51 = vld [vmem:[%s27866_s3 + $0xe50] sm:$0xf]  ;;  %v14171_v4 = vld [vmem:[%s27866_s3 + $0xee8] sm:$0xf0]  ;;  %v14083_v15 = vld [vmem:[%s27866_s3 + $0xe40] sm:$0xf0] }
 0x281   :  { %4619 = vmatpush.bf16.msrb.mxu3 %v13988_v40  ;;  %4606 = vmatpush.bf16.msrb.mxu1 %v13860_v45  ;;  %v14161_v40 = vld [vmem:[%s27866_s3 + $0xed0] sm:$0xf]  ;;  %v18412_v45 = vld [vmem:[%s27866_s3 + $0xf7c] sm:$0xf0]  ;;  %v14174_v17 = vor.u32 %v18391_v13, %v14171_v4 }
 0x282   :  { %4645 = vmatpush.bf16.msrb.mxu2 %v13992_v46  ;;  %4632 = vmatpush.bf16.msrb.mxu0 %v13864_v5  ;;  %v14163_v46 = vld [vmem:[%s27866_s3 + $0xee0] sm:$0xf0]  ;;  %v14162_v5 = vor.u32 %v18392_v50, %v14161_v40  ;;  %v14242_v60 = vor.u32 %v18412_v45, %v14241_v48  ;;  %v14185_v50 = vld [vmem:[%s27866_s3 + $0xef8] sm:$0xf]  ;;  %v18397_v48 = vld [vmem:[%s27866_s3 + $0xf04] sm:$0xf0] }
 0x283   :  { %v14166_v61 = vor.u32 %v18390_v52, %v14163_v46  ;;  %v14195_v40 = vld [vmem:[%s27866_s3 + $0xf20] sm:$0xf0]  ;;  %v14114_v52 = vor.u32 %v18380_v42, %v14113_v16  ;;  %v18395_v46 = vld [vmem:[%s27866_s3 + $0xefc] sm:$0xf]  ;;  %v14155_v16 = vld [vmem:[%s27866_s3 + $0xec8] sm:$0xf0] }
 0x284   :  { %v22840_v7 = vpop.f32.mrf.mxu0  ;;  %v14065_v42 = vld [vmem:[%s27866_s3 + $0xe10] sm:$0xf] }
 0x285   :  { %4620 = vmatpush.bf16.msrb.mxu3 %v13972_v59  ;;  %4607 = vmatpush.bf16.msrb.mxu1 %v13844_v39  ;;  %v3396_v59 = vpop.f32.mrf.mxu2  ;;  %v18408_v39 = vld [vmem:[%s27866_s3 + $0xf5c] sm:$0xf0]  ;;  %v22838_v43 = vpop.f32.mrf.mxu1 }
 0x286   :  { %4646 = vmatpush.bf16.msrb.mxu2 %v13976_v28  ;;  %4633 = vmatpush.bf16.msrb.mxu0 %v13848_v6  ;;  %v18386_v28 = vld [vmem:[%s27866_s3 + $0xeb4] sm:$0xf]  ;;  %v14146_v6 = vor.u32 %v18388_v1, %v14145_v3  ;;  %v14226_v8 = vor.u32 %v18408_v39, %v14225_v63  ;;  %v14186_v3 = vor.u32 %v18397_v48, %v14185_v50  ;;  %v14099_v63 = vld [vmem:[%s27866_s3 + $0xe60] sm:$0xf0]  ;;  %v14062_v59 = vld [vmem:[%s27866_s3 + $0xf98] sm:$0x33] }
 0x287   :  { %v14150_v19 = vor.u32 %v18386_v28, %v14147_v41  ;;  %v18374_v1 = vld [vmem:[%s27866_s3 + $0xe54] sm:$0xf]  ;;  %v14169_v39 = vld [vmem:[%s27866_s3 + $0xed8] sm:$0xf]  ;;  %v18393_v28 = vld [vmem:[%s27866_s3 + $0xee4] sm:$0xf0] }
 0x288   :  { %v14170_v23 = vor.u32 %v18393_v28, %v14169_v39  ;;  %v14067_v50 = vld [vmem:[%s27866_s3 + $0xe20] sm:$0xf0]  ;;  %v18379_v39 = vld [vmem:[%s27866_s3 + $0xe7c] sm:$0xf]  ;;  %v14123_v28 = vld [vmem:[%s27866_s3 + $0xe88] sm:$0xf0] }
 0x289   :  { %4621 = vmatpush.bf16.msrb.mxu3 %v13956_v24  ;;  %4608 = vmatpush.bf16.msrb.mxu1 %v13828_v44  ;;  %v14211_v44 = vld [vmem:[%s27866_s3 + $0xf40] sm:$0xf0]  ;;  %v14130_v24 = vor.u32 %v18384_v12, %v14129_v18  ;;  %v4856_v18 = vunpack.c.l.b16 %v14062_v59  ;;  %v4857_v12 = vunpack.c.h.b16 %v14062_v59  ;;  %v18411_v59 = vld [vmem:[%s27866_s3 + $0xf7c] sm:$0xf] }
 0x28a   :  { %4647 = vmatpush.bf16.msrb.mxu2 %v13960_v29  ;;  %4634 = vmatpush.bf16.msrb.mxu0 %v13832_v36  ;;  %v14193_v29 = vld [vmem:[%s27866_s3 + $0xf10] sm:$0xf]  ;;  %v14214_v36 = vor.u32 %v18402_v34, %v14211_v44  ;;  %v18389_v34 = vld [vmem:[%s27866_s3 + $0xec4] sm:$0xf0] }
 0x28b   :  { %v14194_v49 = vor.u32 %v18400_v22, %v14193_v29  ;;  %v18368_v29 = vld [vmem:[%s27866_s3 + $0xe1c] sm:$0xf0]  ;;  %v4908_v22 = vpack.c.b16 %v4856_v18, %v4856_v18  ;;  %v14233_v18 = vld [vmem:[%s27866_s3 + $0xf58] sm:$0xf] }
 0x28c   :  { %4609 = vmatmul.bf16.vlgmr.msrb.gmra.mxu1 %v20715_v32  ;;  %14011 = vmatmul.msk.bf16.vlgmr.msrb.gmra.mxu3 %vm1173_vm5, %v20639_v53  ;;  %v3816_v54 = vpop.f32.mrf.mxu0 }
 0x28d   :  { %4970 = vmatpush.bf16.msra.mxu3 %v14178_v25  ;;  %4986 = vmatpush.bf16.msra.mxu1 %v4959_v38  ;;  %v18378_v25 = vld [vmem:[%s27866_s3 + $0xe74] sm:$0xf]  ;;  %v14115_v38 = vld [vmem:[%s27866_s3 + $0xe80] sm:$0xf0]  ;;  %v3790_v45 = vpop.f32.mrf.mxu1 }
 0x28e   :  { %4996 = vmatpush.bf16.msra.mxu2 %v14182_v56  ;;  %5012 = vmatpush.bf16.msra.mxu0 %v4962_v47  ;;  %v18398_v56 = vld [vmem:[%s27866_s3 + $0xf14] sm:$0xf]  ;;  %v14187_v47 = vld [vmem:[%s27866_s3 + $0xf08] sm:$0xf0] }
 0x28f   :  { %4635 = vmatmul.bf16.vlgmr.msrb.gmra.mxu0 %v20715_v32  ;;  %14012 = vmatmul.msk.bf16.vlgmr.msrb.gmra.mxu2 %vm1173_vm5, %v20639_v53 }
 0x291   :  { %4971 = vmatpush.bf16.msra.mxu3 %v14162_v5  ;;  %4987 = vmatpush.bf16.msra.mxu1 %v14242_v60  ;;  %v14118_v5 = vor.u32 %v18378_v25, %v14115_v38  ;;  %v18376_v60 = vld [vmem:[%s27866_s3 + $0xe5c] sm:$0xf0] }
 0x292   :  { %4997 = vmatpush.bf16.msra.mxu2 %v14166_v61  ;;  %5013 = vmatpush.bf16.msra.mxu0 %v14246_v55  ;;  %v14198_v61 = vor.u32 %v18398_v56, %v14195_v40  ;;  %v14190_v55 = vor.u32 %v18395_v46, %v14187_v47  ;;  %v14098_v41 = vor.u32 %v18376_v60, %v14097_v51  ;;  %v18366_v40 = vld [vmem:[%s27866_s3 + $0xe14] sm:$0xf]  ;;  %v18383_v47 = vld [vmem:[%s27866_s3 + $0xe9c] sm:$0xf]  ;;  %v14121_v60 = vld [vmem:[%s27866_s3 + $0xe78] sm:$0xf] }
 0x293   :  { %v14154_v56 = vor.u32 %v18389_v34, %v14153_v21  ;;  %v14066_v46 = vor.u32 %v18368_v29, %v14065_v42  ;;  %v14070_v54 = vor.u32 %v18366_v40, %v14067_v50  ;;  %v18375_v21 = vld [vmem:[%s27866_s3 + $0xe5c] sm:$0xf]  ;;  %v14107_v34 = vld [vmem:[%s27866_s3 + $0xe68] sm:$0xf0]  ;;  %v14089_v29 = vld [vmem:[%s27866_s3 + $0xe38] sm:$0xf] }
 0x294   :  { %v18403_v40 = vld [vmem:[%s27866_s3 + $0xf3c] sm:$0xf]  ;;  %v14219_v50 = vld [vmem:[%s27866_s3 + $0xf48] sm:$0xf0] }
 0x295   :  { %4972 = vmatpush.bf16.msra.mxu3 %v14146_v6  ;;  %4988 = vmatpush.bf16.msra.mxu1 %v14226_v8  ;;  %v14102_v6 = vor.u32 %v18374_v1, %v14099_v63  ;;  %v14081_v8 = vld [vmem:[%s27866_s3 + $0xe30] sm:$0xf]  ;;  %v18381_v63 = vld [vmem:[%s27866_s3 + $0xe84] sm:$0xf0] }
 0x296   :  { %4998 = vmatpush.bf16.msra.mxu2 %v14150_v19  ;;  %5014 = vmatpush.bf16.msra.mxu0 %v14230_v33  ;;  %v18372_v19 = vld [vmem:[%s27866_s3 + $0xe3c] sm:$0xf0]  ;;  %v18370_v33 = vld [vmem:[%s27866_s3 + $0xe34] sm:$0xf]  ;;  %v3801_v38 = vpop.f32.mrf.mxu2 }
 0x297   :  { %v14082_v44 = vor.u32 %v18372_v19, %v14081_v8  ;;  %v22973_v48 = vadd.f32 %v22840_v7, %v3801_v38  ;;  %v14139_v7 = vld [vmem:[%s27866_s3 + $0xea8] sm:$0xf0]  ;;  %v14105_v19 = vld [vmem:[%s27866_s3 + $0xe58] sm:$0xf]  ;;  %v14110_v38 = vor.u32 %v18375_v21, %v14107_v34 }
 0x298   :  { %v14142_v1 = vor.u32 %v18383_v47, %v14139_v7  ;;  %v14073_v47 = vld [vmem:[%s27866_s3 + $0xe18] sm:$0xf] }
 0x299   :  { %4973 = vmatpush.bf16.msra.mxu3 %v14130_v24  ;;  %4989 = vmatpush.bf16.msra.mxu1 %v14210_v37  ;;  %v18387_v24 = vld [vmem:[%s27866_s3 + $0xebc] sm:$0xf]  ;;  %v3775_v37 = vpop.f32.mrf.mxu3 }
 0x29a   :  { %4999 = vmatpush.bf16.msra.mxu2 %v14134_v20  ;;  %5015 = vmatpush.bf16.msra.mxu0 %v14214_v36  ;;  %v14086_v20 = vor.u32 %v18370_v33, %v14083_v15  ;;  %v4909_v36 = vpack.c.b16 %v4857_v12, %v4857_v12  ;;  %v22964_v25 = vadd.f32 %v22838_v43, %v3775_v37  ;;  %v14137_v43 = vld [vmem:[%s27866_s3 + $0xe98] sm:$0xf]  ;;  %v18409_v12 = vld [vmem:[%s27866_s3 + $0xf64] sm:$0xf0]  ;;  %v18407_v15 = vld [vmem:[%s27866_s3 + $0xf5c] sm:$0xf] }
 0x29b   :  { %v14158_v45 = vor.u32 %v18387_v24, %v14155_v16  ;;  %v18377_v33 = vld [vmem:[%s27866_s3 + $0xe64] sm:$0xf0]  ;;  %v14234_v16 = vor.u32 %v18409_v12, %v14233_v18  ;;  %v18442_v18 = vld [vmem:[%s27866_s3 + $0x1084] sm:$0xf]  ;;  %v14425_v12 = vld [vmem:[%s27866_s3 + $0x1090] sm:$0xf0] }
 0x29d   :  { %4974 = vmatpush.bf16.msra.mxu3 %v14114_v52  ;;  %4990 = vmatpush.bf16.msra.mxu1 %v14194_v49  ;;  %v18385_v52 = vld [vmem:[%s27866_s3 + $0xea4] sm:$0xf0]  ;;  %v4965_v49 = vsel %vm1177_vm3, %v4908_v22, 0  ;;  %v14217_v22 = vld [vmem:[%s27866_s3 + $0xf38] sm:$0xf] }
 0x29e   :  { %5000 = vmatpush.bf16.msra.mxu2 %v14118_v5  ;;  %5016 = vmatpush.bf16.msra.mxu0 %v14198_v61  ;;  %v4968_v5 = vsel %vm1177_vm3, %v4909_v36, 0  ;;  %v14138_v51 = vor.u32 %v18385_v52, %v14137_v43  ;;  %v14249_v61 = vld [vmem:[%s27866_s3 + $0xf78] sm:$0xf]  ;;  %v3803_v4 = vpop.f32.mrf.mxu2  ;;  %v18405_v36 = vld [vmem:[%s27866_s3 + $0xf44] sm:$0xf0] }
 0x29f   :  { %v18371_v43 = vld [vmem:[%s27866_s3 + $0xe3c] sm:$0xf]  ;;  %v14091_v52 = vld [vmem:[%s27866_s3 + $0xe48] sm:$0xf0] }
 0x2a0   :  { %14255 = vmatmul.msk.bf16.vlgmr.msra.gmra.mxu1 %vm1173_vm5, %v20957_v62 }
 0x2a1   :  { %5022 = vmatpush.bf16.msrb.mxu1 %v14186_v3  ;;  %4975 = vmatpush.bf16.msra.mxu3 %v14098_v41  ;;  %v18413_v3 = vld [vmem:[%s27866_s3 + $0xf84] sm:$0xf0]  ;;  %v3777_v41 = vpop.f32.mrf.mxu3  ;;  %v3827_v24 = vpop.f32.mrf.mxu1 }
 0x2a2   :  { %5048 = vmatpush.bf16.msrb.mxu0 %v14190_v55  ;;  %5001 = vmatpush.bf16.msra.mxu2 %v14102_v6  ;;  %v14251_v55 = vld [vmem:[%s27866_s3 + $0xf88] sm:$0xf0]  ;;  %v14250_v13 = vor.u32 %v18413_v3, %v14249_v61  ;;  %v14122_v6 = vor.u32 %v18381_v63, %v14121_v60  ;;  %v14094_v61 = vor.u32 %v18371_v43, %v14091_v52  ;;  %v18367_v3 = vld [vmem:[%s27866_s3 + $0xe1c] sm:$0xf]  ;;  %v18444_v41 = vld [vmem:[%s27866_s3 + $0x108c] sm:$0xf0] }
 0x2a3   :  { %14256 = vmatmul.msk.bf16.vlgmr.msra.gmra.mxu0 %vm1173_vm5, %v20957_v62  ;;  %v14254_v8 = vor.u32 %v18411_v59, %v14251_v55  ;;  %v14203_v63 = vld [vmem:[%s27866_s3 + $0xf28] sm:$0xf0]  ;;  %v14391_v52 = vld [vmem:[%s27866_s3 + $0x1040] sm:$0xf] }
 0x2a4   :  { %v3853_v37 = vpop.f32.mrf.mxu0 }
 0x2a5   :  { %5023 = vmatpush.bf16.msrb.mxu1 %v14170_v23  ;;  %4976 = vmatpush.bf16.msra.mxu3 %v14082_v44  ;;  %v14126_v23 = vor.u32 %v18379_v39, %v14123_v28  ;;  %v14307_v44 = vld [vmem:[%s27866_s3 + $0x1120] sm:$0x33]  ;;  %v14075_v39 = vld [vmem:[%s27866_s3 + $0xe28] sm:$0xf0] }
 0x2a6   :  { %5049 = vmatpush.bf16.msrb.mxu0 %v14174_v17  ;;  %5002 = vmatpush.bf16.msra.mxu2 %v14086_v20  ;;  %v14235_v17 = vld [vmem:[%s27866_s3 + $0xf68] sm:$0xf0]  ;;  %v14106_v20 = vor.u32 %v18377_v33, %v14105_v19  ;;  %v5276_v60 = vunpack.c.h.b16 %v14307_v44  ;;  %v14423_v28 = vld [vmem:[%s27866_s3 + $0x1080] sm:$0xf]  ;;  %v14078_v21 = vor.u32 %v18367_v3, %v14075_v39 }
 0x2a7   :  { %v14238_v42 = vor.u32 %v18407_v15, %v14235_v17  ;;  %v14424_v34 = vor.u32 %v18444_v41, %v14423_v28  ;;  %v14375_v39 = vld [vmem:[%s27866_s3 + $0x1020] sm:$0xf]  ;;  %v18432_v28 = vld [vmem:[%s27866_s3 + $0x102c] sm:$0xf0] }
 0x2a8   :  { %v5328_v17 = vpack.c.b16 %v5276_v60, %v5276_v60  ;;  %v18454_v60 = vld [vmem:[%s27866_s3 + $0x10e4] sm:$0xf]  ;;  %v14455_v41 = vld [vmem:[%s27866_s3 + $0x10c0] sm:$0xf] }
 0x2a9   :  { %5024 = vmatpush.bf16.msrb.mxu1 %v14154_v56  ;;  %4977 = vmatpush.bf16.msra.mxu3 %v14066_v46  ;;  %v18373_v56 = vld [vmem:[%s27866_s3 + $0xe44] sm:$0xf0]  ;;  %v14218_v46 = vor.u32 %v18405_v36, %v14217_v22  ;;  %v3840_v55 = vpop.f32.mrf.mxu3  ;;  %v14409_v22 = vld [vmem:[%s27866_s3 + $0x1070] sm:$0xf0] }
 0x2aa   :  { %5050 = vmatpush.bf16.msrb.mxu0 %v14158_v45  ;;  %5003 = vmatpush.bf16.msra.mxu2 %v14070_v54  ;;  %v5275_v45 = vunpack.c.l.b16 %v14307_v44  ;;  %v14090_v7 = vor.u32 %v18373_v56, %v14089_v29  ;;  %v14222_v54 = vor.u32 %v18403_v40, %v14219_v50  ;;  %v3866_v4 = vpop.f32.mrf.mxu2  ;;  %v18438_v29 = vld [vmem:[%s27866_s3 + $0x1064] sm:$0xf]  ;;  %v5383_v36 = vsel %vm1177_vm3, %v5328_v17, 0  ;;  %v14489_v56 = vld [vmem:[%s27866_s3 + $0x1110] sm:$0xf0] }
 0x2ab   :  { %v14412_v43 = vor.u32 %v18438_v29, %v14409_v22  ;;  %v14441_v29 = vld [vmem:[%s27866_s3 + $0x10b0] sm:$0xf0]  ;;  %v14431_v22 = vld [vmem:[%s27866_s3 + $0x1088] sm:$0xf] }
 0x2ac   :  { %4978 = vmatmul.bf16.vlgmr.msra.gmra.mxu3 %v21033_v58  ;;  %v5327_v59 = vpack.c.b16 %v5275_v45, %v5275_v45  ;;  %v3855_v33 = vpop.f32.mrf.mxu0 }
 0x2ad   :  { %5038 = vmatpush.bf16.msrb.mxu3 %v4965_v49  ;;  %5025 = vmatpush.bf16.msrb.mxu1 %v14138_v51  ;;  %v18369_v49 = vld [vmem:[%s27866_s3 + $0xe24] sm:$0xf0]  ;;  %v14376_v33 = vor.u32 %v18432_v28, %v14375_v39  ;;  %v14417_v39 = vld [vmem:[%s27866_s3 + $0x1078] sm:$0xf0] }
 0x2ae   :  { %5064 = vmatpush.bf16.msrb.mxu2 %v4968_v5  ;;  %5051 = vmatpush.bf16.msrb.mxu0 %v14142_v1  ;;  %v14201_v5 = vld [vmem:[%s27866_s3 + $0xf18] sm:$0xf]  ;;  %v18401_v51 = vld [vmem:[%s27866_s3 + $0xf24] sm:$0xf0]  ;;  %v18399_v1 = vld [vmem:[%s27866_s3 + $0xf1c] sm:$0xf] }
 0x2af   :  { %5004 = vmatmul.bf16.vlgmr.msra.gmra.mxu2 %v21033_v58  ;;  %v14202_v19 = vor.u32 %v18401_v51, %v14201_v5  ;;  %v14206_v15 = vor.u32 %v18399_v1, %v14203_v63  ;;  %v5380_v44 = vsel %vm1177_vm3, %v5327_v59, 0  ;;  %v18434_v5 = vld [vmem:[%s27866_s3 + $0x1044] sm:$0xf]  ;;  %v14393_v51 = vld [vmem:[%s27866_s3 + $0x1050] sm:$0xf0] }
 0x2b1   :  { %5039 = vmatpush.bf16.msrb.mxu3 %v14250_v13  ;;  %5026 = vmatpush.bf16.msrb.mxu1 %v14122_v6  ;;  %v23096_v13 = vadd.f32 %v3840_v55, %v3827_v24  ;;  %v3829_v6 = vpop.f32.mrf.mxu1  ;;  %v14428_v24 = vor.u32 %v18442_v18, %v14425_v12  ;;  %v3842_v50 = vpop.f32.mrf.mxu3  ;;  %v14396_v55 = vor.u32 %v18434_v5, %v14393_v51  ;;  %v18450_v18 = vld [vmem:[%s27866_s3 + $0x10c4] sm:$0xf]  ;;  %v14457_v12 = vld [vmem:[%s27866_s3 + $0x10d0] sm:$0xf0]  ;;  %v14308_v51 = vld [vmem:[%s27866_s3 + $0x1128] sm:$0x33] }
 0x2b2   :  { %5065 = vmatpush.bf16.msrb.mxu2 %v14254_v8  ;;  %5052 = vmatpush.bf16.msrb.mxu0 %v14126_v23  ;;  %v14074_v8 = vor.u32 %v18369_v49, %v14073_v47  ;;  %v23104_v23 = vadd.f32 %v3866_v4, %v3853_v37  ;;  %v18440_v37 = vld [vmem:[%s27866_s3 + $0x106c] sm:$0xf0]  ;;  %v14471_v47 = vld [vmem:[%s27866_s3 + $0x10e0] sm:$0xf]  ;;  %v14433_v50 = vld [vmem:[%s27866_s3 + $0x1098] sm:$0xf0] }
 0x2b3   :  { %v18456_v49 = vld [vmem:[%s27866_s3 + $0x10ec] sm:$0xf0]  ;;  %v14345_v5 = vld [vmem:[%s27866_s3 + $0xff0] sm:$0xf0] }
 0x2b4   :  { %v14472_v59 = vor.u32 %v18456_v49, %v14471_v47  ;;  %v18452_v6 = vld [vmem:[%s27866_s3 + $0x10cc] sm:$0xf0]  ;;  %v18422_v49 = vld [vmem:[%s27866_s3 + $0xfe4] sm:$0xf] }
 0x2b5   :  { %5040 = vmatpush.bf16.msrb.mxu3 %v14234_v16  ;;  %5027 = vmatpush.bf16.msrb.mxu1 %v14106_v20  ;;  %v14407_v16 = vld [vmem:[%s27866_s3 + $0x1060] sm:$0xf]  ;;  %v14456_v17 = vor.u32 %v18452_v6, %v14455_v41  ;;  %v18424_v47 = vld [vmem:[%s27866_s3 + $0xfec] sm:$0xf0]  ;;  %v14348_v28 = vor.u32 %v18422_v49, %v14345_v5  ;;  %v5277_v6 = vunpack.c.l.b16 %v14308_v51 }
 0x2b6   :  { %5066 = vmatpush.bf16.msrb.mxu2 %v14238_v42  ;;  %5053 = vmatpush.bf16.msrb.mxu0 %v14110_v38  ;;  %v14487_v20 = vld [vmem:[%s27866_s3 + $0x1100] sm:$0xf]  ;;  %v18460_v42 = vld [vmem:[%s27866_s3 + $0x110c] sm:$0xf0]  ;;  %v18458_v38 = vld [vmem:[%s27866_s3 + $0x1104] sm:$0xf]  ;;  %v14408_v40 = vor.u32 %v18440_v37, %v14407_v16  ;;  %v14460_v16 = vor.u32 %v18450_v18, %v14457_v12 }
 0x2b7   :  { %v14488_v45 = vor.u32 %v18460_v42, %v14487_v20  ;;  %v18426_v37 = vld [vmem:[%s27866_s3 + $0x1004] sm:$0xf]  ;;  %v14361_v20 = vld [vmem:[%s27866_s3 + $0x1010] sm:$0xf0]  ;;  %v14327_v41 = vld [vmem:[%s27866_s3 + $0xfc0] sm:$0xf] }
 0x2b8   :  { %v23164_v63 = vpop.f32.mrf.mxu0  ;;  %v18446_v42 = vld [vmem:[%s27866_s3 + $0x10a4] sm:$0xf]  ;;  %v14329_v12 = vld [vmem:[%s27866_s3 + $0xfd0] sm:$0xf0] }
 0x2b9   :  { %5041 = vmatpush.bf16.msrb.mxu3 %v14218_v46  ;;  %5028 = vmatpush.bf16.msrb.mxu1 %v14090_v7  ;;  %v18436_v46 = vld [vmem:[%s27866_s3 + $0x104c] sm:$0xf0]  ;;  %v3868_v7 = vpop.f32.mrf.mxu2  ;;  %v23162_v3 = vpop.f32.mrf.mxu1  ;;  %v18418_v18 = vld [vmem:[%s27866_s3 + $0xfc4] sm:$0xf] }
 0x2ba   :  { %5067 = vmatpush.bf16.msrb.mxu2 %v14222_v54  ;;  %5054 = vmatpush.bf16.msrb.mxu0 %v14094_v61  ;;  %v14492_v54 = vor.u32 %v18458_v38, %v14489_v56  ;;  %v14473_v61 = vld [vmem:[%s27866_s3 + $0x10f0] sm:$0xf0]  ;;  %v14392_v1 = vor.u32 %v18436_v46, %v14391_v52  ;;  %v14364_v52 = vor.u32 %v18426_v37, %v14361_v20  ;;  %v14343_v46 = vld [vmem:[%s27866_s3 + $0xfe0] sm:$0xf]  ;;  %v18416_v20 = vld [vmem:[%s27866_s3 + $0xfac] sm:$0xf0] }
 0x2bb   :  { %v14476_v4 = vor.u32 %v18454_v60, %v14473_v61  ;;  %v14444_v7 = vor.u32 %v18446_v42, %v14441_v29  ;;  %v14415_v61 = vld [vmem:[%s27866_s3 + $0x1068] sm:$0xf]  ;;  %v14311_v37 = vld [vmem:[%s27866_s3 + $0xfa0] sm:$0xf]  ;;  %v5329_v42 = vpack.c.b16 %v5277_v6, %v5277_v6 }
 0x2bd   :  { %5042 = vmatpush.bf16.msrb.mxu3 %v14202_v19  ;;  %5029 = vmatpush.bf16.msrb.mxu1 %v14074_v8  ;;  %v18430_v8 = vld [vmem:[%s27866_s3 + $0x1024] sm:$0xf]  ;;  %v14377_v19 = vld [vmem:[%s27866_s3 + $0x1030] sm:$0xf0]  ;;  %v5386_v49 = vsel %vm1177_vm3, %v5329_v42, 0 }
 0x2be   :  { %5068 = vmatpush.bf16.msrb.mxu2 %v14206_v15  ;;  %5055 = vmatpush.bf16.msrb.mxu0 %v14078_v21  ;;  %v14359_v15 = vld [vmem:[%s27866_s3 + $0x1000] sm:$0xf]  ;;  %v14380_v21 = vor.u32 %v18430_v8, %v14377_v19  ;;  %v5278_v8 = vunpack.c.h.b16 %v14308_v51  ;;  %v14367_v51 = vld [vmem:[%s27866_s3 + $0x1008] sm:$0xf] }
 0x2c0   :  { %5030 = vmatmul.bf16.vlgmr.msrb.gmra.mxu1 %v21033_v58  ;;  %14257 = vmatmul.msk.bf16.vlgmr.msrb.gmra.mxu3 %vm1173_vm5, %v20957_v62  ;;  %v5330_v29 = vpack.c.b16 %v5278_v8, %v5278_v8 }
 0x2c1   :  { %5391 = vmatpush.bf16.msra.mxu3 %v14424_v34  ;;  %5407 = vmatpush.bf16.msra.mxu1 %v5380_v44  ;;  %v18428_v34 = vld [vmem:[%s27866_s3 + $0x100c] sm:$0xf0]  ;;  %v14439_v44 = vld [vmem:[%s27866_s3 + $0x10a0] sm:$0xf]  ;;  %v4156_v38 = vpop.f32.mrf.mxu1 }
 0x2c2   :  { %5417 = vmatpush.bf16.msra.mxu2 %v14428_v24  ;;  %5433 = vmatpush.bf16.msra.mxu0 %v5383_v36  ;;  %v18448_v24 = vld [vmem:[%s27866_s3 + $0x10ac] sm:$0xf0]  ;;  %v18445_v36 = vld [vmem:[%s27866_s3 + $0x1094] sm:$0xf0]  ;;  %v14360_v56 = vor.u32 %v18428_v34, %v14359_v15  ;;  %v14399_v15 = vld [vmem:[%s27866_s3 + $0x1048] sm:$0xf] }
 0x2c3   :  { %5056 = vmatmul.bf16.vlgmr.msrb.gmra.mxu0 %v21033_v58  ;;  %14258 = vmatmul.msk.bf16.vlgmr.msrb.gmra.mxu2 %vm1173_vm5, %v20957_v62  ;;  %v18435_v34 = vld [vmem:[%s27866_s3 + $0x104c] sm:$0xf] }
 0x2c5   :  { %5392 = vmatpush.bf16.msra.mxu3 %v14408_v40  ;;  %5408 = vmatpush.bf16.msra.mxu1 %v14488_v45  ;;  %v18443_v40 = vld [vmem:[%s27866_s3 + $0x108c] sm:$0xf]  ;;  %v4182_v45 = vpop.f32.mrf.mxu0 }
 0x2c6   :  { %5418 = vmatpush.bf16.msra.mxu2 %v14412_v43  ;;  %5434 = vmatpush.bf16.msra.mxu0 %v14492_v54  ;;  %v14440_v43 = vor.u32 %v18448_v24, %v14439_v44  ;;  %v14432_v54 = vor.u32 %v18445_v36, %v14431_v22  ;;  %v14436_v60 = vor.u32 %v18443_v40, %v14433_v50  ;;  %v14401_v44 = vld [vmem:[%s27866_s3 + $0x1058] sm:$0xf0]  ;;  %v14313_v40 = vld [vmem:[%s27866_s3 + $0xfb0] sm:$0xf0] }
 0x2c7   :  { %v4141_v24 = vpop.f32.mrf.mxu3  ;;  %v14404_v45 = vor.u32 %v18435_v34, %v14401_v44  ;;  %v14481_v34 = vld [vmem:[%s27866_s3 + $0x10f8] sm:$0xf0]  ;;  %v18423_v44 = vld [vmem:[%s27866_s3 + $0xfec] sm:$0xf] }
 0x2c8   :  { %v4142_v22 = vadd.f32 %v4141_v24, %v22964_v25  ;;  %v18433_v25 = vld [vmem:[%s27866_s3 + $0x1034] sm:$0xf0]  ;;  %v14353_v24 = vld [vmem:[%s27866_s3 + $0xff8] sm:$0xf0] }
 0x2c9   :  { %5393 = vmatpush.bf16.msra.mxu3 %v14392_v1  ;;  %5409 = vmatpush.bf16.msra.mxu1 %v14472_v59  ;;  %v18441_v1 = vld [vmem:[%s27866_s3 + $0x1074] sm:$0xf0]  ;;  %v14344_v59 = vor.u32 %v18424_v47, %v14343_v46  ;;  %v14312_v46 = vor.u32 %v18416_v20, %v14311_v37  ;;  %v18431_v47 = vld [vmem:[%s27866_s3 + $0x102c] sm:$0xf] }
 0x2ca   :  { %5419 = vmatpush.bf16.msra.mxu2 %v14396_v55  ;;  %5435 = vmatpush.bf16.msra.mxu0 %v14476_v4  ;;  %v18439_v55 = vld [vmem:[%s27866_s3 + $0x106c] sm:$0xf]  ;;  %v18420_v4 = vld [vmem:[%s27866_s3 + $0xfcc] sm:$0xf0]  ;;  %v14416_v19 = vor.u32 %v18441_v1, %v14415_v61  ;;  %v4167_v36 = vpop.f32.mrf.mxu2  ;;  %v18429_v1 = vld [vmem:[%s27866_s3 + $0x1014] sm:$0xf0] }
 0x2cb   :  { %v4168_v50 = vadd.f32 %v4167_v36, %v22973_v48  ;;  %v14385_v48 = vld [vmem:[%s27866_s3 + $0x1038] sm:$0xf0]  ;;  %v14368_v8 = vor.u32 %v18429_v1, %v14367_v51  ;;  %v14447_v51 = vld [vmem:[%s27866_s3 + $0x10a8] sm:$0xf]  ;;  %v18415_v1 = vld [vmem:[%s27866_s3 + $0xfac] sm:$0xf] }
 0x2cc   :  { %v14388_v61 = vor.u32 %v18431_v47, %v14385_v48  ;;  %v18419_v47 = vld [vmem:[%s27866_s3 + $0xfcc] sm:$0xf] }
 0x2cd   :  { %5394 = vmatpush.bf16.msra.mxu3 %v14376_v33  ;;  %5410 = vmatpush.bf16.msra.mxu1 %v14456_v17  ;;  %v14420_v33 = vor.u32 %v18439_v55, %v14417_v39  ;;  %v18437_v17 = vld [vmem:[%s27866_s3 + $0x1054] sm:$0xf0]  ;;  %v14497_v55 = vld [vmem:[%s27866_s3 + $0x1118] sm:$0xf0]  ;;  %v18427_v39 = vld [vmem:[%s27866_s3 + $0x100c] sm:$0xf] }
 0x2ce   :  { %5420 = vmatpush.bf16.msra.mxu2 %v14380_v21  ;;  %5436 = vmatpush.bf16.msra.mxu0 %v14460_v16  ;;  %v14328_v21 = vor.u32 %v18420_v4, %v14327_v41  ;;  %v14332_v16 = vor.u32 %v18418_v18, %v14329_v12  ;;  %v14400_v38 = vor.u32 %v18437_v17, %v14399_v15  ;;  %v14351_v18 = vld [vmem:[%s27866_s3 + $0xfe8] sm:$0xf]  ;;  %v18425_v17 = vld [vmem:[%s27866_s3 + $0xff4] sm:$0xf0] }
 0x2cf   :  { %v4143_v41 = vpop.f32.mrf.mxu3  ;;  %v14479_v12 = vld [vmem:[%s27866_s3 + $0x10e8] sm:$0xf] }
 0x2d0   :  { %v14321_v41 = vld [vmem:[%s27866_s3 + $0xfb8] sm:$0xf0] }
 0x2d1   :  { %5395 = vmatpush.bf16.msra.mxu3 %v14360_v56  ;;  %5411 = vmatpush.bf16.msra.mxu1 %v14440_v43  ;;  %v18414_v56 = vld [vmem:[%s27866_s3 + $0xfa4] sm:$0xf]  ;;  %v14383_v43 = vld [vmem:[%s27866_s3 + $0x1028] sm:$0xf] }
 0x2d2   :  { %5421 = vmatpush.bf16.msra.mxu2 %v14364_v52  ;;  %5437 = vmatpush.bf16.msra.mxu0 %v14444_v7  ;;  %v23302_v52 = vadd.f32 %v23162_v3, %v4142_v22  ;;  %v23311_v7 = vadd.f32 %v23164_v63, %v4168_v50  ;;  %v5389_v3 = vsel %vm1177_vm3, %v5330_v29, 0  ;;  %v14384_v5 = vor.u32 %v18433_v25, %v14383_v43  ;;  %v18461_v63 = vld [vmem:[%s27866_s3 + $0x1114] sm:$0xf0]  ;;  %v4169_v6 = vpop.f32.mrf.mxu2  ;;  %v18451_v43 = vld [vmem:[%s27866_s3 + $0x10cc] sm:$0xf] }
 0x2d3   :  { %v14352_v22 = vor.u32 %v18425_v17, %v14351_v18  ;;  %v14465_v25 = vld [vmem:[%s27866_s3 + $0x10d8] sm:$0xf0]  ;;  %v18492_v6 = vld [vmem:[%s27866_s3 + $0x121c] sm:$0xf0]  ;;  %v14671_v17 = vld [vmem:[%s27866_s3 + $0x1220] sm:$0xf0] }
 0x2d4   :  { %14501 = vmatmul.msk.bf16.vlgmr.msra.gmra.mxu1 %vm1173_vm5, %v21283_v26 }
 0x2d5   :  { %5443 = vmatpush.bf16.msrb.mxu1 %v14432_v54  ;;  %5396 = vmatpush.bf16.msra.mxu3 %v14344_v59  ;;  %v14316_v54 = vor.u32 %v18414_v56, %v14313_v40  ;;  %v18459_v59 = vld [vmem:[%s27866_s3 + $0x110c] sm:$0xf]  ;;  %v4193_v37 = vpop.f32.mrf.mxu1  ;;  %v14463_v56 = vld [vmem:[%s27866_s3 + $0x10c8] sm:$0xf]  ;;  %v18453_v40 = vld [vmem:[%s27866_s3 + $0x10d4] sm:$0xf0] }
 0x2d6   :  { %5469 = vmatpush.bf16.msrb.mxu0 %v14436_v60  ;;  %5422 = vmatpush.bf16.msra.mxu2 %v14348_v28  ;;  %v14495_v60 = vld [vmem:[%s27866_s3 + $0x1108] sm:$0xf]  ;;  %v14369_v28 = vld [vmem:[%s27866_s3 + $0x1018] sm:$0xf0]  ;;  %v4194_v42 = vadd.f32 %v4193_v37, %v23096_v13  ;;  %v18421_v13 = vld [vmem:[%s27866_s3 + $0xfd4] sm:$0xf0]  ;;  %v14464_v48 = vor.u32 %v18453_v40, %v14463_v56 }
 0x2d7   :  { %14502 = vmatmul.msk.bf16.vlgmr.msra.gmra.mxu0 %vm1173_vm5, %v21283_v26  ;;  %v14496_v4 = vor.u32 %v18461_v63, %v14495_v60  ;;  %v14372_v15 = vor.u32 %v18427_v39, %v14369_v28  ;;  %v18449_v60 = vld [vmem:[%s27866_s3 + $0x10b4] sm:$0xf0]  ;;  %v18486_v56 = vld [vmem:[%s27866_s3 + $0x11f4] sm:$0xf]  ;;  %v14655_v40 = vld [vmem:[%s27866_s3 + $0x1200] sm:$0xf0] }
 0x2d8   :  { %v4219_v29 = vpop.f32.mrf.mxu0 }
 0x2d9   :  { %5444 = vmatpush.bf16.msrb.mxu1 %v14416_v19  ;;  %5397 = vmatpush.bf16.msra.mxu3 %v14328_v21  ;;  %v14500_v19 = vor.u32 %v18459_v59, %v14497_v55  ;;  %v18455_v21 = vld [vmem:[%s27866_s3 + $0x10ec] sm:$0xf]  ;;  %v4220_v50 = vadd.f32 %v4219_v29, %v23104_v23  ;;  %v14337_v23 = vld [vmem:[%s27866_s3 + $0xfd8] sm:$0xf0]  ;;  %v14653_v29 = vld [vmem:[%s27866_s3 + $0x11f0] sm:$0xf] }
 0x2da   :  { %5470 = vmatpush.bf16.msrb.mxu0 %v14420_v33  ;;  %5423 = vmatpush.bf16.msra.mxu2 %v14332_v16  ;;  %v18457_v33 = vld [vmem:[%s27866_s3 + $0x10f4] sm:$0xf0]  ;;  %v14553_v16 = vld [vmem:[%s27866_s3 + $0x12b0] sm:$0x33]  ;;  %v14484_v36 = vor.u32 %v18455_v21, %v14481_v34  ;;  %v18447_v59 = vld [vmem:[%s27866_s3 + $0x10ac] sm:$0xf] }
 0x2db   :  { %v14480_v20 = vor.u32 %v18457_v33, %v14479_v12  ;;  %v5697_v63 = vunpack.c.h.b16 %v14553_v16  ;;  %v14449_v55 = vld [vmem:[%s27866_s3 + $0x10b8] sm:$0xf0]  ;;  %v4206_v28 = vpop.f32.mrf.mxu3  ;;  %v14448_v33 = vor.u32 %v18449_v60, %v14447_v51  ;;  %v18482_v51 = vld [vmem:[%s27866_s3 + $0x11d4] sm:$0xf]  ;;  %v14639_v60 = vld [vmem:[%s27866_s3 + $0x11e0] sm:$0xf0] }
 0x2dd   :  { %5445 = vmatpush.bf16.msrb.mxu1 %v14400_v38  ;;  %5398 = vmatpush.bf16.msra.mxu3 %v14312_v46  ;;  %v14335_v38 = vld [vmem:[%s27866_s3 + $0xfc8] sm:$0xf]  ;;  %v5696_v46 = vunpack.c.l.b16 %v14553_v16  ;;  %v4195_v18 = vpop.f32.mrf.mxu1  ;;  %v14324_v16 = vor.u32 %v18415_v1, %v14321_v41  ;;  %v14621_v41 = vld [vmem:[%s27866_s3 + $0x11b0] sm:$0xf] }
 0x2de   :  { %5471 = vmatpush.bf16.msrb.mxu0 %v14404_v45  ;;  %5424 = vmatpush.bf16.msra.mxu2 %v14316_v54  ;;  %v14356_v45 = vor.u32 %v18423_v44, %v14353_v24  ;;  %v14319_v54 = vld [vmem:[%s27866_s3 + $0xfa8] sm:$0xf]  ;;  %v14452_v44 = vor.u32 %v18447_v59, %v14449_v55  ;;  %v5749_v24 = vpack.c.b16 %v5697_v63, %v5697_v63  ;;  %v18502_v63 = vld [vmem:[%s27866_s3 + $0x1274] sm:$0xf]  ;;  %v18500_v18 = vld [vmem:[%s27866_s3 + $0x125c] sm:$0xf0] }
 0x2df   :  { %v5748_v39 = vpack.c.b16 %v5696_v46, %v5696_v46 }
 0x2e0   :  { %5399 = vmatmul.bf16.vlgmr.msra.gmra.mxu3 %v21365_v10  ;;  %v4221_v34 = vpop.f32.mrf.mxu0 }
 0x2e1   :  { %5459 = vmatpush.bf16.msrb.mxu3 %v5386_v49  ;;  %5446 = vmatpush.bf16.msrb.mxu1 %v14384_v5  ;;  %v14336_v49 = vor.u32 %v18421_v13, %v14335_v38  ;;  %v18417_v5 = vld [vmem:[%s27866_s3 + $0xfb4] sm:$0xf0]  ;;  %v18508_v38 = vld [vmem:[%s27866_s3 + $0x129c] sm:$0xf0]  ;;  %v14735_v13 = vld [vmem:[%s27866_s3 + $0x12a0] sm:$0xf0] }
 0x2e2   :  { %5485 = vmatpush.bf16.msrb.mxu2 %v5389_v3  ;;  %5472 = vmatpush.bf16.msrb.mxu0 %v14388_v61  ;;  %v14468_v3 = vor.u32 %v18451_v43, %v14465_v25  ;;  %v14340_v61 = vor.u32 %v18419_v47, %v14337_v23  ;;  %v14320_v12 = vor.u32 %v18417_v5, %v14319_v54  ;;  %v14637_v23 = vld [vmem:[%s27866_s3 + $0x11d0] sm:$0xf]  ;;  %v18504_v5 = vld [vmem:[%s27866_s3 + $0x127c] sm:$0xf0] }
 0x2e3   :  { %5425 = vmatmul.bf16.vlgmr.msra.gmra.mxu2 %v21365_v10  ;;  %v4208_v25 = vpop.f32.mrf.mxu3  ;;  %v14658_v47 = vor.u32 %v18486_v56, %v14655_v40  ;;  %v14717_v54 = vld [vmem:[%s27866_s3 + $0x1270] sm:$0xf]  ;;  %v14687_v56 = vld [vmem:[%s27866_s3 + $0x1240] sm:$0xf0]  ;;  %v14677_v40 = vld [vmem:[%s27866_s3 + $0x1218] sm:$0xf] }
 0x2e4   :  { %v14679_v25 = vld [vmem:[%s27866_s3 + $0x1228] sm:$0xf0] }
 0x2e5   :  { %5460 = vmatpush.bf16.msrb.mxu3 %v14496_v4  ;;  %5447 = vmatpush.bf16.msrb.mxu1 %v14368_v8  ;;  %v14669_v4 = vld [vmem:[%s27866_s3 + $0x1210] sm:$0xf]  ;;  %v23424_v8 = vadd.f32 %v4206_v28, %v4194_v42  ;;  %v14642_v28 = vor.u32 %v18482_v51, %v14639_v60  ;;  %v14591_v51 = vld [vmem:[%s27866_s3 + $0x1180] sm:$0xf0]  ;;  %v14554_v60 = vld [vmem:[%s27866_s3 + $0x12b8] sm:$0x33] }
 0x2e6   :  { %5486 = vmatpush.bf16.msrb.mxu2 %v14500_v19  ;;  %5473 = vmatpush.bf16.msrb.mxu0 %v14372_v15  ;;  %v4232_v19 = vpop.f32.mrf.mxu2  ;;  %v18490_v15 = vld [vmem:[%s27866_s3 + $0x1214] sm:$0xf]  ;;  %v14670_v37 = vor.u32 %v18492_v6, %v14669_v4  ;;  %v18480_v4 = vld [vmem:[%s27866_s3 + $0x11bc] sm:$0xf0]  ;;  %v14701_v6 = vld [vmem:[%s27866_s3 + $0x1250] sm:$0xf] }
 0x2e7   :  { %v23432_v21 = vadd.f32 %v4232_v19, %v4220_v50  ;;  %v14674_v42 = vor.u32 %v18490_v15, %v14671_v17  ;;  %v5804_v50 = vsel %vm1177_vm3, %v5749_v24, 0  ;;  %v18498_v15 = vld [vmem:[%s27866_s3 + $0x1254] sm:$0xf]  ;;  %v14703_v17 = vld [vmem:[%s27866_s3 + $0x1260] sm:$0xf0]  ;;  %v14622_v34 = vor.u32 %v18480_v4, %v14621_v41 }
 0x2e8   :  { %v14702_v24 = vor.u32 %v18500_v18, %v14701_v6  ;;  %v14663_v41 = vld [vmem:[%s27866_s3 + $0x1208] sm:$0xf0]  ;;  %v14573_v6 = vld [vmem:[%s27866_s3 + $0x1150] sm:$0xf]  ;;  %v5698_v18 = vunpack.c.l.b16 %v14554_v60 }
 0x2e9   :  { %5461 = vmatpush.bf16.msrb.mxu3 %v14480_v20  ;;  %5448 = vmatpush.bf16.msrb.mxu1 %v14352_v22  ;;  %v5801_v20 = vsel %vm1177_vm3, %v5748_v39, 0  ;;  %v18488_v22 = vld [vmem:[%s27866_s3 + $0x11fc] sm:$0xf0]  ;;  %v23490_v1 = vpop.f32.mrf.mxu1  ;;  %v14718_v39 = vor.u32 %v18504_v5, %v14717_v54  ;;  %v18470_v5 = vld [vmem:[%s27866_s3 + $0x1174] sm:$0xf] }
 0x2ea   :  { %5487 = vmatpush.bf16.msrb.mxu2 %v14484_v36  ;;  %5474 = vmatpush.bf16.msrb.mxu0 %v14356_v45  ;;  %v14733_v36 = vld [vmem:[%s27866_s3 + $0x1290] sm:$0xf]  ;;  %v18506_v45 = vld [vmem:[%s27866_s3 + $0x1294] sm:$0xf]  ;;  %v14654_v43 = vor.u32 %v18488_v22, %v14653_v29  ;;  %v14706_v29 = vor.u32 %v18498_v15, %v14703_v17  ;;  %v18472_v54 = vld [vmem:[%s27866_s3 + $0x117c] sm:$0xf0]  ;;  %v14594_v4 = vor.u32 %v18470_v5, %v14591_v51 }
 0x2eb   :  { %v14734_v46 = vor.u32 %v18508_v38, %v14733_v36  ;;  %v18474_v22 = vld [vmem:[%s27866_s3 + $0x1194] sm:$0xf]  ;;  %v14607_v36 = vld [vmem:[%s27866_s3 + $0x11a0] sm:$0xf0] }
 0x2ec   :  { %v23492_v55 = vpop.f32.mrf.mxu0  ;;  %v18494_v38 = vld [vmem:[%s27866_s3 + $0x1234] sm:$0xf]  ;;  %v14575_v17 = vld [vmem:[%s27866_s3 + $0x1160] sm:$0xf0] }
 0x2ed   :  { %5462 = vmatpush.bf16.msrb.mxu3 %v14464_v48  ;;  %5449 = vmatpush.bf16.msrb.mxu1 %v14336_v49  ;;  %v18484_v48 = vld [vmem:[%s27866_s3 + $0x11dc] sm:$0xf0]  ;;  %v18466_v15 = vld [vmem:[%s27866_s3 + $0x1154] sm:$0xf] }
 0x2ee   :  { %5488 = vmatpush.bf16.msrb.mxu2 %v14468_v3  ;;  %5475 = vmatpush.bf16.msrb.mxu0 %v14340_v61  ;;  %v4234_v49 = vpop.f32.mrf.mxu2  ;;  %v14738_v3 = vor.u32 %v18506_v45, %v14735_v13  ;;  %v14719_v61 = vld [vmem:[%s27866_s3 + $0x1280] sm:$0xf0]  ;;  %v14638_v59 = vor.u32 %v18484_v48, %v14637_v23  ;;  %v14610_v23 = vor.u32 %v18474_v22, %v14607_v36  ;;  %v14589_v48 = vld [vmem:[%s27866_s3 + $0x1170] sm:$0xf]  ;;  %v18464_v36 = vld [vmem:[%s27866_s3 + $0x113c] sm:$0xf0] }
 0x2ef   :  { %v14722_v19 = vor.u32 %v18502_v63, %v14719_v61  ;;  %v14690_v49 = vor.u32 %v18494_v38, %v14687_v56  ;;  %v14661_v61 = vld [vmem:[%s27866_s3 + $0x11f8] sm:$0xf]  ;;  %v14557_v22 = vld [vmem:[%s27866_s3 + $0x1130] sm:$0xf]  ;;  %v5750_v38 = vpack.c.b16 %v5698_v18, %v5698_v18 }
 0x2f1   :  { %5463 = vmatpush.bf16.msrb.mxu3 %v14448_v33  ;;  %5450 = vmatpush.bf16.msrb.mxu1 %v14320_v12  ;;  %v18478_v12 = vld [vmem:[%s27866_s3 + $0x11b4] sm:$0xf]  ;;  %v14623_v33 = vld [vmem:[%s27866_s3 + $0x11c0] sm:$0xf0]  ;;  %v4573_v45 = vpop.f32.mrf.mxu1  ;;  %v5807_v5 = vsel %vm1177_vm3, %v5750_v38, 0 }
 0x2f2   :  { %5489 = vmatpush.bf16.msrb.mxu2 %v14452_v44  ;;  %5476 = vmatpush.bf16.msrb.mxu0 %v14324_v16  ;;  %v14605_v44 = vld [vmem:[%s27866_s3 + $0x1190] sm:$0xf]  ;;  %v14626_v16 = vor.u32 %v18478_v12, %v14623_v33  ;;  %v5699_v12 = vunpack.c.h.b16 %v14554_v60  ;;  %v14613_v60 = vld [vmem:[%s27866_s3 + $0x1198] sm:$0xf] }
 0x2f4   :  { %5451 = vmatmul.bf16.vlgmr.msrb.gmra.mxu1 %v21365_v10  ;;  %14503 = vmatmul.msk.bf16.vlgmr.msrb.gmra.mxu3 %vm1173_vm5, %v21283_v26  ;;  %v5751_v56 = vpack.c.b16 %v5699_v12, %v5699_v12 }
 0x2f5   :  { %5812 = vmatpush.bf16.msra.mxu3 %v14670_v37  ;;  %5828 = vmatpush.bf16.msra.mxu1 %v5801_v20  ;;  %v18476_v37 = vld [vmem:[%s27866_s3 + $0x119c] sm:$0xf0]  ;;  %v14685_v20 = vld [vmem:[%s27866_s3 + $0x1230] sm:$0xf] }
 0x2f6   :  { %5838 = vmatpush.bf16.msra.mxu2 %v14674_v42  ;;  %5854 = vmatpush.bf16.msra.mxu0 %v5804_v50  ;;  %v18496_v42 = vld [vmem:[%s27866_s3 + $0x123c] sm:$0xf0]  ;;  %v18493_v50 = vld [vmem:[%s27866_s3 + $0x1224] sm:$0xf0]  ;;  %v14606_v13 = vor.u32 %v18476_v37, %v14605_v44  ;;  %v14645_v44 = vld [vmem:[%s27866_s3 + $0x11d8] sm:$0xf] }
 0x2f7   :  { %5477 = vmatmul.bf16.vlgmr.msrb.gmra.mxu0 %v21365_v10  ;;  %14504 = vmatmul.msk.bf16.vlgmr.msrb.gmra.mxu2 %vm1173_vm5, %v21283_v26  ;;  %v18483_v37 = vld [vmem:[%s27866_s3 + $0x11dc] sm:$0xf] }
 0x2f9   :  { %5813 = vmatpush.bf16.msra.mxu3 %v14654_v43  ;;  %5829 = vmatpush.bf16.msra.mxu1 %v14734_v46  ;;  %v18491_v43 = vld [vmem:[%s27866_s3 + $0x121c] sm:$0xf]  ;;  %v4599_v46 = vpop.f32.mrf.mxu0 }
 0x2fa   :  { %5839 = vmatpush.bf16.msra.mxu2 %v14658_v47  ;;  %5855 = vmatpush.bf16.msra.mxu0 %v14738_v3  ;;  %v14686_v47 = vor.u32 %v18496_v42, %v14685_v20  ;;  %v14678_v3 = vor.u32 %v18493_v50, %v14677_v40  ;;  %v14682_v63 = vor.u32 %v18491_v43, %v14679_v25  ;;  %v14647_v20 = vld [vmem:[%s27866_s3 + $0x11e8] sm:$0xf0]  ;;  %v14559_v43 = vld [vmem:[%s27866_s3 + $0x1140] sm:$0xf0] }
 0x2fb   :  { %v4558_v42 = vpop.f32.mrf.mxu3  ;;  %v14650_v46 = vor.u32 %v18483_v37, %v14647_v20  ;;  %v14727_v37 = vld [vmem:[%s27866_s3 + $0x1288] sm:$0xf0]  ;;  %v18471_v20 = vld [vmem:[%s27866_s3 + $0x117c] sm:$0xf] }
 0x2fc   :  { %v4572_v40 = vadd.f32 %v23490_v1, %v4558_v42  ;;  %v18481_v1 = vld [vmem:[%s27866_s3 + $0x11c4] sm:$0xf0]  ;;  %v14599_v42 = vld [vmem:[%s27866_s3 + $0x1188] sm:$0xf0] }
 0x2fd   :  { %5814 = vmatpush.bf16.msra.mxu3 %v14638_v59  ;;  %5830 = vmatpush.bf16.msra.mxu1 %v14718_v39  ;;  %v18489_v59 = vld [vmem:[%s27866_s3 + $0x1204] sm:$0xf0]  ;;  %v14590_v39 = vor.u32 %v18472_v54, %v14589_v48  ;;  %v14558_v48 = vor.u32 %v18464_v36, %v14557_v22  ;;  %v18479_v54 = vld [vmem:[%s27866_s3 + $0x11bc] sm:$0xf] }
 0x2fe   :  { %5840 = vmatpush.bf16.msra.mxu2 %v14642_v28  ;;  %5856 = vmatpush.bf16.msra.mxu0 %v14722_v19  ;;  %v18487_v28 = vld [vmem:[%s27866_s3 + $0x11fc] sm:$0xf]  ;;  %v18468_v19 = vld [vmem:[%s27866_s3 + $0x115c] sm:$0xf0]  ;;  %v14662_v33 = vor.u32 %v18489_v59, %v14661_v61  ;;  %v4584_v50 = vpop.f32.mrf.mxu2  ;;  %v18477_v59 = vld [vmem:[%s27866_s3 + $0x11a4] sm:$0xf0] }
 0x2ff   :  { %v4598_v25 = vadd.f32 %v23492_v55, %v4584_v50  ;;  %v14631_v55 = vld [vmem:[%s27866_s3 + $0x11c8] sm:$0xf0]  ;;  %v14614_v12 = vor.u32 %v18477_v59, %v14613_v60  ;;  %v14581_v50 = vld [vmem:[%s27866_s3 + $0x1158] sm:$0xf]  ;;  %v18463_v59 = vld [vmem:[%s27866_s3 + $0x113c] sm:$0xf] }
 0x300   :  { %v14634_v61 = vor.u32 %v18479_v54, %v14631_v55  ;;  %v14583_v54 = vld [vmem:[%s27866_s3 + $0x1168] sm:$0xf0]  ;;  %v14693_v60 = vld [vmem:[%s27866_s3 + $0x1238] sm:$0xf] }
 0x301   :  { %5815 = vmatpush.bf16.msra.mxu3 %v14622_v34  ;;  %5831 = vmatpush.bf16.msra.mxu1 %v14702_v24  ;;  %v14666_v34 = vor.u32 %v18487_v28, %v14663_v41  ;;  %v18485_v24 = vld [vmem:[%s27866_s3 + $0x11e4] sm:$0xf0]  ;;  %v14743_v28 = vld [vmem:[%s27866_s3 + $0x12a8] sm:$0xf0]  ;;  %v18475_v41 = vld [vmem:[%s27866_s3 + $0x119c] sm:$0xf] }
 0x302   :  { %5841 = vmatpush.bf16.msra.mxu2 %v14626_v16  ;;  %5857 = vmatpush.bf16.msra.mxu0 %v14706_v29  ;;  %v14574_v16 = vor.u32 %v18468_v19, %v14573_v6  ;;  %v14578_v29 = vor.u32 %v18466_v15, %v14575_v17  ;;  %v14646_v45 = vor.u32 %v18485_v24, %v14645_v44  ;;  %v14597_v15 = vld [vmem:[%s27866_s3 + $0x1178] sm:$0xf]  ;;  %v18473_v24 = vld [vmem:[%s27866_s3 + $0x1184] sm:$0xf0] }
 0x303   :  { %v4560_v6 = vpop.f32.mrf.mxu3  ;;  %v14725_v17 = vld [vmem:[%s27866_s3 + $0x1278] sm:$0xf] }
 0x304   :  { %v14567_v6 = vld [vmem:[%s27866_s3 + $0x1148] sm:$0xf0] }
 0x305   :  { %5816 = vmatpush.bf16.msra.mxu3 %v14606_v13  ;;  %5832 = vmatpush.bf16.msra.mxu1 %v14686_v47  ;;  %v18462_v13 = vld [vmem:[%s27866_s3 + $0x1134] sm:$0xf]  ;;  %v14629_v47 = vld [vmem:[%s27866_s3 + $0x11b8] sm:$0xf] }
 0x306   :  { %5842 = vmatpush.bf16.msra.mxu2 %v14610_v23  ;;  %5858 = vmatpush.bf16.msra.mxu0 %v14690_v49  ;;  %v23630_v23 = vadd.f32 %v4572_v40, %v23302_v52  ;;  %v23639_v49 = vadd.f32 %v4598_v25, %v23311_v7  ;;  %v5810_v52 = vsel %vm1177_vm3, %v5751_v56, 0  ;;  %v14630_v51 = vor.u32 %v18481_v1, %v14629_v47  ;;  %v18509_v7 = vld [vmem:[%s27866_s3 + $0x12a4] sm:$0xf0]  ;;  %v4586_v18 = vpop.f32.mrf.mxu2  ;;  %v14711_v47 = vld [vmem:[%s27866_s3 + $0x1268] sm:$0xf0] }
 0x307   :  { %v14598_v56 = vor.u32 %v18473_v24, %v14597_v15  ;;  %v18469_v25 = vld [vmem:[%s27866_s3 + $0x1164] sm:$0xf0]  ;;  %v18588_v18 = vld [vmem:[%s27866_s3 + $0x153c] sm:$0xf0]  ;;  %v14967_v24 = vld [vmem:[%s27866_s3 + $0x1540] sm:$0xf0] }
 0x308   :  { %14747 = vmatmul.msk.bf16.vlgmr.msra.gmra.mxu1 %vm1173_vm5, %v21617_v14 }
 0x309   :  { %5864 = vmatpush.bf16.msrb.mxu1 %v14678_v3  ;;  %5817 = vmatpush.bf16.msra.mxu3 %v14590_v39  ;;  %v14562_v3 = vor.u32 %v18462_v13, %v14559_v43  ;;  %v18507_v39 = vld [vmem:[%s27866_s3 + $0x129c] sm:$0xf]  ;;  %v4610_v22 = vpop.f32.mrf.mxu1  ;;  %v18501_v13 = vld [vmem:[%s27866_s3 + $0x1264] sm:$0xf0]  ;;  %v14602_v43 = vor.u32 %v18471_v20, %v14599_v42 }
 0x30a   :  { %5890 = vmatpush.bf16.msrb.mxu0 %v14682_v63  ;;  %5843 = vmatpush.bf16.msra.mxu2 %v14594_v4  ;;  %v14741_v63 = vld [vmem:[%s27866_s3 + $0x1298] sm:$0xf]  ;;  %v14615_v4 = vld [vmem:[%s27866_s3 + $0x11a8] sm:$0xf0] }
 0x30b   :  { %14748 = vmatmul.msk.bf16.vlgmr.msra.gmra.mxu0 %vm1173_vm5, %v21617_v14  ;;  %v14742_v19 = vor.u32 %v18509_v7, %v14741_v63  ;;  %v14618_v44 = vor.u32 %v18475_v41, %v14615_v4  ;;  %v18497_v63 = vld [vmem:[%s27866_s3 + $0x1244] sm:$0xf0] }
 0x30c   :  { %v4636_v38 = vpop.f32.mrf.mxu0 }
 0x30d   :  { %5865 = vmatpush.bf16.msrb.mxu1 %v14662_v33  ;;  %5818 = vmatpush.bf16.msra.mxu3 %v14574_v16  ;;  %v14746_v33 = vor.u32 %v18507_v39, %v14743_v28  ;;  %v18503_v16 = vld [vmem:[%s27866_s3 + $0x127c] sm:$0xf]  ;;  %v14695_v28 = vld [vmem:[%s27866_s3 + $0x1248] sm:$0xf0] }
 0x30e   :  { %5891 = vmatpush.bf16.msrb.mxu0 %v14666_v34  ;;  %5844 = vmatpush.bf16.msra.mxu2 %v14578_v29  ;;  %v18505_v34 = vld [vmem:[%s27866_s3 + $0x1284] sm:$0xf0]  ;;  %v14849_v29 = vld [vmem:[%s27866_s3 + $0x15d0] sm:$0x33]  ;;  %v14730_v40 = vor.u32 %v18503_v16, %v14727_v37  ;;  %v18495_v39 = vld [vmem:[%s27866_s3 + $0x123c] sm:$0xf] }
 0x30f   :  { %v14726_v36 = vor.u32 %v18505_v34, %v14725_v17  ;;  %v6172_v1 = vunpack.c.l.b16 %v14849_v29  ;;  %v6173_v7 = vunpack.c.h.b16 %v14849_v29  ;;  %v4623_v4 = vpop.f32.mrf.mxu3  ;;  %v14694_v34 = vor.u32 %v18497_v63, %v14693_v60  ;;  %v18600_v63 = vld [vmem:[%s27866_s3 + $0x159c] sm:$0xf0] }
 0x310   :  { %v14698_v20 = vor.u32 %v18495_v39, %v14695_v28  ;;  %v15015_v39 = vld [vmem:[%s27866_s3 + $0x15a0] sm:$0xf0] }
 0x311   :  { %5866 = vmatpush.bf16.msrb.mxu1 %v14646_v45  ;;  %5819 = vmatpush.bf16.msra.mxu3 %v14558_v48  ;;  %v14709_v45 = vld [vmem:[%s27866_s3 + $0x1258] sm:$0xf]  ;;  %v18467_v48 = vld [vmem:[%s27866_s3 + $0x115c] sm:$0xf]  ;;  %v6224_v41 = vpack.c.b16 %v6172_v1, %v6172_v1  ;;  %v4612_v15 = vpop.f32.mrf.mxu1  ;;  %v6225_v42 = vpack.c.b16 %v6173_v7, %v6173_v7  ;;  %v18578_v7 = vld [vmem:[%s27866_s3 + $0x14f4] sm:$0xf] }
 0x312   :  { %5892 = vmatpush.bf16.msrb.mxu0 %v14650_v46  ;;  %5845 = vmatpush.bf16.msra.mxu2 %v14562_v3  ;;  %v18499_v46 = vld [vmem:[%s27866_s3 + $0x125c] sm:$0xf]  ;;  %v14710_v55 = vor.u32 %v18501_v13, %v14709_v45  ;;  %v14565_v3 = vld [vmem:[%s27866_s3 + $0x1138] sm:$0xf]  ;;  %v18584_v45 = vld [vmem:[%s27866_s3 + $0x151c] sm:$0xf0] }
 0x313   :  { %v18604_v13 = vld [vmem:[%s27866_s3 + $0x15bc] sm:$0xf0] }
 0x314   :  { %5820 = vmatmul.bf16.vlgmr.msra.gmra.mxu3 %v21701_v35  ;;  %v4638_v37 = vpop.f32.mrf.mxu0 }
 0x315   :  { %5880 = vmatpush.bf16.msrb.mxu3 %v5807_v5  ;;  %5867 = vmatpush.bf16.msrb.mxu1 %v14630_v51  ;;  %v14582_v5 = vor.u32 %v18469_v25, %v14581_v50  ;;  %v18465_v51 = vld [vmem:[%s27866_s3 + $0x1144] sm:$0xf0]  ;;  %v6280_v25 = vsel %vm1177_vm3, %v6225_v42, 0 }
 0x316   :  { %5906 = vmatpush.bf16.msrb.mxu2 %v5810_v52  ;;  %5893 = vmatpush.bf16.msrb.mxu0 %v14634_v61  ;;  %v14714_v52 = vor.u32 %v18499_v46, %v14711_v47  ;;  %v14586_v61 = vor.u32 %v18467_v48, %v14583_v54  ;;  %v14566_v17 = vor.u32 %v18465_v51, %v14565_v3  ;;  %v18602_v46 = vld [vmem:[%s27866_s3 + $0x15b4] sm:$0xf]  ;;  %v15031_v47 = vld [vmem:[%s27866_s3 + $0x15c0] sm:$0xf0]  ;;  %v14933_v3 = vld [vmem:[%s27866_s3 + $0x14f0] sm:$0xf] }
 0x317   :  { %5846 = vmatmul.bf16.vlgmr.msra.gmra.mxu2 %v21701_v35  ;;  %v4625_v48 = vpop.f32.mrf.mxu3  ;;  %v15034_v60 = vor.u32 %v18602_v46, %v15031_v47 }
 0x318   :  { %v14975_v48 = vld [vmem:[%s27866_s3 + $0x1548] sm:$0xf0] }
 0x319   :  { %5881 = vmatpush.bf16.msrb.mxu3 %v14742_v19  ;;  %5868 = vmatpush.bf16.msrb.mxu1 %v14614_v12  ;;  %v14965_v19 = vld [vmem:[%s27866_s3 + $0x1530] sm:$0xf]  ;;  %v4624_v12 = vadd.f32 %v4623_v4, %v4610_v22  ;;  %v14570_v22 = vor.u32 %v18463_v59, %v14567_v6  ;;  %v18598_v59 = vld [vmem:[%s27866_s3 + $0x1594] sm:$0xf] }
 0x31a   :  { %5907 = vmatpush.bf16.msrb.mxu2 %v14746_v33  ;;  %5894 = vmatpush.bf16.msrb.mxu0 %v14618_v44  ;;  %v4649_v33 = vpop.f32.mrf.mxu2  ;;  %v18586_v44 = vld [vmem:[%s27866_s3 + $0x1534] sm:$0xf]  ;;  %v15018_v15 = vor.u32 %v18598_v59, %v15015_v39  ;;  %v14957_v39 = vld [vmem:[%s27866_s3 + $0x1518] sm:$0xf] }
 0x31b   :  { %v4650_v16 = vadd.f32 %v4649_v33, %v4636_v38  ;;  %v23757_v29 = vadd.f32 %v4624_v12, %v23424_v8  ;;  %v14970_v50 = vor.u32 %v18586_v44, %v14967_v24  ;;  %v14949_v38 = vld [vmem:[%s27866_s3 + $0x1510] sm:$0xf]  ;;  %v18576_v12 = vld [vmem:[%s27866_s3 + $0x14dc] sm:$0xf0]  ;;  %v14919_v44 = vld [vmem:[%s27866_s3 + $0x14e0] sm:$0xf0] }
 0x31c   :  { %v15029_v8 = vld [vmem:[%s27866_s3 + $0x15b0] sm:$0xf]  ;;  %v14950_v1 = vor.u32 %v18584_v45, %v14949_v38  ;;  %v18594_v24 = vld [vmem:[%s27866_s3 + $0x1574] sm:$0xf] }
 0x31d   :  { %5882 = vmatpush.bf16.msrb.mxu3 %v14726_v36  ;;  %5869 = vmatpush.bf16.msrb.mxu1 %v14598_v56  ;;  %v14966_v36 = vor.u32 %v18588_v18, %v14965_v19  ;;  %v6277_v56 = vsel %vm1177_vm3, %v6224_v41, 0  ;;  %v15030_v54 = vor.u32 %v18604_v13, %v15029_v8  ;;  %v23818_v28 = vpop.f32.mrf.mxu1  ;;  %v14917_v18 = vld [vmem:[%s27866_s3 + $0x14d0] sm:$0xf]  ;;  %v18570_v45 = vld [vmem:[%s27866_s3 + $0x14b4] sm:$0xf] }
 0x31e   :  { %5908 = vmatpush.bf16.msrb.mxu2 %v14730_v40  ;;  %5895 = vmatpush.bf16.msrb.mxu0 %v14602_v43  ;;  %v23761_v40 = vadd.f32 %v4650_v16, %v23432_v21  ;;  %v18582_v21 = vld [vmem:[%s27866_s3 + $0x1514] sm:$0xf]  ;;  %v14951_v43 = vld [vmem:[%s27866_s3 + $0x1520] sm:$0xf0]  ;;  %v14997_v33 = vld [vmem:[%s27866_s3 + $0x1570] sm:$0xf]  ;;  %v14918_v37 = vor.u32 %v18576_v12, %v14917_v18 }
 0x31f   :  { %v14999_v16 = vld [vmem:[%s27866_s3 + $0x1580] sm:$0xf0]  ;;  %v18590_v13 = vld [vmem:[%s27866_s3 + $0x1554] sm:$0xf]  ;;  %v14959_v18 = vld [vmem:[%s27866_s3 + $0x1528] sm:$0xf0] }
 0x320   :  { %v23820_v4 = vpop.f32.mrf.mxu0  ;;  %v15002_v38 = vor.u32 %v18594_v24, %v14999_v16  ;;  %v14903_v8 = vld [vmem:[%s27866_s3 + $0x14c0] sm:$0xf0]  ;;  %v18562_v24 = vld [vmem:[%s27866_s3 + $0x1474] sm:$0xf] }
 0x321   :  { %5883 = vmatpush.bf16.msrb.mxu3 %v14710_v55  ;;  %5870 = vmatpush.bf16.msrb.mxu1 %v14582_v5  ;;  %v14954_v55 = vor.u32 %v18582_v21, %v14951_v43  ;;  %v18580_v5 = vld [vmem:[%s27866_s3 + $0x14fc] sm:$0xf0]  ;;  %v14983_v21 = vld [vmem:[%s27866_s3 + $0x1560] sm:$0xf0]  ;;  %v14973_v43 = vld [vmem:[%s27866_s3 + $0x1538] sm:$0xf] }
 0x322   :  { %5909 = vmatpush.bf16.msrb.mxu2 %v14714_v52  ;;  %5896 = vmatpush.bf16.msrb.mxu0 %v14586_v61  ;;  %v15013_v52 = vld [vmem:[%s27866_s3 + $0x1590] sm:$0xf]  ;;  %v4651_v51 = vpop.f32.mrf.mxu2  ;;  %v14935_v61 = vld [vmem:[%s27866_s3 + $0x1500] sm:$0xf0]  ;;  %v14934_v41 = vor.u32 %v18580_v5, %v14933_v3  ;;  %v14906_v3 = vor.u32 %v18570_v45, %v14903_v8  ;;  %v18560_v8 = vld [vmem:[%s27866_s3 + $0x145c] sm:$0xf0] }
 0x323   :  { %v15014_v6 = vor.u32 %v18600_v63, %v15013_v52  ;;  %v14938_v19 = vor.u32 %v18578_v7, %v14935_v61  ;;  %v14885_v5 = vld [vmem:[%s27866_s3 + $0x1490] sm:$0xf]  ;;  %v18568_v52 = vld [vmem:[%s27866_s3 + $0x149c] sm:$0xf0]  ;;  %v14986_v51 = vor.u32 %v18590_v13, %v14983_v21  ;;  %v18566_v63 = vld [vmem:[%s27866_s3 + $0x1494] sm:$0xf] }
 0x324   :  { %v14887_v7 = vld [vmem:[%s27866_s3 + $0x14a0] sm:$0xf0]  ;;  %v14850_v61 = vld [vmem:[%s27866_s3 + $0x15d8] sm:$0x33]  ;;  %v14853_v45 = vld [vmem:[%s27866_s3 + $0x1450] sm:$0xf] }
 0x325   :  { %5884 = vmatpush.bf16.msrb.mxu3 %v14694_v34  ;;  %5871 = vmatpush.bf16.msrb.mxu1 %v14566_v17  ;;  %v18596_v17 = vld [vmem:[%s27866_s3 + $0x157c] sm:$0xf0]  ;;  %v18574_v34 = vld [vmem:[%s27866_s3 + $0x14d4] sm:$0xf]  ;;  %v4994_v46 = vpop.f32.mrf.mxu1  ;;  %v14890_v12 = vor.u32 %v18566_v63, %v14887_v7  ;;  %v14871_v16 = vld [vmem:[%s27866_s3 + $0x1480] sm:$0xf0] }
 0x326   :  { %5910 = vmatpush.bf16.msrb.mxu2 %v14698_v20  ;;  %5897 = vmatpush.bf16.msrb.mxu0 %v14570_v22  ;;  %v14901_v20 = vld [vmem:[%s27866_s3 + $0x14b0] sm:$0xf]  ;;  %v14998_v42 = vor.u32 %v18596_v17, %v14997_v33  ;;  %v14922_v22 = vor.u32 %v18574_v34, %v14919_v44  ;;  %v6174_v17 = vunpack.c.l.b16 %v14850_v61  ;;  %v6175_v34 = vunpack.c.h.b16 %v14850_v61  ;;  %v14909_v61 = vld [vmem:[%s27866_s3 + $0x14b8] sm:$0xf] }
 0x327   :  { %v14869_v33 = vld [vmem:[%s27866_s3 + $0x1470] sm:$0xf] }
 0x328   :  { %5872 = vmatmul.bf16.vlgmr.msrb.gmra.mxu1 %v21701_v35  ;;  %14749 = vmatmul.msk.bf16.vlgmr.msrb.gmra.mxu3 %vm1173_vm5, %v21617_v14  ;;  %v6226_v13 = vpack.c.b16 %v6174_v17, %v6174_v17  ;;  %v6227_v21 = vpack.c.b16 %v6175_v34, %v6175_v34 }
 0x329   :  { %6288 = vmatpush.bf16.msra.mxu3 %v14966_v36  ;;  %6304 = vmatpush.bf16.msra.mxu1 %v6277_v56  ;;  %v18572_v36 = vld [vmem:[%s27866_s3 + $0x14bc] sm:$0xf0]  ;;  %v14981_v56 = vld [vmem:[%s27866_s3 + $0x1550] sm:$0xf] }
 0x32a   :  { %6314 = vmatpush.bf16.msra.mxu2 %v14970_v50  ;;  %6330 = vmatpush.bf16.msra.mxu0 %v6280_v25  ;;  %v18592_v50 = vld [vmem:[%s27866_s3 + $0x155c] sm:$0xf0]  ;;  %v18589_v25 = vld [vmem:[%s27866_s3 + $0x1544] sm:$0xf0]  ;;  %v14902_v47 = vor.u32 %v18572_v36, %v14901_v20  ;;  %v14941_v20 = vld [vmem:[%s27866_s3 + $0x14f8] sm:$0xf] }
 0x32b   :  { %5898 = vmatmul.bf16.vlgmr.msrb.gmra.mxu0 %v21701_v35  ;;  %14750 = vmatmul.msk.bf16.vlgmr.msrb.gmra.mxu2 %vm1173_vm5, %v21617_v14  ;;  %v18579_v36 = vld [vmem:[%s27866_s3 + $0x14fc] sm:$0xf]  ;;  %v6283_v63 = vsel %vm1177_vm3, %v6226_v13, 0 }
 0x32d   :  { %6289 = vmatpush.bf16.msra.mxu3 %v14950_v1  ;;  %6305 = vmatpush.bf16.msra.mxu1 %v15030_v54  ;;  %v18587_v1 = vld [vmem:[%s27866_s3 + $0x153c] sm:$0xf]  ;;  %v5020_v54 = vpop.f32.mrf.mxu0 }
 0x32e   :  { %6315 = vmatpush.bf16.msra.mxu2 %v14954_v55  ;;  %6331 = vmatpush.bf16.msra.mxu0 %v15034_v60  ;;  %v14982_v55 = vor.u32 %v18592_v50, %v14981_v56  ;;  %v14974_v60 = vor.u32 %v18589_v25, %v14973_v43  ;;  %v14978_v59 = vor.u32 %v18587_v1, %v14975_v48  ;;  %v14943_v56 = vld [vmem:[%s27866_s3 + $0x1508] sm:$0xf0]  ;;  %v14855_v1 = vld [vmem:[%s27866_s3 + $0x1460] sm:$0xf0] }
 0x32f   :  { %v4979_v50 = vpop.f32.mrf.mxu3  ;;  %v14946_v54 = vor.u32 %v18579_v36, %v14943_v56  ;;  %v15023_v36 = vld [vmem:[%s27866_s3 + $0x15a8] sm:$0xf0]  ;;  %v18567_v56 = vld [vmem:[%s27866_s3 + $0x149c] sm:$0xf] }
 0x330   :  { %v4993_v43 = vadd.f32 %v23818_v28, %v4979_v50  ;;  %v18577_v28 = vld [vmem:[%s27866_s3 + $0x14e4] sm:$0xf0]  ;;  %v14895_v50 = vld [vmem:[%s27866_s3 + $0x14a8] sm:$0xf0] }
 0x331   :  { %6290 = vmatpush.bf16.msra.mxu3 %v14934_v41  ;;  %6306 = vmatpush.bf16.msra.mxu1 %v15014_v6  ;;  %v18585_v41 = vld [vmem:[%s27866_s3 + $0x1524] sm:$0xf0]  ;;  %v14886_v6 = vor.u32 %v18568_v52, %v14885_v5  ;;  %v14854_v5 = vor.u32 %v18560_v8, %v14853_v45  ;;  %v18575_v52 = vld [vmem:[%s27866_s3 + $0x14dc] sm:$0xf] }
 0x332   :  { %6316 = vmatpush.bf16.msra.mxu2 %v14938_v19  ;;  %6332 = vmatpush.bf16.msra.mxu0 %v15018_v15  ;;  %v18583_v19 = vld [vmem:[%s27866_s3 + $0x151c] sm:$0xf]  ;;  %v18564_v15 = vld [vmem:[%s27866_s3 + $0x147c] sm:$0xf0]  ;;  %v14958_v44 = vor.u32 %v18585_v41, %v14957_v39  ;;  %v5005_v25 = vpop.f32.mrf.mxu2  ;;  %v18573_v41 = vld [vmem:[%s27866_s3 + $0x14c4] sm:$0xf0] }
 0x333   :  { %v5019_v48 = vadd.f32 %v23820_v4, %v5005_v25  ;;  %v14927_v4 = vld [vmem:[%s27866_s3 + $0x14e8] sm:$0xf0]  ;;  %v14910_v34 = vor.u32 %v18573_v41, %v14909_v61  ;;  %v14877_v25 = vld [vmem:[%s27866_s3 + $0x1478] sm:$0xf]  ;;  %v18559_v41 = vld [vmem:[%s27866_s3 + $0x145c] sm:$0xf] }
 0x334   :  { %v14930_v39 = vor.u32 %v18575_v52, %v14927_v4  ;;  %v14879_v52 = vld [vmem:[%s27866_s3 + $0x1488] sm:$0xf0]  ;;  %v14989_v61 = vld [vmem:[%s27866_s3 + $0x1558] sm:$0xf] }
 0x335   :  { %6291 = vmatpush.bf16.msra.mxu3 %v14918_v37  ;;  %6307 = vmatpush.bf16.msra.mxu1 %v14998_v42  ;;  %v14962_v37 = vor.u32 %v18583_v19, %v14959_v18  ;;  %v18581_v42 = vld [vmem:[%s27866_s3 + $0x1504] sm:$0xf0]  ;;  %v15039_v19 = vld [vmem:[%s27866_s3 + $0x15c8] sm:$0xf0]  ;;  %v18571_v18 = vld [vmem:[%s27866_s3 + $0x14bc] sm:$0xf] }
 0x336   :  { %6317 = vmatpush.bf16.msra.mxu2 %v14922_v22  ;;  %6333 = vmatpush.bf16.msra.mxu0 %v15002_v38  ;;  %v14870_v22 = vor.u32 %v18564_v15, %v14869_v33  ;;  %v14874_v38 = vor.u32 %v18562_v24, %v14871_v16  ;;  %v14942_v46 = vor.u32 %v18581_v42, %v14941_v20  ;;  %v14893_v24 = vld [vmem:[%s27866_s3 + $0x1498] sm:$0xf]  ;;  %v18569_v42 = vld [vmem:[%s27866_s3 + $0x14a4] sm:$0xf0] }
 0x337   :  { %v4981_v33 = vpop.f32.mrf.mxu3  ;;  %v15021_v16 = vld [vmem:[%s27866_s3 + $0x1598] sm:$0xf] }
 0x338   :  { %v14863_v33 = vld [vmem:[%s27866_s3 + $0x1468] sm:$0xf0] }
 0x339   :  { %6292 = vmatpush.bf16.msra.mxu3 %v14902_v47  ;;  %6308 = vmatpush.bf16.msra.mxu1 %v14982_v55  ;;  %v18558_v47 = vld [vmem:[%s27866_s3 + $0x1454] sm:$0xf]  ;;  %v14925_v55 = vld [vmem:[%s27866_s3 + $0x14d8] sm:$0xf] }
 0x33a   :  { %6318 = vmatpush.bf16.msra.mxu2 %v14906_v3  ;;  %6334 = vmatpush.bf16.msra.mxu0 %v14986_v51  ;;  %v23958_v3 = vadd.f32 %v4993_v43, %v23630_v23  ;;  %v23967_v51 = vadd.f32 %v5019_v48, %v23639_v49  ;;  %v6286_v23 = vsel %vm1177_vm3, %v6227_v21, 0  ;;  %v14926_v7 = vor.u32 %v18577_v28, %v14925_v55  ;;  %v18605_v49 = vld [vmem:[%s27866_s3 + $0x15c4] sm:$0xf0]  ;;  %v5007_v17 = vpop.f32.mrf.mxu2  ;;  %v15007_v55 = vld [vmem:[%s27866_s3 + $0x1588] sm:$0xf0] }
 0x33b   :  { %v14894_v21 = vor.u32 %v18569_v42, %v14893_v24  ;;  %v18565_v48 = vld [vmem:[%s27866_s3 + $0x1484] sm:$0xf0]  ;;  %v18540_v17 = vld [vmem:[%s27866_s3 + $0x13ac] sm:$0xf0]  ;;  %v15163_v42 = vld [vmem:[%s27866_s3 + $0x13b0] sm:$0xf0] }
 0x33c   :  { %15043 = vmatmul.msk.bf16.vlgmr.msra.gmra.mxu1 %vm1173_vm5, %v20136_v11 }
 0x33d   :  { %6340 = vmatpush.bf16.msrb.mxu1 %v14974_v60  ;;  %6293 = vmatpush.bf16.msra.mxu3 %v14886_v6  ;;  %v14858_v60 = vor.u32 %v18558_v47, %v14855_v1  ;;  %v18603_v6 = vld [vmem:[%s27866_s3 + $0x15bc] sm:$0xf]  ;;  %v5031_v45 = vpop.f32.mrf.mxu1  ;;  %v18597_v47 = vld [vmem:[%s27866_s3 + $0x1584] sm:$0xf0]  ;;  %v14898_v1 = vor.u32 %v18567_v56, %v14895_v50 }
 0x33e   :  { %6366 = vmatpush.bf16.msrb.mxu0 %v14978_v59  ;;  %6319 = vmatpush.bf16.msra.mxu2 %v14890_v12  ;;  %v15037_v59 = vld [vmem:[%s27866_s3 + $0x15b8] sm:$0xf]  ;;  %v14911_v12 = vld [vmem:[%s27866_s3 + $0x14c8] sm:$0xf0] }
 0x33f   :  { %15044 = vmatmul.msk.bf16.vlgmr.msra.gmra.mxu0 %vm1173_vm5, %v20136_v11  ;;  %v15038_v15 = vor.u32 %v18605_v49, %v15037_v59  ;;  %v14914_v20 = vor.u32 %v18571_v18, %v14911_v12  ;;  %v18593_v59 = vld [vmem:[%s27866_s3 + $0x1564] sm:$0xf0] }
 0x340   :  { %v5057_v13 = vpop.f32.mrf.mxu0 }
 0x341   :  { %6341 = vmatpush.bf16.msrb.mxu1 %v14958_v44  ;;  %6294 = vmatpush.bf16.msra.mxu3 %v14870_v22  ;;  %v15042_v44 = vor.u32 %v18603_v6, %v15039_v19  ;;  %v18599_v22 = vld [vmem:[%s27866_s3 + $0x159c] sm:$0xf]  ;;  %v14991_v19 = vld [vmem:[%s27866_s3 + $0x1568] sm:$0xf0] }
 0x342   :  { %6367 = vmatpush.bf16.msrb.mxu0 %v14962_v37  ;;  %6320 = vmatpush.bf16.msra.mxu2 %v14874_v38  ;;  %v18601_v37 = vld [vmem:[%s27866_s3 + $0x15a4] sm:$0xf0]  ;;  %v14799_v38 = vld [vmem:[%s27866_s3 + $0x1440] sm:$0x33]  ;;  %v15026_v43 = vor.u32 %v18599_v22, %v15023_v36  ;;  %v18591_v6 = vld [vmem:[%s27866_s3 + $0x155c] sm:$0xf] }
 0x343   :  { %v15022_v8 = vor.u32 %v18601_v37, %v15021_v16  ;;  %v6538_v28 = vunpack.c.l.b16 %v14799_v38  ;;  %v6539_v49 = vunpack.c.h.b16 %v14799_v38  ;;  %v5044_v12 = vpop.f32.mrf.mxu3  ;;  %v14990_v37 = vor.u32 %v18593_v59, %v14989_v61  ;;  %v18552_v59 = vld [vmem:[%s27866_s3 + $0x140c] sm:$0xf0] }
 0x344   :  { %v14994_v56 = vor.u32 %v18591_v6, %v14991_v19  ;;  %v15211_v6 = vld [vmem:[%s27866_s3 + $0x1410] sm:$0xf0] }
 0x345   :  { %6342 = vmatpush.bf16.msrb.mxu1 %v14942_v46  ;;  %6295 = vmatpush.bf16.msra.mxu3 %v14854_v5  ;;  %v15005_v46 = vld [vmem:[%s27866_s3 + $0x1578] sm:$0xf]  ;;  %v18563_v5 = vld [vmem:[%s27866_s3 + $0x147c] sm:$0xf]  ;;  %v6590_v18 = vpack.c.b16 %v6538_v28, %v6538_v28  ;;  %v5033_v24 = vpop.f32.mrf.mxu1  ;;  %v6591_v50 = vpack.c.b16 %v6539_v49, %v6539_v49  ;;  %v18530_v49 = vld [vmem:[%s27866_s3 + $0x1364] sm:$0xf] }
 0x346   :  { %6368 = vmatpush.bf16.msrb.mxu0 %v14946_v54  ;;  %6321 = vmatpush.bf16.msra.mxu2 %v14858_v60  ;;  %v18595_v54 = vld [vmem:[%s27866_s3 + $0x157c] sm:$0xf]  ;;  %v15006_v4 = vor.u32 %v18597_v47, %v15005_v46  ;;  %v14861_v60 = vld [vmem:[%s27866_s3 + $0x1458] sm:$0xf]  ;;  %v18536_v46 = vld [vmem:[%s27866_s3 + $0x138c] sm:$0xf0] }
 0x347   :  { %v18556_v47 = vld [vmem:[%s27866_s3 + $0x142c] sm:$0xf0] }
 0x348   :  { %6296 = vmatmul.bf16.vlgmr.msra.gmra.mxu3 %v20134_v9  ;;  %v5059_v36 = vpop.f32.mrf.mxu0 }
 0x349   :  { %6356 = vmatpush.bf16.msrb.mxu3 %v6283_v63  ;;  %6343 = vmatpush.bf16.msrb.mxu1 %v14926_v7  ;;  %v14878_v63 = vor.u32 %v18565_v48, %v14877_v25  ;;  %v18561_v7 = vld [vmem:[%s27866_s3 + $0x1464] sm:$0xf0]  ;;  %v6646_v48 = vsel %vm1177_vm3, %v6591_v50, 0 }
 0x34a   :  { %6382 = vmatpush.bf16.msrb.mxu2 %v6286_v23  ;;  %6369 = vmatpush.bf16.msrb.mxu0 %v14930_v39  ;;  %v15010_v23 = vor.u32 %v18595_v54, %v15007_v55  ;;  %v14882_v39 = vor.u32 %v18563_v5, %v14879_v52  ;;  %v14862_v16 = vor.u32 %v18561_v7, %v14861_v60  ;;  %v18554_v54 = vld [vmem:[%s27866_s3 + $0x1424] sm:$0xf]  ;;  %v15227_v55 = vld [vmem:[%s27866_s3 + $0x1430] sm:$0xf0]  ;;  %v15129_v60 = vld [vmem:[%s27866_s3 + $0x1360] sm:$0xf] }
 0x34b   :  { %6322 = vmatmul.bf16.vlgmr.msra.gmra.mxu2 %v20134_v9  ;;  %v5046_v5 = vpop.f32.mrf.mxu3  ;;  %v15230_v61 = vor.u32 %v18554_v54, %v15227_v55 }
 0x34c   :  { %v15171_v5 = vld [vmem:[%s27866_s3 + $0x13b8] sm:$0xf0] }
 0x34d   :  { %6357 = vmatpush.bf16.msrb.mxu3 %v15038_v15  ;;  %6344 = vmatpush.bf16.msrb.mxu1 %v14910_v34  ;;  %v15161_v15 = vld [vmem:[%s27866_s3 + $0x13a0] sm:$0xf]  ;;  %v5045_v34 = vadd.f32 %v5044_v12, %v5031_v45  ;;  %v14866_v45 = vor.u32 %v18559_v41, %v14863_v33  ;;  %v18550_v41 = vld [vmem:[%s27866_s3 + $0x1404] sm:$0xf] }
 0x34e   :  { %6383 = vmatpush.bf16.msrb.mxu2 %v15042_v44  ;;  %6370 = vmatpush.bf16.msrb.mxu0 %v14914_v20  ;;  %v5070_v44 = vpop.f32.mrf.mxu2  ;;  %v18538_v20 = vld [vmem:[%s27866_s3 + $0x13a4] sm:$0xf]  ;;  %v15214_v24 = vor.u32 %v18550_v41, %v15211_v6  ;;  %v15153_v6 = vld [vmem:[%s27866_s3 + $0x1388] sm:$0xf] }
 0x34f   :  { %v5071_v22 = vadd.f32 %v5070_v44, %v5057_v13  ;;  %v24085_v38 = vadd.f32 %v5045_v34, %v23757_v29  ;;  %v15166_v25 = vor.u32 %v18538_v20, %v15163_v42  ;;  %v15145_v13 = vld [vmem:[%s27866_s3 + $0x1380] sm:$0xf]  ;;  %v18528_v34 = vld [vmem:[%s27866_s3 + $0x134c] sm:$0xf0]  ;;  %v15115_v20 = vld [vmem:[%s27866_s3 + $0x1350] sm:$0xf0] }
 0x350   :  { %v15225_v29 = vld [vmem:[%s27866_s3 + $0x1420] sm:$0xf]  ;;  %v15146_v28 = vor.u32 %v18536_v46, %v15145_v13  ;;  %v18546_v42 = vld [vmem:[%s27866_s3 + $0x13e4] sm:$0xf] }
 0x351   :  { %6358 = vmatpush.bf16.msrb.mxu3 %v15022_v8  ;;  %6345 = vmatpush.bf16.msrb.mxu1 %v14894_v21  ;;  %v15162_v8 = vor.u32 %v18540_v17, %v15161_v15  ;;  %v6643_v21 = vsel %vm1177_vm3, %v6590_v18, 0  ;;  %v15226_v52 = vor.u32 %v18556_v47, %v15225_v29  ;;  %v24146_v19 = vpop.f32.mrf.mxu1  ;;  %v15113_v17 = vld [vmem:[%s27866_s3 + $0x1340] sm:$0xf]  ;;  %v18522_v46 = vld [vmem:[%s27866_s3 + $0x1324] sm:$0xf] }
 0x352   :  { %6384 = vmatpush.bf16.msrb.mxu2 %v15026_v43  ;;  %6371 = vmatpush.bf16.msrb.mxu0 %v14898_v1  ;;  %v24089_v43 = vadd.f32 %v5071_v22, %v23761_v40  ;;  %v18534_v40 = vld [vmem:[%s27866_s3 + $0x1384] sm:$0xf]  ;;  %v15147_v1 = vld [vmem:[%s27866_s3 + $0x1390] sm:$0xf0]  ;;  %v15193_v44 = vld [vmem:[%s27866_s3 + $0x13e0] sm:$0xf]  ;;  %v15114_v36 = vor.u32 %v18528_v34, %v15113_v17 }
 0x353   :  { %v15195_v22 = vld [vmem:[%s27866_s3 + $0x13f0] sm:$0xf0]  ;;  %v18542_v47 = vld [vmem:[%s27866_s3 + $0x13c4] sm:$0xf]  ;;  %v15155_v17 = vld [vmem:[%s27866_s3 + $0x1398] sm:$0xf0] }
 0x354   :  { %v24148_v12 = vpop.f32.mrf.mxu0  ;;  %v15198_v13 = vor.u32 %v18546_v42, %v15195_v22  ;;  %v15099_v29 = vld [vmem:[%s27866_s3 + $0x1330] sm:$0xf0]  ;;  %v18514_v42 = vld [vmem:[%s27866_s3 + $0x12e4] sm:$0xf] }
 0x355   :  { %6359 = vmatpush.bf16.msrb.mxu3 %v15006_v4  ;;  %6346 = vmatpush.bf16.msrb.mxu1 %v14878_v63  ;;  %v15150_v4 = vor.u32 %v18534_v40, %v15147_v1  ;;  %v18532_v63 = vld [vmem:[%s27866_s3 + $0x136c] sm:$0xf0]  ;;  %v15179_v40 = vld [vmem:[%s27866_s3 + $0x13d0] sm:$0xf0]  ;;  %v15169_v1 = vld [vmem:[%s27866_s3 + $0x13a8] sm:$0xf] }
 0x356   :  { %6385 = vmatpush.bf16.msrb.mxu2 %v15010_v23  ;;  %6372 = vmatpush.bf16.msrb.mxu0 %v14882_v39  ;;  %v15209_v23 = vld [vmem:[%s27866_s3 + $0x1400] sm:$0xf]  ;;  %v5072_v7 = vpop.f32.mrf.mxu2  ;;  %v15131_v39 = vld [vmem:[%s27866_s3 + $0x1370] sm:$0xf0]  ;;  %v15130_v18 = vor.u32 %v18532_v63, %v15129_v60  ;;  %v15102_v60 = vor.u32 %v18522_v46, %v15099_v29  ;;  %v18512_v29 = vld [vmem:[%s27866_s3 + $0x12cc] sm:$0xf0] }
 0x357   :  { %v15210_v33 = vor.u32 %v18552_v59, %v15209_v23  ;;  %v15134_v15 = vor.u32 %v18530_v49, %v15131_v39  ;;  %v15081_v63 = vld [vmem:[%s27866_s3 + $0x1300] sm:$0xf]  ;;  %v18520_v23 = vld [vmem:[%s27866_s3 + $0x130c] sm:$0xf0]  ;;  %v15182_v7 = vor.u32 %v18542_v47, %v15179_v40  ;;  %v18518_v59 = vld [vmem:[%s27866_s3 + $0x1304] sm:$0xf] }
 0x358   :  { %v15083_v49 = vld [vmem:[%s27866_s3 + $0x1310] sm:$0xf0]  ;;  %v14800_v39 = vld [vmem:[%s27866_s3 + $0x1448] sm:$0x33]  ;;  %v15049_v46 = vld [vmem:[%s27866_s3 + $0x12c0] sm:$0xf] }
 0x359   :  { %6360 = vmatpush.bf16.msrb.mxu3 %v14990_v37  ;;  %6347 = vmatpush.bf16.msrb.mxu1 %v14862_v16  ;;  %v18548_v16 = vld [vmem:[%s27866_s3 + $0x13ec] sm:$0xf0]  ;;  %v18526_v37 = vld [vmem:[%s27866_s3 + $0x1344] sm:$0xf]  ;;  %v5415_v54 = vpop.f32.mrf.mxu1  ;;  %v15086_v34 = vor.u32 %v18518_v59, %v15083_v49  ;;  %v15067_v22 = vld [vmem:[%s27866_s3 + $0x12f0] sm:$0xf0] }
 0x35a   :  { %6386 = vmatpush.bf16.msrb.mxu2 %v14994_v56  ;;  %6373 = vmatpush.bf16.msrb.mxu0 %v14866_v45  ;;  %v15097_v56 = vld [vmem:[%s27866_s3 + $0x1320] sm:$0xf]  ;;  %v15194_v50 = vor.u32 %v18548_v16, %v15193_v44  ;;  %v15118_v45 = vor.u32 %v18526_v37, %v15115_v20  ;;  %v6540_v16 = vunpack.c.l.b16 %v14800_v39  ;;  %v6541_v37 = vunpack.c.h.b16 %v14800_v39  ;;  %v15105_v39 = vld [vmem:[%s27866_s3 + $0x1328] sm:$0xf] }
 0x35b   :  { %v15065_v44 = vld [vmem:[%s27866_s3 + $0x12e0] sm:$0xf] }
 0x35c   :  { %6348 = vmatmul.bf16.vlgmr.msrb.gmra.mxu1 %v20134_v9  ;;  %15045 = vmatmul.msk.bf16.vlgmr.msrb.gmra.mxu3 %vm1173_vm5, %v20136_v11  ;;  %v6592_v47 = vpack.c.b16 %v6540_v16, %v6540_v16  ;;  %v6593_v40 = vpack.c.b16 %v6541_v37, %v6541_v37 }
 0x35d   :  { %6654 = vmatpush.bf16.msra.mxu3 %v15162_v8  ;;  %6670 = vmatpush.bf16.msra.mxu1 %v6643_v21  ;;  %v18524_v8 = vld [vmem:[%s27866_s3 + $0x132c] sm:$0xf0]  ;;  %v15177_v21 = vld [vmem:[%s27866_s3 + $0x13c0] sm:$0xf] }
 0x35e   :  { %6680 = vmatpush.bf16.msra.mxu2 %v15166_v25  ;;  %6696 = vmatpush.bf16.msra.mxu0 %v6646_v48  ;;  %v18544_v25 = vld [vmem:[%s27866_s3 + $0x13cc] sm:$0xf0]  ;;  %v18541_v48 = vld [vmem:[%s27866_s3 + $0x13b4] sm:$0xf0]  ;;  %v15098_v55 = vor.u32 %v18524_v8, %v15097_v56  ;;  %v15137_v56 = vld [vmem:[%s27866_s3 + $0x1368] sm:$0xf] }
 0x35f   :  { %6374 = vmatmul.bf16.vlgmr.msrb.gmra.mxu0 %v20134_v9  ;;  %15046 = vmatmul.msk.bf16.vlgmr.msrb.gmra.mxu2 %vm1173_vm5, %v20136_v11  ;;  %v18531_v8 = vld [vmem:[%s27866_s3 + $0x136c] sm:$0xf]  ;;  %v6649_v59 = vsel %vm1177_vm3, %v6592_v47, 0 }
 0x361   :  { %6655 = vmatpush.bf16.msra.mxu3 %v15146_v28  ;;  %6671 = vmatpush.bf16.msra.mxu1 %v15226_v52  ;;  %v18539_v28 = vld [vmem:[%s27866_s3 + $0x13ac] sm:$0xf]  ;;  %v5441_v52 = vpop.f32.mrf.mxu0 }
 0x362   :  { %6681 = vmatpush.bf16.msra.mxu2 %v15150_v4  ;;  %6697 = vmatpush.bf16.msra.mxu0 %v15230_v61  ;;  %v15178_v4 = vor.u32 %v18544_v25, %v15177_v21  ;;  %v15170_v61 = vor.u32 %v18541_v48, %v15169_v1  ;;  %v15174_v41 = vor.u32 %v18539_v28, %v15171_v5  ;;  %v15139_v21 = vld [vmem:[%s27866_s3 + $0x1378] sm:$0xf0]  ;;  %v15051_v28 = vld [vmem:[%s27866_s3 + $0x12d0] sm:$0xf0] }
 0x363   :  { %v5400_v25 = vpop.f32.mrf.mxu3  ;;  %v15142_v52 = vor.u32 %v18531_v8, %v15139_v21  ;;  %v15219_v8 = vld [vmem:[%s27866_s3 + $0x1418] sm:$0xf0]  ;;  %v18519_v21 = vld [vmem:[%s27866_s3 + $0x130c] sm:$0xf] }
 0x364   :  { %v5414_v1 = vadd.f32 %v24146_v19, %v5400_v25  ;;  %v18529_v19 = vld [vmem:[%s27866_s3 + $0x1354] sm:$0xf0]  ;;  %v15091_v25 = vld [vmem:[%s27866_s3 + $0x1318] sm:$0xf0] }
 0x365   :  { %6656 = vmatpush.bf16.msra.mxu3 %v15130_v18  ;;  %6672 = vmatpush.bf16.msra.mxu1 %v15210_v33  ;;  %v18537_v18 = vld [vmem:[%s27866_s3 + $0x1394] sm:$0xf0]  ;;  %v15082_v33 = vor.u32 %v18520_v23, %v15081_v63  ;;  %v15050_v63 = vor.u32 %v18512_v29, %v15049_v46  ;;  %v18527_v23 = vld [vmem:[%s27866_s3 + $0x134c] sm:$0xf] }
 0x366   :  { %6682 = vmatpush.bf16.msra.mxu2 %v15134_v15  ;;  %6698 = vmatpush.bf16.msra.mxu0 %v15214_v24  ;;  %v18535_v15 = vld [vmem:[%s27866_s3 + $0x138c] sm:$0xf]  ;;  %v18516_v24 = vld [vmem:[%s27866_s3 + $0x12ec] sm:$0xf0]  ;;  %v15154_v20 = vor.u32 %v18537_v18, %v15153_v6  ;;  %v5426_v48 = vpop.f32.mrf.mxu2  ;;  %v18525_v18 = vld [vmem:[%s27866_s3 + $0x1334] sm:$0xf0] }
 0x367   :  { %v5440_v5 = vadd.f32 %v24148_v12, %v5426_v48  ;;  %v15123_v12 = vld [vmem:[%s27866_s3 + $0x1358] sm:$0xf0]  ;;  %v15106_v37 = vor.u32 %v18525_v18, %v15105_v39  ;;  %v15073_v48 = vld [vmem:[%s27866_s3 + $0x12e8] sm:$0xf]  ;;  %v18511_v18 = vld [vmem:[%s27866_s3 + $0x12cc] sm:$0xf] }
 0x368   :  { %v15126_v6 = vor.u32 %v18527_v23, %v15123_v12  ;;  %v15075_v23 = vld [vmem:[%s27866_s3 + $0x12f8] sm:$0xf0]  ;;  %v15185_v39 = vld [vmem:[%s27866_s3 + $0x13c8] sm:$0xf] }
 0x369   :  { %6657 = vmatpush.bf16.msra.mxu3 %v15114_v36  ;;  %6673 = vmatpush.bf16.msra.mxu1 %v15194_v50  ;;  %v15158_v36 = vor.u32 %v18535_v15, %v15155_v17  ;;  %v18533_v50 = vld [vmem:[%s27866_s3 + $0x1374] sm:$0xf0]  ;;  %v15235_v15 = vld [vmem:[%s27866_s3 + $0x1438] sm:$0xf0]  ;;  %v18523_v17 = vld [vmem:[%s27866_s3 + $0x132c] sm:$0xf] }
 0x36a   :  { %6683 = vmatpush.bf16.msra.mxu2 %v15118_v45  ;;  %6699 = vmatpush.bf16.msra.mxu0 %v15198_v13  ;;  %v15066_v45 = vor.u32 %v18516_v24, %v15065_v44  ;;  %v15070_v13 = vor.u32 %v18514_v42, %v15067_v22  ;;  %v15138_v54 = vor.u32 %v18533_v50, %v15137_v56  ;;  %v15089_v42 = vld [vmem:[%s27866_s3 + $0x1308] sm:$0xf]  ;;  %v18521_v50 = vld [vmem:[%s27866_s3 + $0x1314] sm:$0xf0] }
 0x36b   :  { %v5402_v44 = vpop.f32.mrf.mxu3  ;;  %v15217_v22 = vld [vmem:[%s27866_s3 + $0x1408] sm:$0xf] }
 0x36c   :  { %v15059_v44 = vld [vmem:[%s27866_s3 + $0x12d8] sm:$0xf0] }
 0x36d   :  { %6658 = vmatpush.bf16.msra.mxu3 %v15098_v55  ;;  %6674 = vmatpush.bf16.msra.mxu1 %v15178_v4  ;;  %v18510_v55 = vld [vmem:[%s27866_s3 + $0x12c4] sm:$0xf]  ;;  %v15121_v4 = vld [vmem:[%s27866_s3 + $0x1348] sm:$0xf] }
 0x36e   :  { %6684 = vmatpush.bf16.msra.mxu2 %v15102_v60  ;;  %6700 = vmatpush.bf16.msra.mxu0 %v15182_v7  ;;  %v24286_v60 = vadd.f32 %v5414_v1, %v23958_v3  ;;  %v24295_v7 = vadd.f32 %v5440_v5, %v23967_v51  ;;  %v6652_v3 = vsel %vm1177_vm3, %v6593_v40, 0  ;;  %v15122_v49 = vor.u32 %v18529_v19, %v15121_v4  ;;  %v18557_v51 = vld [vmem:[%s27866_s3 + $0x1434] sm:$0xf0]  ;;  %v5428_v16 = vpop.f32.mrf.mxu2  ;;  %v15203_v4 = vld [vmem:[%s27866_s3 + $0x13f8] sm:$0xf0] }
 0x36f   :  { %v15090_v40 = vor.u32 %v18521_v50, %v15089_v42  ;;  %v18517_v5 = vld [vmem:[%s27866_s3 + $0x12f4] sm:$0xf0]  ;;  %v18636_v16 = vld [vmem:[%s27866_s3 + $0x16cc] sm:$0xf0]  ;;  %v15409_v50 = vld [vmem:[%s27866_s3 + $0x16d0] sm:$0xf0] }
 0x370   :  { %15239 = vmatmul.msk.bf16.vlgmr.msra.gmra.mxu1 %vm1173_vm5, %v20393_v30 }
 0x371   :  { %6706 = vmatpush.bf16.msrb.mxu1 %v15170_v61  ;;  %6659 = vmatpush.bf16.msra.mxu3 %v15082_v33  ;;  %v15054_v61 = vor.u32 %v18510_v55, %v15051_v28  ;;  %v18555_v33 = vld [vmem:[%s27866_s3 + $0x142c] sm:$0xf]  ;;  %v5452_v46 = vpop.f32.mrf.mxu1  ;;  %v18549_v55 = vld [vmem:[%s27866_s3 + $0x13f4] sm:$0xf0]  ;;  %v15094_v28 = vor.u32 %v18519_v21, %v15091_v25 }
 0x372   :  { %6732 = vmatpush.bf16.msrb.mxu0 %v15174_v41  ;;  %6685 = vmatpush.bf16.msra.mxu2 %v15086_v34  ;;  %v15233_v41 = vld [vmem:[%s27866_s3 + $0x1428] sm:$0xf]  ;;  %v15107_v34 = vld [vmem:[%s27866_s3 + $0x1338] sm:$0xf0] }
 0x373   :  { %15240 = vmatmul.msk.bf16.vlgmr.msra.gmra.mxu0 %vm1173_vm5, %v20393_v30  ;;  %v15234_v24 = vor.u32 %v18557_v51, %v15233_v41  ;;  %v15110_v56 = vor.u32 %v18523_v17, %v15107_v34  ;;  %v18545_v41 = vld [vmem:[%s27866_s3 + $0x13d4] sm:$0xf0] }
 0x374   :  { %v5478_v47 = vpop.f32.mrf.mxu0 }
 0x375   :  { %6707 = vmatpush.bf16.msrb.mxu1 %v15154_v20  ;;  %6660 = vmatpush.bf16.msra.mxu3 %v15066_v45  ;;  %v15238_v20 = vor.u32 %v18555_v33, %v15235_v15  ;;  %v18551_v45 = vld [vmem:[%s27866_s3 + $0x140c] sm:$0xf]  ;;  %v15187_v15 = vld [vmem:[%s27866_s3 + $0x13d8] sm:$0xf0] }
 0x376   :  { %6733 = vmatpush.bf16.msrb.mxu0 %v15158_v36  ;;  %6686 = vmatpush.bf16.msra.mxu2 %v15070_v13  ;;  %v18553_v36 = vld [vmem:[%s27866_s3 + $0x1414] sm:$0xf0]  ;;  %v15291_v13 = vld [vmem:[%s27866_s3 + $0x1760] sm:$0x33]  ;;  %v15222_v1 = vor.u32 %v18551_v45, %v15219_v8  ;;  %v18543_v33 = vld [vmem:[%s27866_s3 + $0x13cc] sm:$0xf] }
 0x377   :  { %v15218_v29 = vor.u32 %v18553_v36, %v15217_v22  ;;  %v6955_v19 = vunpack.c.l.b16 %v15291_v13  ;;  %v6956_v51 = vunpack.c.h.b16 %v15291_v13  ;;  %v5465_v34 = vpop.f32.mrf.mxu3  ;;  %v15186_v36 = vor.u32 %v18545_v41, %v15185_v39  ;;  %v18648_v41 = vld [vmem:[%s27866_s3 + $0x172c] sm:$0xf0] }
 0x378   :  { %v15190_v21 = vor.u32 %v18543_v33, %v15187_v15  ;;  %v15457_v33 = vld [vmem:[%s27866_s3 + $0x1730] sm:$0xf0] }
 0x379   :  { %6708 = vmatpush.bf16.msrb.mxu1 %v15138_v54  ;;  %6661 = vmatpush.bf16.msra.mxu3 %v15050_v63  ;;  %v15201_v54 = vld [vmem:[%s27866_s3 + $0x13e8] sm:$0xf]  ;;  %v18515_v63 = vld [vmem:[%s27866_s3 + $0x12ec] sm:$0xf]  ;;  %v7007_v17 = vpack.c.b16 %v6955_v19, %v6955_v19  ;;  %v5454_v42 = vpop.f32.mrf.mxu1  ;;  %v7008_v25 = vpack.c.b16 %v6956_v51, %v6956_v51  ;;  %v18626_v51 = vld [vmem:[%s27866_s3 + $0x1684] sm:$0xf] }
 0x37a   :  { %6734 = vmatpush.bf16.msrb.mxu0 %v15142_v52  ;;  %6687 = vmatpush.bf16.msra.mxu2 %v15054_v61  ;;  %v18547_v52 = vld [vmem:[%s27866_s3 + $0x13ec] sm:$0xf]  ;;  %v15202_v12 = vor.u32 %v18549_v55, %v15201_v54  ;;  %v15057_v61 = vld [vmem:[%s27866_s3 + $0x12c8] sm:$0xf]  ;;  %v18632_v54 = vld [vmem:[%s27866_s3 + $0x16ac] sm:$0xf0] }
 0x37b   :  { %v18652_v55 = vld [vmem:[%s27866_s3 + $0x174c] sm:$0xf0] }
 0x37c   :  { %6662 = vmatmul.bf16.vlgmr.msra.gmra.mxu3 %v20391_v27  ;;  %v5480_v8 = vpop.f32.mrf.mxu0 }
 0x37d   :  { %6722 = vmatpush.bf16.msrb.mxu3 %v6649_v59  ;;  %6709 = vmatpush.bf16.msrb.mxu1 %v15122_v49  ;;  %v15074_v59 = vor.u32 %v18517_v5, %v15073_v48  ;;  %v18513_v49 = vld [vmem:[%s27866_s3 + $0x12d4] sm:$0xf0]  ;;  %v7063_v5 = vsel %vm1177_vm3, %v7008_v25, 0 }
 0x37e   :  { %6748 = vmatpush.bf16.msrb.mxu2 %v6652_v3  ;;  %6735 = vmatpush.bf16.msrb.mxu0 %v15126_v6  ;;  %v15206_v3 = vor.u32 %v18547_v52, %v15203_v4  ;;  %v15078_v6 = vor.u32 %v18515_v63, %v15075_v23  ;;  %v15058_v22 = vor.u32 %v18513_v49, %v15057_v61  ;;  %v18650_v52 = vld [vmem:[%s27866_s3 + $0x1744] sm:$0xf]  ;;  %v15473_v4 = vld [vmem:[%s27866_s3 + $0x1750] sm:$0xf0]  ;;  %v15375_v61 = vld [vmem:[%s27866_s3 + $0x1680] sm:$0xf] }
 0x37f   :  { %6688 = vmatmul.bf16.vlgmr.msra.gmra.mxu2 %v20391_v27  ;;  %v5467_v63 = vpop.f32.mrf.mxu3  ;;  %v15476_v39 = vor.u32 %v18650_v52, %v15473_v4 }
 0x380   :  { %v15417_v63 = vld [vmem:[%s27866_s3 + $0x16d8] sm:$0xf0] }
 0x381   :  { %6723 = vmatpush.bf16.msrb.mxu3 %v15234_v24  ;;  %6710 = vmatpush.bf16.msrb.mxu1 %v15106_v37  ;;  %v15407_v24 = vld [vmem:[%s27866_s3 + $0x16c0] sm:$0xf]  ;;  %v5466_v37 = vadd.f32 %v5465_v34, %v5452_v46  ;;  %v15062_v46 = vor.u32 %v18511_v18, %v15059_v44  ;;  %v18646_v18 = vld [vmem:[%s27866_s3 + $0x1724] sm:$0xf] }
 0x382   :  { %6749 = vmatpush.bf16.msrb.mxu2 %v15238_v20  ;;  %6736 = vmatpush.bf16.msrb.mxu0 %v15110_v56  ;;  %v5491_v20 = vpop.f32.mrf.mxu2  ;;  %v18634_v56 = vld [vmem:[%s27866_s3 + $0x16c4] sm:$0xf]  ;;  %v15460_v42 = vor.u32 %v18646_v18, %v15457_v33  ;;  %v15399_v33 = vld [vmem:[%s27866_s3 + $0x16a8] sm:$0xf] }
 0x383   :  { %v5492_v45 = vadd.f32 %v5491_v20, %v5478_v47  ;;  %v24413_v13 = vadd.f32 %v5466_v37, %v24085_v38  ;;  %v15412_v48 = vor.u32 %v18634_v56, %v15409_v50  ;;  %v15391_v47 = vld [vmem:[%s27866_s3 + $0x16a0] sm:$0xf]  ;;  %v18624_v37 = vld [vmem:[%s27866_s3 + $0x166c] sm:$0xf0]  ;;  %v15361_v56 = vld [vmem:[%s27866_s3 + $0x1670] sm:$0xf0] }
 0x384   :  { %v15471_v38 = vld [vmem:[%s27866_s3 + $0x1740] sm:$0xf]  ;;  %v15392_v19 = vor.u32 %v18632_v54, %v15391_v47  ;;  %v18642_v50 = vld [vmem:[%s27866_s3 + $0x1704] sm:$0xf] }
 0x385   :  { %6724 = vmatpush.bf16.msrb.mxu3 %v15218_v29  ;;  %6711 = vmatpush.bf16.msrb.mxu1 %v15090_v40  ;;  %v15408_v29 = vor.u32 %v18636_v16, %v15407_v24  ;;  %v7060_v40 = vsel %vm1177_vm3, %v7007_v17, 0  ;;  %v15472_v23 = vor.u32 %v18652_v55, %v15471_v38  ;;  %v24474_v15 = vpop.f32.mrf.mxu1  ;;  %v15359_v16 = vld [vmem:[%s27866_s3 + $0x1660] sm:$0xf]  ;;  %v18618_v54 = vld [vmem:[%s27866_s3 + $0x1644] sm:$0xf] }
 0x386   :  { %6750 = vmatpush.bf16.msrb.mxu2 %v15222_v1  ;;  %6737 = vmatpush.bf16.msrb.mxu0 %v15094_v28  ;;  %v24417_v1 = vadd.f32 %v5492_v45, %v24089_v43  ;;  %v18630_v43 = vld [vmem:[%s27866_s3 + $0x16a4] sm:$0xf]  ;;  %v15393_v28 = vld [vmem:[%s27866_s3 + $0x16b0] sm:$0xf0]  ;;  %v15439_v20 = vld [vmem:[%s27866_s3 + $0x1700] sm:$0xf]  ;;  %v15360_v8 = vor.u32 %v18624_v37, %v15359_v16 }
 0x387   :  { %v15441_v45 = vld [vmem:[%s27866_s3 + $0x1710] sm:$0xf0]  ;;  %v18638_v55 = vld [vmem:[%s27866_s3 + $0x16e4] sm:$0xf]  ;;  %v15401_v16 = vld [vmem:[%s27866_s3 + $0x16b8] sm:$0xf0] }
 0x388   :  { %v24476_v34 = vpop.f32.mrf.mxu0  ;;  %v15444_v47 = vor.u32 %v18642_v50, %v15441_v45  ;;  %v15345_v38 = vld [vmem:[%s27866_s3 + $0x1650] sm:$0xf0]  ;;  %v18610_v50 = vld [vmem:[%s27866_s3 + $0x1604] sm:$0xf] }
 0x389   :  { %6725 = vmatpush.bf16.msrb.mxu3 %v15202_v12  ;;  %6712 = vmatpush.bf16.msrb.mxu1 %v15074_v59  ;;  %v15396_v12 = vor.u32 %v18630_v43, %v15393_v28  ;;  %v18628_v59 = vld [vmem:[%s27866_s3 + $0x168c] sm:$0xf0]  ;;  %v15425_v43 = vld [vmem:[%s27866_s3 + $0x16f0] sm:$0xf0]  ;;  %v15415_v28 = vld [vmem:[%s27866_s3 + $0x16c8] sm:$0xf] }
 0x38a   :  { %6751 = vmatpush.bf16.msrb.mxu2 %v15206_v3  ;;  %6738 = vmatpush.bf16.msrb.mxu0 %v15078_v6  ;;  %v15455_v3 = vld [vmem:[%s27866_s3 + $0x1720] sm:$0xf]  ;;  %v5493_v49 = vpop.f32.mrf.mxu2  ;;  %v15377_v6 = vld [vmem:[%s27866_s3 + $0x1690] sm:$0xf0]  ;;  %v15376_v17 = vor.u32 %v18628_v59, %v15375_v61  ;;  %v15348_v61 = vor.u32 %v18618_v54, %v15345_v38  ;;  %v18608_v38 = vld [vmem:[%s27866_s3 + $0x15ec] sm:$0xf0] }
 0x38b   :  { %v15456_v44 = vor.u32 %v18648_v41, %v15455_v3  ;;  %v15380_v24 = vor.u32 %v18626_v51, %v15377_v6  ;;  %v15327_v59 = vld [vmem:[%s27866_s3 + $0x1620] sm:$0xf]  ;;  %v18616_v3 = vld [vmem:[%s27866_s3 + $0x162c] sm:$0xf0]  ;;  %v15428_v49 = vor.u32 %v18638_v55, %v15425_v43  ;;  %v18614_v41 = vld [vmem:[%s27866_s3 + $0x1624] sm:$0xf] }
 0x38c   :  { %v15329_v51 = vld [vmem:[%s27866_s3 + $0x1630] sm:$0xf0]  ;;  %v15292_v6 = vld [vmem:[%s27866_s3 + $0x1768] sm:$0x33]  ;;  %v15295_v54 = vld [vmem:[%s27866_s3 + $0x15e0] sm:$0xf] }
 0x38d   :  { %6726 = vmatpush.bf16.msrb.mxu3 %v15186_v36  ;;  %6713 = vmatpush.bf16.msrb.mxu1 %v15058_v22  ;;  %v18644_v22 = vld [vmem:[%s27866_s3 + $0x170c] sm:$0xf0]  ;;  %v18622_v36 = vld [vmem:[%s27866_s3 + $0x1664] sm:$0xf]  ;;  %v5836_v52 = vpop.f32.mrf.mxu1  ;;  %v15332_v37 = vor.u32 %v18614_v41, %v15329_v51  ;;  %v15313_v45 = vld [vmem:[%s27866_s3 + $0x1610] sm:$0xf0] }
 0x38e   :  { %6752 = vmatpush.bf16.msrb.mxu2 %v15190_v21  ;;  %6739 = vmatpush.bf16.msrb.mxu0 %v15062_v46  ;;  %v15343_v21 = vld [vmem:[%s27866_s3 + $0x1640] sm:$0xf]  ;;  %v15440_v25 = vor.u32 %v18644_v22, %v15439_v20  ;;  %v15364_v46 = vor.u32 %v18622_v36, %v15361_v56  ;;  %v6957_v22 = vunpack.c.l.b16 %v15292_v6  ;;  %v6958_v36 = vunpack.c.h.b16 %v15292_v6 }
 0x38f   :  { %v15311_v20 = vld [vmem:[%s27866_s3 + $0x1600] sm:$0xf] }
 0x390   :  { %6714 = vmatmul.bf16.vlgmr.msrb.gmra.mxu1 %v20391_v27  ;;  %15241 = vmatmul.msk.bf16.vlgmr.msrb.gmra.mxu3 %vm1173_vm5, %v20393_v30  ;;  %v7009_v55 = vpack.c.b16 %v6957_v22, %v6957_v22  ;;  %v7010_v43 = vpack.c.b16 %v6958_v36, %v6958_v36 }
 0x391   :  { %7071 = vmatpush.bf16.msra.mxu3 %v15408_v29  ;;  %7087 = vmatpush.bf16.msra.mxu1 %v7060_v40  ;;  %v18620_v29 = vld [vmem:[%s27866_s3 + $0x164c] sm:$0xf0]  ;;  %v15423_v40 = vld [vmem:[%s27866_s3 + $0x16e0] sm:$0xf] }
 0x392   :  { %7097 = vmatpush.bf16.msra.mxu2 %v15412_v48  ;;  %7113 = vmatpush.bf16.msra.mxu0 %v7063_v5  ;;  %v18640_v48 = vld [vmem:[%s27866_s3 + $0x16ec] sm:$0xf0]  ;;  %v18637_v5 = vld [vmem:[%s27866_s3 + $0x16d4] sm:$0xf0]  ;;  %v15344_v4 = vor.u32 %v18620_v29, %v15343_v21  ;;  %v15383_v21 = vld [vmem:[%s27866_s3 + $0x1688] sm:$0xf] }
 0x393   :  { %6740 = vmatmul.bf16.vlgmr.msrb.gmra.mxu0 %v20391_v27  ;;  %15242 = vmatmul.msk.bf16.vlgmr.msrb.gmra.mxu2 %vm1173_vm5, %v20393_v30  ;;  %v18627_v29 = vld [vmem:[%s27866_s3 + $0x168c] sm:$0xf]  ;;  %v7066_v41 = vsel %vm1177_vm3, %v7009_v55, 0 }
 0x395   :  { %7072 = vmatpush.bf16.msra.mxu3 %v15392_v19  ;;  %7088 = vmatpush.bf16.msra.mxu1 %v15472_v23  ;;  %v18635_v19 = vld [vmem:[%s27866_s3 + $0x16cc] sm:$0xf]  ;;  %v5862_v23 = vpop.f32.mrf.mxu0 }
 0x396   :  { %7098 = vmatpush.bf16.msra.mxu2 %v15396_v12  ;;  %7114 = vmatpush.bf16.msra.mxu0 %v15476_v39  ;;  %v15424_v12 = vor.u32 %v18640_v48, %v15423_v40  ;;  %v15416_v39 = vor.u32 %v18637_v5, %v15415_v28  ;;  %v15420_v18 = vor.u32 %v18635_v19, %v15417_v63  ;;  %v15385_v40 = vld [vmem:[%s27866_s3 + $0x1698] sm:$0xf0]  ;;  %v15297_v19 = vld [vmem:[%s27866_s3 + $0x15f0] sm:$0xf0] }
 0x397   :  { %v5821_v48 = vpop.f32.mrf.mxu3  ;;  %v15388_v23 = vor.u32 %v18627_v29, %v15385_v40  ;;  %v18617_v29 = vld [vmem:[%s27866_s3 + $0x1634] sm:$0xf0]  ;;  %v18647_v40 = vld [vmem:[%s27866_s3 + $0x172c] sm:$0xf] }
 0x398   :  { %v5835_v28 = vadd.f32 %v24474_v15, %v5821_v48  ;;  %v18625_v15 = vld [vmem:[%s27866_s3 + $0x1674] sm:$0xf0]  ;;  %v15465_v48 = vld [vmem:[%s27866_s3 + $0x1738] sm:$0xf0] }
 0x399   :  { %7073 = vmatpush.bf16.msra.mxu3 %v15376_v17  ;;  %7089 = vmatpush.bf16.msra.mxu1 %v15456_v44  ;;  %v18633_v17 = vld [vmem:[%s27866_s3 + $0x16b4] sm:$0xf0]  ;;  %v15328_v44 = vor.u32 %v18616_v3, %v15327_v59  ;;  %v15296_v59 = vor.u32 %v18608_v38, %v15295_v54  ;;  %v18623_v3 = vld [vmem:[%s27866_s3 + $0x166c] sm:$0xf]  ;;  %v15337_v54 = vld [vmem:[%s27866_s3 + $0x1638] sm:$0xf0] }
 0x39a   :  { %7099 = vmatpush.bf16.msra.mxu2 %v15380_v24  ;;  %7115 = vmatpush.bf16.msra.mxu0 %v15460_v42  ;;  %v18631_v24 = vld [vmem:[%s27866_s3 + $0x16ac] sm:$0xf]  ;;  %v18612_v42 = vld [vmem:[%s27866_s3 + $0x160c] sm:$0xf0]  ;;  %v15400_v56 = vor.u32 %v18633_v17, %v15399_v33  ;;  %v5847_v5 = vpop.f32.mrf.mxu2  ;;  %v18653_v33 = vld [vmem:[%s27866_s3 + $0x1754] sm:$0xf0] }
 0x39b   :  { %v5861_v63 = vadd.f32 %v24476_v34, %v5847_v5  ;;  %v15369_v34 = vld [vmem:[%s27866_s3 + $0x1678] sm:$0xf0]  ;;  %v15537_v38 = vld [vmem:[%s27866_s3 + $0x18f0] sm:$0x33] }
 0x39d   :  { %7074 = vmatpush.bf16.msra.mxu3 %v15360_v8  ;;  %7090 = vmatpush.bf16.msra.mxu1 %v15440_v25  ;;  %v15404_v8 = vor.u32 %v18631_v24, %v15401_v16  ;;  %v18629_v25 = vld [vmem:[%s27866_s3 + $0x1694] sm:$0xf0]  ;;  %v18651_v16 = vld [vmem:[%s27866_s3 + $0x174c] sm:$0xf] }
 0x39e   :  { %7100 = vmatpush.bf16.msra.mxu2 %v15364_v46  ;;  %7116 = vmatpush.bf16.msra.mxu0 %v15444_v47  ;;  %v15312_v46 = vor.u32 %v18612_v42, %v15311_v20  ;;  %v15316_v47 = vor.u32 %v18610_v50, %v15313_v45  ;;  %v15384_v52 = vor.u32 %v18629_v25, %v15383_v21  ;;  %v18621_v24 = vld [vmem:[%s27866_s3 + $0x1654] sm:$0xf0]  ;;  %v18619_v20 = vld [vmem:[%s27866_s3 + $0x164c] sm:$0xf]  ;;  %v15353_v42 = vld [vmem:[%s27866_s3 + $0x1658] sm:$0xf0] }
 0x39f   :  { %v5823_v22 = vpop.f32.mrf.mxu3  ;;  %v15463_v21 = vld [vmem:[%s27866_s3 + $0x1728] sm:$0xf]  ;;  %v18649_v25 = vld [vmem:[%s27866_s3 + $0x1734] sm:$0xf0] }
 0x3a1   :  { %7075 = vmatpush.bf16.msra.mxu3 %v15344_v4  ;;  %7091 = vmatpush.bf16.msra.mxu1 %v15424_v12  ;;  %v18606_v4 = vld [vmem:[%s27866_s3 + $0x15e4] sm:$0xf]  ;;  %v15367_v12 = vld [vmem:[%s27866_s3 + $0x1668] sm:$0xf] }
 0x3a2   :  { %7101 = vmatpush.bf16.msra.mxu2 %v15348_v61  ;;  %7117 = vmatpush.bf16.msra.mxu0 %v15428_v49  ;;  %v24614_v61 = vadd.f32 %v5835_v28, %v24286_v60  ;;  %v24623_v49 = vadd.f32 %v5861_v63, %v24295_v7  ;;  %v7069_v60 = vsel %vm1177_vm3, %v7010_v43, 0  ;;  %v15368_v6 = vor.u32 %v18625_v15, %v15367_v12  ;;  %v15479_v7 = vld [vmem:[%s27866_s3 + $0x1748] sm:$0xf]  ;;  %v18645_v63 = vld [vmem:[%s27866_s3 + $0x1714] sm:$0xf0] }
 0x3a3   :  { %v15480_v36 = vor.u32 %v18653_v33, %v15479_v7  ;;  %v15464_v43 = vor.u32 %v18649_v25, %v15463_v21  ;;  %v18613_v12 = vld [vmem:[%s27866_s3 + $0x1614] sm:$0xf0]  ;;  %v18643_v15 = vld [vmem:[%s27866_s3 + $0x170c] sm:$0xf]  ;;  %v15431_v33 = vld [vmem:[%s27866_s3 + $0x16e8] sm:$0xf] }
 0x3a4   :  { %15485 = vmatmul.msk.bf16.vlgmr.msra.gmra.mxu1 %vm1173_vm5, %v20639_v53  ;;  %v5920_v51 = vmax.f32 %v22650_v0, %v24614_v61  ;;  %v5921_v17 = vmax.f32 %v22659_v2, %v24623_v49  ;;  %v18609_v7 = vld [vmem:[%s27866_s3 + $0x15f4] sm:$0xf0]  ;;  %v18907_v2 = vld [vmem:[%s27866_s3 + $0x1fac] sm:$0xf]  ;;  %v16829_v49 = vld [vmem:[%s27866_s3 + $0x1fb8] sm:$0xf0] }
 0x3a5   :  { %7123 = vmatpush.bf16.msrb.mxu1 %v15416_v39  ;;  %7076 = vmatpush.bf16.msra.mxu3 %v15328_v44  ;;  %v15300_v39 = vor.u32 %v18606_v4, %v15297_v19  ;;  %v15372_v44 = vor.u32 %v18623_v3, %v15369_v34  ;;  %v5873_v55 = vpop.f32.mrf.mxu1  ;;  %v15319_v4 = vld [vmem:[%s27866_s3 + $0x1608] sm:$0xf]  ;;  %v7376_v3 = vunpack.c.l.b16 %v15537_v38  ;;  %v18611_v34 = vld [vmem:[%s27866_s3 + $0x160c] sm:$0xf] }
 0x3a6   :  { %7149 = vmatpush.bf16.msrb.mxu0 %v15420_v18  ;;  %7102 = vmatpush.bf16.msra.mxu2 %v15332_v37  ;;  %v15351_v18 = vld [vmem:[%s27866_s3 + $0x1648] sm:$0xf]  ;;  %v15481_v37 = vld [vmem:[%s27866_s3 + $0x1758] sm:$0xf0] }
 0x3a7   :  { %15486 = vmatmul.msk.bf16.vlgmr.msra.gmra.mxu0 %vm1173_vm5, %v20639_v53  ;;  %v15352_v50 = vor.u32 %v18621_v24, %v15351_v18  ;;  %v15484_v45 = vor.u32 %v18651_v16, %v15481_v37  ;;  %v15447_v19 = vld [vmem:[%s27866_s3 + $0x1708] sm:$0xf]  ;;  %v7377_v24 = vunpack.c.h.b16 %v15537_v38  ;;  %v18607_v37 = vld [vmem:[%s27866_s3 + $0x15ec] sm:$0xf]  ;;  %v7428_v22 = vpack.c.b16 %v7376_v3, %v7376_v3 }
 0x3a8   :  { %v5899_v28 = vpop.f32.mrf.mxu0 }
 0x3a9   :  { %7124 = vmatpush.bf16.msrb.mxu1 %v15400_v56  ;;  %7077 = vmatpush.bf16.msra.mxu3 %v15312_v46  ;;  %v5849_v56 = vpop.f32.mrf.mxu2  ;;  %v15356_v46 = vor.u32 %v18619_v20, %v15353_v42  ;;  %v18639_v20 = vld [vmem:[%s27866_s3 + $0x16ec] sm:$0xf]  ;;  %v15433_v42 = vld [vmem:[%s27866_s3 + $0x16f8] sm:$0xf0] }
 0x3aa   :  { %7150 = vmatpush.bf16.msrb.mxu0 %v15404_v8  ;;  %7103 = vmatpush.bf16.msra.mxu2 %v15316_v47  ;;  %v15335_v8 = vld [vmem:[%s27866_s3 + $0x1628] sm:$0xf]  ;;  %v18615_v47 = vld [vmem:[%s27866_s3 + $0x162c] sm:$0xf]  ;;  %v15305_v56 = vld [vmem:[%s27866_s3 + $0x15f8] sm:$0xf0]  ;;  %v15436_v38 = vor.u32 %v18639_v20, %v15433_v42 }
 0x3ab   :  { %v15336_v5 = vor.u32 %v18617_v29, %v15335_v8  ;;  %v18696_v20 = vld [vmem:[%s27866_s3 + $0x18bc] sm:$0xf0]  ;;  %v18674_v42 = vld [vmem:[%s27866_s3 + $0x1814] sm:$0xf] }
 0x3ad   :  { %7125 = vmatpush.bf16.msrb.mxu1 %v15384_v52  ;;  %7078 = vmatpush.bf16.msra.mxu3 %v15296_v59  ;;  %v15468_v52 = vor.u32 %v18647_v40, %v15465_v48  ;;  %v15449_v59 = vld [vmem:[%s27866_s3 + $0x1718] sm:$0xf0]  ;;  %v5875_v25 = vpop.f32.mrf.mxu1  ;;  %v18682_v40 = vld [vmem:[%s27866_s3 + $0x1854] sm:$0xf]  ;;  %v15655_v48 = vld [vmem:[%s27866_s3 + $0x1860] sm:$0xf0] }
 0x3ae   :  { %7151 = vmatpush.bf16.msrb.mxu0 %v15388_v23  ;;  %7104 = vmatpush.bf16.msra.mxu2 %v15300_v39  ;;  %v15340_v23 = vor.u32 %v18615_v47, %v15337_v54  ;;  %v15321_v39 = vld [vmem:[%s27866_s3 + $0x1618] sm:$0xf0]  ;;  %v15452_v18 = vor.u32 %v18643_v15, %v15449_v59  ;;  %v18678_v15 = vld [vmem:[%s27866_s3 + $0x1834] sm:$0xf]  ;;  %v15639_v59 = vld [vmem:[%s27866_s3 + $0x1840] sm:$0xf0] }
 0x3af   :  { %v15324_v16 = vor.u32 %v18611_v34, %v15321_v39  ;;  %v18698_v39 = vld [vmem:[%s27866_s3 + $0x18d4] sm:$0xf] }
 0x3b0   :  { %7079 = vmatmul.bf16.vlgmr.msra.gmra.mxu3 %v20715_v32  ;;  %v5901_v54 = vpop.f32.mrf.mxu0 }
 0x3b1   :  { %7139 = vmatpush.bf16.msrb.mxu3 %v7066_v41  ;;  %7126 = vmatpush.bf16.msrb.mxu1 %v15368_v6  ;;  %v15448_v41 = vor.u32 %v18645_v63, %v15447_v19  ;;  %v15320_v6 = vor.u32 %v18613_v12, %v15319_v4  ;;  %v5912_v21 = vpop.f32.mrf.mxu2  ;;  %v7481_v4 = vsel %vm1177_vm3, %v7428_v22, 0  ;;  %v15658_v63 = vor.u32 %v18682_v40, %v15655_v48  ;;  %v15623_v22 = vld [vmem:[%s27866_s3 + $0x1820] sm:$0xf0]  ;;  %v15685_v40 = vld [vmem:[%s27866_s3 + $0x1890] sm:$0xf] }
 0x3b2   :  { %7165 = vmatpush.bf16.msrb.mxu2 %v7069_v60  ;;  %7152 = vmatpush.bf16.msrb.mxu0 %v15372_v44  ;;  %v15303_v60 = vld [vmem:[%s27866_s3 + $0x15e8] sm:$0xf]  ;;  %v18641_v44 = vld [vmem:[%s27866_s3 + $0x16f4] sm:$0xf0]  ;;  %v5913_v47 = vadd.f32 %v5912_v21, %v5899_v28  ;;  %v15637_v28 = vld [vmem:[%s27866_s3 + $0x1830] sm:$0xf]  ;;  %v15626_v25 = vor.u32 %v18674_v42, %v15623_v22 }
 0x3b3   :  { %7105 = vmatmul.bf16.vlgmr.msra.gmra.mxu2 %v20715_v32  ;;  %v15432_v29 = vor.u32 %v18641_v44, %v15431_v33  ;;  %v15621_v33 = vld [vmem:[%s27866_s3 + $0x1810] sm:$0xf]  ;;  %v18676_v44 = vld [vmem:[%s27866_s3 + $0x181c] sm:$0xf0]  ;;  %v18670_v54 = vld [vmem:[%s27866_s3 + $0x17f4] sm:$0xf] }
 0x3b4   :  { %v24749_v19 = vadd.f32 %v5913_v47, %v24417_v1  ;;  %v18700_v1 = vld [vmem:[%s27866_s3 + $0x18dc] sm:$0xf0] }
 0x3b5   :  { %7140 = vmatpush.bf16.msrb.mxu3 %v15480_v36  ;;  %7127 = vmatpush.bf16.msrb.mxu1 %v15352_v50  ;;  %v5886_v36 = vpop.f32.mrf.mxu3  ;;  %v15653_v50 = vld [vmem:[%s27866_s3 + $0x1850] sm:$0xf]  ;;  %v18692_v47 = vld [vmem:[%s27866_s3 + $0x189c] sm:$0xf0] }
 0x3b6   :  { %7166 = vmatpush.bf16.msrb.mxu2 %v15484_v45  ;;  %7153 = vmatpush.bf16.msrb.mxu0 %v15356_v46  ;;  %v18684_v45 = vld [vmem:[%s27866_s3 + $0x185c] sm:$0xf0]  ;;  %v5887_v8 = vadd.f32 %v5886_v36, %v5873_v55  ;;  %v15304_v46 = vor.u32 %v18609_v7, %v15303_v60  ;;  %v5923_v3 = vmax.f32 %v22781_v57, %v24749_v19  ;;  %v18694_v36 = vld [vmem:[%s27866_s3 + $0x18b4] sm:$0xf] }
 0x3b7   :  { %v15642_v7 = vor.u32 %v18678_v15, %v15639_v59  ;;  %v18666_v59 = vld [vmem:[%s27866_s3 + $0x17d4] sm:$0xf]  ;;  %v18664_v42 = vld [vmem:[%s27866_s3 + $0x17bc] sm:$0xf0] }
 0x3b8   :  { %v24745_v55 = vadd.f32 %v5887_v8, %v24413_v13  ;;  %v15717_v13 = vld [vmem:[%s27866_s3 + $0x18d0] sm:$0xf] }
 0x3b9   :  { %7141 = vmatpush.bf16.msrb.mxu3 %v15464_v43  ;;  %7128 = vmatpush.bf16.msrb.mxu1 %v15336_v5  ;;  %v7429_v43 = vpack.c.b16 %v7377_v24, %v7377_v24  ;;  %v15308_v5 = vor.u32 %v18607_v37, %v15305_v56  ;;  %v15701_v24 = vld [vmem:[%s27866_s3 + $0x18b0] sm:$0xf]  ;;  %v15703_v56 = vld [vmem:[%s27866_s3 + $0x18c0] sm:$0xf0] }
 0x3ba   :  { %7167 = vmatpush.bf16.msrb.mxu2 %v15468_v52  ;;  %7154 = vmatpush.bf16.msrb.mxu0 %v15340_v23  ;;  %v15654_v52 = vor.u32 %v18684_v45, %v15653_v50  ;;  %v18680_v23 = vld [vmem:[%s27866_s3 + $0x183c] sm:$0xf0]  ;;  %v5922_v12 = vmax.f32 %v22777_v31, %v24745_v55  ;;  %v24810_v50 = vpop.f32.mrf.mxu1  ;;  %v15622_v45 = vor.u32 %v18676_v44, %v15621_v33  ;;  %v18683_v33 = vld [vmem:[%s27866_s3 + $0x185c] sm:$0xf]  ;;  %v15663_v44 = vld [vmem:[%s27866_s3 + $0x1868] sm:$0xf0] }
 0x3bb   :  { %v7484_v34 = vsel %vm1177_vm3, %v7429_v43, 0  ;;  %v15638_v60 = vor.u32 %v18680_v23, %v15637_v28  ;;  %v15702_v21 = vor.u32 %v18696_v20, %v15701_v24  ;;  %v15706_v48 = vor.u32 %v18694_v36, %v15703_v56  ;;  %v18690_v43 = vld [vmem:[%s27866_s3 + $0x1894] sm:$0xf]  ;;  %v18668_v23 = vld [vmem:[%s27866_s3 + $0x17dc] sm:$0xf0] }
 0x3bc   :  { %v24812_v8 = vpop.f32.mrf.mxu0  ;;  %v15573_v20 = vld [vmem:[%s27866_s3 + $0x17b0] sm:$0xf]  ;;  %v18662_v56 = vld [vmem:[%s27866_s3 + $0x17b4] sm:$0xf] }
 0x3bd   :  { %7142 = vmatpush.bf16.msrb.mxu3 %v15448_v41  ;;  %7129 = vmatpush.bf16.msrb.mxu1 %v15320_v6  ;;  %v15719_v41 = vld [vmem:[%s27866_s3 + $0x18e0] sm:$0xf0]  ;;  %v5888_v6 = vpop.f32.mrf.mxu3  ;;  %v18986_v55 = vld [vmem:[%s27866_s3 + $0x2234] sm:$0xf] }
 0x3be   :  { %7168 = vmatpush.bf16.msrb.mxu2 %v15452_v18  ;;  %7155 = vmatpush.bf16.msrb.mxu0 %v15324_v16  ;;  %v15718_v18 = vor.u32 %v18700_v1, %v15717_v13  ;;  %v5914_v16 = vpop.f32.mrf.mxu2  ;;  %v15722_v37 = vor.u32 %v18698_v39, %v15719_v41  ;;  %v15669_v13 = vld [vmem:[%s27866_s3 + $0x1870] sm:$0xf]  ;;  %v18688_v1 = vld [vmem:[%s27866_s3 + $0x187c] sm:$0xf0]  ;;  %v18686_v39 = vld [vmem:[%s27866_s3 + $0x1874] sm:$0xf] }
 0x3bf   :  { %v15671_v41 = vld [vmem:[%s27866_s3 + $0x1880] sm:$0xf0]  ;;  %v18685_v6 = vld [vmem:[%s27866_s3 + $0x1864] sm:$0xf0]  ;;  %v15670_v16 = vor.u32 %v18688_v1, %v15669_v13  ;;  %v15629_v13 = vld [vmem:[%s27866_s3 + $0x1818] sm:$0xf] }
 0x3c0   :  { %v15674_v22 = vor.u32 %v18686_v39, %v15671_v41  ;;  %v18677_v1 = vld [vmem:[%s27866_s3 + $0x1824] sm:$0xf0] }
 0x3c1   :  { %7143 = vmatpush.bf16.msrb.mxu3 %v15432_v29  ;;  %7130 = vmatpush.bf16.msrb.mxu1 %v15304_v46  ;;  %v15605_v46 = vld [vmem:[%s27866_s3 + $0x17f0] sm:$0xf]  ;;  %v18672_v29 = vld [vmem:[%s27866_s3 + $0x17fc] sm:$0xf0] }
 0x3c2   :  { %7169 = vmatpush.bf16.msrb.mxu2 %v15436_v38  ;;  %7156 = vmatpush.bf16.msrb.mxu0 %v15308_v5  ;;  %v15607_v38 = vld [vmem:[%s27866_s3 + $0x1800] sm:$0xf0] }
 0x3c3   :  { %v15687_v5 = vld [vmem:[%s27866_s3 + $0x18a0] sm:$0xf0]  ;;  %v15610_v28 = vor.u32 %v18670_v54, %v15607_v38  ;;  %v15557_v38 = vld [vmem:[%s27866_s3 + $0x1790] sm:$0xf] }
 0x3c4   :  { %7131 = vmatmul.bf16.vlgmr.msrb.gmra.mxu1 %v20715_v32  ;;  %15487 = vmatmul.msk.bf16.vlgmr.msrb.gmra.mxu3 %vm1173_vm5, %v20639_v53  ;;  %v15690_v15 = vor.u32 %v18690_v43, %v15687_v5  ;;  %v6338_v24 = vpop.f32.mrf.mxu0  ;;  %v18660_v43 = vld [vmem:[%s27866_s3 + $0x179c] sm:$0xf0] }
 0x3c5   :  { %7492 = vmatpush.bf16.msra.mxu3 %v15654_v52  ;;  %7508 = vmatpush.bf16.msra.mxu1 %v7481_v4  ;;  %v15606_v52 = vor.u32 %v18672_v29, %v15605_v46  ;;  %v15589_v4 = vld [vmem:[%s27866_s3 + $0x17d0] sm:$0xf]  ;;  %v15645_v46 = vld [vmem:[%s27866_s3 + $0x1838] sm:$0xf]  ;;  %v18681_v29 = vld [vmem:[%s27866_s3 + $0x1844] sm:$0xf0]  ;;  %v15630_v24 = vor.u32 %v18677_v1, %v15629_v13 }
 0x3c6   :  { %7518 = vmatpush.bf16.msra.mxu2 %v15658_v63  ;;  %7534 = vmatpush.bf16.msra.mxu0 %v7484_v34  ;;  %v15686_v63 = vor.u32 %v18692_v47, %v15685_v40  ;;  %v15591_v34 = vld [vmem:[%s27866_s3 + $0x17e0] sm:$0xf0]  ;;  %v15574_v40 = vor.u32 %v18664_v42, %v15573_v20  ;;  %v15647_v47 = vld [vmem:[%s27866_s3 + $0x1848] sm:$0xf0]  ;;  %v15581_v1 = vld [vmem:[%s27866_s3 + $0x17b8] sm:$0xf] }
 0x3c7   :  { %7157 = vmatmul.bf16.vlgmr.msrb.gmra.mxu0 %v20715_v32  ;;  %15488 = vmatmul.msk.bf16.vlgmr.msrb.gmra.mxu2 %vm1173_vm5, %v20639_v53 }
 0x3c9   :  { %7493 = vmatpush.bf16.msra.mxu3 %v15638_v60  ;;  %7509 = vmatpush.bf16.msra.mxu1 %v15718_v18  ;;  %v15661_v60 = vld [vmem:[%s27866_s3 + $0x1858] sm:$0xf]  ;;  %v6312_v18 = vpop.f32.mrf.mxu1 }
 0x3ca   :  { %7519 = vmatpush.bf16.msra.mxu2 %v15642_v7  ;;  %7535 = vmatpush.bf16.msra.mxu0 %v15722_v37  ;;  %v15590_v7 = vor.u32 %v18668_v23, %v15589_v4  ;;  %v15594_v37 = vor.u32 %v18666_v59, %v15591_v34  ;;  %v15662_v36 = vor.u32 %v18685_v6, %v15661_v60  ;;  %v18675_v59 = vld [vmem:[%s27866_s3 + $0x181c] sm:$0xf]  ;;  %v15631_v34 = vld [vmem:[%s27866_s3 + $0x1828] sm:$0xf0]  ;;  %v15541_v60 = vld [vmem:[%s27866_s3 + $0x1770] sm:$0xf] }
 0x3cb   :  { %v15646_v4 = vor.u32 %v18681_v29, %v15645_v46  ;;  %v6297_v39 = vpop.f32.mrf.mxu3  ;;  %v18656_v6 = vld [vmem:[%s27866_s3 + $0x177c] sm:$0xf0]  ;;  %v15634_v42 = vor.u32 %v18675_v59, %v15631_v34  ;;  %v15597_v29 = vld [vmem:[%s27866_s3 + $0x17d8] sm:$0xf]  ;;  %v18697_v59 = vld [vmem:[%s27866_s3 + $0x18c4] sm:$0xf0] }
 0x3cd   :  { %7494 = vmatpush.bf16.msra.mxu3 %v15622_v45  ;;  %7510 = vmatpush.bf16.msra.mxu1 %v15702_v21  ;;  %v15575_v45 = vld [vmem:[%s27866_s3 + $0x17c0] sm:$0xf0]  ;;  %v15538_v21 = vld [vmem:[%s27866_s3 + $0x18f8] sm:$0x33] }
 0x3ce   :  { %7520 = vmatpush.bf16.msra.mxu2 %v15626_v25  ;;  %7536 = vmatpush.bf16.msra.mxu0 %v15706_v48  ;;  %v15666_v25 = vor.u32 %v18683_v33, %v15663_v44  ;;  %v18679_v48 = vld [vmem:[%s27866_s3 + $0x183c] sm:$0xf]  ;;  %v15578_v54 = vor.u32 %v18662_v56, %v15575_v45  ;;  %v7378_v5 = vunpack.c.l.b16 %v15538_v21  ;;  %v24936_v33 = vadd.f32 %v24810_v50, %v6297_v39  ;;  %v6323_v44 = vpop.f32.mrf.mxu2  ;;  %v15613_v50 = vld [vmem:[%s27866_s3 + $0x17f8] sm:$0xf]  ;;  %v18665_v39 = vld [vmem:[%s27866_s3 + $0x17c4] sm:$0xf0] }
 0x3cf   :  { %v15650_v23 = vor.u32 %v18679_v48, %v15647_v47  ;;  %v24945_v20 = vadd.f32 %v24812_v8, %v6323_v44  ;;  %v18671_v56 = vld [vmem:[%s27866_s3 + $0x17fc] sm:$0xf]  ;;  %v15615_v8 = vld [vmem:[%s27866_s3 + $0x1808] sm:$0xf0]  ;;  %v18701_v48 = vld [vmem:[%s27866_s3 + $0x18e4] sm:$0xf0] }
 0x3d0   :  { %v7430_v18 = vpack.c.b16 %v7378_v5, %v7378_v5  ;;  %v15618_v47 = vor.u32 %v18671_v56, %v15615_v8  ;;  %v18667_v5 = vld [vmem:[%s27866_s3 + $0x17dc] sm:$0xf]  ;;  %v18661_v8 = vld [vmem:[%s27866_s3 + $0x17a4] sm:$0xf0] }
 0x3d1   :  { %7495 = vmatpush.bf16.msra.mxu3 %v15606_v52  ;;  %7511 = vmatpush.bf16.msra.mxu1 %v15686_v63  ;;  %v7379_v52 = vunpack.c.h.b16 %v15538_v21  ;;  %v18658_v63 = vld [vmem:[%s27866_s3 + $0x1794] sm:$0xf] }
 0x3d2   :  { %7521 = vmatpush.bf16.msra.mxu2 %v15610_v28  ;;  %7537 = vmatpush.bf16.msra.mxu0 %v15690_v15  ;;  %v15559_v28 = vld [vmem:[%s27866_s3 + $0x17a0] sm:$0xf0]  ;;  %v15558_v15 = vor.u32 %v18660_v43, %v15557_v38  ;;  %v7487_v21 = vsel %vm1177_vm3, %v7430_v18, 0  ;;  %v18699_v38 = vld [vmem:[%s27866_s3 + $0x18dc] sm:$0xf] }
 0x3d3   :  { %v15562_v41 = vor.u32 %v18658_v63, %v15559_v28  ;;  %v15727_v43 = vld [vmem:[%s27866_s3 + $0x18e8] sm:$0xf0] }
 0x3d4   :  { %v15730_v13 = vor.u32 %v18699_v38, %v15727_v43  ;;  %v15583_v18 = vld [vmem:[%s27866_s3 + $0x17c8] sm:$0xf0]  ;;  %v18657_v38 = vld [vmem:[%s27866_s3 + $0x1784] sm:$0xf0]  ;;  %v15677_v43 = vld [vmem:[%s27866_s3 + $0x1878] sm:$0xf] }
 0x3d5   :  { %7496 = vmatpush.bf16.msra.mxu3 %v15590_v7  ;;  %7512 = vmatpush.bf16.msra.mxu1 %v15670_v16  ;;  %v7431_v7 = vpack.c.b16 %v7379_v52, %v7379_v52  ;;  %v18654_v16 = vld [vmem:[%s27866_s3 + $0x1774] sm:$0xf]  ;;  %v15599_v52 = vld [vmem:[%s27866_s3 + $0x17e8] sm:$0xf0] }
 0x3d6   :  { %7522 = vmatpush.bf16.msra.mxu2 %v15594_v37  ;;  %7538 = vmatpush.bf16.msra.mxu0 %v15674_v22  ;;  %v15543_v37 = vld [vmem:[%s27866_s3 + $0x1780] sm:$0xf0]  ;;  %v18673_v22 = vld [vmem:[%s27866_s3 + $0x1804] sm:$0xf0]  ;;  %v6325_v28 = vpop.f32.mrf.mxu2  ;;  %v15602_v34 = vor.u32 %v18667_v5, %v15599_v52 }
 0x3d7   :  { %v15546_v45 = vor.u32 %v18654_v16, %v15543_v37  ;;  %v15614_v46 = vor.u32 %v18673_v22, %v15613_v50  ;;  %v15582_v37 = vor.u32 %v18665_v39, %v15581_v1  ;;  %v15565_v50 = vld [vmem:[%s27866_s3 + $0x1798] sm:$0xf]  ;;  %v18689_v5 = vld [vmem:[%s27866_s3 + $0x1884] sm:$0xf0]  ;;  %v18687_v28 = vld [vmem:[%s27866_s3 + $0x187c] sm:$0xf] }
 0x3d8   :  { %15731 = vmatmul.msk.bf16.vlgmr.msra.gmra.mxu1 %vm1173_vm5, %v20957_v62  ;;  %v15693_v22 = vld [vmem:[%s27866_s3 + $0x1898] sm:$0xf] }
 0x3d9   :  { %7544 = vmatpush.bf16.msrb.mxu1 %v15662_v36  ;;  %7497 = vmatpush.bf16.msra.mxu3 %v15574_v40  ;;  %v15542_v36 = vor.u32 %v18656_v6, %v15541_v60  ;;  %v15725_v40 = vld [vmem:[%s27866_s3 + $0x18d8] sm:$0xf]  ;;  %v15711_v60 = vld [vmem:[%s27866_s3 + $0x18c8] sm:$0xf0]  ;;  %v18663_v6 = vld [vmem:[%s27866_s3 + $0x17bc] sm:$0xf]  ;;  %v6349_v44 = vpop.f32.mrf.mxu1 }
 0x3da   :  { %7570 = vmatpush.bf16.msrb.mxu0 %v15666_v25  ;;  %7523 = vmatpush.bf16.msra.mxu2 %v15578_v54  ;;  %v7490_v25 = vsel %vm1177_vm3, %v7431_v7, 0  ;;  %v18669_v54 = vld [vmem:[%s27866_s3 + $0x17e4] sm:$0xf0]  ;;  %v15726_v63 = vor.u32 %v18701_v48, %v15725_v40  ;;  %v15783_v7 = vld [vmem:[%s27866_s3 + $0x1a80] sm:$0x33]  ;;  %v15586_v56 = vor.u32 %v18663_v6, %v15583_v18  ;;  %v15678_v18 = vor.u32 %v18689_v5, %v15677_v43 }
 0x3db   :  { %15732 = vmatmul.msk.bf16.vlgmr.msra.gmra.mxu0 %vm1173_vm5, %v20957_v62  ;;  %v15549_v48 = vld [vmem:[%s27866_s3 + $0x1778] sm:$0xf]  ;;  %v7798_v52 = vunpack.c.h.b16 %v15783_v7 }
 0x3dc   :  { %v6375_v16 = vpop.f32.mrf.mxu0  ;;  %v15550_v6 = vor.u32 %v18657_v38, %v15549_v48  ;;  %v18746_v48 = vld [vmem:[%s27866_s3 + $0x1a64] sm:$0xf] }
 0x3dd   :  { %7545 = vmatpush.bf16.msrb.mxu1 %v15646_v4  ;;  %7498 = vmatpush.bf16.msra.mxu3 %v15558_v15  ;;  %v6299_v4 = vpop.f32.mrf.mxu3  ;;  %v15709_v15 = vld [vmem:[%s27866_s3 + $0x18b8] sm:$0xf] }
 0x3de   :  { %7571 = vmatpush.bf16.msrb.mxu0 %v15650_v23  ;;  %7524 = vmatpush.bf16.msra.mxu2 %v15562_v41  ;;  %v15598_v23 = vor.u32 %v18669_v54, %v15597_v29  ;;  %v18695_v41 = vld [vmem:[%s27866_s3 + $0x18bc] sm:$0xf]  ;;  %v15567_v29 = vld [vmem:[%s27866_s3 + $0x17a8] sm:$0xf0] }
 0x3e1   :  { %7546 = vmatpush.bf16.msrb.mxu1 %v15630_v24  ;;  %7499 = vmatpush.bf16.msra.mxu3 %v15542_v36  ;;  %v15710_v24 = vor.u32 %v18697_v59, %v15709_v15  ;;  %v18693_v36 = vld [vmem:[%s27866_s3 + $0x18a4] sm:$0xf0]  ;;  %v15551_v15 = vld [vmem:[%s27866_s3 + $0x1788] sm:$0xf0]  ;;  %v15899_v59 = vld [vmem:[%s27866_s3 + $0x19e0] sm:$0xf] }
 0x3e2   :  { %7572 = vmatpush.bf16.msrb.mxu0 %v15634_v42  ;;  %7525 = vmatpush.bf16.msra.mxu2 %v15546_v45  ;;  %v15714_v42 = vor.u32 %v18695_v41, %v15711_v60  ;;  %v18691_v45 = vld [vmem:[%s27866_s3 + $0x189c] sm:$0xf]  ;;  %v15694_v40 = vor.u32 %v18693_v36, %v15693_v22  ;;  %v6388_v41 = vpop.f32.mrf.mxu2  ;;  %v6351_v60 = vpop.f32.mrf.mxu1 }
 0x3e4   :  { %7500 = vmatmul.bf16.vlgmr.msra.gmra.mxu3 %v21033_v58 }
 0x3e5   :  { %7560 = vmatpush.bf16.msrb.mxu3 %v7487_v21  ;;  %7547 = vmatpush.bf16.msrb.mxu1 %v15614_v46  ;;  %v15695_v21 = vld [vmem:[%s27866_s3 + $0x18a8] sm:$0xf0]  ;;  %v18659_v46 = vld [vmem:[%s27866_s3 + $0x179c] sm:$0xf]  ;;  %v6362_v1 = vpop.f32.mrf.mxu3 }
 0x3e6   :  { %7586 = vmatpush.bf16.msrb.mxu2 %v7490_v25  ;;  %7573 = vmatpush.bf16.msrb.mxu0 %v15618_v47  ;;  %v7797_v25 = vunpack.c.l.b16 %v15783_v7  ;;  %v15566_v47 = vor.u32 %v18661_v8, %v15565_v50  ;;  %v15698_v54 = vor.u32 %v18691_v45, %v15695_v21  ;;  %v15570_v4 = vor.u32 %v18659_v46, %v15567_v29  ;;  %v18730_v7 = vld [vmem:[%s27866_s3 + $0x19e4] sm:$0xf]  ;;  %v15883_v45 = vld [vmem:[%s27866_s3 + $0x19c0] sm:$0xf]  ;;  %v15885_v29 = vld [vmem:[%s27866_s3 + $0x19d0] sm:$0xf0] }
 0x3e7   :  { %7526 = vmatmul.bf16.vlgmr.msra.gmra.mxu2 %v21033_v58  ;;  %v25068_v39 = vadd.f32 %v6362_v1, %v6349_v44  ;;  %v7850_v50 = vpack.c.b16 %v7798_v52, %v7798_v52  ;;  %v15963_v21 = vld [vmem:[%s27866_s3 + $0x1a60] sm:$0xf]  ;;  %v18726_v46 = vld [vmem:[%s27866_s3 + $0x19c4] sm:$0xf] }
 0x3e8   :  { %v15888_v5 = vor.u32 %v18726_v46, %v15885_v29  ;;  %v15867_v52 = vld [vmem:[%s27866_s3 + $0x19a0] sm:$0xf]  ;;  %v18722_v1 = vld [vmem:[%s27866_s3 + $0x19a4] sm:$0xf]  ;;  %v18716_v29 = vld [vmem:[%s27866_s3 + $0x196c] sm:$0xf0] }
 0x3e9   :  { %7561 = vmatpush.bf16.msrb.mxu3 %v15726_v63  ;;  %7548 = vmatpush.bf16.msrb.mxu1 %v15598_v23  ;;  %v18655_v63 = vld [vmem:[%s27866_s3 + $0x177c] sm:$0xf]  ;;  %v15679_v23 = vld [vmem:[%s27866_s3 + $0x1888] sm:$0xf0] }
 0x3ea   :  { %7587 = vmatpush.bf16.msrb.mxu2 %v15730_v13  ;;  %7574 = vmatpush.bf16.msrb.mxu0 %v15602_v34  ;;  %v7849_v13 = vpack.c.b16 %v7797_v25, %v7797_v25  ;;  %v18732_v34 = vld [vmem:[%s27866_s3 + $0x19ec] sm:$0xf0]  ;;  %v15682_v44 = vor.u32 %v18687_v28, %v15679_v23  ;;  %v15554_v22 = vor.u32 %v18655_v63, %v15551_v15  ;;  %v15947_v63 = vld [vmem:[%s27866_s3 + $0x1a40] sm:$0xf]  ;;  %v6390_v28 = vpop.f32.mrf.mxu2  ;;  %v15869_v15 = vld [vmem:[%s27866_s3 + $0x19b0] sm:$0xf0] }
 0x3eb   :  { %v15900_v36 = vor.u32 %v18732_v34, %v15899_v59  ;;  %v18748_v25 = vld [vmem:[%s27866_s3 + $0x1a6c] sm:$0xf0]  ;;  %v18742_v59 = vld [vmem:[%s27866_s3 + $0x1a44] sm:$0xf]  ;;  %v15949_v34 = vld [vmem:[%s27866_s3 + $0x1a50] sm:$0xf0] }
 0x3ec   :  { %v15964_v43 = vor.u32 %v18748_v25, %v15963_v21  ;;  %v15835_v21 = vld [vmem:[%s27866_s3 + $0x1960] sm:$0xf] }
 0x3ed   :  { %7562 = vmatpush.bf16.msrb.mxu3 %v15710_v24  ;;  %7549 = vmatpush.bf16.msrb.mxu1 %v15582_v37  ;;  %v15901_v24 = vld [vmem:[%s27866_s3 + $0x19f0] sm:$0xf0]  ;;  %v25076_v37 = vadd.f32 %v6388_v41, %v6375_v16  ;;  %v18728_v16 = vld [vmem:[%s27866_s3 + $0x19cc] sm:$0xf0]  ;;  %v6364_v38 = vpop.f32.mrf.mxu3  ;;  %v25134_v41 = vpop.f32.mrf.mxu1  ;;  %v15836_v28 = vor.u32 %v18716_v29, %v15835_v21  ;;  %v15803_v21 = vld [vmem:[%s27866_s3 + $0x1920] sm:$0xf] }
 0x3ee   :  { %7588 = vmatpush.bf16.msrb.mxu2 %v15714_v42  ;;  %7575 = vmatpush.bf16.msrb.mxu0 %v15586_v56  ;;  %v6377_v42 = vpop.f32.mrf.mxu0  ;;  %v7902_v56 = vsel %vm1177_vm3, %v7849_v13, 0  ;;  %v15904_v8 = vor.u32 %v18730_v7, %v15901_v24  ;;  %v18744_v13 = vld [vmem:[%s27866_s3 + $0x1a4c] sm:$0xf0]  ;;  %v15872_v7 = vor.u32 %v18722_v1, %v15869_v15  ;;  %v15851_v24 = vld [vmem:[%s27866_s3 + $0x1980] sm:$0xf] }
 0x3ef   :  { %v18720_v42 = vld [vmem:[%s27866_s3 + $0x198c] sm:$0xf0]  ;;  %v15837_v38 = vld [vmem:[%s27866_s3 + $0x1970] sm:$0xf0] }
 0x3f1   :  { %7563 = vmatpush.bf16.msrb.mxu3 %v15694_v40  ;;  %7550 = vmatpush.bf16.msrb.mxu1 %v15566_v47  ;;  %v7905_v40 = vsel %vm1177_vm3, %v7850_v50, 0  ;;  %v15965_v47 = vld [vmem:[%s27866_s3 + $0x1a70] sm:$0xf0]  ;;  %v15952_v50 = vor.u32 %v18742_v59, %v15949_v34  ;;  %v15819_v34 = vld [vmem:[%s27866_s3 + $0x1940] sm:$0xf] }
 0x3f2   :  { %7589 = vmatpush.bf16.msrb.mxu2 %v15698_v54  ;;  %7576 = vmatpush.bf16.msrb.mxu0 %v15570_v4  ;;  %v15884_v54 = vor.u32 %v18728_v16, %v15883_v45  ;;  %v18724_v4 = vld [vmem:[%s27866_s3 + $0x19ac] sm:$0xf0]  ;;  %v15968_v23 = vor.u32 %v18746_v48, %v15965_v47  ;;  %v15933_v45 = vld [vmem:[%s27866_s3 + $0x1a30] sm:$0xf0]  ;;  %v15852_v16 = vor.u32 %v18720_v42, %v15851_v24  ;;  %v18710_v24 = vld [vmem:[%s27866_s3 + $0x1944] sm:$0xf] }
 0x3f3   :  { %v15868_v60 = vor.u32 %v18724_v4, %v15867_v52  ;;  %v18736_v48 = vld [vmem:[%s27866_s3 + $0x1a0c] sm:$0xf0]  ;;  %v15907_v52 = vld [vmem:[%s27866_s3 + $0x19e8] sm:$0xf]  ;;  %v18733_v4 = vld [vmem:[%s27866_s3 + $0x19f4] sm:$0xf0] }
 0x3f4   :  { %v15821_v42 = vld [vmem:[%s27866_s3 + $0x1950] sm:$0xf0] }
 0x3f5   :  { %7564 = vmatpush.bf16.msrb.mxu3 %v15678_v18  ;;  %7551 = vmatpush.bf16.msrb.mxu1 %v15550_v6  ;;  %v15948_v18 = vor.u32 %v18744_v13, %v15947_v63  ;;  %v6678_v63 = vpop.f32.mrf.mxu1  ;;  %v15909_v13 = vld [vmem:[%s27866_s3 + $0x19f8] sm:$0xf0] }
 0x3f6   :  { %7590 = vmatpush.bf16.msrb.mxu2 %v15682_v44  ;;  %7577 = vmatpush.bf16.msrb.mxu0 %v15554_v22  ;;  %v25136_v6 = vpop.f32.mrf.mxu0  ;;  %v15931_v44 = vld [vmem:[%s27866_s3 + $0x1a20] sm:$0xf]  ;;  %v18740_v22 = vld [vmem:[%s27866_s3 + $0x1a2c] sm:$0xf0] }
 0x3f7   :  { %v15932_v25 = vor.u32 %v18740_v22, %v15931_v44  ;;  %v15784_v44 = vld [vmem:[%s27866_s3 + $0x1a88] sm:$0x33] }
 0x3f8   :  { %7552 = vmatmul.bf16.vlgmr.msrb.gmra.mxu1 %v21033_v58  ;;  %15733 = vmatmul.msk.bf16.vlgmr.msrb.gmra.mxu3 %vm1173_vm5, %v20957_v62  ;;  %v15891_v22 = vld [vmem:[%s27866_s3 + $0x19c8] sm:$0xf]  ;;  %v7800_v29 = vunpack.c.h.b16 %v15784_v44 }
 0x3f9   :  { %7913 = vmatpush.bf16.msra.mxu3 %v15900_v36  ;;  %7929 = vmatpush.bf16.msra.mxu1 %v7902_v56  ;;  %v18718_v36 = vld [vmem:[%s27866_s3 + $0x1984] sm:$0xf]  ;;  %v15853_v56 = vld [vmem:[%s27866_s3 + $0x1990] sm:$0xf0] }
 0x3fa   :  { %7939 = vmatpush.bf16.msra.mxu2 %v15904_v8  ;;  %7955 = vmatpush.bf16.msra.mxu0 %v7905_v40  ;;  %v18738_v8 = vld [vmem:[%s27866_s3 + $0x1a24] sm:$0xf]  ;;  %v15856_v46 = vor.u32 %v18718_v36, %v15853_v56  ;;  %v15915_v40 = vld [vmem:[%s27866_s3 + $0x1a00] sm:$0xf]  ;;  %v18729_v36 = vld [vmem:[%s27866_s3 + $0x19d4] sm:$0xf0] }
 0x3fb   :  { %7578 = vmatmul.bf16.vlgmr.msrb.gmra.mxu0 %v21033_v58  ;;  %15734 = vmatmul.msk.bf16.vlgmr.msrb.gmra.mxu2 %vm1173_vm5, %v20957_v62  ;;  %v15936_v47 = vor.u32 %v18738_v8, %v15933_v45  ;;  %v15916_v15 = vor.u32 %v18736_v48, %v15915_v40  ;;  %v18727_v8 = vld [vmem:[%s27866_s3 + $0x19cc] sm:$0xf]  ;;  %v15893_v45 = vld [vmem:[%s27866_s3 + $0x19d8] sm:$0xf0]  ;;  %v15892_v40 = vor.u32 %v18729_v36, %v15891_v22  ;;  %v18706_v48 = vld [vmem:[%s27866_s3 + $0x1924] sm:$0xf] }
 0x3fc   :  { %v18719_v36 = vld [vmem:[%s27866_s3 + $0x198c] sm:$0xf] }
 0x3fd   :  { %7914 = vmatpush.bf16.msra.mxu3 %v15884_v54  ;;  %7930 = vmatpush.bf16.msra.mxu1 %v15964_v43  ;;  %v18714_v54 = vld [vmem:[%s27866_s3 + $0x1964] sm:$0xf] }
 0x3fe   :  { %7940 = vmatpush.bf16.msra.mxu2 %v15888_v5  ;;  %7956 = vmatpush.bf16.msra.mxu0 %v15968_v23  ;;  %v18734_v43 = vld [vmem:[%s27866_s3 + $0x1a04] sm:$0xf]  ;;  %v15917_v5 = vld [vmem:[%s27866_s3 + $0x1a10] sm:$0xf0]  ;;  %v18731_v23 = vld [vmem:[%s27866_s3 + $0x19ec] sm:$0xf]  ;;  %v6704_v1 = vpop.f32.mrf.mxu0  ;;  %v15840_v59 = vor.u32 %v18714_v54, %v15837_v38  ;;  %v15896_v54 = vor.u32 %v18727_v8, %v15893_v45 }
 0x3ff   :  { %v15875_v38 = vld [vmem:[%s27866_s3 + $0x19a8] sm:$0xf]  ;;  %v6663_v63 = vpop.f32.mrf.mxu3 }
 0x401   :  { %7915 = vmatpush.bf16.msra.mxu3 %v15868_v60  ;;  %7931 = vmatpush.bf16.msra.mxu1 %v15948_v18  ;;  %v18712_v60 = vld [vmem:[%s27866_s3 + $0x194c] sm:$0xf0]  ;;  %v15920_v18 = vor.u32 %v18734_v43, %v15917_v5  ;;  %v18725_v43 = vld [vmem:[%s27866_s3 + $0x19b4] sm:$0xf0] }
 0x402   :  { %7941 = vmatpush.bf16.msra.mxu2 %v15872_v7  ;;  %7957 = vmatpush.bf16.msra.mxu0 %v15952_v50  ;;  %v15908_v7 = vor.u32 %v18733_v4, %v15907_v52  ;;  %v15912_v50 = vor.u32 %v18731_v23, %v15909_v13  ;;  %v15820_v56 = vor.u32 %v18712_v60, %v15819_v34  ;;  %v18723_v52 = vld [vmem:[%s27866_s3 + $0x19ac] sm:$0xf]  ;;  %v15877_v4 = vld [vmem:[%s27866_s3 + $0x19b8] sm:$0xf0]  ;;  %v15787_v23 = vld [vmem:[%s27866_s3 + $0x1900] sm:$0xf]  ;;  %v6689_v34 = vpop.f32.mrf.mxu2 }
 0x403   :  { %v18704_v13 = vld [vmem:[%s27866_s3 + $0x190c] sm:$0xf0]  ;;  %v15876_v60 = vor.u32 %v18725_v43, %v15875_v38 }
 0x404   :  { %v15788_v22 = vor.u32 %v18704_v13, %v15787_v23  ;;  %v18745_v23 = vld [vmem:[%s27866_s3 + $0x1a54] sm:$0xf0] }
 0x405   :  { %7916 = vmatpush.bf16.msra.mxu3 %v15852_v16  ;;  %7932 = vmatpush.bf16.msra.mxu1 %v15932_v25  ;;  %v15824_v16 = vor.u32 %v18710_v24, %v15821_v42  ;;  %v18708_v25 = vld [vmem:[%s27866_s3 + $0x192c] sm:$0xf0]  ;;  %v6690_v24 = vadd.f32 %v6689_v34, %v24945_v20  ;;  %v15880_v42 = vor.u32 %v18723_v52, %v15877_v4  ;;  %v15861_v20 = vld [vmem:[%s27866_s3 + $0x1998] sm:$0xf0]  ;;  %v18711_v34 = vld [vmem:[%s27866_s3 + $0x194c] sm:$0xf] }
 0x406   :  { %7942 = vmatpush.bf16.msra.mxu2 %v15856_v46  ;;  %7958 = vmatpush.bf16.msra.mxu0 %v15936_v47  ;;  %v7799_v46 = vunpack.c.l.b16 %v15784_v44  ;;  %v15805_v47 = vld [vmem:[%s27866_s3 + $0x1930] sm:$0xf0]  ;;  %v15804_v5 = vor.u32 %v18708_v25, %v15803_v21  ;;  %v15859_v44 = vld [vmem:[%s27866_s3 + $0x1988] sm:$0xf] }
 0x407   :  { %v15843_v21 = vld [vmem:[%s27866_s3 + $0x1968] sm:$0xf]  ;;  %v6665_v38 = vpop.f32.mrf.mxu3 }
 0x408   :  { %v7851_v1 = vpack.c.b16 %v7799_v46, %v7799_v46  ;;  %v15971_v25 = vld [vmem:[%s27866_s3 + $0x1a68] sm:$0xf]  ;;  %v15864_v46 = vor.u32 %v18719_v36, %v15861_v20  ;;  %v18737_v38 = vld [vmem:[%s27866_s3 + $0x1a14] sm:$0xf0] }
 0x409   :  { %7917 = vmatpush.bf16.msra.mxu3 %v15836_v28  ;;  %7933 = vmatpush.bf16.msra.mxu1 %v15916_v15  ;;  %v15808_v28 = vor.u32 %v18706_v48, %v15805_v47  ;;  %v7852_v15 = vpack.c.b16 %v7800_v29, %v7800_v29  ;;  %v18717_v29 = vld [vmem:[%s27866_s3 + $0x1974] sm:$0xf0]  ;;  %v15973_v48 = vld [vmem:[%s27866_s3 + $0x1a78] sm:$0xf0]  ;;  %v18715_v47 = vld [vmem:[%s27866_s3 + $0x196c] sm:$0xf] }
 0x40a   :  { %7943 = vmatpush.bf16.msra.mxu2 %v15840_v59  ;;  %7959 = vmatpush.bf16.msra.mxu0 %v15920_v18  ;;  %v6664_v59 = vadd.f32 %v6663_v63, %v24936_v33  ;;  %v18702_v18 = vld [vmem:[%s27866_s3 + $0x1904] sm:$0xf]  ;;  %v18721_v33 = vld [vmem:[%s27866_s3 + $0x1994] sm:$0xf0]  ;;  %v7908_v45 = vsel %vm1177_vm3, %v7851_v1, 0  ;;  %v15844_v52 = vor.u32 %v18717_v29, %v15843_v21 }
 0x40b   :  { %v15827_v63 = vld [vmem:[%s27866_s3 + $0x1948] sm:$0xf]  ;;  %v18713_v1 = vld [vmem:[%s27866_s3 + $0x1954] sm:$0xf0]  ;;  %v15941_v21 = vld [vmem:[%s27866_s3 + $0x1a38] sm:$0xf0] }
 0x40c   :  { %15977 = vmatmul.msk.bf16.vlgmr.msra.gmra.mxu1 %vm1173_vm5, %v21283_v26  ;;  %v15811_v36 = vld [vmem:[%s27866_s3 + $0x1928] sm:$0xf] }
 0x40d   :  { %7965 = vmatpush.bf16.msrb.mxu1 %v15908_v7  ;;  %7918 = vmatpush.bf16.msra.mxu3 %v15820_v56  ;;  %v15789_v7 = vld [vmem:[%s27866_s3 + $0x1910] sm:$0xf0]  ;;  %v25283_v56 = vadd.f32 %v25136_v6, %v6690_v24  ;;  %v18749_v6 = vld [vmem:[%s27866_s3 + $0x1a74] sm:$0xf0]  ;;  %v15939_v20 = vld [vmem:[%s27866_s3 + $0x1a28] sm:$0xf] }
 0x40e   :  { %7991 = vmatpush.bf16.msrb.mxu0 %v15912_v50  ;;  %7944 = vmatpush.bf16.msra.mxu2 %v15824_v16  ;;  %v25274_v50 = vadd.f32 %v25134_v41, %v6664_v59  ;;  %v15792_v8 = vor.u32 %v18702_v18, %v15789_v7  ;;  %v7911_v41 = vsel %vm1177_vm3, %v7852_v15, 0  ;;  %v15860_v16 = vor.u32 %v18721_v33, %v15859_v44  ;;  %v18743_v15 = vld [vmem:[%s27866_s3 + $0x1a4c] sm:$0xf]  ;;  %v15957_v59 = vld [vmem:[%s27866_s3 + $0x1a58] sm:$0xf0]  ;;  %v6715_v7 = vpop.f32.mrf.mxu1 }
 0x40f   :  { %15978 = vmatmul.msk.bf16.vlgmr.msra.gmra.mxu0 %vm1173_vm5, %v21283_v26  ;;  %v15972_v43 = vor.u32 %v18749_v6, %v15971_v25  ;;  %v16029_v18 = vld [vmem:[%s27866_s3 + $0x1c10] sm:$0x33]  ;;  %v15828_v33 = vor.u32 %v18713_v1, %v15827_v63  ;;  %v18707_v6 = vld [vmem:[%s27866_s3 + $0x192c] sm:$0xf]  ;;  %v15795_v29 = vld [vmem:[%s27866_s3 + $0x1908] sm:$0xf] }
 0x410   :  { %v6741_v44 = vpop.f32.mrf.mxu0  ;;  %v8218_v25 = vunpack.c.l.b16 %v16029_v18  ;;  %v15925_v63 = vld [vmem:[%s27866_s3 + $0x1a18] sm:$0xf0]  ;;  %v16145_v1 = vld [vmem:[%s27866_s3 + $0x1b70] sm:$0xf] }
 0x411   :  { %7966 = vmatpush.bf16.msrb.mxu1 %v15892_v40  ;;  %7919 = vmatpush.bf16.msra.mxu3 %v15804_v5  ;;  %v18747_v40 = vld [vmem:[%s27866_s3 + $0x1a6c] sm:$0xf]  ;;  %v6691_v5 = vpop.f32.mrf.mxu2 }
 0x412   :  { %7992 = vmatpush.bf16.msrb.mxu0 %v15896_v54  ;;  %7945 = vmatpush.bf16.msra.mxu2 %v15808_v28  ;;  %v15845_v54 = vld [vmem:[%s27866_s3 + $0x1978] sm:$0xf0]  ;;  %v15976_v4 = vor.u32 %v18747_v40, %v15973_v48  ;;  %v15955_v28 = vld [vmem:[%s27866_s3 + $0x1a48] sm:$0xf] }
 0x413   :  { %v15848_v13 = vor.u32 %v18715_v47, %v15845_v54  ;;  %v15956_v24 = vor.u32 %v18745_v23, %v15955_v28  ;;  %v18705_v47 = vld [vmem:[%s27866_s3 + $0x1914] sm:$0xf0]  ;;  %v15923_v54 = vld [vmem:[%s27866_s3 + $0x1a08] sm:$0xf]  ;;  %v8270_v28 = vpack.c.b16 %v8218_v25, %v8218_v25  ;;  %v6728_v23 = vpop.f32.mrf.mxu3  ;;  %v18796_v25 = vld [vmem:[%s27866_s3 + $0x1bfc] sm:$0xf0] }
 0x415   :  { %7967 = vmatpush.bf16.msrb.mxu1 %v15876_v60  ;;  %7920 = vmatpush.bf16.msra.mxu3 %v15788_v22  ;;  %v15829_v60 = vld [vmem:[%s27866_s3 + $0x1958] sm:$0xf0]  ;;  %v15960_v22 = vor.u32 %v18743_v15, %v15957_v59  ;;  %v18780_v15 = vld [vmem:[%s27866_s3 + $0x1b7c] sm:$0xf0] }
 0x416   :  { %7993 = vmatpush.bf16.msrb.mxu0 %v15880_v42  ;;  %7946 = vmatpush.bf16.msra.mxu2 %v15792_v8  ;;  %v6716_v42 = vadd.f32 %v6715_v7, %v25068_v39  ;;  %v18741_v8 = vld [vmem:[%s27866_s3 + $0x1a34] sm:$0xf0]  ;;  %v15924_v7 = vor.u32 %v18737_v38, %v15923_v54 }
 0x417   :  { %v18709_v39 = vld [vmem:[%s27866_s3 + $0x1934] sm:$0xf0] }
 0x418   :  { %7921 = vmatmul.bf16.vlgmr.msra.gmra.mxu3 %v21365_v10  ;;  %v15812_v40 = vor.u32 %v18709_v39, %v15811_v36  ;;  %v25396_v59 = vadd.f32 %v6728_v23, %v6716_v42  ;;  %v18770_v23 = vld [vmem:[%s27866_s3 + $0x1b34] sm:$0xf] }
 0x419   :  { %7981 = vmatpush.bf16.msrb.mxu3 %v7908_v45  ;;  %7968 = vmatpush.bf16.msrb.mxu1 %v15860_v16  ;;  %v6742_v45 = vadd.f32 %v6741_v44, %v25076_v37  ;;  %v18739_v16 = vld [vmem:[%s27866_s3 + $0x1a2c] sm:$0xf]  ;;  %v15813_v37 = vld [vmem:[%s27866_s3 + $0x1938] sm:$0xf0]  ;;  %v16147_v44 = vld [vmem:[%s27866_s3 + $0x1b80] sm:$0xf0] }
 0x41a   :  { %8007 = vmatpush.bf16.msrb.mxu2 %v7911_v41  ;;  %7994 = vmatpush.bf16.msrb.mxu0 %v15864_v46  ;;  %v15832_v41 = vor.u32 %v18711_v34, %v15829_v60  ;;  %v15940_v46 = vor.u32 %v18741_v8, %v15939_v20  ;;  %v15944_v48 = vor.u32 %v18739_v16, %v15941_v21  ;;  %v6754_v34 = vpop.f32.mrf.mxu2  ;;  %v6717_v60 = vpop.f32.mrf.mxu1  ;;  %v16129_v16 = vld [vmem:[%s27866_s3 + $0x1b50] sm:$0xf] }
 0x41b   :  { %7947 = vmatmul.bf16.vlgmr.msra.gmra.mxu2 %v21365_v10  ;;  %v15816_v5 = vor.u32 %v18707_v6, %v15813_v37  ;;  %v16146_v8 = vor.u32 %v18780_v15, %v16145_v1  ;;  %v16209_v21 = vld [vmem:[%s27866_s3 + $0x1bf0] sm:$0xf]  ;;  %v18774_v6 = vld [vmem:[%s27866_s3 + $0x1b54] sm:$0xf]  ;;  %v16131_v37 = vld [vmem:[%s27866_s3 + $0x1b60] sm:$0xf0] }
 0x41c   :  { %v16210_v54 = vor.u32 %v18796_v25, %v16209_v21  ;;  %v16134_v38 = vor.u32 %v18774_v6, %v16131_v37  ;;  %v18790_v1 = vld [vmem:[%s27866_s3 + $0x1bd4] sm:$0xf]  ;;  %v16195_v15 = vld [vmem:[%s27866_s3 + $0x1be0] sm:$0xf0]  ;;  %v16081_v21 = vld [vmem:[%s27866_s3 + $0x1af0] sm:$0xf] }
 0x41d   :  { %7982 = vmatpush.bf16.msrb.mxu3 %v15972_v43  ;;  %7969 = vmatpush.bf16.msrb.mxu1 %v15844_v52  ;;  %v8219_v43 = vunpack.c.h.b16 %v16029_v18  ;;  %v18703_v52 = vld [vmem:[%s27866_s3 + $0x190c] sm:$0xf]  ;;  %v15796_v18 = vor.u32 %v18705_v47, %v15795_v29  ;;  %v18794_v29 = vld [vmem:[%s27866_s3 + $0x1bf4] sm:$0xf]  ;;  %v6730_v47 = vpop.f32.mrf.mxu3  ;;  %v18764_v37 = vld [vmem:[%s27866_s3 + $0x1afc] sm:$0xf0] }
 0x41e   :  { %8008 = vmatpush.bf16.msrb.mxu2 %v15976_v4  ;;  %7995 = vmatpush.bf16.msrb.mxu0 %v15848_v13  ;;  %v18735_v4 = vld [vmem:[%s27866_s3 + $0x1a0c] sm:$0xf]  ;;  %v15797_v13 = vld [vmem:[%s27866_s3 + $0x1918] sm:$0xf0]  ;;  %v16083_v47 = vld [vmem:[%s27866_s3 + $0x1b00] sm:$0xf0] }
 0x41f   :  { %v15928_v42 = vor.u32 %v18735_v4, %v15925_v63  ;;  %v8271_v36 = vpack.c.b16 %v8219_v43, %v8219_v43  ;;  %v15800_v20 = vor.u32 %v18703_v52, %v15797_v13  ;;  %v16113_v43 = vld [vmem:[%s27866_s3 + $0x1b30] sm:$0xf]  ;;  %v16115_v13 = vld [vmem:[%s27866_s3 + $0x1b40] sm:$0xf0] }
 0x420   :  { %v16193_v52 = vld [vmem:[%s27866_s3 + $0x1bd0] sm:$0xf] }
 0x421   :  { %7983 = vmatpush.bf16.msrb.mxu3 %v15956_v24  ;;  %7970 = vmatpush.bf16.msrb.mxu1 %v15828_v33  ;;  %v18778_v24 = vld [vmem:[%s27866_s3 + $0x1b74] sm:$0xf]  ;;  %v25404_v33 = vadd.f32 %v6754_v34, %v6742_v45  ;;  %v18776_v45 = vld [vmem:[%s27866_s3 + $0x1b5c] sm:$0xf0] }
 0x422   :  { %8009 = vmatpush.bf16.msrb.mxu2 %v15960_v22  ;;  %7996 = vmatpush.bf16.msrb.mxu0 %v15832_v41  ;;  %v6743_v22 = vpop.f32.mrf.mxu0  ;;  %v8323_v41 = vsel %vm1177_vm3, %v8270_v28, 0  ;;  %v16150_v39 = vor.u32 %v18778_v24, %v16147_v44  ;;  %v6756_v4 = vpop.f32.mrf.mxu2  ;;  %v18792_v28 = vld [vmem:[%s27866_s3 + $0x1bdc] sm:$0xf0]  ;;  %v16118_v24 = vor.u32 %v18770_v23, %v16115_v13  ;;  %v16097_v44 = vld [vmem:[%s27866_s3 + $0x1b10] sm:$0xf] }
 0x423   :  { %v25462_v34 = vpop.f32.mrf.mxu1  ;;  %v18768_v22 = vld [vmem:[%s27866_s3 + $0x1b1c] sm:$0xf0]  ;;  %v16082_v4 = vor.u32 %v18764_v37, %v16081_v21  ;;  %v16049_v21 = vld [vmem:[%s27866_s3 + $0x1ab0] sm:$0xf] }
 0x425   :  { %7984 = vmatpush.bf16.msrb.mxu3 %v15940_v46  ;;  %7971 = vmatpush.bf16.msrb.mxu1 %v15812_v40  ;;  %v8326_v46 = vsel %vm1177_vm3, %v8271_v36, 0  ;;  %v16211_v40 = vld [vmem:[%s27866_s3 + $0x1c00] sm:$0xf0]  ;;  %v16198_v36 = vor.u32 %v18790_v1, %v16195_v15  ;;  %v16065_v15 = vld [vmem:[%s27866_s3 + $0x1ad0] sm:$0xf] }
 0x426   :  { %8010 = vmatpush.bf16.msrb.mxu2 %v15944_v48  ;;  %7997 = vmatpush.bf16.msrb.mxu0 %v15816_v5  ;;  %v16130_v48 = vor.u32 %v18776_v45, %v16129_v16  ;;  %v18772_v5 = vld [vmem:[%s27866_s3 + $0x1b3c] sm:$0xf0]  ;;  %v16214_v63 = vor.u32 %v18794_v29, %v16211_v40  ;;  %v16179_v16 = vld [vmem:[%s27866_s3 + $0x1bc0] sm:$0xf0]  ;;  %v16098_v45 = vor.u32 %v18768_v22, %v16097_v44  ;;  %v18758_v44 = vld [vmem:[%s27866_s3 + $0x1ad4] sm:$0xf] }
 0x427   :  { %v16114_v60 = vor.u32 %v18772_v5, %v16113_v43  ;;  %v18784_v29 = vld [vmem:[%s27866_s3 + $0x1b9c] sm:$0xf0]  ;;  %v16153_v43 = vld [vmem:[%s27866_s3 + $0x1b78] sm:$0xf]  ;;  %v18781_v5 = vld [vmem:[%s27866_s3 + $0x1b84] sm:$0xf0] }
 0x428   :  { %v16067_v22 = vld [vmem:[%s27866_s3 + $0x1ae0] sm:$0xf0] }
 0x429   :  { %7985 = vmatpush.bf16.msrb.mxu3 %v15924_v7  ;;  %7972 = vmatpush.bf16.msrb.mxu1 %v15796_v18  ;;  %v16194_v7 = vor.u32 %v18792_v28, %v16193_v52  ;;  %v16155_v28 = vld [vmem:[%s27866_s3 + $0x1b88] sm:$0xf0] }
 0x42a   :  { %8011 = vmatpush.bf16.msrb.mxu2 %v15928_v42  ;;  %7998 = vmatpush.bf16.msrb.mxu0 %v15800_v20  ;;  %v25464_v18 = vpop.f32.mrf.mxu0  ;;  %v16177_v42 = vld [vmem:[%s27866_s3 + $0x1bb0] sm:$0xf]  ;;  %v18788_v20 = vld [vmem:[%s27866_s3 + $0x1bbc] sm:$0xf0] }
 0x42b   :  { %v16178_v25 = vor.u32 %v18788_v20, %v16177_v42  ;;  %v7095_v52 = vpop.f32.mrf.mxu1  ;;  %v16030_v42 = vld [vmem:[%s27866_s3 + $0x1c18] sm:$0x33] }
 0x42c   :  { %7973 = vmatmul.bf16.vlgmr.msrb.gmra.mxu1 %v21365_v10  ;;  %15979 = vmatmul.msk.bf16.vlgmr.msrb.gmra.mxu3 %vm1173_vm5, %v21283_v26  ;;  %v16137_v20 = vld [vmem:[%s27866_s3 + $0x1b58] sm:$0xf]  ;;  %v8221_v37 = vunpack.c.h.b16 %v16030_v42 }
 0x42d   :  { %8334 = vmatpush.bf16.msra.mxu3 %v16146_v8  ;;  %8350 = vmatpush.bf16.msra.mxu1 %v8323_v41  ;;  %v18766_v8 = vld [vmem:[%s27866_s3 + $0x1b14] sm:$0xf]  ;;  %v16099_v41 = vld [vmem:[%s27866_s3 + $0x1b20] sm:$0xf0] }
 0x42e   :  { %8360 = vmatpush.bf16.msra.mxu2 %v16150_v39  ;;  %8376 = vmatpush.bf16.msra.mxu0 %v8326_v46  ;;  %v18786_v39 = vld [vmem:[%s27866_s3 + $0x1bb4] sm:$0xf]  ;;  %v16102_v6 = vor.u32 %v18766_v8, %v16099_v41  ;;  %v16161_v46 = vld [vmem:[%s27866_s3 + $0x1b90] sm:$0xf]  ;;  %v18777_v8 = vld [vmem:[%s27866_s3 + $0x1b64] sm:$0xf0] }
 0x42f   :  { %7999 = vmatmul.bf16.vlgmr.msrb.gmra.mxu0 %v21365_v10  ;;  %15980 = vmatmul.msk.bf16.vlgmr.msrb.gmra.mxu2 %vm1173_vm5, %v21283_v26  ;;  %v16182_v40 = vor.u32 %v18786_v39, %v16179_v16  ;;  %v16162_v13 = vor.u32 %v18784_v29, %v16161_v46  ;;  %v18775_v39 = vld [vmem:[%s27866_s3 + $0x1b5c] sm:$0xf]  ;;  %v16139_v16 = vld [vmem:[%s27866_s3 + $0x1b68] sm:$0xf0]  ;;  %v16138_v46 = vor.u32 %v18777_v8, %v16137_v20  ;;  %v18754_v29 = vld [vmem:[%s27866_s3 + $0x1ab4] sm:$0xf] }
 0x430   :  { %v18767_v8 = vld [vmem:[%s27866_s3 + $0x1b1c] sm:$0xf] }
 0x431   :  { %8335 = vmatpush.bf16.msra.mxu3 %v16130_v48  ;;  %8351 = vmatpush.bf16.msra.mxu1 %v16210_v54  ;;  %v18762_v48 = vld [vmem:[%s27866_s3 + $0x1af4] sm:$0xf] }
 0x432   :  { %8361 = vmatpush.bf16.msra.mxu2 %v16134_v38  ;;  %8377 = vmatpush.bf16.msra.mxu0 %v16214_v63  ;;  %v18782_v54 = vld [vmem:[%s27866_s3 + $0x1b94] sm:$0xf]  ;;  %v16163_v38 = vld [vmem:[%s27866_s3 + $0x1ba0] sm:$0xf0]  ;;  %v18779_v63 = vld [vmem:[%s27866_s3 + $0x1b7c] sm:$0xf]  ;;  %v7121_v23 = vpop.f32.mrf.mxu0  ;;  %v16086_v1 = vor.u32 %v18762_v48, %v16083_v47  ;;  %v16142_v48 = vor.u32 %v18775_v39, %v16139_v16 }
 0x433   :  { %v16121_v47 = vld [vmem:[%s27866_s3 + $0x1b38] sm:$0xf]  ;;  %v7080_v52 = vpop.f32.mrf.mxu3 }
 0x435   :  { %8336 = vmatpush.bf16.msra.mxu3 %v16114_v60  ;;  %8352 = vmatpush.bf16.msra.mxu1 %v16194_v7  ;;  %v18760_v60 = vld [vmem:[%s27866_s3 + $0x1adc] sm:$0xf0]  ;;  %v16166_v7 = vor.u32 %v18782_v54, %v16163_v38  ;;  %v18773_v54 = vld [vmem:[%s27866_s3 + $0x1b44] sm:$0xf0] }
 0x436   :  { %8362 = vmatpush.bf16.msra.mxu2 %v16118_v24  ;;  %8378 = vmatpush.bf16.msra.mxu0 %v16198_v36  ;;  %v16154_v24 = vor.u32 %v18781_v5, %v16153_v43  ;;  %v16158_v36 = vor.u32 %v18779_v63, %v16155_v28  ;;  %v16066_v41 = vor.u32 %v18760_v60, %v16065_v15  ;;  %v18771_v43 = vld [vmem:[%s27866_s3 + $0x1b3c] sm:$0xf]  ;;  %v16123_v5 = vld [vmem:[%s27866_s3 + $0x1b48] sm:$0xf0]  ;;  %v16033_v63 = vld [vmem:[%s27866_s3 + $0x1a90] sm:$0xf]  ;;  %v7106_v15 = vpop.f32.mrf.mxu2 }
 0x437   :  { %v18752_v28 = vld [vmem:[%s27866_s3 + $0x1a9c] sm:$0xf0]  ;;  %v16122_v60 = vor.u32 %v18773_v54, %v16121_v47 }
 0x438   :  { %v16034_v20 = vor.u32 %v18752_v28, %v16033_v63  ;;  %v18793_v63 = vld [vmem:[%s27866_s3 + $0x1be4] sm:$0xf0] }
 0x439   :  { %8337 = vmatpush.bf16.msra.mxu3 %v16098_v45  ;;  %8353 = vmatpush.bf16.msra.mxu1 %v16178_v25  ;;  %v16070_v45 = vor.u32 %v18758_v44, %v16067_v22  ;;  %v18756_v25 = vld [vmem:[%s27866_s3 + $0x1abc] sm:$0xf0]  ;;  %v7120_v44 = vadd.f32 %v25464_v18, %v7106_v15  ;;  %v16126_v22 = vor.u32 %v18771_v43, %v16123_v5  ;;  %v16107_v18 = vld [vmem:[%s27866_s3 + $0x1b28] sm:$0xf0]  ;;  %v18759_v15 = vld [vmem:[%s27866_s3 + $0x1adc] sm:$0xf] }
 0x43a   :  { %8363 = vmatpush.bf16.msra.mxu2 %v16102_v6  ;;  %8379 = vmatpush.bf16.msra.mxu0 %v16182_v40  ;;  %v8220_v6 = vunpack.c.l.b16 %v16030_v42  ;;  %v16051_v40 = vld [vmem:[%s27866_s3 + $0x1ac0] sm:$0xf0]  ;;  %v16050_v38 = vor.u32 %v18756_v25, %v16049_v21  ;;  %v16105_v42 = vld [vmem:[%s27866_s3 + $0x1b18] sm:$0xf] }
 0x43b   :  { %v16089_v21 = vld [vmem:[%s27866_s3 + $0x1af8] sm:$0xf]  ;;  %v7082_v47 = vpop.f32.mrf.mxu3 }
 0x43c   :  { %v8272_v23 = vpack.c.b16 %v8220_v6, %v8220_v6  ;;  %v16217_v25 = vld [vmem:[%s27866_s3 + $0x1bf8] sm:$0xf]  ;;  %v16110_v6 = vor.u32 %v18767_v8, %v16107_v18  ;;  %v18789_v18 = vld [vmem:[%s27866_s3 + $0x1bc4] sm:$0xf0] }
 0x43d   :  { %8338 = vmatpush.bf16.msra.mxu3 %v16082_v4  ;;  %8354 = vmatpush.bf16.msra.mxu1 %v16162_v13  ;;  %v16054_v4 = vor.u32 %v18754_v29, %v16051_v40  ;;  %v8273_v13 = vpack.c.b16 %v8221_v37, %v8221_v37  ;;  %v18765_v37 = vld [vmem:[%s27866_s3 + $0x1b04] sm:$0xf0]  ;;  %v16219_v29 = vld [vmem:[%s27866_s3 + $0x1c08] sm:$0xf0]  ;;  %v18763_v40 = vld [vmem:[%s27866_s3 + $0x1afc] sm:$0xf] }
 0x43e   :  { %8364 = vmatpush.bf16.msra.mxu2 %v16086_v1  ;;  %8380 = vmatpush.bf16.msra.mxu0 %v16166_v7  ;;  %v7094_v1 = vadd.f32 %v25462_v34, %v7080_v52  ;;  %v18750_v7 = vld [vmem:[%s27866_s3 + $0x1a94] sm:$0xf]  ;;  %v18769_v34 = vld [vmem:[%s27866_s3 + $0x1b24] sm:$0xf0]  ;;  %v8329_v16 = vsel %vm1177_vm3, %v8272_v23, 0  ;;  %v16090_v43 = vor.u32 %v18765_v37, %v16089_v21 }
 0x43f   :  { %v16073_v52 = vld [vmem:[%s27866_s3 + $0x1ad8] sm:$0xf]  ;;  %v18761_v23 = vld [vmem:[%s27866_s3 + $0x1ae4] sm:$0xf0] }
 0x440   :  { %16223 = vmatmul.msk.bf16.vlgmr.msra.gmra.mxu1 %vm1173_vm5, %v21617_v14  ;;  %v16185_v8 = vld [vmem:[%s27866_s3 + $0x1bb8] sm:$0xf]  ;;  %v18785_v47 = vld [vmem:[%s27866_s3 + $0x1ba4] sm:$0xf0] }
 0x441   :  { %8386 = vmatpush.bf16.msrb.mxu1 %v16154_v24  ;;  %8339 = vmatpush.bf16.msra.mxu3 %v16066_v41  ;;  %v16035_v24 = vld [vmem:[%s27866_s3 + $0x1aa0] sm:$0xf0]  ;;  %v25611_v41 = vadd.f32 %v7120_v44, %v25283_v56  ;;  %v18797_v56 = vld [vmem:[%s27866_s3 + $0x1c04] sm:$0xf0]  ;;  %v16041_v37 = vld [vmem:[%s27866_s3 + $0x1a98] sm:$0xf] }
 0x442   :  { %8412 = vmatpush.bf16.msrb.mxu0 %v16158_v36  ;;  %8365 = vmatpush.bf16.msra.mxu2 %v16070_v45  ;;  %v25602_v36 = vadd.f32 %v7094_v1, %v25274_v50  ;;  %v16038_v39 = vor.u32 %v18750_v7, %v16035_v24  ;;  %v8332_v50 = vsel %vm1177_vm3, %v8273_v13, 0  ;;  %v16106_v45 = vor.u32 %v18769_v34, %v16105_v42  ;;  %v18791_v13 = vld [vmem:[%s27866_s3 + $0x1bdc] sm:$0xf]  ;;  %v16203_v1 = vld [vmem:[%s27866_s3 + $0x1be8] sm:$0xf0]  ;;  %v7132_v24 = vpop.f32.mrf.mxu1 }
 0x443   :  { %16224 = vmatmul.msk.bf16.vlgmr.msra.gmra.mxu0 %vm1173_vm5, %v21617_v14  ;;  %v16218_v54 = vor.u32 %v18797_v56, %v16217_v25  ;;  %v16325_v7 = vld [vmem:[%s27866_s3 + $0x1f30] sm:$0x33]  ;;  %v16074_v42 = vor.u32 %v18761_v23, %v16073_v52  ;;  %v16206_v34 = vor.u32 %v18791_v13, %v16203_v1  ;;  %v18755_v25 = vld [vmem:[%s27866_s3 + $0x1abc] sm:$0xf]  ;;  %v16059_v56 = vld [vmem:[%s27866_s3 + $0x1ac8] sm:$0xf0] }
 0x444   :  { %v8694_v21 = vunpack.c.l.b16 %v16325_v7  ;;  %v16171_v52 = vld [vmem:[%s27866_s3 + $0x1ba8] sm:$0xf0]  ;;  %v16441_v23 = vld [vmem:[%s27866_s3 + $0x1e90] sm:$0xf]  ;;  %v18876_v13 = vld [vmem:[%s27866_s3 + $0x1e9c] sm:$0xf0] }
 0x445   :  { %8387 = vmatpush.bf16.msrb.mxu1 %v16138_v46  ;;  %8340 = vmatpush.bf16.msra.mxu3 %v16050_v38  ;;  %v18795_v46 = vld [vmem:[%s27866_s3 + $0x1bfc] sm:$0xf]  ;;  %v7108_v38 = vpop.f32.mrf.mxu2 }
 0x446   :  { %8413 = vmatpush.bf16.msrb.mxu0 %v16142_v48  ;;  %8366 = vmatpush.bf16.msra.mxu2 %v16054_v4  ;;  %v16091_v48 = vld [vmem:[%s27866_s3 + $0x1b08] sm:$0xf0]  ;;  %v16222_v5 = vor.u32 %v18795_v46, %v16219_v29  ;;  %v16201_v4 = vld [vmem:[%s27866_s3 + $0x1bd8] sm:$0xf]  ;;  %v16062_v38 = vor.u32 %v18755_v25, %v16059_v56  ;;  %v18872_v56 = vld [vmem:[%s27866_s3 + $0x1e7c] sm:$0xf0] }
 0x447   :  { %v16094_v28 = vor.u32 %v18763_v40, %v16091_v48  ;;  %v16202_v44 = vor.u32 %v18793_v63, %v16201_v4  ;;  %v18753_v40 = vld [vmem:[%s27866_s3 + $0x1aa4] sm:$0xf0]  ;;  %v16169_v48 = vld [vmem:[%s27866_s3 + $0x1b98] sm:$0xf]  ;;  %v8746_v4 = vpack.c.b16 %v8694_v21, %v8694_v21  ;;  %v7145_v63 = vpop.f32.mrf.mxu3 }
 0x448   :  { %v7146_v1 = vadd.f32 %v7145_v63, %v7132_v24 }
 0x449   :  { %8388 = vmatpush.bf16.msrb.mxu1 %v16122_v60  ;;  %8341 = vmatpush.bf16.msra.mxu3 %v16034_v20  ;;  %v16075_v60 = vld [vmem:[%s27866_s3 + $0x1ae8] sm:$0xf0]  ;;  %v16057_v20 = vld [vmem:[%s27866_s3 + $0x1ab8] sm:$0xf] }
 0x44a   :  { %8414 = vmatpush.bf16.msrb.mxu0 %v16126_v22  ;;  %8367 = vmatpush.bf16.msra.mxu2 %v16038_v39  ;;  %v7158_v22 = vpop.f32.mrf.mxu0  ;;  %v16078_v39 = vor.u32 %v18759_v15, %v16075_v60  ;;  %v7134_v60 = vpop.f32.mrf.mxu1  ;;  %v25729_v24 = vadd.f32 %v7146_v1, %v25396_v59  ;;  %v16505_v59 = vld [vmem:[%s27866_s3 + $0x1f10] sm:$0xf]  ;;  %v18886_v1 = vld [vmem:[%s27866_s3 + $0x1ef4] sm:$0xf] }
 0x44c   :  { %8342 = vmatmul.bf16.vlgmr.msra.gmra.mxu3 %v21701_v35 }
 0x44d   :  { %8402 = vmatpush.bf16.msrb.mxu3 %v8329_v16  ;;  %8389 = vmatpush.bf16.msrb.mxu1 %v16106_v45  ;;  %v18757_v16 = vld [vmem:[%s27866_s3 + $0x1ac4] sm:$0xf0]  ;;  %v16187_v45 = vld [vmem:[%s27866_s3 + $0x1bc8] sm:$0xf0]  ;;  %v7171_v15 = vpop.f32.mrf.mxu2 }
 0x44e   :  { %8428 = vmatpush.bf16.msrb.mxu2 %v8332_v50  ;;  %8415 = vmatpush.bf16.msrb.mxu0 %v16110_v6  ;;  %v18787_v50 = vld [vmem:[%s27866_s3 + $0x1bbc] sm:$0xf]  ;;  %v16186_v6 = vor.u32 %v18789_v18, %v16185_v8  ;;  %v16058_v46 = vor.u32 %v18757_v16, %v16057_v20  ;;  %v7172_v20 = vadd.f32 %v7171_v15, %v7158_v22  ;;  %v16425_v22 = vld [vmem:[%s27866_s3 + $0x1e70] sm:$0xf]  ;;  %v16491_v15 = vld [vmem:[%s27866_s3 + $0x1f00] sm:$0xf0] }
 0x44f   :  { %8368 = vmatmul.bf16.vlgmr.msra.gmra.mxu2 %v21701_v35  ;;  %v16190_v29 = vor.u32 %v18787_v50, %v16187_v45  ;;  %v16442_v50 = vor.u32 %v18876_v13, %v16441_v23  ;;  %v8799_v45 = vsel %vm1177_vm3, %v8746_v4, 0  ;;  %v18866_v23 = vld [vmem:[%s27866_s3 + $0x1e54] sm:$0xf]  ;;  %v16411_v13 = vld [vmem:[%s27866_s3 + $0x1e60] sm:$0xf0] }
 0x450   :  { %v25733_v21 = vadd.f32 %v7172_v20, %v25404_v33  ;;  %v18870_v33 = vld [vmem:[%s27866_s3 + $0x1e74] sm:$0xf]  ;;  %v16393_v20 = vld [vmem:[%s27866_s3 + $0x1e30] sm:$0xf] }
 0x451   :  { %8403 = vmatpush.bf16.msrb.mxu3 %v16218_v54  ;;  %8390 = vmatpush.bf16.msrb.mxu1 %v16090_v43  ;;  %v8695_v54 = vunpack.c.h.b16 %v16325_v7  ;;  %v18751_v43 = vld [vmem:[%s27866_s3 + $0x1a9c] sm:$0xf]  ;;  %v16042_v7 = vor.u32 %v18753_v40, %v16041_v37  ;;  %v16427_v37 = vld [vmem:[%s27866_s3 + $0x1e80] sm:$0xf0] }
 0x452   :  { %8429 = vmatpush.bf16.msrb.mxu2 %v16222_v5  ;;  %8416 = vmatpush.bf16.msrb.mxu0 %v16094_v28  ;;  %v18783_v5 = vld [vmem:[%s27866_s3 + $0x1b9c] sm:$0xf]  ;;  %v16043_v28 = vld [vmem:[%s27866_s3 + $0x1aa8] sm:$0xf0]  ;;  %v7160_v8 = vpop.f32.mrf.mxu0  ;;  %v16507_v40 = vld [vmem:[%s27866_s3 + $0x1f20] sm:$0xf0] }
 0x453   :  { %v16174_v18 = vor.u32 %v18783_v5, %v16171_v52  ;;  %v16046_v16 = vor.u32 %v18751_v43, %v16043_v28  ;;  %v16409_v43 = vld [vmem:[%s27866_s3 + $0x1e50] sm:$0xf]  ;;  %v18868_v5 = vld [vmem:[%s27866_s3 + $0x1e5c] sm:$0xf0] }
 0x454   :  { %v16489_v52 = vld [vmem:[%s27866_s3 + $0x1ef0] sm:$0xf]  ;;  %v18888_v28 = vld [vmem:[%s27866_s3 + $0x1efc] sm:$0xf0] }
 0x455   :  { %8404 = vmatpush.bf16.msrb.mxu3 %v16202_v44  ;;  %8391 = vmatpush.bf16.msrb.mxu1 %v16074_v42  ;;  %v16170_v44 = vor.u32 %v18785_v47, %v16169_v48  ;;  %v18874_v42 = vld [vmem:[%s27866_s3 + $0x1e94] sm:$0xf]  ;;  %v16426_v48 = vor.u32 %v18872_v56, %v16425_v22  ;;  %v7147_v47 = vpop.f32.mrf.mxu3  ;;  %v7173_v4 = vpop.f32.mrf.mxu2  ;;  %v18864_v8 = vld [vmem:[%s27866_s3 + $0x1e3c] sm:$0xf0]  ;;  %v16475_v22 = vld [vmem:[%s27866_s3 + $0x1ee0] sm:$0xf0] }
 0x456   :  { %8430 = vmatpush.bf16.msrb.mxu2 %v16206_v34  ;;  %8417 = vmatpush.bf16.msrb.mxu0 %v16078_v39  ;;  %v16443_v34 = vld [vmem:[%s27866_s3 + $0x1ea0] sm:$0xf0]  ;;  %v8747_v39 = vpack.c.b16 %v8695_v54, %v8695_v54  ;;  %v25790_v60 = vpop.f32.mrf.mxu1  ;;  %v16394_v56 = vor.u32 %v18864_v8, %v16393_v20  ;;  %v18854_v20 = vld [vmem:[%s27866_s3 + $0x1df4] sm:$0xf] }
 0x457   :  { %v16446_v25 = vor.u32 %v18874_v42, %v16443_v34  ;;  %v16490_v42 = vor.u32 %v18888_v28, %v16489_v52  ;;  %v16414_v34 = vor.u32 %v18866_v23, %v16411_v13  ;;  %v16379_v47 = vld [vmem:[%s27866_s3 + $0x1e20] sm:$0xf0]  ;;  %v16451_v28 = vld [vmem:[%s27866_s3 + $0x1ea8] sm:$0xf0] }
 0x458   :  { %v16363_v8 = vld [vmem:[%s27866_s3 + $0x1e00] sm:$0xf0] }
 0x459   :  { %8405 = vmatpush.bf16.msrb.mxu3 %v16186_v6  ;;  %8392 = vmatpush.bf16.msrb.mxu1 %v16058_v46  ;;  %v18892_v6 = vld [vmem:[%s27866_s3 + $0x1f1c] sm:$0xf0]  ;;  %v8802_v46 = vsel %vm1177_vm3, %v8747_v39, 0  ;;  %v16494_v39 = vor.u32 %v18886_v1, %v16491_v15  ;;  %v16361_v15 = vld [vmem:[%s27866_s3 + $0x1df0] sm:$0xf] }
 0x45a   :  { %8431 = vmatpush.bf16.msrb.mxu2 %v16190_v29  ;;  %8418 = vmatpush.bf16.msrb.mxu0 %v16062_v38  ;;  %v18890_v29 = vld [vmem:[%s27866_s3 + $0x1f14] sm:$0xf]  ;;  %v16506_v54 = vor.u32 %v18892_v6, %v16505_v59  ;;  %v16430_v38 = vor.u32 %v18870_v33, %v16427_v37  ;;  %v16377_v59 = vld [vmem:[%s27866_s3 + $0x1e10] sm:$0xf]  ;;  %v18860_v37 = vld [vmem:[%s27866_s3 + $0x1e1c] sm:$0xf0] }
 0x45b   :  { %v16510_v63 = vor.u32 %v18890_v29, %v16507_v40  ;;  %v18880_v29 = vld [vmem:[%s27866_s3 + $0x1ebc] sm:$0xf0]  ;;  %v16378_v4 = vor.u32 %v18860_v37, %v16377_v59  ;;  %v16345_v59 = vld [vmem:[%s27866_s3 + $0x1dd0] sm:$0xf] }
 0x45d   :  { %8406 = vmatpush.bf16.msrb.mxu3 %v16170_v44  ;;  %8393 = vmatpush.bf16.msrb.mxu1 %v16042_v7  ;;  %v16410_v7 = vor.u32 %v18868_v5, %v16409_v43  ;;  %v25792_v44 = vpop.f32.mrf.mxu0  ;;  %v16449_v43 = vld [vmem:[%s27866_s3 + $0x1e98] sm:$0xf]  ;;  %v18877_v5 = vld [vmem:[%s27866_s3 + $0x1ea4] sm:$0xf0] }
 0x45e   :  { %8432 = vmatpush.bf16.msrb.mxu2 %v16174_v18  ;;  %8419 = vmatpush.bf16.msrb.mxu0 %v16046_v16  ;;  %v16473_v18 = vld [vmem:[%s27866_s3 + $0x1ed0] sm:$0xf]  ;;  %v18884_v16 = vld [vmem:[%s27866_s3 + $0x1edc] sm:$0xf0]  ;;  %v7516_v52 = vpop.f32.mrf.mxu1 }
 0x45f   :  { %v16474_v6 = vor.u32 %v18884_v16, %v16473_v18  ;;  %v16326_v18 = vld [vmem:[%s27866_s3 + $0x1f38] sm:$0x33] }
 0x460   :  { %8394 = vmatmul.bf16.vlgmr.msrb.gmra.mxu1 %v21701_v35  ;;  %16225 = vmatmul.msk.bf16.vlgmr.msrb.gmra.mxu3 %vm1173_vm5, %v21617_v14  ;;  %v16433_v16 = vld [vmem:[%s27866_s3 + $0x1e78] sm:$0xf]  ;;  %v8697_v37 = vunpack.c.h.b16 %v16326_v18 }
 0x461   :  { %8810 = vmatpush.bf16.msra.mxu3 %v16442_v50  ;;  %8826 = vmatpush.bf16.msra.mxu1 %v8799_v45  ;;  %v18862_v50 = vld [vmem:[%s27866_s3 + $0x1e34] sm:$0xf]  ;;  %v16395_v45 = vld [vmem:[%s27866_s3 + $0x1e40] sm:$0xf0] }
 0x462   :  { %8836 = vmatpush.bf16.msra.mxu2 %v16446_v25  ;;  %8852 = vmatpush.bf16.msra.mxu0 %v8802_v46  ;;  %v18882_v25 = vld [vmem:[%s27866_s3 + $0x1ed4] sm:$0xf]  ;;  %v16398_v33 = vor.u32 %v18862_v50, %v16395_v45  ;;  %v16457_v46 = vld [vmem:[%s27866_s3 + $0x1eb0] sm:$0xf]  ;;  %v18873_v50 = vld [vmem:[%s27866_s3 + $0x1e84] sm:$0xf0] }
 0x463   :  { %8420 = vmatmul.bf16.vlgmr.msrb.gmra.mxu0 %v21701_v35  ;;  %16226 = vmatmul.msk.bf16.vlgmr.msrb.gmra.mxu2 %vm1173_vm5, %v21617_v14  ;;  %v16478_v40 = vor.u32 %v18882_v25, %v16475_v22  ;;  %v16458_v13 = vor.u32 %v18880_v29, %v16457_v46  ;;  %v18871_v25 = vld [vmem:[%s27866_s3 + $0x1e7c] sm:$0xf]  ;;  %v16435_v22 = vld [vmem:[%s27866_s3 + $0x1e88] sm:$0xf0]  ;;  %v16434_v46 = vor.u32 %v18873_v50, %v16433_v16  ;;  %v18850_v29 = vld [vmem:[%s27866_s3 + $0x1dd4] sm:$0xf] }
 0x464   :  { %v18863_v50 = vld [vmem:[%s27866_s3 + $0x1e3c] sm:$0xf] }
 0x465   :  { %8811 = vmatpush.bf16.msra.mxu3 %v16426_v48  ;;  %8827 = vmatpush.bf16.msra.mxu1 %v16506_v54  ;;  %v18858_v48 = vld [vmem:[%s27866_s3 + $0x1e14] sm:$0xf]  ;;  %v7542_v23 = vpop.f32.mrf.mxu0 }
 0x466   :  { %8837 = vmatpush.bf16.msra.mxu2 %v16430_v38  ;;  %8853 = vmatpush.bf16.msra.mxu0 %v16510_v63  ;;  %v18878_v54 = vld [vmem:[%s27866_s3 + $0x1eb4] sm:$0xf]  ;;  %v16459_v38 = vld [vmem:[%s27866_s3 + $0x1ec0] sm:$0xf0]  ;;  %v18875_v63 = vld [vmem:[%s27866_s3 + $0x1e9c] sm:$0xf]  ;;  %v16382_v1 = vor.u32 %v18858_v48, %v16379_v47  ;;  %v16438_v48 = vor.u32 %v18871_v25, %v16435_v22 }
 0x467   :  { %v16417_v47 = vld [vmem:[%s27866_s3 + $0x1e58] sm:$0xf]  ;;  %v7501_v52 = vpop.f32.mrf.mxu3 }
 0x469   :  { %8812 = vmatpush.bf16.msra.mxu3 %v16410_v7  ;;  %8828 = vmatpush.bf16.msra.mxu1 %v16490_v42  ;;  %v18856_v7 = vld [vmem:[%s27866_s3 + $0x1dfc] sm:$0xf0]  ;;  %v16462_v42 = vor.u32 %v18878_v54, %v16459_v38  ;;  %v18869_v54 = vld [vmem:[%s27866_s3 + $0x1e64] sm:$0xf0] }
 0x46a   :  { %8838 = vmatpush.bf16.msra.mxu2 %v16414_v34  ;;  %8854 = vmatpush.bf16.msra.mxu0 %v16494_v39  ;;  %v16450_v34 = vor.u32 %v18877_v5, %v16449_v43  ;;  %v16454_v39 = vor.u32 %v18875_v63, %v16451_v28  ;;  %v16362_v45 = vor.u32 %v18856_v7, %v16361_v15  ;;  %v18867_v43 = vld [vmem:[%s27866_s3 + $0x1e5c] sm:$0xf]  ;;  %v16419_v5 = vld [vmem:[%s27866_s3 + $0x1e68] sm:$0xf0]  ;;  %v16329_v63 = vld [vmem:[%s27866_s3 + $0x1db0] sm:$0xf]  ;;  %v7527_v15 = vpop.f32.mrf.mxu2 }
 0x46b   :  { %v18848_v28 = vld [vmem:[%s27866_s3 + $0x1dbc] sm:$0xf0]  ;;  %v16418_v7 = vor.u32 %v18869_v54, %v16417_v47 }
 0x46c   :  { %v16330_v16 = vor.u32 %v18848_v28, %v16329_v63  ;;  %v18889_v63 = vld [vmem:[%s27866_s3 + $0x1f04] sm:$0xf0] }
 0x46d   :  { %8813 = vmatpush.bf16.msra.mxu3 %v16394_v56  ;;  %8829 = vmatpush.bf16.msra.mxu1 %v16474_v6  ;;  %v16366_v56 = vor.u32 %v18854_v20, %v16363_v8  ;;  %v18852_v6 = vld [vmem:[%s27866_s3 + $0x1ddc] sm:$0xf0]  ;;  %v7541_v20 = vadd.f32 %v25792_v44, %v7527_v15  ;;  %v16422_v8 = vor.u32 %v18867_v43, %v16419_v5  ;;  %v16403_v44 = vld [vmem:[%s27866_s3 + $0x1e48] sm:$0xf0]  ;;  %v18855_v15 = vld [vmem:[%s27866_s3 + $0x1dfc] sm:$0xf] }
 0x46e   :  { %8839 = vmatpush.bf16.msra.mxu2 %v16398_v33  ;;  %8855 = vmatpush.bf16.msra.mxu0 %v16478_v40  ;;  %v8696_v33 = vunpack.c.l.b16 %v16326_v18  ;;  %v16347_v40 = vld [vmem:[%s27866_s3 + $0x1de0] sm:$0xf0]  ;;  %v16346_v38 = vor.u32 %v18852_v6, %v16345_v59  ;;  %v16401_v18 = vld [vmem:[%s27866_s3 + $0x1e38] sm:$0xf] }
 0x46f   :  { %v16385_v59 = vld [vmem:[%s27866_s3 + $0x1e18] sm:$0xf]  ;;  %v7503_v47 = vpop.f32.mrf.mxu3 }
 0x470   :  { %v8748_v23 = vpack.c.b16 %v8696_v33, %v8696_v33  ;;  %v16513_v6 = vld [vmem:[%s27866_s3 + $0x1f18] sm:$0xf]  ;;  %v16406_v33 = vor.u32 %v18863_v50, %v16403_v44  ;;  %v18885_v44 = vld [vmem:[%s27866_s3 + $0x1ee4] sm:$0xf0] }
 0x471   :  { %8814 = vmatpush.bf16.msra.mxu3 %v16378_v4  ;;  %8830 = vmatpush.bf16.msra.mxu1 %v16458_v13  ;;  %v16350_v4 = vor.u32 %v18850_v29, %v16347_v40  ;;  %v8749_v13 = vpack.c.b16 %v8697_v37, %v8697_v37  ;;  %v18861_v37 = vld [vmem:[%s27866_s3 + $0x1e24] sm:$0xf0]  ;;  %v16515_v29 = vld [vmem:[%s27866_s3 + $0x1f28] sm:$0xf0]  ;;  %v18859_v40 = vld [vmem:[%s27866_s3 + $0x1e1c] sm:$0xf] }
 0x472   :  { %8840 = vmatpush.bf16.msra.mxu2 %v16382_v1  ;;  %8856 = vmatpush.bf16.msra.mxu0 %v16462_v42  ;;  %v7515_v1 = vadd.f32 %v25790_v60, %v7501_v52  ;;  %v18846_v42 = vld [vmem:[%s27866_s3 + $0x1db4] sm:$0xf]  ;;  %v18865_v60 = vld [vmem:[%s27866_s3 + $0x1e44] sm:$0xf0]  ;;  %v8805_v22 = vsel %vm1177_vm3, %v8748_v23, 0  ;;  %v16386_v43 = vor.u32 %v18861_v37, %v16385_v59 }
 0x473   :  { %v16369_v52 = vld [vmem:[%s27866_s3 + $0x1df8] sm:$0xf]  ;;  %v18857_v23 = vld [vmem:[%s27866_s3 + $0x1e04] sm:$0xf0] }
 0x474   :  { %16519 = vmatmul.msk.bf16.vlgmr.msra.gmra.mxu1 %vm1173_vm5, %v20136_v11  ;;  %v16481_v50 = vld [vmem:[%s27866_s3 + $0x1ed8] sm:$0xf]  ;;  %v18881_v47 = vld [vmem:[%s27866_s3 + $0x1ec4] sm:$0xf0] }
 0x475   :  { %8862 = vmatpush.bf16.msrb.mxu1 %v16450_v34  ;;  %8815 = vmatpush.bf16.msra.mxu3 %v16362_v45  ;;  %v16331_v34 = vld [vmem:[%s27866_s3 + $0x1dc0] sm:$0xf0]  ;;  %v25939_v45 = vadd.f32 %v7541_v20, %v25611_v41  ;;  %v18893_v41 = vld [vmem:[%s27866_s3 + $0x1f24] sm:$0xf0]  ;;  %v16337_v37 = vld [vmem:[%s27866_s3 + $0x1db8] sm:$0xf] }
 0x476   :  { %8888 = vmatpush.bf16.msrb.mxu0 %v16454_v39  ;;  %8841 = vmatpush.bf16.msra.mxu2 %v16366_v56  ;;  %v25930_v39 = vadd.f32 %v7515_v1, %v25602_v36  ;;  %v16334_v25 = vor.u32 %v18846_v42, %v16331_v34  ;;  %v8808_v36 = vsel %vm1177_vm3, %v8749_v13, 0  ;;  %v16402_v56 = vor.u32 %v18865_v60, %v16401_v18  ;;  %v18887_v13 = vld [vmem:[%s27866_s3 + $0x1efc] sm:$0xf]  ;;  %v16499_v1 = vld [vmem:[%s27866_s3 + $0x1f08] sm:$0xf0]  ;;  %v7553_v34 = vpop.f32.mrf.mxu1 }
 0x477   :  { %16520 = vmatmul.msk.bf16.vlgmr.msra.gmra.mxu0 %vm1173_vm5, %v20136_v11  ;;  %v16514_v54 = vor.u32 %v18893_v41, %v16513_v6  ;;  %v16275_v42 = vld [vmem:[%s27866_s3 + $0x1da0] sm:$0x33]  ;;  %v16370_v18 = vor.u32 %v18857_v23, %v16369_v52  ;;  %v16502_v60 = vor.u32 %v18887_v13, %v16499_v1  ;;  %v18851_v6 = vld [vmem:[%s27866_s3 + $0x1ddc] sm:$0xf]  ;;  %v16355_v41 = vld [vmem:[%s27866_s3 + $0x1de8] sm:$0xf0] }
 0x478   :  { %v9060_v59 = vunpack.c.l.b16 %v16275_v42  ;;  %v16467_v52 = vld [vmem:[%s27866_s3 + $0x1ec8] sm:$0xf0]  ;;  %v16637_v23 = vld [vmem:[%s27866_s3 + $0x1d00] sm:$0xf]  ;;  %v18828_v13 = vld [vmem:[%s27866_s3 + $0x1d0c] sm:$0xf0] }
 0x479   :  { %8863 = vmatpush.bf16.msrb.mxu1 %v16434_v46  ;;  %8816 = vmatpush.bf16.msra.mxu3 %v16346_v38  ;;  %v18891_v46 = vld [vmem:[%s27866_s3 + $0x1f1c] sm:$0xf]  ;;  %v7529_v38 = vpop.f32.mrf.mxu2 }
 0x47a   :  { %8889 = vmatpush.bf16.msrb.mxu0 %v16438_v48  ;;  %8842 = vmatpush.bf16.msra.mxu2 %v16350_v4  ;;  %v16387_v48 = vld [vmem:[%s27866_s3 + $0x1e28] sm:$0xf0]  ;;  %v16518_v5 = vor.u32 %v18891_v46, %v16515_v29  ;;  %v16497_v4 = vld [vmem:[%s27866_s3 + $0x1ef8] sm:$0xf]  ;;  %v16358_v38 = vor.u32 %v18851_v6, %v16355_v41  ;;  %v18824_v41 = vld [vmem:[%s27866_s3 + $0x1cec] sm:$0xf0] }
 0x47b   :  { %v16390_v28 = vor.u32 %v18859_v40, %v16387_v48  ;;  %v16498_v20 = vor.u32 %v18889_v63, %v16497_v4  ;;  %v18849_v40 = vld [vmem:[%s27866_s3 + $0x1dc4] sm:$0xf0]  ;;  %v16465_v48 = vld [vmem:[%s27866_s3 + $0x1eb8] sm:$0xf]  ;;  %v9112_v4 = vpack.c.b16 %v9060_v59, %v9060_v59  ;;  %v7566_v63 = vpop.f32.mrf.mxu3 }
 0x47c   :  { %v7567_v1 = vadd.f32 %v7566_v63, %v7553_v34 }
 0x47d   :  { %8864 = vmatpush.bf16.msrb.mxu1 %v16418_v7  ;;  %8817 = vmatpush.bf16.msra.mxu3 %v16330_v16  ;;  %v16371_v7 = vld [vmem:[%s27866_s3 + $0x1e08] sm:$0xf0]  ;;  %v16353_v16 = vld [vmem:[%s27866_s3 + $0x1dd8] sm:$0xf] }
 0x47e   :  { %8890 = vmatpush.bf16.msrb.mxu0 %v16422_v8  ;;  %8843 = vmatpush.bf16.msra.mxu2 %v16334_v25  ;;  %v7579_v8 = vpop.f32.mrf.mxu0  ;;  %v16374_v25 = vor.u32 %v18855_v15, %v16371_v7  ;;  %v7555_v7 = vpop.f32.mrf.mxu1  ;;  %v26057_v34 = vadd.f32 %v7567_v1, %v25729_v24  ;;  %v16701_v24 = vld [vmem:[%s27866_s3 + $0x1d80] sm:$0xf]  ;;  %v18838_v1 = vld [vmem:[%s27866_s3 + $0x1d64] sm:$0xf] }
 0x480   :  { %8818 = vmatmul.bf16.vlgmr.msra.gmra.mxu3 %v20134_v9 }
 0x481   :  { %8878 = vmatpush.bf16.msrb.mxu3 %v8805_v22  ;;  %8865 = vmatpush.bf16.msrb.mxu1 %v16402_v56  ;;  %v18853_v22 = vld [vmem:[%s27866_s3 + $0x1de4] sm:$0xf0]  ;;  %v16483_v56 = vld [vmem:[%s27866_s3 + $0x1ee8] sm:$0xf0]  ;;  %v7592_v15 = vpop.f32.mrf.mxu2 }
 0x482   :  { %8904 = vmatpush.bf16.msrb.mxu2 %v8808_v36  ;;  %8891 = vmatpush.bf16.msrb.mxu0 %v16406_v33  ;;  %v18883_v36 = vld [vmem:[%s27866_s3 + $0x1edc] sm:$0xf]  ;;  %v16482_v33 = vor.u32 %v18885_v44, %v16481_v50  ;;  %v16354_v46 = vor.u32 %v18853_v22, %v16353_v16  ;;  %v7593_v16 = vadd.f32 %v7592_v15, %v7579_v8  ;;  %v16621_v8 = vld [vmem:[%s27866_s3 + $0x1ce0] sm:$0xf]  ;;  %v16687_v15 = vld [vmem:[%s27866_s3 + $0x1d70] sm:$0xf0] }
 0x483   :  { %8844 = vmatmul.bf16.vlgmr.msra.gmra.mxu2 %v20134_v9  ;;  %v16486_v29 = vor.u32 %v18883_v36, %v16483_v56  ;;  %v16638_v36 = vor.u32 %v18828_v13, %v16637_v23  ;;  %v9165_v56 = vsel %vm1177_vm3, %v9112_v4, 0  ;;  %v18818_v23 = vld [vmem:[%s27866_s3 + $0x1cc4] sm:$0xf]  ;;  %v16607_v13 = vld [vmem:[%s27866_s3 + $0x1cd0] sm:$0xf0] }
 0x484   :  { %v26061_v59 = vadd.f32 %v7593_v16, %v25733_v21  ;;  %v18822_v21 = vld [vmem:[%s27866_s3 + $0x1ce4] sm:$0xf]  ;;  %v18816_v16 = vld [vmem:[%s27866_s3 + $0x1cac] sm:$0xf0] }
 0x485   :  { %8879 = vmatpush.bf16.msrb.mxu3 %v16514_v54  ;;  %8866 = vmatpush.bf16.msrb.mxu1 %v16386_v43  ;;  %v9061_v54 = vunpack.c.h.b16 %v16275_v42  ;;  %v18847_v43 = vld [vmem:[%s27866_s3 + $0x1dbc] sm:$0xf]  ;;  %v16338_v42 = vor.u32 %v18849_v40, %v16337_v37  ;;  %v16623_v37 = vld [vmem:[%s27866_s3 + $0x1cf0] sm:$0xf0] }
 0x486   :  { %8905 = vmatpush.bf16.msrb.mxu2 %v16518_v5  ;;  %8892 = vmatpush.bf16.msrb.mxu0 %v16390_v28  ;;  %v18879_v5 = vld [vmem:[%s27866_s3 + $0x1ebc] sm:$0xf]  ;;  %v16339_v28 = vld [vmem:[%s27866_s3 + $0x1dc8] sm:$0xf0]  ;;  %v7581_v50 = vpop.f32.mrf.mxu0  ;;  %v16703_v40 = vld [vmem:[%s27866_s3 + $0x1d90] sm:$0xf0] }
 0x487   :  { %v16470_v44 = vor.u32 %v18879_v5, %v16467_v52  ;;  %v16342_v22 = vor.u32 %v18847_v43, %v16339_v28  ;;  %v16605_v43 = vld [vmem:[%s27866_s3 + $0x1cc0] sm:$0xf]  ;;  %v18820_v5 = vld [vmem:[%s27866_s3 + $0x1ccc] sm:$0xf0]  ;;  %v16690_v50 = vor.u32 %v18838_v1, %v16687_v15 }
 0x488   :  { %v16685_v52 = vld [vmem:[%s27866_s3 + $0x1d60] sm:$0xf]  ;;  %v18840_v28 = vld [vmem:[%s27866_s3 + $0x1d6c] sm:$0xf0] }
 0x489   :  { %8880 = vmatpush.bf16.msrb.mxu3 %v16498_v20  ;;  %8867 = vmatpush.bf16.msrb.mxu1 %v16370_v18  ;;  %v16466_v20 = vor.u32 %v18881_v47, %v16465_v48  ;;  %v18826_v18 = vld [vmem:[%s27866_s3 + $0x1d04] sm:$0xf]  ;;  %v16622_v48 = vor.u32 %v18824_v41, %v16621_v8  ;;  %v7568_v47 = vpop.f32.mrf.mxu3  ;;  %v7594_v4 = vpop.f32.mrf.mxu2  ;;  %v16573_v8 = vld [vmem:[%s27866_s3 + $0x1c80] sm:$0xf]  ;;  %v18808_v1 = vld [vmem:[%s27866_s3 + $0x1c6c] sm:$0xf0] }
 0x48a   :  { %8906 = vmatpush.bf16.msrb.mxu2 %v16502_v60  ;;  %8893 = vmatpush.bf16.msrb.mxu0 %v16374_v25  ;;  %v16639_v60 = vld [vmem:[%s27866_s3 + $0x1d10] sm:$0xf0]  ;;  %v9113_v25 = vpack.c.b16 %v9061_v54, %v9061_v54  ;;  %v26118_v7 = vpop.f32.mrf.mxu1  ;;  %v16647_v4 = vld [vmem:[%s27866_s3 + $0x1d18] sm:$0xf0] }
 0x48b   :  { %v16642_v6 = vor.u32 %v18826_v18, %v16639_v60  ;;  %v16610_v18 = vor.u32 %v18818_v23, %v16607_v13  ;;  %v16589_v60 = vld [vmem:[%s27866_s3 + $0x1ca0] sm:$0xf]  ;;  %v16655_v47 = vld [vmem:[%s27866_s3 + $0x1d30] sm:$0xf0] }
 0x48c   :  { %v16557_v13 = vld [vmem:[%s27866_s3 + $0x1c60] sm:$0xf] }
 0x48d   :  { %8881 = vmatpush.bf16.msrb.mxu3 %v16482_v33  ;;  %8868 = vmatpush.bf16.msrb.mxu1 %v16354_v46  ;;  %v18844_v33 = vld [vmem:[%s27866_s3 + $0x1d8c] sm:$0xf0]  ;;  %v9168_v46 = vsel %vm1177_vm3, %v9113_v25, 0  ;;  %v18814_v25 = vld [vmem:[%s27866_s3 + $0x1ca4] sm:$0xf] }
 0x48e   :  { %8907 = vmatpush.bf16.msrb.mxu2 %v16486_v29  ;;  %8894 = vmatpush.bf16.msrb.mxu0 %v16358_v38  ;;  %v18842_v29 = vld [vmem:[%s27866_s3 + $0x1d84] sm:$0xf]  ;;  %v16702_v54 = vor.u32 %v18844_v33, %v16701_v24  ;;  %v16626_v38 = vor.u32 %v18822_v21, %v16623_v37  ;;  %v18812_v33 = vld [vmem:[%s27866_s3 + $0x1c8c] sm:$0xf0]  ;;  %v16653_v21 = vld [vmem:[%s27866_s3 + $0x1d20] sm:$0xf] }
 0x48f   :  { %v16706_v63 = vor.u32 %v18842_v29, %v16703_v40  ;;  %v18832_v37 = vld [vmem:[%s27866_s3 + $0x1d2c] sm:$0xf0]  ;;  %v18810_v29 = vld [vmem:[%s27866_s3 + $0x1c84] sm:$0xf]  ;;  %v16575_v40 = vld [vmem:[%s27866_s3 + $0x1c90] sm:$0xf0] }
 0x490   :  { %v16578_v23 = vor.u32 %v18810_v29, %v16575_v40  ;;  %v18821_v29 = vld [vmem:[%s27866_s3 + $0x1cd4] sm:$0xf0] }
 0x491   :  { %8882 = vmatpush.bf16.msrb.mxu3 %v16466_v20  ;;  %8869 = vmatpush.bf16.msrb.mxu1 %v16338_v42  ;;  %v16606_v42 = vor.u32 %v18820_v5, %v16605_v43  ;;  %v26120_v20 = vpop.f32.mrf.mxu0  ;;  %v16574_v5 = vor.u32 %v18812_v33, %v16573_v8  ;;  %v18802_v33 = vld [vmem:[%s27866_s3 + $0x1c44] sm:$0xf] }
 0x492   :  { %8908 = vmatpush.bf16.msrb.mxu2 %v16470_v44  ;;  %8895 = vmatpush.bf16.msrb.mxu0 %v16342_v22  ;;  %v18836_v44 = vld [vmem:[%s27866_s3 + $0x1d4c] sm:$0xf0]  ;;  %v16591_v22 = vld [vmem:[%s27866_s3 + $0x1cb0] sm:$0xf0]  ;;  %v7937_v43 = vpop.f32.mrf.mxu1 }
 0x493   :  { %v16594_v24 = vor.u32 %v18814_v25, %v16591_v22  ;;  %v18823_v25 = vld [vmem:[%s27866_s3 + $0x1cec] sm:$0xf]  ;;  %v16631_v22 = vld [vmem:[%s27866_s3 + $0x1cf8] sm:$0xf0]  ;;  %v16525_v43 = vld [vmem:[%s27866_s3 + $0x1c20] sm:$0xf] }
 0x494   :  { %8870 = vmatmul.bf16.vlgmr.msrb.gmra.mxu1 %v20134_v9  ;;  %16521 = vmatmul.msk.bf16.vlgmr.msrb.gmra.mxu3 %vm1173_vm5, %v20136_v11 }
 0x495   :  { %9176 = vmatpush.bf16.msra.mxu3 %v16638_v36  ;;  %9192 = vmatpush.bf16.msra.mxu1 %v9165_v56  ;;  %v18834_v36 = vld [vmem:[%s27866_s3 + $0x1d44] sm:$0xf]  ;;  %v16671_v56 = vld [vmem:[%s27866_s3 + $0x1d50] sm:$0xf0] }
 0x496   :  { %9202 = vmatpush.bf16.msra.mxu2 %v16642_v6  ;;  %9218 = vmatpush.bf16.msra.mxu0 %v9168_v46  ;;  %v16590_v6 = vor.u32 %v18816_v16, %v16589_v60  ;;  %v16674_v46 = vor.u32 %v18834_v36, %v16671_v56  ;;  %v16276_v60 = vld [vmem:[%s27866_s3 + $0x1da8] sm:$0x33]  ;;  %v16541_v56 = vld [vmem:[%s27866_s3 + $0x1c40] sm:$0xf] }
 0x497   :  { %8896 = vmatmul.bf16.vlgmr.msrb.gmra.mxu0 %v20134_v9  ;;  %16522 = vmatmul.msk.bf16.vlgmr.msrb.gmra.mxu2 %vm1173_vm5, %v20136_v11  ;;  %v16686_v9 = vor.u32 %v18840_v28, %v16685_v52  ;;  %v16669_v11 = vld [vmem:[%s27866_s3 + $0x1d40] sm:$0xf]  ;;  %v18827_v52 = vld [vmem:[%s27866_s3 + $0x1d0c] sm:$0xf]  ;;  %v16654_v28 = vor.u32 %v18832_v37, %v16653_v21  ;;  %v9062_v8 = vunpack.c.l.b16 %v16276_v60  ;;  %v16543_v21 = vld [vmem:[%s27866_s3 + $0x1c50] sm:$0xf0]  ;;  %v16634_v37 = vor.u32 %v18823_v25, %v16631_v22 }
 0x498   :  { %v16670_v41 = vor.u32 %v18836_v44, %v16669_v11  ;;  %v16650_v16 = vor.u32 %v18827_v52, %v16647_v4  ;;  %v16629_v11 = vld [vmem:[%s27866_s3 + $0x1ce8] sm:$0xf]  ;;  %v16558_v44 = vor.u32 %v18808_v1, %v16557_v13  ;;  %v18798_v13 = vld [vmem:[%s27866_s3 + $0x1c24] sm:$0xf]  ;;  %v16527_v1 = vld [vmem:[%s27866_s3 + $0x1c30] sm:$0xf0] }
 0x499   :  { %9177 = vmatpush.bf16.msra.mxu3 %v16622_v48  ;;  %9193 = vmatpush.bf16.msra.mxu1 %v16702_v54  ;;  %v18830_v48 = vld [vmem:[%s27866_s3 + $0x1d24] sm:$0xf]  ;;  %v16645_v54 = vld [vmem:[%s27866_s3 + $0x1d08] sm:$0xf]  ;;  %v9114_v52 = vpack.c.b16 %v9062_v8, %v9062_v8  ;;  %v18843_v8 = vld [vmem:[%s27866_s3 + $0x1d8c] sm:$0xf] }
 0x49a   :  { %9203 = vmatpush.bf16.msra.mxu2 %v16626_v38  ;;  %9219 = vmatpush.bf16.msra.mxu0 %v16706_v63  ;;  %v18829_v38 = vld [vmem:[%s27866_s3 + $0x1d14] sm:$0xf0]  ;;  %v7963_v63 = vpop.f32.mrf.mxu0  ;;  %v16658_v15 = vor.u32 %v18830_v48, %v16655_v47  ;;  %v18819_v48 = vld [vmem:[%s27866_s3 + $0x1ccc] sm:$0xf]  ;;  %v16615_v47 = vld [vmem:[%s27866_s3 + $0x1cd8] sm:$0xf0] }
 0x49b   :  { %v16581_v22 = vld [vmem:[%s27866_s3 + $0x1c88] sm:$0xf] }
 0x49d   :  { %9178 = vmatpush.bf16.msra.mxu3 %v16606_v42  ;;  %9194 = vmatpush.bf16.msra.mxu1 %v16686_v9  ;;  %v16646_v42 = vor.u32 %v18829_v38, %v16645_v54  ;;  %v18806_v9 = vld [vmem:[%s27866_s3 + $0x1c64] sm:$0xf]  ;;  %v7922_v54 = vpop.f32.mrf.mxu3  ;;  %v16546_v38 = vor.u32 %v18802_v33, %v16543_v21  ;;  %v16583_v33 = vld [vmem:[%s27866_s3 + $0x1c98] sm:$0xf0] }
 0x49e   :  { %9204 = vmatpush.bf16.msra.mxu2 %v16610_v18  ;;  %9220 = vmatpush.bf16.msra.mxu0 %v16690_v50  ;;  %v16559_v18 = vld [vmem:[%s27866_s3 + $0x1c70] sm:$0xf0]  ;;  %v18825_v50 = vld [vmem:[%s27866_s3 + $0x1cf4] sm:$0xf0]  ;;  %v7936_v63 = vadd.f32 %v26118_v7, %v7922_v54 }
 0x49f   :  { %v16562_v36 = vor.u32 %v18806_v9, %v16559_v18  ;;  %v16597_v9 = vld [vmem:[%s27866_s3 + $0x1ca8] sm:$0xf]  ;;  %v18817_v7 = vld [vmem:[%s27866_s3 + $0x1cb4] sm:$0xf0] }
 0x4a0   :  { %v26258_v18 = vadd.f32 %v7936_v63, %v25930_v39  ;;  %v16598_v25 = vor.u32 %v18817_v7, %v16597_v9  ;;  %v18841_v54 = vld [vmem:[%s27866_s3 + $0x1d74] sm:$0xf0]  ;;  %v16567_v63 = vld [vmem:[%s27866_s3 + $0x1c78] sm:$0xf0]  ;;  %v16549_v9 = vld [vmem:[%s27866_s3 + $0x1c48] sm:$0xf] }
 0x4a1   :  { %9179 = vmatpush.bf16.msra.mxu3 %v16590_v6  ;;  %9195 = vmatpush.bf16.msra.mxu1 %v16670_v41  ;;  %v18804_v6 = vld [vmem:[%s27866_s3 + $0x1c4c] sm:$0xf0]  ;;  %v9063_v41 = vunpack.c.h.b16 %v16276_v60  ;;  %v16677_v7 = vld [vmem:[%s27866_s3 + $0x1d48] sm:$0xf] }
 0x4a2   :  { %9205 = vmatpush.bf16.msra.mxu2 %v16594_v24  ;;  %9221 = vmatpush.bf16.msra.mxu0 %v16674_v46  ;;  %v16630_v24 = vor.u32 %v18825_v50, %v16629_v11  ;;  %v16613_v46 = vld [vmem:[%s27866_s3 + $0x1cc8] sm:$0xf]  ;;  %v16542_v40 = vor.u32 %v18804_v6, %v16541_v56  ;;  %v16530_v50 = vor.u32 %v18798_v13, %v16527_v1  ;;  %v18813_v6 = vld [vmem:[%s27866_s3 + $0x1c94] sm:$0xf0] }
 0x4a3   :  { %v9115_v4 = vpack.c.b16 %v9063_v41, %v9063_v41  ;;  %v16711_v41 = vld [vmem:[%s27866_s3 + $0x1d98] sm:$0xf0] }
 0x4a5   :  { %9180 = vmatpush.bf16.msra.mxu3 %v16574_v5  ;;  %9196 = vmatpush.bf16.msra.mxu1 %v16654_v28  ;;  %v18800_v5 = vld [vmem:[%s27866_s3 + $0x1c2c] sm:$0xf0]  ;;  %v7948_v28 = vpop.f32.mrf.mxu2  ;;  %v9174_v39 = vsel %vm1177_vm3, %v9115_v4, 0  ;;  %v7924_v21 = vpop.f32.mrf.mxu3  ;;  %v18807_v4 = vld [vmem:[%s27866_s3 + $0x1c6c] sm:$0xf] }
 0x4a6   :  { %9206 = vmatpush.bf16.msra.mxu2 %v16578_v23  ;;  %9222 = vmatpush.bf16.msra.mxu0 %v16658_v15  ;;  %v16614_v23 = vor.u32 %v18821_v29, %v16613_v46  ;;  %v7962_v15 = vadd.f32 %v26120_v20, %v7948_v28  ;;  %v16526_v60 = vor.u32 %v18800_v5, %v16525_v43  ;;  %v16599_v20 = vld [vmem:[%s27866_s3 + $0x1cb8] sm:$0xf0]  ;;  %v18809_v43 = vld [vmem:[%s27866_s3 + $0x1c74] sm:$0xf0]  ;;  %v18839_v5 = vld [vmem:[%s27866_s3 + $0x1d6c] sm:$0xf] }
 0x4a7   :  { %v16582_v29 = vor.u32 %v18813_v6, %v16581_v22  ;;  %v16767_v28 = vld [vmem:[%s27866_s3 + $0x20c0] sm:$0x33]  ;;  %v16551_v22 = vld [vmem:[%s27866_s3 + $0x1c58] sm:$0xf0] }
 0x4a8   :  { %16715 = vmatmul.msk.bf16.vlgmr.msra.gmra.mxu1 %vm1173_vm5, %v20393_v30  ;;  %v26267_v11 = vadd.f32 %v7962_v15, %v25939_v45  ;;  %v18845_v45 = vld [vmem:[%s27866_s3 + $0x1d94] sm:$0xf0] }
 0x4a9   :  { %9228 = vmatpush.bf16.msrb.mxu1 %v16646_v42  ;;  %9181 = vmatpush.bf16.msra.mxu3 %v16558_v44  ;;  %v16618_v42 = vor.u32 %v18819_v48, %v16615_v47  ;;  %v9171_v44 = vsel %vm1177_vm3, %v9114_v52, 0  ;;  %v16565_v48 = vld [vmem:[%s27866_s3 + $0x1c68] sm:$0xf]  ;;  %v16695_v52 = vld [vmem:[%s27866_s3 + $0x1d78] sm:$0xf0] }
 0x4aa   :  { %9254 = vmatpush.bf16.msrb.mxu0 %v16650_v16  ;;  %9207 = vmatpush.bf16.msra.mxu2 %v16562_v36  ;;  %v18815_v16 = vld [vmem:[%s27866_s3 + $0x1cac] sm:$0xf]  ;;  %v16709_v36 = vld [vmem:[%s27866_s3 + $0x1d88] sm:$0xf]  ;;  %v16566_v15 = vor.u32 %v18809_v43, %v16565_v48 }
 0x4ab   :  { %16716 = vmatmul.msk.bf16.vlgmr.msra.gmra.mxu0 %vm1173_vm5, %v20393_v30  ;;  %v16602_v56 = vor.u32 %v18815_v16, %v16599_v20  ;;  %v16693_v47 = vld [vmem:[%s27866_s3 + $0x1d68] sm:$0xf]  ;;  %v16570_v16 = vor.u32 %v18807_v4, %v16567_v63  ;;  %v18805_v20 = vld [vmem:[%s27866_s3 + $0x1c54] sm:$0xf0] }
 0x4ac   :  { %v16694_v13 = vor.u32 %v18841_v54, %v16693_v47  ;;  %v8000_v1 = vpop.f32.mrf.mxu0  ;;  %v16535_v47 = vld [vmem:[%s27866_s3 + $0x1c38] sm:$0xf0]  ;;  %v16883_v54 = vld [vmem:[%s27866_s3 + $0x2020] sm:$0xf] }
 0x4ad   :  { %9229 = vmatpush.bf16.msrb.mxu1 %v16630_v24  ;;  %9182 = vmatpush.bf16.msra.mxu3 %v16542_v40  ;;  %v18811_v24 = vld [vmem:[%s27866_s3 + $0x1c8c] sm:$0xf]  ;;  %v7950_v46 = vpop.f32.mrf.mxu2  ;;  %v16714_v40 = vor.u32 %v18843_v8, %v16711_v41  ;;  %v18801_v8 = vld [vmem:[%s27866_s3 + $0x1c34] sm:$0xf0]  ;;  %v16661_v41 = vld [vmem:[%s27866_s3 + $0x1d28] sm:$0xf] }
 0x4ae   :  { %9255 = vmatpush.bf16.msrb.mxu0 %v16634_v37  ;;  %9208 = vmatpush.bf16.msra.mxu2 %v16546_v38  ;;  %v16710_v37 = vor.u32 %v18845_v45, %v16709_v36  ;;  %v16586_v38 = vor.u32 %v18811_v24, %v16583_v33  ;;  %v16533_v45 = vld [vmem:[%s27866_s3 + $0x1c28] sm:$0xf]  ;;  %v18833_v24 = vld [vmem:[%s27866_s3 + $0x1d34] sm:$0xf0]  ;;  %v9478_v33 = vunpack.c.h.b16 %v16767_v28  ;;  %v18831_v46 = vld [vmem:[%s27866_s3 + $0x1d2c] sm:$0xf] }
 0x4af   :  { %v7987_v48 = vpop.f32.mrf.mxu3  ;;  %v16534_v4 = vor.u32 %v18801_v8, %v16533_v45  ;;  %v16662_v63 = vor.u32 %v18833_v24, %v16661_v41  ;;  %v18938_v45 = vld [vmem:[%s27866_s3 + $0x20a4] sm:$0xf] }
 0x4b1   :  { %9230 = vmatpush.bf16.msrb.mxu1 %v16614_v23  ;;  %9183 = vmatpush.bf16.msra.mxu3 %v16526_v60  ;;  %v7974_v23 = vpop.f32.mrf.mxu1  ;;  %v18837_v60 = vld [vmem:[%s27866_s3 + $0x1d54] sm:$0xf0] }
 0x4b2   :  { %9256 = vmatpush.bf16.msrb.mxu0 %v16618_v42  ;;  %9209 = vmatpush.bf16.msra.mxu2 %v16530_v50  ;;  %v16698_v42 = vor.u32 %v18839_v5, %v16695_v52  ;;  %v18835_v50 = vld [vmem:[%s27866_s3 + $0x1d4c] sm:$0xf]  ;;  %v16678_v36 = vor.u32 %v18837_v60, %v16677_v7  ;;  %v7988_v43 = vadd.f32 %v7987_v48, %v7974_v23  ;;  %v18914_v48 = vld [vmem:[%s27866_s3 + $0x1fe4] sm:$0xf] }
 0x4b3   :  { %v9530_v7 = vpack.c.b16 %v9478_v33, %v9478_v33  ;;  %v16851_v33 = vld [vmem:[%s27866_s3 + $0x1fe0] sm:$0xf] }
 0x4b4   :  { %9184 = vmatmul.bf16.vlgmr.msra.gmra.mxu3 %v20391_v27  ;;  %v26385_v23 = vadd.f32 %v7988_v43, %v26057_v34  ;;  %v16947_v34 = vld [vmem:[%s27866_s3 + $0x20a0] sm:$0xf] }
 0x4b5   :  { %9244 = vmatpush.bf16.msrb.mxu3 %v9171_v44  ;;  %9231 = vmatpush.bf16.msrb.mxu1 %v16598_v25  ;;  %v16679_v44 = vld [vmem:[%s27866_s3 + $0x1d58] sm:$0xf0]  ;;  %v18803_v25 = vld [vmem:[%s27866_s3 + $0x1c4c] sm:$0xf]  ;;  %v8013_v5 = vpop.f32.mrf.mxu2 }
 0x4b6   :  { %9270 = vmatpush.bf16.msrb.mxu2 %v9174_v39  ;;  %9257 = vmatpush.bf16.msrb.mxu0 %v16602_v56  ;;  %v9477_v39 = vunpack.c.l.b16 %v16767_v28  ;;  %v16550_v56 = vor.u32 %v18805_v20, %v16549_v9  ;;  %v16682_v6 = vor.u32 %v18835_v50, %v16679_v44  ;;  %v16554_v21 = vor.u32 %v18803_v25, %v16551_v22  ;;  %v18922_v28 = vld [vmem:[%s27866_s3 + $0x2024] sm:$0xf]  ;;  %v18940_v25 = vld [vmem:[%s27866_s3 + $0x20ac] sm:$0xf0]  ;;  %v16869_v22 = vld [vmem:[%s27866_s3 + $0x2010] sm:$0xf0] }
 0x4b7   :  { %9210 = vmatmul.bf16.vlgmr.msra.gmra.mxu2 %v20391_v27  ;;  %v7989_v8 = vpop.f32.mrf.mxu3  ;;  %v16948_v41 = vor.u32 %v18940_v25, %v16947_v34  ;;  %v16899_v34 = vld [vmem:[%s27866_s3 + $0x2040] sm:$0xf]  ;;  %v18928_v25 = vld [vmem:[%s27866_s3 + $0x204c] sm:$0xf0] }
 0x4b8   :  { %v18925_v8 = vld [vmem:[%s27866_s3 + $0x2034] sm:$0xf0] }
 0x4b9   :  { %9245 = vmatpush.bf16.msrb.mxu3 %v16710_v37  ;;  %9232 = vmatpush.bf16.msrb.mxu1 %v16582_v29  ;;  %v18799_v37 = vld [vmem:[%s27866_s3 + $0x1c2c] sm:$0xf]  ;;  %v16663_v29 = vld [vmem:[%s27866_s3 + $0x1d38] sm:$0xf0]  ;;  %v7976_v52 = vpop.f32.mrf.mxu1 }
 0x4ba   :  { %9271 = vmatpush.bf16.msrb.mxu2 %v16714_v40  ;;  %9258 = vmatpush.bf16.msrb.mxu0 %v16586_v38  ;;  %v9529_v40 = vpack.c.b16 %v9477_v39, %v9477_v39  ;;  %v18924_v38 = vld [vmem:[%s27866_s3 + $0x202c] sm:$0xf0]  ;;  %v16666_v9 = vor.u32 %v18831_v46, %v16663_v29  ;;  %v16538_v60 = vor.u32 %v18799_v37, %v16535_v47  ;;  %v16931_v37 = vld [vmem:[%s27866_s3 + $0x2080] sm:$0xf]  ;;  %v16853_v47 = vld [vmem:[%s27866_s3 + $0x1ff0] sm:$0xf0] }
 0x4bb   :  { %v18920_v39 = vld [vmem:[%s27866_s3 + $0x200c] sm:$0xf0] }
 0x4bc   :  { %v9582_v20 = vsel %vm1177_vm3, %v9529_v40, 0  ;;  %v18936_v40 = vld [vmem:[%s27866_s3 + $0x208c] sm:$0xf0] }
 0x4bd   :  { %9246 = vmatpush.bf16.msrb.mxu3 %v16694_v13  ;;  %9233 = vmatpush.bf16.msrb.mxu1 %v16566_v15  ;;  %v16885_v13 = vld [vmem:[%s27866_s3 + $0x2030] sm:$0xf0]  ;;  %v8014_v15 = vadd.f32 %v8013_v5, %v8000_v1  ;;  %v16867_v1 = vld [vmem:[%s27866_s3 + $0x2000] sm:$0xf]  ;;  %v8015_v46 = vpop.f32.mrf.mxu2 }
 0x4be   :  { %9272 = vmatpush.bf16.msrb.mxu2 %v16698_v42  ;;  %9259 = vmatpush.bf16.msrb.mxu0 %v16570_v16  ;;  %v8002_v42 = vpop.f32.mrf.mxu0  ;;  %v16884_v16 = vor.u32 %v18924_v38, %v16883_v54  ;;  %v16888_v44 = vor.u32 %v18922_v28, %v16885_v13  ;;  %v18934_v54 = vld [vmem:[%s27866_s3 + $0x2084] sm:$0xf]  ;;  %v16933_v38 = vld [vmem:[%s27866_s3 + $0x2090] sm:$0xf0]  ;;  %v18912_v28 = vld [vmem:[%s27866_s3 + $0x1fcc] sm:$0xf0]  ;;  %v16900_v46 = vor.u32 %v18928_v25, %v16899_v34 }
 0x4bf   :  { %v26389_v50 = vadd.f32 %v8014_v15, %v26061_v59  ;;  %v18918_v59 = vld [vmem:[%s27866_s3 + $0x2004] sm:$0xf]  ;;  %v16936_v13 = vor.u32 %v18934_v54, %v16933_v38  ;;  %v18932_v15 = vld [vmem:[%s27866_s3 + $0x206c] sm:$0xf0]  ;;  %v16859_v34 = vld [vmem:[%s27866_s3 + $0x1fe8] sm:$0xf] }
 0x4c0   :  { %v16872_v24 = vor.u32 %v18918_v59, %v16869_v22  ;;  %v18910_v42 = vld [vmem:[%s27866_s3 + $0x1fc4] sm:$0xf]  ;;  %v18917_v25 = vld [vmem:[%s27866_s3 + $0x1ff4] sm:$0xf0] }
 0x4c1   :  { %9247 = vmatpush.bf16.msrb.mxu3 %v16678_v36  ;;  %9234 = vmatpush.bf16.msrb.mxu1 %v16550_v56  ;;  %v9585_v36 = vsel %vm1177_vm3, %v9530_v7, 0  ;;  %v16949_v56 = vld [vmem:[%s27866_s3 + $0x20b0] sm:$0xf0]  ;;  %v26446_v43 = vpop.f32.mrf.mxu1  ;;  %v18930_v7 = vld [vmem:[%s27866_s3 + $0x2064] sm:$0xf] }
 0x4c2   :  { %9273 = vmatpush.bf16.msrb.mxu2 %v16682_v6  ;;  %9260 = vmatpush.bf16.msrb.mxu0 %v16554_v21  ;;  %v16868_v6 = vor.u32 %v18920_v39, %v16867_v1  ;;  %v18916_v21 = vld [vmem:[%s27866_s3 + $0x1fec] sm:$0xf0]  ;;  %v16952_v29 = vor.u32 %v18938_v45, %v16949_v56  ;;  %v18906_v22 = vld [vmem:[%s27866_s3 + $0x1fa4] sm:$0xf]  ;;  %v16901_v56 = vld [vmem:[%s27866_s3 + $0x2050] sm:$0xf0] }
 0x4c3   :  { %v16852_v5 = vor.u32 %v18916_v21, %v16851_v33  ;;  %v18908_v39 = vld [vmem:[%s27866_s3 + $0x1fac] sm:$0xf0]  ;;  %v18926_v45 = vld [vmem:[%s27866_s3 + $0x2044] sm:$0xf]  ;;  %v18923_v33 = vld [vmem:[%s27866_s3 + $0x202c] sm:$0xf] }
 0x4c4   :  { %v16893_v21 = vld [vmem:[%s27866_s3 + $0x2038] sm:$0xf0]  ;;  %v18902_v38 = vld [vmem:[%s27866_s3 + $0x1f84] sm:$0xf] }
 0x4c5   :  { %9248 = vmatpush.bf16.msrb.mxu3 %v16662_v63  ;;  %9235 = vmatpush.bf16.msrb.mxu1 %v16534_v4  ;;  %v16856_v4 = vor.u32 %v18914_v48, %v16853_v47  ;;  %v16835_v63 = vld [vmem:[%s27866_s3 + $0x1fc0] sm:$0xf]  ;;  %v18904_v48 = vld [vmem:[%s27866_s3 + $0x1f8c] sm:$0xf0]  ;;  %v16904_v47 = vor.u32 %v18926_v45, %v16901_v56 }
 0x4c6   :  { %9274 = vmatpush.bf16.msrb.mxu2 %v16666_v9  ;;  %9261 = vmatpush.bf16.msrb.mxu0 %v16538_v60  ;;  %v26448_v52 = vpop.f32.mrf.mxu0  ;;  %v16837_v9 = vld [vmem:[%s27866_s3 + $0x1fd0] sm:$0xf0] }
 0x4c7   :  { %v16917_v60 = vld [vmem:[%s27866_s3 + $0x2070] sm:$0xf0]  ;;  %v16840_v1 = vor.u32 %v18910_v42, %v16837_v9  ;;  %v16787_v9 = vld [vmem:[%s27866_s3 + $0x1f60] sm:$0xf] }
 0x4c8   :  { %9236 = vmatmul.bf16.vlgmr.msrb.gmra.mxu1 %v20391_v27  ;;  %16717 = vmatmul.msk.bf16.vlgmr.msrb.gmra.mxu3 %vm1173_vm5, %v20393_v30  ;;  %v16920_v59 = vor.u32 %v18930_v7, %v16917_v60  ;;  %v18900_v7 = vld [vmem:[%s27866_s3 + $0x1f6c] sm:$0xf0] }
 0x4c9   :  { %9593 = vmatpush.bf16.msra.mxu3 %v16884_v16  ;;  %9609 = vmatpush.bf16.msra.mxu1 %v9582_v20  ;;  %v16836_v16 = vor.u32 %v18912_v28, %v16835_v63  ;;  %v16819_v20 = vld [vmem:[%s27866_s3 + $0x1fa0] sm:$0xf]  ;;  %v16875_v63 = vld [vmem:[%s27866_s3 + $0x2008] sm:$0xf]  ;;  %v18921_v28 = vld [vmem:[%s27866_s3 + $0x2014] sm:$0xf0] }
 0x4ca   :  { %9619 = vmatpush.bf16.msra.mxu2 %v16888_v44  ;;  %9635 = vmatpush.bf16.msra.mxu0 %v9585_v36  ;;  %v16821_v36 = vld [vmem:[%s27866_s3 + $0x1fb0] sm:$0xf0] }
 0x4cb   :  { %9262 = vmatmul.bf16.vlgmr.msrb.gmra.mxu0 %v20391_v27  ;;  %16718 = vmatmul.msk.bf16.vlgmr.msrb.gmra.mxu2 %vm1173_vm5, %v20393_v30  ;;  %v16932_v27 = vor.u32 %v18936_v40, %v16931_v37  ;;  %v16915_v30 = vld [vmem:[%s27866_s3 + $0x2060] sm:$0xf] }
 0x4cc   :  { %v16916_v44 = vor.u32 %v18932_v15, %v16915_v30  ;;  %v16803_v40 = vld [vmem:[%s27866_s3 + $0x1f80] sm:$0xf]  ;;  %v16877_v15 = vld [vmem:[%s27866_s3 + $0x2018] sm:$0xf0] }
 0x4cd   :  { %9594 = vmatpush.bf16.msra.mxu3 %v16868_v6  ;;  %9610 = vmatpush.bf16.msra.mxu1 %v16948_v41  ;;  %v16891_v6 = vld [vmem:[%s27866_s3 + $0x2028] sm:$0xf]  ;;  %v8358_v41 = vpop.f32.mrf.mxu1  ;;  %v16804_v30 = vor.u32 %v18904_v48, %v16803_v40 }
 0x4ce   :  { %9620 = vmatpush.bf16.msra.mxu2 %v16872_v24  ;;  %9636 = vmatpush.bf16.msra.mxu0 %v16952_v29  ;;  %v16820_v24 = vor.u32 %v18908_v39, %v16819_v20  ;;  %v8384_v37 = vpop.f32.mrf.mxu0  ;;  %v16824_v29 = vor.u32 %v18906_v22, %v16821_v36  ;;  %v16892_v54 = vor.u32 %v18925_v8, %v16891_v6  ;;  %v18915_v22 = vld [vmem:[%s27866_s3 + $0x1fec] sm:$0xf]  ;;  %v16861_v36 = vld [vmem:[%s27866_s3 + $0x1ff8] sm:$0xf0]  ;;  %v16771_v6 = vld [vmem:[%s27866_s3 + $0x1f40] sm:$0xf] }
 0x4cf   :  { %v16876_v20 = vor.u32 %v18921_v28, %v16875_v63  ;;  %v8343_v45 = vpop.f32.mrf.mxu3  ;;  %v18896_v8 = vld [vmem:[%s27866_s3 + $0x1f4c] sm:$0xf0]  ;;  %v16860_v37 = vor.u32 %v18917_v25, %v16859_v34  ;;  %v16864_v48 = vor.u32 %v18915_v22, %v16861_v36  ;;  %v16832_v34 = vor.u32 %v18907_v2, %v16829_v49  ;;  %v18905_v25 = vld [vmem:[%s27866_s3 + $0x1f94] sm:$0xf0]  ;;  %v16941_v22 = vld [vmem:[%s27866_s3 + $0x2098] sm:$0xf0] }
 0x4d0   :  { %v18903_v36 = vld [vmem:[%s27866_s3 + $0x1f8c] sm:$0xf]  ;;  %v16781_v2 = vld [vmem:[%s27866_s3 + $0x1f58] sm:$0xf0]  ;;  %v17129_v49 = vld [vmem:[%s27866_s3 + $0x21b0] sm:$0xf] }
 0x4d1   :  { %9595 = vmatpush.bf16.msra.mxu3 %v16852_v5  ;;  %9611 = vmatpush.bf16.msra.mxu1 %v16932_v27  ;;  %v16805_v5 = vld [vmem:[%s27866_s3 + $0x1f90] sm:$0xf0]  ;;  %v16768_v27 = vld [vmem:[%s27866_s3 + $0x20c8] sm:$0x33] }
 0x4d2   :  { %9621 = vmatpush.bf16.msra.mxu2 %v16856_v4  ;;  %9637 = vmatpush.bf16.msra.mxu0 %v16936_v13  ;;  %v16896_v4 = vor.u32 %v18923_v33, %v16893_v21  ;;  %v18919_v13 = vld [vmem:[%s27866_s3 + $0x200c] sm:$0xf]  ;;  %v16808_v42 = vor.u32 %v18902_v38, %v16805_v5  ;;  %v9479_v60 = vunpack.c.l.b16 %v16768_v27  ;;  %v8357_v33 = vadd.f32 %v26446_v43, %v8343_v45  ;;  %v8369_v21 = vpop.f32.mrf.mxu2  ;;  %v18913_v43 = vld [vmem:[%s27866_s3 + $0x1fd4] sm:$0xf0]  ;;  %v16813_v45 = vld [vmem:[%s27866_s3 + $0x1f98] sm:$0xf0] }
 0x4d3   :  { %v16880_v39 = vor.u32 %v18919_v13, %v16877_v15  ;;  %v8383_v40 = vadd.f32 %v26448_v52, %v8369_v21  ;;  %v16772_v38 = vor.u32 %v18896_v8, %v16771_v6  ;;  %v18911_v5 = vld [vmem:[%s27866_s3 + $0x1fcc] sm:$0xf]  ;;  %v16845_v52 = vld [vmem:[%s27866_s3 + $0x1fd8] sm:$0xf0]  ;;  %v16827_v13 = vld [vmem:[%s27866_s3 + $0x1fa8] sm:$0xf] }
 0x4d4   :  { %v9531_v41 = vpack.c.b16 %v9479_v60, %v9479_v60  ;;  %v18941_v15 = vld [vmem:[%s27866_s3 + $0x20b4] sm:$0xf0]  ;;  %v16848_v61 = vor.u32 %v18911_v5, %v16845_v52  ;;  %v16795_v21 = vld [vmem:[%s27866_s3 + $0x1f68] sm:$0xf] }
 0x4d5   :  { %9596 = vmatpush.bf16.msra.mxu3 %v16836_v16  ;;  %9612 = vmatpush.bf16.msra.mxu1 %v16916_v44  ;;  %v9480_v16 = vunpack.c.h.b16 %v16768_v27  ;;  %v18898_v44 = vld [vmem:[%s27866_s3 + $0x1f64] sm:$0xf]  ;;  %v8439_v27 = vadd.f32 %v8383_v40, %v26267_v11  ;;  %v16955_v11 = vld [vmem:[%s27866_s3 + $0x20a8] sm:$0xf]  ;;  %v18901_v40 = vld [vmem:[%s27866_s3 + $0x1f74] sm:$0xf0] }
 0x4d6   :  { %9622 = vmatpush.bf16.msra.mxu2 %v16840_v1  ;;  %9638 = vmatpush.bf16.msra.mxu0 %v16920_v59  ;;  %v16789_v1 = vld [vmem:[%s27866_s3 + $0x1f70] sm:$0xf0]  ;;  %v16788_v59 = vor.u32 %v18900_v7, %v16787_v9  ;;  %v9588_v63 = vsel %vm1177_vm3, %v9531_v41, 0  ;;  %v16957_v9 = vld [vmem:[%s27866_s3 + $0x20b8] sm:$0xf0]  ;;  %v16956_v7 = vor.u32 %v18941_v15, %v16955_v11 }
 0x4d7   :  { %v16792_v56 = vor.u32 %v18898_v44, %v16789_v1  ;;  %v26612_v0 = vmax.f32 %v5921_v17, %v8439_v27  ;;  %v8345_v17 = vpop.f32.mrf.mxu3  ;;  %v16811_v44 = vld [vmem:[%s27866_s3 + $0x1f88] sm:$0xf]  ;;  %v16796_v27 = vor.u32 %v18901_v40, %v16795_v21  ;;  %v18895_v15 = vld [vmem:[%s27866_s3 + $0x1f4c] sm:$0xf] }
 0x4d8   :  { %v16939_v1 = vld [vmem:[%s27866_s3 + $0x2088] sm:$0xf]  ;;  %v18972_v17 = vld [vmem:[%s27866_s3 + $0x21bc] sm:$0xf0] }
 0x4d9   :  { %9597 = vmatpush.bf16.msra.mxu3 %v16820_v24  ;;  %9613 = vmatpush.bf16.msra.mxu1 %v16900_v46  ;;  %v9532_v24 = vpack.c.b16 %v9480_v16, %v9480_v16  ;;  %v18894_v46 = vld [vmem:[%s27866_s3 + $0x1f44] sm:$0xf]  ;;  %v16779_v52 = vld [vmem:[%s27866_s3 + $0x1f48] sm:$0xf] }
 0x4da   :  { %9623 = vmatpush.bf16.msra.mxu2 %v16824_v29  ;;  %9639 = vmatpush.bf16.msra.mxu0 %v16904_v47  ;;  %v16773_v29 = vld [vmem:[%s27866_s3 + $0x1f50] sm:$0xf0]  ;;  %v16843_v47 = vld [vmem:[%s27866_s3 + $0x1fc8] sm:$0xf]  ;;  %v8371_v60 = vpop.f32.mrf.mxu2 }
 0x4db   :  { %v9591_v28 = vsel %vm1177_vm3, %v9532_v24, 0  ;;  %v16812_v24 = vor.u32 %v18905_v25, %v16811_v44 }
 0x4dc   :  { %16961 = vmatmul.msk.bf16.vlgmr.msra.gmra.mxu1 %vm1173_vm5, %v20639_v53 }
 0x4dd   :  { %9645 = vmatpush.bf16.msrb.mxu1 %v16892_v54  ;;  %9598 = vmatpush.bf16.msra.mxu3 %v16804_v30  ;;  %v8438_v54 = vadd.f32 %v8357_v33, %v26258_v18  ;;  %v16844_v30 = vor.u32 %v18913_v43, %v16843_v47  ;;  %v8395_v6 = vpop.f32.mrf.mxu1  ;;  %v16925_v47 = vld [vmem:[%s27866_s3 + $0x2078] sm:$0xf0] }
 0x4de   :  { %9671 = vmatpush.bf16.msrb.mxu0 %v16896_v4  ;;  %9624 = vmatpush.bf16.msra.mxu2 %v16808_v42  ;;  %v16776_v4 = vor.u32 %v18894_v46, %v16773_v29  ;;  %v18939_v42 = vld [vmem:[%s27866_s3 + $0x20ac] sm:$0xf]  ;;  %v18933_v46 = vld [vmem:[%s27866_s3 + $0x2074] sm:$0xf0]  ;;  %v16816_v29 = vor.u32 %v18903_v36, %v16813_v45  ;;  %v16784_v45 = vor.u32 %v18895_v15, %v16781_v2  ;;  %v17081_v15 = vld [vmem:[%s27866_s3 + $0x2150] sm:$0xf] }
 0x4df   :  { %16962 = vmatmul.msk.bf16.vlgmr.msra.gmra.mxu0 %vm1173_vm5, %v20639_v53  ;;  %v26598_v18 = vmax.f32 %v5920_v51, %v8438_v54  ;;  %v18909_v51 = vld [vmem:[%s27866_s3 + $0x1fb4] sm:$0xf0]  ;;  %v18899_v54 = vld [vmem:[%s27866_s3 + $0x1f6c] sm:$0xf]  ;;  %v17083_v2 = vld [vmem:[%s27866_s3 + $0x2160] sm:$0xf0] }
 0x4e0   :  { %v16828_v16 = vor.u32 %v18909_v51, %v16827_v13  ;;  %v8421_v41 = vpop.f32.mrf.mxu0  ;;  %v16909_v51 = vld [vmem:[%s27866_s3 + $0x2058] sm:$0xf0] }
 0x4e1   :  { %9646 = vmatpush.bf16.msrb.mxu1 %v16876_v20  ;;  %9599 = vmatpush.bf16.msra.mxu3 %v16788_v59  ;;  %v16960_v20 = vor.u32 %v18939_v42, %v16957_v9  ;;  %v18935_v59 = vld [vmem:[%s27866_s3 + $0x208c] sm:$0xf] }
 0x4e2   :  { %9672 = vmatpush.bf16.msrb.mxu0 %v16880_v39  ;;  %9625 = vmatpush.bf16.msra.mxu2 %v16792_v56  ;;  %v18937_v39 = vld [vmem:[%s27866_s3 + $0x2094] sm:$0xf0]  ;;  %v17013_v56 = vld [vmem:[%s27866_s3 + $0x2250] sm:$0x33]  ;;  %v16944_v33 = vor.u32 %v18935_v59, %v16941_v22 }
 0x4e3   :  { %v16940_v8 = vor.u32 %v18937_v39, %v16939_v1  ;;  %v9898_v43 = vunpack.c.l.b16 %v17013_v56  ;;  %v9899_v13 = vunpack.c.h.b16 %v17013_v56  ;;  %v8408_v9 = vpop.f32.mrf.mxu3  ;;  %v18970_v1 = vld [vmem:[%s27866_s3 + $0x21b4] sm:$0xf]  ;;  %v17131_v39 = vld [vmem:[%s27866_s3 + $0x21c0] sm:$0xf0]  ;;  %v17130_v56 = vor.u32 %v18972_v17, %v17129_v49 }
 0x4e4   :  { %v18978_v49 = vld [vmem:[%s27866_s3 + $0x21f4] sm:$0xf]  ;;  %v17163_v17 = vld [vmem:[%s27866_s3 + $0x2200] sm:$0xf0] }
 0x4e5   :  { %9647 = vmatpush.bf16.msrb.mxu1 %v16860_v37  ;;  %9600 = vmatpush.bf16.msra.mxu3 %v16772_v38  ;;  %v16923_v37 = vld [vmem:[%s27866_s3 + $0x2068] sm:$0xf]  ;;  %v16797_v38 = vld [vmem:[%s27866_s3 + $0x1f78] sm:$0xf0]  ;;  %v9950_v42 = vpack.c.b16 %v9898_v43, %v9898_v43  ;;  %v9951_v22 = vpack.c.b16 %v9899_v13, %v9899_v13  ;;  %v17177_v43 = vld [vmem:[%s27866_s3 + $0x2210] sm:$0xf] }
 0x4e6   :  { %9673 = vmatpush.bf16.msrb.mxu0 %v16864_v48  ;;  %9626 = vmatpush.bf16.msra.mxu2 %v16776_v4  ;;  %v18931_v48 = vld [vmem:[%s27866_s3 + $0x206c] sm:$0xf]  ;;  %v16924_v5 = vor.u32 %v18933_v46, %v16923_v37  ;;  %v16800_v11 = vor.u32 %v18899_v54, %v16797_v38  ;;  %v8434_v60 = vpop.f32.mrf.mxu2  ;;  %v18966_v37 = vld [vmem:[%s27866_s3 + $0x2194] sm:$0xf]  ;;  %v17115_v46 = vld [vmem:[%s27866_s3 + $0x21a0] sm:$0xf0] }
 0x4e7   :  { %v16928_v4 = vor.u32 %v18931_v48, %v16925_v47  ;;  %v10006_v31 = vsel %vm1177_vm3, %v9951_v22, 0  ;;  %v17097_v48 = vld [vmem:[%s27866_s3 + $0x2170] sm:$0xf]  ;;  %v18964_v47 = vld [vmem:[%s27866_s3 + $0x217c] sm:$0xf0] }
 0x4e8   :  { %9601 = vmatmul.bf16.vlgmr.msra.gmra.mxu3 %v20715_v32  ;;  %v8423_v25 = vpop.f32.mrf.mxu0  ;;  %v18974_v22 = vld [vmem:[%s27866_s3 + $0x21d4] sm:$0xf] }
 0x4e9   :  { %9661 = vmatpush.bf16.msrb.mxu3 %v9588_v63  ;;  %9648 = vmatpush.bf16.msrb.mxu1 %v16844_v30  ;;  %v18897_v63 = vld [vmem:[%s27866_s3 + $0x1f54] sm:$0xf0]  ;;  %v18954_v25 = vld [vmem:[%s27866_s3 + $0x2134] sm:$0xf] }
 0x4ea   :  { %9687 = vmatpush.bf16.msrb.mxu2 %v9591_v28  ;;  %9674 = vmatpush.bf16.msrb.mxu0 %v16848_v61  ;;  %v16907_v28 = vld [vmem:[%s27866_s3 + $0x2048] sm:$0xf]  ;;  %v18929_v30 = vld [vmem:[%s27866_s3 + $0x2054] sm:$0xf0]  ;;  %v18927_v61 = vld [vmem:[%s27866_s3 + $0x204c] sm:$0xf] }
 0x4eb   :  { %9627 = vmatmul.bf16.vlgmr.msra.gmra.mxu2 %v20715_v32  ;;  %v16908_v44 = vor.u32 %v18929_v30, %v16907_v28  ;;  %v16912_v59 = vor.u32 %v18927_v61, %v16909_v51  ;;  %v8410_v57 = vpop.f32.mrf.mxu3  ;;  %v17098_v30 = vor.u32 %v18964_v47, %v17097_v48  ;;  %v18960_v61 = vld [vmem:[%s27866_s3 + $0x215c] sm:$0xf0]  ;;  %v18969_v48 = vld [vmem:[%s27866_s3 + $0x21a4] sm:$0xf0] }
 0x4ec   :  { %v17014_v57 = vld [vmem:[%s27866_s3 + $0x2258] sm:$0x33] }
 0x4ed   :  { %9662 = vmatpush.bf16.msrb.mxu3 %v16956_v7  ;;  %9649 = vmatpush.bf16.msrb.mxu1 %v16828_v16  ;;  %v8409_v7 = vadd.f32 %v8408_v9, %v8395_v6  ;;  %v8397_v16 = vpop.f32.mrf.mxu1  ;;  %v10003_v6 = vsel %vm1177_vm3, %v9950_v42, 0  ;;  %v18980_v42 = vld [vmem:[%s27866_s3 + $0x21fc] sm:$0xf0]  ;;  %v18958_v9 = vld [vmem:[%s27866_s3 + $0x2154] sm:$0xf] }
 0x4ee   :  { %9688 = vmatpush.bf16.msrb.mxu2 %v16960_v20  ;;  %9675 = vmatpush.bf16.msrb.mxu0 %v16832_v34  ;;  %v16780_v20 = vor.u32 %v18897_v63, %v16779_v52  ;;  %v8435_v34 = vadd.f32 %v8434_v60, %v8421_v41  ;;  %v18968_v41 = vld [vmem:[%s27866_s3 + $0x219c] sm:$0xf0]  ;;  %v8436_v54 = vpop.f32.mrf.mxu2  ;;  %v18962_v52 = vld [vmem:[%s27866_s3 + $0x2174] sm:$0xf]  ;;  %v17179_v63 = vld [vmem:[%s27866_s3 + $0x2220] sm:$0xf0] }
 0x4ef   :  { %v8440_v36 = vadd.f32 %v8409_v7, %v26385_v23  ;;  %v17193_v23 = vld [vmem:[%s27866_s3 + $0x2230] sm:$0xf]  ;;  %v17082_v7 = vor.u32 %v18960_v61, %v17081_v15  ;;  %v17123_v54 = vld [vmem:[%s27866_s3 + $0x21a8] sm:$0xf0]  ;;  %v17105_v15 = vld [vmem:[%s27866_s3 + $0x2178] sm:$0xf] }
 0x4f0   :  { %v17065_v60 = vld [vmem:[%s27866_s3 + $0x2130] sm:$0xf]  ;;  %v18965_v61 = vld [vmem:[%s27866_s3 + $0x2184] sm:$0xf0] }
 0x4f1   :  { %9663 = vmatpush.bf16.msrb.mxu3 %v16940_v8  ;;  %9650 = vmatpush.bf16.msrb.mxu1 %v16812_v24  ;;  %v8441_v8 = vadd.f32 %v8435_v34, %v26389_v50  ;;  %v17134_v24 = vor.u32 %v18970_v1, %v17131_v39  ;;  %v26733_v21 = vmax.f32 %v5922_v12, %v8440_v36  ;;  %v18988_v50 = vld [vmem:[%s27866_s3 + $0x223c] sm:$0xf0]  ;;  %v17195_v12 = vld [vmem:[%s27866_s3 + $0x2240] sm:$0xf0]  ;;  %v17145_v1 = vld [vmem:[%s27866_s3 + $0x21d0] sm:$0xf] }
 0x4f2   :  { %9689 = vmatpush.bf16.msrb.mxu2 %v16944_v33  ;;  %9676 = vmatpush.bf16.msrb.mxu0 %v16816_v29  ;;  %v17113_v33 = vld [vmem:[%s27866_s3 + $0x2190] sm:$0xf]  ;;  %v17194_v19 = vor.u32 %v18988_v50, %v17193_v23  ;;  %v17198_v38 = vor.u32 %v18986_v55, %v17195_v12  ;;  %v18976_v39 = vld [vmem:[%s27866_s3 + $0x21dc] sm:$0xf0]  ;;  %v17166_v34 = vor.u32 %v18978_v49, %v17163_v17  ;;  %v17147_v36 = vld [vmem:[%s27866_s3 + $0x21e0] sm:$0xf0] }
 0x4f3   :  { %v26747_v29 = vmax.f32 %v5923_v3, %v8441_v8  ;;  %v17114_v40 = vor.u32 %v18968_v41, %v17113_v33  ;;  %v17118_v3 = vor.u32 %v18966_v37, %v17115_v46  ;;  %v17139_v33 = vld [vmem:[%s27866_s3 + $0x21c8] sm:$0xf0]  ;;  %v17146_v23 = vor.u32 %v18976_v39, %v17145_v1  ;;  %v17049_v37 = vld [vmem:[%s27866_s3 + $0x2110] sm:$0xf]  ;;  %v18952_v46 = vld [vmem:[%s27866_s3 + $0x211c] sm:$0xf0] }
 0x4f4   :  { %v26788_v13 = vpop.f32.mrf.mxu0  ;;  %v18950_v12 = vld [vmem:[%s27866_s3 + $0x2114] sm:$0xf]  ;;  %v17050_v47 = vor.u32 %v18952_v46, %v17049_v37  ;;  %v17017_v49 = vld [vmem:[%s27866_s3 + $0x20d0] sm:$0xf]  ;;  %v18944_v17 = vld [vmem:[%s27866_s3 + $0x20dc] sm:$0xf0] }
 0x4f5   :  { %9664 = vmatpush.bf16.msrb.mxu3 %v16924_v5  ;;  %9651 = vmatpush.bf16.msrb.mxu1 %v16796_v27  ;;  %v18984_v5 = vld [vmem:[%s27866_s3 + $0x221c] sm:$0xf0]  ;;  %v17099_v27 = vld [vmem:[%s27866_s3 + $0x2180] sm:$0xf0]  ;;  %v26786_v28 = vpop.f32.mrf.mxu1  ;;  %v18942_v1 = vld [vmem:[%s27866_s3 + $0x20d4] sm:$0xf] }
 0x4f6   :  { %9690 = vmatpush.bf16.msrb.mxu2 %v16928_v4  ;;  %9677 = vmatpush.bf16.msrb.mxu0 %v16800_v11  ;;  %v18982_v4 = vld [vmem:[%s27866_s3 + $0x2214] sm:$0xf]  ;;  %v17102_v11 = vor.u32 %v18962_v52, %v17099_v27  ;;  %v18948_v52 = vld [vmem:[%s27866_s3 + $0x20fc] sm:$0xf0]  ;;  %v9900_v27 = vunpack.c.l.b16 %v17014_v57  ;;  %v17019_v39 = vld [vmem:[%s27866_s3 + $0x20e0] sm:$0xf0] }
 0x4f7   :  { %v17182_v51 = vor.u32 %v18982_v4, %v17179_v63  ;;  %v9901_v4 = vunpack.c.h.b16 %v17014_v57  ;;  %v18987_v37 = vld [vmem:[%s27866_s3 + $0x223c] sm:$0xf]  ;;  %v17203_v46 = vld [vmem:[%s27866_s3 + $0x2248] sm:$0xf0] }
 0x4f9   :  { %9665 = vmatpush.bf16.msrb.mxu3 %v16908_v44  ;;  %9652 = vmatpush.bf16.msrb.mxu1 %v16780_v20  ;;  %v17086_v20 = vor.u32 %v18958_v9, %v17083_v2  ;;  %v18956_v44 = vld [vmem:[%s27866_s3 + $0x213c] sm:$0xf0] }
 0x4fa   :  { %9691 = vmatpush.bf16.msrb.mxu2 %v16912_v59  ;;  %9678 = vmatpush.bf16.msrb.mxu0 %v16784_v45  ;;  %v17067_v59 = vld [vmem:[%s27866_s3 + $0x2140] sm:$0xf0]  ;;  %v17137_v45 = vld [vmem:[%s27866_s3 + $0x21b8] sm:$0xf]  ;;  %v17066_v8 = vor.u32 %v18956_v44, %v17065_v60  ;;  %v9953_v60 = vpack.c.b16 %v9901_v4, %v9901_v4  ;;  %v17106_v44 = vor.u32 %v18965_v61, %v17105_v15  ;;  %v17059_v4 = vld [vmem:[%s27866_s3 + $0x2128] sm:$0xf0] }
 0x4fb   :  { %v17070_v50 = vor.u32 %v18954_v25, %v17067_v59  ;;  %v18961_v59 = vld [vmem:[%s27866_s3 + $0x2164] sm:$0xf0] }
 0x4fc   :  { %9653 = vmatmul.bf16.vlgmr.msrb.gmra.mxu1 %v20715_v32  ;;  %16963 = vmatmul.msk.bf16.vlgmr.msrb.gmra.mxu3 %vm1173_vm5, %v20639_v53  ;;  %v8860_v41 = vpop.f32.mrf.mxu0 }
 0x4fd   :  { %10014 = vmatpush.bf16.msra.mxu3 %v17130_v56  ;;  %10030 = vmatpush.bf16.msra.mxu1 %v10003_v6  ;;  %v18973_v56 = vld [vmem:[%s27866_s3 + $0x21c4] sm:$0xf0]  ;;  %v8834_v6 = vpop.f32.mrf.mxu1 }
 0x4fe   :  { %10040 = vmatpush.bf16.msra.mxu2 %v17134_v24  ;;  %10056 = vmatpush.bf16.msra.mxu0 %v10006_v31  ;;  %v18971_v24 = vld [vmem:[%s27866_s3 + $0x21bc] sm:$0xf]  ;;  %v17150_v31 = vor.u32 %v18974_v22, %v17147_v36  ;;  %v17138_v55 = vor.u32 %v18973_v56, %v17137_v45  ;;  %v17018_v22 = vor.u32 %v18944_v17, %v17017_v49  ;;  %v10012_v6 = vsel %vm1177_vm3, %v9953_v60, 0  ;;  %v18989_v41 = vld [vmem:[%s27866_s3 + $0x2244] sm:$0xf0] }
 0x4ff   :  { %9679 = vmatmul.bf16.vlgmr.msrb.gmra.mxu0 %v20715_v32  ;;  %16964 = vmatmul.msk.bf16.vlgmr.msrb.gmra.mxu2 %vm1173_vm5, %v20639_v53  ;;  %v17178_v32 = vor.u32 %v18984_v5, %v17177_v43  ;;  %v17161_v53 = vld [vmem:[%s27866_s3 + $0x21f0] sm:$0xf]  ;;  %v18967_v43 = vld [vmem:[%s27866_s3 + $0x219c] sm:$0xf]  ;;  %v17022_v45 = vor.u32 %v18942_v1, %v17019_v39  ;;  %v17171_v17 = vld [vmem:[%s27866_s3 + $0x2208] sm:$0xf0] }
 0x500   :  { %v17162_v16 = vor.u32 %v18980_v42, %v17161_v53  ;;  %v17033_v5 = vld [vmem:[%s27866_s3 + $0x20f0] sm:$0xf]  ;;  %v17107_v42 = vld [vmem:[%s27866_s3 + $0x2188] sm:$0xf0]  ;;  %v18959_v36 = vld [vmem:[%s27866_s3 + $0x215c] sm:$0xf] }
 0x501   :  { %10015 = vmatpush.bf16.msra.mxu3 %v17114_v40  ;;  %10031 = vmatpush.bf16.msra.mxu1 %v17194_v19  ;;  %v17051_v40 = vld [vmem:[%s27866_s3 + $0x2120] sm:$0xf0]  ;;  %v17142_v19 = vor.u32 %v18971_v24, %v17139_v33  ;;  %v17034_v53 = vor.u32 %v18948_v52, %v17033_v5  ;;  %v17073_v24 = vld [vmem:[%s27866_s3 + $0x2138] sm:$0xf]  ;;  %v18983_v5 = vld [vmem:[%s27866_s3 + $0x221c] sm:$0xf] }
 0x502   :  { %10041 = vmatpush.bf16.msra.mxu2 %v17118_v3  ;;  %10057 = vmatpush.bf16.msra.mxu0 %v17198_v38  ;;  %v17121_v3 = vld [vmem:[%s27866_s3 + $0x2198] sm:$0xf]  ;;  %v17054_v38 = vor.u32 %v18950_v12, %v17051_v40  ;;  %v17187_v52 = vld [vmem:[%s27866_s3 + $0x2228] sm:$0xf0]  ;;  %v18979_v49 = vld [vmem:[%s27866_s3 + $0x21fc] sm:$0xf] }
 0x503   :  { %v17122_v63 = vor.u32 %v18969_v48, %v17121_v3  ;;  %v8819_v9 = vpop.f32.mrf.mxu3  ;;  %v17201_v33 = vld [vmem:[%s27866_s3 + $0x2238] sm:$0xf]  ;;  %v17206_v3 = vor.u32 %v18987_v37, %v17203_v46  ;;  %v17190_v61 = vor.u32 %v18983_v5, %v17187_v52  ;;  %v18947_v60 = vld [vmem:[%s27866_s3 + $0x20fc] sm:$0xf]  ;;  %v17359_v5 = vld [vmem:[%s27866_s3 + $0x2320] sm:$0xf] }
 0x504   :  { %v17202_v40 = vor.u32 %v18989_v41, %v17201_v33  ;;  %v17057_v48 = vld [vmem:[%s27866_s3 + $0x2118] sm:$0xf]  ;;  %v17027_v33 = vld [vmem:[%s27866_s3 + $0x20e8] sm:$0xf0]  ;;  %v17375_v41 = vld [vmem:[%s27866_s3 + $0x2340] sm:$0xf] }
 0x505   :  { %10016 = vmatpush.bf16.msra.mxu3 %v17098_v30  ;;  %10032 = vmatpush.bf16.msra.mxu1 %v17178_v32  ;;  %v18946_v30 = vld [vmem:[%s27866_s3 + $0x20f4] sm:$0xf]  ;;  %v17035_v32 = vld [vmem:[%s27866_s3 + $0x2100] sm:$0xf0]  ;;  %v17025_v1 = vld [vmem:[%s27866_s3 + $0x20d8] sm:$0xf] }
 0x506   :  { %10042 = vmatpush.bf16.msra.mxu2 %v17102_v11  ;;  %10058 = vmatpush.bf16.msra.mxu0 %v17182_v51  ;;  %v17126_v11 = vor.u32 %v18967_v43, %v17123_v54  ;;  %v18963_v51 = vld [vmem:[%s27866_s3 + $0x217c] sm:$0xf]  ;;  %v17038_v2 = vor.u32 %v18946_v30, %v17035_v32  ;;  %v18985_v43 = vld [vmem:[%s27866_s3 + $0x2224] sm:$0xf0]  ;;  %v19016_v52 = vld [vmem:[%s27866_s3 + $0x232c] sm:$0xf0] }
 0x507   :  { %v17110_v25 = vor.u32 %v18963_v51, %v17107_v42  ;;  %v17169_v51 = vld [vmem:[%s27866_s3 + $0x21f8] sm:$0xf]  ;;  %v18981_v42 = vld [vmem:[%s27866_s3 + $0x2204] sm:$0xf0] }
 0x509   :  { %10017 = vmatpush.bf16.msra.mxu3 %v17082_v7  ;;  %10033 = vmatpush.bf16.msra.mxu1 %v17162_v16  ;;  %v9952_v7 = vpack.c.b16 %v9900_v27, %v9900_v27  ;;  %v26912_v16 = vadd.f32 %v26786_v28, %v8819_v9  ;;  %v17089_v28 = vld [vmem:[%s27866_s3 + $0x2158] sm:$0xf]  ;;  %v18951_v27 = vld [vmem:[%s27866_s3 + $0x211c] sm:$0xf] }
 0x50a   :  { %10043 = vmatpush.bf16.msra.mxu2 %v17086_v20  ;;  %10059 = vmatpush.bf16.msra.mxu0 %v17166_v34  ;;  %v8845_v20 = vpop.f32.mrf.mxu2  ;;  %v17062_v9 = vor.u32 %v18951_v27, %v17059_v4  ;;  %v17439_v27 = vld [vmem:[%s27866_s3 + $0x23c0] sm:$0xf]  ;;  %v19036_v4 = vld [vmem:[%s27866_s3 + $0x23cc] sm:$0xf0] }
 0x50b   :  { %v26921_v34 = vadd.f32 %v26788_v13, %v8845_v20  ;;  %v17091_v13 = vld [vmem:[%s27866_s3 + $0x2168] sm:$0xf0]  ;;  %v10009_v56 = vsel %vm1177_vm3, %v9952_v7, 0  ;;  %v8821_v12 = vpop.f32.mrf.mxu3 }
 0x50c   :  { %v17043_v20 = vld [vmem:[%s27866_s3 + $0x2108] sm:$0xf0]  ;;  %v19018_v12 = vld [vmem:[%s27866_s3 + $0x2344] sm:$0xf] }
 0x50d   :  { %10018 = vmatpush.bf16.msra.mxu3 %v17066_v8  ;;  %10034 = vmatpush.bf16.msra.mxu1 %v17146_v23  ;;  %v17090_v8 = vor.u32 %v18961_v59, %v17089_v28  ;;  %v17094_v23 = vor.u32 %v18959_v36, %v17091_v13  ;;  %v18945_v28 = vld [vmem:[%s27866_s3 + $0x20e4] sm:$0xf0]  ;;  %v17153_v59 = vld [vmem:[%s27866_s3 + $0x21d8] sm:$0xf]  ;;  %v17046_v13 = vor.u32 %v18947_v60, %v17043_v20  ;;  %v19032_v60 = vld [vmem:[%s27866_s3 + $0x23ac] sm:$0xf0] }
 0x50e   :  { %10044 = vmatpush.bf16.msra.mxu2 %v17070_v50  ;;  %10060 = vmatpush.bf16.msra.mxu0 %v17150_v31  ;;  %v18957_v50 = vld [vmem:[%s27866_s3 + $0x2144] sm:$0xf0]  ;;  %v18955_v31 = vld [vmem:[%s27866_s3 + $0x213c] sm:$0xf]  ;;  %v19010_v20 = vld [vmem:[%s27866_s3 + $0x2304] sm:$0xf] }
 0x510   :  { %17207 = vmatmul.msk.bf16.vlgmr.msra.gmra.mxu1 %vm1173_vm5, %v20957_v62 }
 0x511   :  { %10066 = vmatpush.bf16.msrb.mxu1 %v17138_v55  ;;  %10019 = vmatpush.bf16.msra.mxu3 %v17050_v47  ;;  %v17075_v55 = vld [vmem:[%s27866_s3 + $0x2148] sm:$0xf0]  ;;  %v17185_v47 = vld [vmem:[%s27866_s3 + $0x2218] sm:$0xf]  ;;  %v8871_v30 = vpop.f32.mrf.mxu1 }
 0x512   :  { %10092 = vmatpush.bf16.msrb.mxu0 %v17142_v19  ;;  %10045 = vmatpush.bf16.msra.mxu2 %v17054_v38  ;;  %v8847_v57 = vpop.f32.mrf.mxu2  ;;  %v17074_v19 = vor.u32 %v18957_v50, %v17073_v24  ;;  %v17078_v54 = vor.u32 %v18955_v31, %v17075_v55  ;;  %v18953_v38 = vld [vmem:[%s27866_s3 + $0x2124] sm:$0xf0]  ;;  %v17186_v32 = vor.u32 %v18985_v43, %v17185_v47 }
 0x513   :  { %17208 = vmatmul.msk.bf16.vlgmr.msra.gmra.mxu0 %vm1173_vm5, %v20957_v62  ;;  %v17058_v15 = vor.u32 %v18953_v38, %v17057_v48  ;;  %v17026_v31 = vor.u32 %v18945_v28, %v17025_v1  ;;  %v19030_v1 = vld [vmem:[%s27866_s3 + $0x23a4] sm:$0xf] }
 0x515   :  { %10067 = vmatpush.bf16.msrb.mxu1 %v17122_v63  ;;  %10020 = vmatpush.bf16.msra.mxu3 %v17034_v53  ;;  %v17259_v63 = vld [vmem:[%s27866_s3 + $0x23e0] sm:$0x33]  ;;  %v17041_v53 = vld [vmem:[%s27866_s3 + $0x20f8] sm:$0xf] }
 0x516   :  { %10093 = vmatpush.bf16.msrb.mxu0 %v17126_v11  ;;  %10046 = vmatpush.bf16.msra.mxu2 %v17038_v2  ;;  %v8897_v11 = vpop.f32.mrf.mxu0  ;;  %v18949_v2 = vld [vmem:[%s27866_s3 + $0x2104] sm:$0xf0]  ;;  %v10319_v7 = vunpack.c.l.b16 %v17259_v63  ;;  %v10320_v36 = vunpack.c.h.b16 %v17259_v63  ;;  %v19014_v63 = vld [vmem:[%s27866_s3 + $0x2324] sm:$0xf] }
 0x517   :  { %v17042_v39 = vor.u32 %v18949_v2, %v17041_v53  ;;  %v8884_v24 = vpop.f32.mrf.mxu3  ;;  %v19012_v2 = vld [vmem:[%s27866_s3 + $0x230c] sm:$0xf0] }
 0x518   :  { %v27044_v50 = vadd.f32 %v8884_v24, %v8871_v30  ;;  %v10372_v48 = vpack.c.b16 %v10320_v36, %v10320_v36  ;;  %v17361_v30 = vld [vmem:[%s27866_s3 + $0x2330] sm:$0xf0]  ;;  %v17327_v36 = vld [vmem:[%s27866_s3 + $0x22e0] sm:$0xf]  ;;  %v19026_v24 = vld [vmem:[%s27866_s3 + $0x2384] sm:$0xf] }
 0x519   :  { %10068 = vmatpush.bf16.msrb.mxu1 %v17106_v44  ;;  %10021 = vmatpush.bf16.msra.mxu3 %v17018_v22  ;;  %v17170_v44 = vor.u32 %v18981_v42, %v17169_v51  ;;  %v18977_v22 = vld [vmem:[%s27866_s3 + $0x21e4] sm:$0xf0]  ;;  %v8873_v46 = vpop.f32.mrf.mxu1  ;;  %v17440_v51 = vor.u32 %v19036_v4, %v17439_v27  ;;  %v17364_v42 = vor.u32 %v19014_v63, %v17361_v30  ;;  %v17385_v27 = vld [vmem:[%s27866_s3 + $0x2358] sm:$0xf0] }
 0x51a   :  { %10094 = vmatpush.bf16.msrb.mxu0 %v17110_v25  ;;  %10047 = vmatpush.bf16.msra.mxu2 %v17022_v45  ;;  %v17174_v25 = vor.u32 %v18979_v49, %v17171_v17  ;;  %v18943_v45 = vld [vmem:[%s27866_s3 + $0x20dc] sm:$0xf]  ;;  %v8910_v37 = vpop.f32.mrf.mxu2  ;;  %v17154_v55 = vor.u32 %v18977_v22, %v17153_v59  ;;  %v17423_v49 = vld [vmem:[%s27866_s3 + $0x23a0] sm:$0xf] }
 0x51b   :  { %v27052_v57 = vadd.f32 %v8910_v37, %v8897_v11  ;;  %v17030_v47 = vor.u32 %v18943_v45, %v17027_v33  ;;  %v19034_v11 = vld [vmem:[%s27866_s3 + $0x23c4] sm:$0xf]  ;;  %v17409_v33 = vld [vmem:[%s27866_s3 + $0x2390] sm:$0xf0] }
 0x51c   :  { %10022 = vmatmul.bf16.vlgmr.msra.gmra.mxu3 %v21033_v58 }
 0x51d   :  { %10082 = vmatpush.bf16.msrb.mxu3 %v10009_v56  ;;  %10069 = vmatpush.bf16.msrb.mxu1 %v17090_v8  ;;  %v18975_v56 = vld [vmem:[%s27866_s3 + $0x21dc] sm:$0xf]  ;;  %v10371_v8 = vpack.c.b16 %v10319_v7, %v10319_v7 }
 0x51e   :  { %10108 = vmatpush.bf16.msrb.mxu2 %v10012_v6  ;;  %10095 = vmatpush.bf16.msrb.mxu0 %v17094_v23  ;;  %v17155_v6 = vld [vmem:[%s27866_s3 + $0x21e8] sm:$0xf0]  ;;  %v19020_v23 = vld [vmem:[%s27866_s3 + $0x234c] sm:$0xf0] }
 0x51f   :  { %10048 = vmatmul.bf16.vlgmr.msra.gmra.mxu2 %v21033_v58  ;;  %v17376_v43 = vor.u32 %v19020_v23, %v17375_v41  ;;  %v8886_v53 = vpop.f32.mrf.mxu3  ;;  %v17311_v23 = vld [vmem:[%s27866_s3 + $0x22c0] sm:$0xf] }
 0x520   :  { %v18998_v53 = vld [vmem:[%s27866_s3 + $0x22a4] sm:$0xf] }
 0x521   :  { %10083 = vmatpush.bf16.msrb.mxu3 %v17202_v40  ;;  %10070 = vmatpush.bf16.msrb.mxu1 %v17074_v19  ;;  %v17377_v40 = vld [vmem:[%s27866_s3 + $0x2350] sm:$0xf0]  ;;  %v8899_v19 = vpop.f32.mrf.mxu0 }
 0x522   :  { %10109 = vmatpush.bf16.msrb.mxu2 %v17206_v3  ;;  %10096 = vmatpush.bf16.msrb.mxu0 %v17078_v54  ;;  %v17158_v3 = vor.u32 %v18975_v56, %v17155_v6  ;;  %v10424_v54 = vsel %vm1177_vm3, %v10371_v8, 0  ;;  %v17380_v38 = vor.u32 %v19018_v12, %v17377_v40  ;;  %v8912_v17 = vpop.f32.mrf.mxu2  ;;  %v19028_v56 = vld [vmem:[%s27866_s3 + $0x238c] sm:$0xf0]  ;;  %v19006_v6 = vld [vmem:[%s27866_s3 + $0x22e4] sm:$0xf]  ;;  %v17412_v40 = vor.u32 %v19026_v24, %v17409_v33 }
 0x523   :  { %v17329_v8 = vld [vmem:[%s27866_s3 + $0x22f0] sm:$0xf0]  ;;  %v19024_v12 = vld [vmem:[%s27866_s3 + $0x236c] sm:$0xf0]  ;;  %v19002_v19 = vld [vmem:[%s27866_s3 + $0x22c4] sm:$0xf] }
 0x524   :  { %v17332_v46 = vor.u32 %v19006_v6, %v17329_v8  ;;  %v19011_v6 = vld [vmem:[%s27866_s3 + $0x230c] sm:$0xf]  ;;  %v17353_v8 = vld [vmem:[%s27866_s3 + $0x2318] sm:$0xf0] }
 0x525   :  { %10084 = vmatpush.bf16.msrb.mxu3 %v17186_v32  ;;  %10071 = vmatpush.bf16.msrb.mxu1 %v17058_v15  ;;  %v10427_v32 = vsel %vm1177_vm3, %v10372_v48, 0  ;;  %v17441_v15 = vld [vmem:[%s27866_s3 + $0x23d0] sm:$0xf0]  ;;  %v19022_v48 = vld [vmem:[%s27866_s3 + $0x2364] sm:$0xf] }
 0x526   :  { %10110 = vmatpush.bf16.msrb.mxu2 %v17190_v61  ;;  %10097 = vmatpush.bf16.msrb.mxu0 %v17062_v9  ;;  %v17360_v61 = vor.u32 %v19016_v52, %v17359_v5  ;;  %v17343_v9 = vld [vmem:[%s27866_s3 + $0x2300] sm:$0xf]  ;;  %v17444_v7 = vor.u32 %v19034_v11, %v17441_v15  ;;  %v19019_v52 = vld [vmem:[%s27866_s3 + $0x234c] sm:$0xf]  ;;  %v19000_v11 = vld [vmem:[%s27866_s3 + $0x22ac] sm:$0xf0] }
 0x527   :  { %v17344_v28 = vor.u32 %v19012_v2, %v17343_v9  ;;  %v17388_v9 = vor.u32 %v19019_v52, %v17385_v27  ;;  %v17367_v2 = vld [vmem:[%s27866_s3 + $0x2328] sm:$0xf] }
 0x529   :  { %10085 = vmatpush.bf16.msrb.mxu3 %v17170_v44  ;;  %10072 = vmatpush.bf16.msrb.mxu1 %v17042_v39  ;;  %v17345_v44 = vld [vmem:[%s27866_s3 + $0x2310] sm:$0xf0]  ;;  %v27112_v59 = vpop.f32.mrf.mxu0 }
 0x52a   :  { %10111 = vmatpush.bf16.msrb.mxu2 %v17174_v25  ;;  %10098 = vmatpush.bf16.msrb.mxu0 %v17046_v13  ;;  %v17425_v39 = vld [vmem:[%s27866_s3 + $0x23b0] sm:$0xf0]  ;;  %v27110_v25 = vpop.f32.mrf.mxu1  ;;  %v17348_v22 = vor.u32 %v19010_v20, %v17345_v44  ;;  %v19008_v13 = vld [vmem:[%s27866_s3 + $0x22ec] sm:$0xf0]  ;;  %v17279_v44 = vld [vmem:[%s27866_s3 + $0x2280] sm:$0xf] }
 0x52b   :  { %v17428_v45 = vor.u32 %v19030_v1, %v17425_v39  ;;  %v17328_v41 = vor.u32 %v19008_v13, %v17327_v36  ;;  %v18996_v1 = vld [vmem:[%s27866_s3 + $0x228c] sm:$0xf0]  ;;  %v17281_v36 = vld [vmem:[%s27866_s3 + $0x2290] sm:$0xf0] }
 0x52d   :  { %10086 = vmatpush.bf16.msrb.mxu3 %v17154_v55  ;;  %10073 = vmatpush.bf16.msrb.mxu1 %v17026_v31  ;;  %v19004_v31 = vld [vmem:[%s27866_s3 + $0x22cc] sm:$0xf0]  ;;  %v17391_v55 = vld [vmem:[%s27866_s3 + $0x2360] sm:$0xf] }
 0x52e   :  { %10112 = vmatpush.bf16.msrb.mxu2 %v17158_v3  ;;  %10099 = vmatpush.bf16.msrb.mxu0 %v17030_v47  ;;  %v17313_v3 = vld [vmem:[%s27866_s3 + $0x22d0] sm:$0xf0]  ;;  %v17312_v5 = vor.u32 %v19004_v31, %v17311_v23  ;;  %v17392_v63 = vor.u32 %v19024_v12, %v17391_v55  ;;  %v18992_v23 = vld [vmem:[%s27866_s3 + $0x226c] sm:$0xf0] }
 0x52f   :  { %v17393_v47 = vld [vmem:[%s27866_s3 + $0x2370] sm:$0xf0]  ;;  %v17316_v30 = vor.u32 %v19002_v19, %v17313_v3 }
 0x530   :  { %10074 = vmatmul.bf16.vlgmr.msrb.gmra.mxu1 %v21033_v58  ;;  %17209 = vmatmul.msk.bf16.vlgmr.msrb.gmra.mxu3 %vm1173_vm5, %v20957_v62  ;;  %v17396_v15 = vor.u32 %v19022_v48, %v17393_v47  ;;  %v17265_v19 = vld [vmem:[%s27866_s3 + $0x2270] sm:$0xf0]  ;;  %v17356_v48 = vor.u32 %v19011_v6, %v17353_v8  ;;  %v17335_v47 = vld [vmem:[%s27866_s3 + $0x22e8] sm:$0xf] }
 0x531   :  { %10435 = vmatpush.bf16.msra.mxu3 %v17376_v43  ;;  %10451 = vmatpush.bf16.msra.mxu1 %v10424_v54  ;;  %v17383_v43 = vld [vmem:[%s27866_s3 + $0x2348] sm:$0xf]  ;;  %v19021_v54 = vld [vmem:[%s27866_s3 + $0x2354] sm:$0xf0]  ;;  %v9226_v4 = vpop.f32.mrf.mxu0 }
 0x532   :  { %10461 = vmatpush.bf16.msra.mxu2 %v17380_v38  ;;  %10477 = vmatpush.bf16.msra.mxu0 %v10427_v32  ;;  %v9200_v38 = vpop.f32.mrf.mxu1  ;;  %v17295_v32 = vld [vmem:[%s27866_s3 + $0x22a0] sm:$0xf] }
 0x533   :  { %10100 = vmatmul.bf16.vlgmr.msrb.gmra.mxu0 %v21033_v58  ;;  %17210 = vmatmul.msk.bf16.vlgmr.msrb.gmra.mxu2 %vm1173_vm5, %v20957_v62  ;;  %v17424_v58 = vor.u32 %v19032_v60, %v17423_v49  ;;  %v17407_v62 = vld [vmem:[%s27866_s3 + $0x2380] sm:$0xf]  ;;  %v19017_v49 = vld [vmem:[%s27866_s3 + $0x2334] sm:$0xf0]  ;;  %v17296_v17 = vor.u32 %v19000_v11, %v17295_v32  ;;  %v17369_v60 = vld [vmem:[%s27866_s3 + $0x2338] sm:$0xf0] }
 0x534   :  { %v17408_v37 = vor.u32 %v19028_v56, %v17407_v62  ;;  %v17351_v62 = vld [vmem:[%s27866_s3 + $0x2308] sm:$0xf]  ;;  %v17280_v56 = vor.u32 %v18996_v1, %v17279_v44  ;;  %v19007_v38 = vld [vmem:[%s27866_s3 + $0x22ec] sm:$0xf]  ;;  %v19005_v11 = vld [vmem:[%s27866_s3 + $0x22d4] sm:$0xf0] }
 0x535   :  { %10436 = vmatpush.bf16.msra.mxu3 %v17360_v61  ;;  %10452 = vmatpush.bf16.msra.mxu1 %v17440_v51  ;;  %v17384_v61 = vor.u32 %v19021_v54, %v17383_v43  ;;  %v17297_v51 = vld [vmem:[%s27866_s3 + $0x22b0] sm:$0xf0]  ;;  %v19001_v1 = vld [vmem:[%s27866_s3 + $0x22b4] sm:$0xf0] }
 0x536   :  { %10462 = vmatpush.bf16.msra.mxu2 %v17364_v42  ;;  %10478 = vmatpush.bf16.msra.mxu0 %v17444_v7  ;;  %v17260_v42 = vld [vmem:[%s27866_s3 + $0x23e8] sm:$0x33]  ;;  %v17300_v20 = vor.u32 %v18998_v53, %v17297_v51  ;;  %v17321_v51 = vld [vmem:[%s27866_s3 + $0x22d8] sm:$0xf0] }
 0x537   :  { %v19015_v7 = vld [vmem:[%s27866_s3 + $0x232c] sm:$0xf]  ;;  %v10321_v39 = vunpack.c.l.b16 %v17260_v42  ;;  %v9185_v24 = vpop.f32.mrf.mxu3 }
 0x538   :  { %v17372_v13 = vor.u32 %v19015_v7, %v17369_v60  ;;  %v9186_v31 = vadd.f32 %v9185_v24, %v26912_v16  ;;  %v19009_v16 = vld [vmem:[%s27866_s3 + $0x22f4] sm:$0xf0]  ;;  %v19003_v53 = vld [vmem:[%s27866_s3 + $0x22cc] sm:$0xf]  ;;  %v17303_v7 = vld [vmem:[%s27866_s3 + $0x22a8] sm:$0xf] }
 0x539   :  { %10437 = vmatpush.bf16.msra.mxu3 %v17344_v28  ;;  %10453 = vmatpush.bf16.msra.mxu1 %v17424_v58  ;;  %v10322_v28 = vunpack.c.h.b16 %v17260_v42  ;;  %v17368_v58 = vor.u32 %v19017_v49, %v17367_v2  ;;  %v17336_v4 = vor.u32 %v19009_v16, %v17335_v47  ;;  %v17431_v60 = vld [vmem:[%s27866_s3 + $0x23a8] sm:$0xf]  ;;  %v17324_v44 = vor.u32 %v19003_v53, %v17321_v51  ;;  %v18993_v47 = vld [vmem:[%s27866_s3 + $0x2274] sm:$0xf0] }
 0x53a   :  { %10463 = vmatpush.bf16.msra.mxu2 %v17348_v22  ;;  %10479 = vmatpush.bf16.msra.mxu0 %v17428_v45  ;;  %v18994_v22 = vld [vmem:[%s27866_s3 + $0x2284] sm:$0xf]  ;;  %v19013_v45 = vld [vmem:[%s27866_s3 + $0x2314] sm:$0xf0]  ;;  %v9211_v55 = vpop.f32.mrf.mxu2  ;;  %v27250_v43 = vadd.f32 %v27110_v25, %v9186_v31  ;;  %v17304_v6 = vor.u32 %v19001_v1, %v17303_v7  ;;  %v17287_v24 = vld [vmem:[%s27866_s3 + $0x2288] sm:$0xf] }
 0x53b   :  { %v17284_v33 = vor.u32 %v18994_v22, %v17281_v36  ;;  %v17352_v12 = vor.u32 %v19013_v45, %v17351_v62  ;;  %v9212_v3 = vadd.f32 %v9211_v55, %v26921_v34  ;;  %v17337_v34 = vld [vmem:[%s27866_s3 + $0x22f8] sm:$0xf0]  ;;  %v17505_v36 = vld [vmem:[%s27866_s3 + $0x2570] sm:$0x33]  ;;  %v17399_v16 = vld [vmem:[%s27866_s3 + $0x2368] sm:$0xf] }
 0x53c   :  { %v17340_v32 = vor.u32 %v19007_v38, %v17337_v34  ;;  %v17305_v22 = vld [vmem:[%s27866_s3 + $0x22b8] sm:$0xf0]  ;;  %v10740_v55 = vunpack.c.l.b16 %v17505_v36  ;;  %v10741_v38 = vunpack.c.h.b16 %v17505_v36  ;;  %v19062_v36 = vld [vmem:[%s27866_s3 + $0x24b4] sm:$0xf] }
 0x53d   :  { %10438 = vmatpush.bf16.msra.mxu3 %v17328_v41  ;;  %10454 = vmatpush.bf16.msra.mxu1 %v17408_v37  ;;  %v17263_v41 = vld [vmem:[%s27866_s3 + $0x2260] sm:$0xf]  ;;  %v10373_v37 = vpack.c.b16 %v10321_v39, %v10321_v39  ;;  %v19031_v39 = vld [vmem:[%s27866_s3 + $0x23ac] sm:$0xf]  ;;  %v17417_v31 = vld [vmem:[%s27866_s3 + $0x2398] sm:$0xf0] }
 0x53e   :  { %10464 = vmatpush.bf16.msra.mxu2 %v17332_v46  ;;  %10480 = vmatpush.bf16.msra.mxu0 %v17412_v40  ;;  %v10374_v46 = vpack.c.b16 %v10322_v28, %v10322_v28  ;;  %v18990_v40 = vld [vmem:[%s27866_s3 + $0x2264] sm:$0xf]  ;;  %v17264_v54 = vor.u32 %v18992_v23, %v17263_v41  ;;  %v17433_v28 = vld [vmem:[%s27866_s3 + $0x23b8] sm:$0xf0]  ;;  %v19029_v41 = vld [vmem:[%s27866_s3 + $0x2394] sm:$0xf0]  ;;  %v10793_v7 = vpack.c.b16 %v10741_v38, %v10741_v38 }
 0x53f   :  { %v17268_v52 = vor.u32 %v18990_v40, %v17265_v19  ;;  %v10430_v27 = vsel %vm1177_vm3, %v10373_v37, 0  ;;  %v9187_v42 = vpop.f32.mrf.mxu3  ;;  %v17436_v8 = vor.u32 %v19031_v39, %v17433_v28  ;;  %v17271_v19 = vld [vmem:[%s27866_s3 + $0x2268] sm:$0xf]  ;;  %v17605_v39 = vld [vmem:[%s27866_s3 + $0x24b0] sm:$0xf] }
 0x540   :  { %v10433_v25 = vsel %vm1177_vm3, %v10374_v46, 0  ;;  %v19027_v46 = vld [vmem:[%s27866_s3 + $0x238c] sm:$0xf]  ;;  %v17272_v53 = vor.u32 %v18993_v47, %v17271_v19  ;;  %v19066_v42 = vld [vmem:[%s27866_s3 + $0x24d4] sm:$0xf] }
 0x541   :  { %10439 = vmatpush.bf16.msra.mxu3 %v17312_v5  ;;  %10455 = vmatpush.bf16.msra.mxu1 %v17392_v63  ;;  %v27259_v5 = vadd.f32 %v27112_v59, %v9212_v3  ;;  %v17319_v63 = vld [vmem:[%s27866_s3 + $0x22c8] sm:$0xf]  ;;  %v19037_v59 = vld [vmem:[%s27866_s3 + $0x23d4] sm:$0xf0]  ;;  %v19064_v28 = vld [vmem:[%s27866_s3 + $0x24bc] sm:$0xf0] }
 0x542   :  { %10465 = vmatpush.bf16.msra.mxu2 %v17316_v30  ;;  %10481 = vmatpush.bf16.msra.mxu0 %v17396_v15  ;;  %v17447_v30 = vld [vmem:[%s27866_s3 + $0x23c8] sm:$0xf]  ;;  %v19035_v15 = vld [vmem:[%s27866_s3 + $0x23cc] sm:$0xf]  ;;  %v9213_v2 = vpop.f32.mrf.mxu2  ;;  %v17320_v49 = vor.u32 %v19005_v11, %v17319_v63 }
 0x544   :  { %17453 = vmatmul.msk.bf16.vlgmr.msra.gmra.mxu1 %vm1173_vm5, %v21283_v26 }
 0x545   :  { %10487 = vmatpush.bf16.msrb.mxu1 %v17384_v61  ;;  %10440 = vmatpush.bf16.msra.mxu3 %v17296_v17  ;;  %v17449_v61 = vld [vmem:[%s27866_s3 + $0x23d8] sm:$0xf0] }
 0x546   :  { %10513 = vmatpush.bf16.msrb.mxu0 %v17388_v9  ;;  %10466 = vmatpush.bf16.msra.mxu2 %v17300_v20  ;;  %v17448_v9 = vor.u32 %v19037_v59, %v17447_v30  ;;  %v17452_v17 = vor.u32 %v19035_v15, %v17449_v61  ;;  %v19033_v20 = vld [vmem:[%s27866_s3 + $0x23b4] sm:$0xf0]  ;;  %v17273_v30 = vld [vmem:[%s27866_s3 + $0x2278] sm:$0xf0]  ;;  %v17621_v59 = vld [vmem:[%s27866_s3 + $0x24d0] sm:$0xf] }
 0x547   :  { %17454 = vmatmul.msk.bf16.vlgmr.msra.gmra.mxu0 %vm1173_vm5, %v21283_v26  ;;  %v17432_v62 = vor.u32 %v19033_v20, %v17431_v60 }
 0x549   :  { %10488 = vmatpush.bf16.msrb.mxu1 %v17368_v58  ;;  %10441 = vmatpush.bf16.msra.mxu3 %v17280_v56  ;;  %v18999_v58 = vld [vmem:[%s27866_s3 + $0x22ac] sm:$0xf]  ;;  %v9263_v56 = vpop.f32.mrf.mxu0 }
 0x54a   :  { %10514 = vmatpush.bf16.msrb.mxu0 %v17372_v13  ;;  %10467 = vmatpush.bf16.msra.mxu2 %v17284_v33  ;;  %v9237_v13 = vpop.f32.mrf.mxu1  ;;  %v17415_v33 = vld [vmem:[%s27866_s3 + $0x2388] sm:$0xf]  ;;  %v9264_v23 = vadd.f32 %v9263_v56, %v27052_v57  ;;  %v17308_v37 = vor.u32 %v18999_v58, %v17305_v22  ;;  %v17289_v57 = vld [vmem:[%s27866_s3 + $0x2298] sm:$0xf0]  ;;  %v17685_v58 = vld [vmem:[%s27866_s3 + $0x2550] sm:$0xf] }
 0x54b   :  { %v9238_v45 = vadd.f32 %v9237_v13, %v27044_v50  ;;  %v18997_v50 = vld [vmem:[%s27866_s3 + $0x2294] sm:$0xf0]  ;;  %v17416_v40 = vor.u32 %v19029_v41, %v17415_v33  ;;  %v9250_v63 = vpop.f32.mrf.mxu3  ;;  %v19084_v22 = vld [vmem:[%s27866_s3 + $0x255c] sm:$0xf0]  ;;  %v17607_v13 = vld [vmem:[%s27866_s3 + $0x24c0] sm:$0xf0] }
 0x54c   :  { %v17288_v3 = vor.u32 %v18997_v50, %v17287_v24  ;;  %v17687_v56 = vld [vmem:[%s27866_s3 + $0x2560] sm:$0xf0]  ;;  %v17686_v24 = vor.u32 %v19084_v22, %v17685_v58  ;;  %v17610_v33 = vor.u32 %v19062_v36, %v17607_v13  ;;  %v17589_v41 = vld [vmem:[%s27866_s3 + $0x2490] sm:$0xf]  ;;  %v19048_v13 = vld [vmem:[%s27866_s3 + $0x243c] sm:$0xf0] }
 0x54d   :  { %10489 = vmatpush.bf16.msrb.mxu1 %v17352_v12  ;;  %10442 = vmatpush.bf16.msra.mxu3 %v17264_v54  ;;  %v18995_v12 = vld [vmem:[%s27866_s3 + $0x228c] sm:$0xf]  ;;  %v19025_v54 = vld [vmem:[%s27866_s3 + $0x2374] sm:$0xf0]  ;;  %v27372_v11 = vadd.f32 %v9250_v63, %v9238_v45  ;;  %v19082_v45 = vld [vmem:[%s27866_s3 + $0x2554] sm:$0xf] }
 0x54e   :  { %10515 = vmatpush.bf16.msrb.mxu0 %v17356_v48  ;;  %10468 = vmatpush.bf16.msra.mxu2 %v17268_v52  ;;  %v17420_v48 = vor.u32 %v19027_v46, %v17417_v31  ;;  %v17292_v34 = vor.u32 %v18995_v12, %v17289_v57  ;;  %v18991_v52 = vld [vmem:[%s27866_s3 + $0x226c] sm:$0xf]  ;;  %v9276_v15 = vpop.f32.mrf.mxu2  ;;  %v17400_v51 = vor.u32 %v19025_v54, %v17399_v16  ;;  %v19080_v31 = vld [vmem:[%s27866_s3 + $0x253c] sm:$0xf0]  ;;  %v17591_v12 = vld [vmem:[%s27866_s3 + $0x24a0] sm:$0xf0] }
 0x54f   :  { %v27380_v2 = vadd.f32 %v9276_v15, %v9264_v23  ;;  %v17276_v60 = vor.u32 %v18991_v52, %v17273_v30  ;;  %v19060_v23 = vld [vmem:[%s27866_s3 + $0x249c] sm:$0xf0]  ;;  %v17690_v46 = vor.u32 %v19082_v45, %v17687_v56  ;;  %v19078_v57 = vld [vmem:[%s27866_s3 + $0x2534] sm:$0xf]  ;;  %v17573_v16 = vld [vmem:[%s27866_s3 + $0x2470] sm:$0xf] }
 0x550   :  { %10443 = vmatmul.bf16.vlgmr.msra.gmra.mxu3 %v21365_v10  ;;  %v19056_v54 = vld [vmem:[%s27866_s3 + $0x247c] sm:$0xf0]  ;;  %v19054_v52 = vld [vmem:[%s27866_s3 + $0x2474] sm:$0xf]  ;;  %v17557_v30 = vld [vmem:[%s27866_s3 + $0x2450] sm:$0xf] }
 0x551   :  { %10503 = vmatpush.bf16.msrb.mxu3 %v10430_v27  ;;  %10490 = vmatpush.bf16.msrb.mxu1 %v17336_v4  ;;  %v19023_v27 = vld [vmem:[%s27866_s3 + $0x236c] sm:$0xf]  ;;  %v10792_v4 = vpack.c.b16 %v10740_v55, %v10740_v55  ;;  %v19058_v55 = vld [vmem:[%s27866_s3 + $0x2494] sm:$0xf]  ;;  %v17574_v63 = vor.u32 %v19056_v54, %v17573_v16  ;;  %v19052_v15 = vld [vmem:[%s27866_s3 + $0x245c] sm:$0xf0] }
 0x552   :  { %10529 = vmatpush.bf16.msrb.mxu2 %v10433_v25  ;;  %10516 = vmatpush.bf16.msrb.mxu0 %v17340_v32  ;;  %v17401_v25 = vld [vmem:[%s27866_s3 + $0x2378] sm:$0xf0]  ;;  %v19068_v32 = vld [vmem:[%s27866_s3 + $0x24dc] sm:$0xf0]  ;;  %v9239_v61 = vpop.f32.mrf.mxu1  ;;  %v17594_v47 = vor.u32 %v19058_v55, %v17591_v12  ;;  %v17541_v36 = vld [vmem:[%s27866_s3 + $0x2430] sm:$0xf] }
 0x553   :  { %10469 = vmatmul.bf16.vlgmr.msra.gmra.mxu2 %v21365_v10  ;;  %v17622_v20 = vor.u32 %v19068_v32, %v17621_v59  ;;  %v17637_v61 = vld [vmem:[%s27866_s3 + $0x24f0] sm:$0xf]  ;;  %v19046_v56 = vld [vmem:[%s27866_s3 + $0x2434] sm:$0xf]  ;;  %v19044_v55 = vld [vmem:[%s27866_s3 + $0x241c] sm:$0xf0] }
 0x554   :  { %v17597_v16 = vld [vmem:[%s27866_s3 + $0x2498] sm:$0xf]  ;;  %v19061_v54 = vld [vmem:[%s27866_s3 + $0x24a4] sm:$0xf0] }
 0x555   :  { %10504 = vmatpush.bf16.msrb.mxu3 %v17448_v9  ;;  %10491 = vmatpush.bf16.msrb.mxu1 %v17320_v49  ;;  %v17623_v9 = vld [vmem:[%s27866_s3 + $0x24e0] sm:$0xf0]  ;;  %v9265_v49 = vpop.f32.mrf.mxu0 }
 0x556   :  { %10530 = vmatpush.bf16.msrb.mxu2 %v17452_v17  ;;  %10517 = vmatpush.bf16.msrb.mxu0 %v17324_v44  ;;  %v17404_v17 = vor.u32 %v19023_v27, %v17401_v25  ;;  %v10845_v44 = vsel %vm1177_vm3, %v10792_v4, 0  ;;  %v17626_v1 = vor.u32 %v19066_v42, %v17623_v9  ;;  %v9278_v50 = vpop.f32.mrf.mxu2  ;;  %v17575_v27 = vld [vmem:[%s27866_s3 + $0x2480] sm:$0xf0]  ;;  %v19074_v25 = vld [vmem:[%s27866_s3 + $0x2514] sm:$0xf] }
 0x557   :  { %v17655_v4 = vld [vmem:[%s27866_s3 + $0x2520] sm:$0xf0]  ;;  %v17578_v32 = vor.u32 %v19054_v52, %v17575_v27  ;;  %v19050_v42 = vld [vmem:[%s27866_s3 + $0x2454] sm:$0xf]  ;;  %v17615_v50 = vld [vmem:[%s27866_s3 + $0x24c8] sm:$0xf0] }
 0x558   :  { %v17559_v9 = vld [vmem:[%s27866_s3 + $0x2460] sm:$0xf0]  ;;  %v19070_v49 = vld [vmem:[%s27866_s3 + $0x24f4] sm:$0xf] }
 0x559   :  { %10505 = vmatpush.bf16.msrb.mxu3 %v17432_v62  ;;  %10492 = vmatpush.bf16.msrb.mxu1 %v17304_v6  ;;  %v10848_v62 = vsel %vm1177_vm3, %v10793_v7, 0  ;;  %v17606_v6 = vor.u32 %v19064_v28, %v17605_v39  ;;  %v17629_v7 = vld [vmem:[%s27866_s3 + $0x24d8] sm:$0xf]  ;;  %v17631_v39 = vld [vmem:[%s27866_s3 + $0x24e8] sm:$0xf0]  ;;  %v17562_v22 = vor.u32 %v19050_v42, %v17559_v9 }
 0x55a   :  { %10531 = vmatpush.bf16.msrb.mxu2 %v17436_v8  ;;  %10518 = vmatpush.bf16.msrb.mxu0 %v17308_v37  ;;  %v9252_v8 = vpop.f32.mrf.mxu3  ;;  %v17669_v37 = vld [vmem:[%s27866_s3 + $0x2530] sm:$0xf]  ;;  %v27438_v19 = vpop.f32.mrf.mxu1  ;;  %v17581_v9 = vld [vmem:[%s27866_s3 + $0x2478] sm:$0xf] }
 0x55b   :  { %v17506_v8 = vld [vmem:[%s27866_s3 + $0x2578] sm:$0x33] }
 0x55c   :  { %v10742_v12 = vunpack.c.l.b16 %v17506_v8 }
 0x55d   :  { %10506 = vmatpush.bf16.msrb.mxu3 %v17416_v40  ;;  %10493 = vmatpush.bf16.msrb.mxu1 %v17288_v3  ;;  %v17671_v40 = vld [vmem:[%s27866_s3 + $0x2540] sm:$0xf0]  ;;  %v17590_v3 = vor.u32 %v19060_v23, %v17589_v41  ;;  %v19065_v41 = vld [vmem:[%s27866_s3 + $0x24c4] sm:$0xf0]  ;;  %v17542_v23 = vor.u32 %v19048_v13, %v17541_v36  ;;  %v19083_v36 = vld [vmem:[%s27866_s3 + $0x255c] sm:$0xf] }
 0x55e   :  { %10532 = vmatpush.bf16.msrb.mxu2 %v17420_v48  ;;  %10519 = vmatpush.bf16.msrb.mxu0 %v17292_v34  ;;  %v27440_v48 = vpop.f32.mrf.mxu0  ;;  %v17674_v38 = vor.u32 %v19078_v57, %v17671_v40  ;;  %v19076_v34 = vld [vmem:[%s27866_s3 + $0x251c] sm:$0xf0]  ;;  %v10743_v57 = vunpack.c.h.b16 %v17506_v8  ;;  %v17695_v13 = vld [vmem:[%s27866_s3 + $0x2568] sm:$0xf0] }
 0x561   :  { %10507 = vmatpush.bf16.msrb.mxu3 %v17400_v51  ;;  %10494 = vmatpush.bf16.msrb.mxu1 %v17272_v53  ;;  %v19072_v53 = vld [vmem:[%s27866_s3 + $0x24fc] sm:$0xf0]  ;;  %v17658_v51 = vor.u32 %v19074_v25, %v17655_v4  ;;  %v17509_v25 = vld [vmem:[%s27866_s3 + $0x23f0] sm:$0xf] }
 0x562   :  { %10533 = vmatpush.bf16.msrb.mxu2 %v17404_v17  ;;  %10520 = vmatpush.bf16.msrb.mxu0 %v17276_v60  ;;  %v17639_v17 = vld [vmem:[%s27866_s3 + $0x2500] sm:$0xf0]  ;;  %v19069_v60 = vld [vmem:[%s27866_s3 + $0x24e4] sm:$0xf0]  ;;  %v17638_v58 = vor.u32 %v19072_v53, %v17637_v61  ;;  %v19040_v4 = vld [vmem:[%s27866_s3 + $0x23fc] sm:$0xf0] }
 0x563   :  { %v17630_v45 = vor.u32 %v19069_v60, %v17629_v7  ;;  %v19038_v61 = vld [vmem:[%s27866_s3 + $0x23f4] sm:$0xf]  ;;  %v17511_v53 = vld [vmem:[%s27866_s3 + $0x2400] sm:$0xf0]  ;;  %v19055_v7 = vld [vmem:[%s27866_s3 + $0x247c] sm:$0xf] }
 0x564   :  { %10495 = vmatmul.bf16.vlgmr.msrb.gmra.mxu1 %v21365_v10  ;;  %17455 = vmatmul.msk.bf16.vlgmr.msrb.gmra.mxu3 %vm1173_vm5, %v21283_v26 }
 0x565   :  { %10856 = vmatpush.bf16.msra.mxu3 %v17622_v20  ;;  %10872 = vmatpush.bf16.msra.mxu1 %v10845_v44  ;;  %v9617_v20 = vpop.f32.mrf.mxu1  ;;  %v17558_v44 = vor.u32 %v19052_v15, %v17557_v30  ;;  %v10795_v30 = vpack.c.b16 %v10743_v57, %v10743_v57  ;;  %v17598_v15 = vor.u32 %v19061_v54, %v17597_v16  ;;  %v17551_v57 = vld [vmem:[%s27866_s3 + $0x2448] sm:$0xf0]  ;;  %v17533_v54 = vld [vmem:[%s27866_s3 + $0x2418] sm:$0xf] }
 0x566   :  { %10882 = vmatpush.bf16.msra.mxu2 %v17626_v1  ;;  %10898 = vmatpush.bf16.msra.mxu0 %v10848_v62  ;;  %v19067_v1 = vld [vmem:[%s27866_s3 + $0x24dc] sm:$0xf]  ;;  %v9643_v28 = vpop.f32.mrf.mxu0  ;;  %v17642_v62 = vor.u32 %v19070_v49, %v17639_v17  ;;  %v17510_v17 = vor.u32 %v19040_v4, %v17509_v25  ;;  %v17514_v20 = vor.u32 %v19038_v61, %v17511_v53  ;;  %v17663_v25 = vld [vmem:[%s27866_s3 + $0x2528] sm:$0xf0]  ;;  %v17645_v61 = vld [vmem:[%s27866_s3 + $0x24f8] sm:$0xf] }
 0x567   :  { %10521 = vmatmul.bf16.vlgmr.msrb.gmra.mxu0 %v21365_v10  ;;  %17456 = vmatmul.msk.bf16.vlgmr.msrb.gmra.mxu2 %vm1173_vm5, %v21283_v26  ;;  %v17670_v10 = vor.u32 %v19080_v31, %v17669_v37  ;;  %v17653_v26 = vld [vmem:[%s27866_s3 + $0x2510] sm:$0xf]  ;;  %v19063_v37 = vld [vmem:[%s27866_s3 + $0x24bc] sm:$0xf]  ;;  %v17693_v28 = vld [vmem:[%s27866_s3 + $0x2558] sm:$0xf] }
 0x568   :  { %v17654_v59 = vor.u32 %v19076_v34, %v17653_v26  ;;  %v17525_v31 = vld [vmem:[%s27866_s3 + $0x2410] sm:$0xf]  ;;  %v17599_v34 = vld [vmem:[%s27866_s3 + $0x24a8] sm:$0xf0]  ;;  %v19043_v4 = vld [vmem:[%s27866_s3 + $0x241c] sm:$0xf] }
 0x569   :  { %10857 = vmatpush.bf16.msra.mxu3 %v17606_v6  ;;  %10873 = vmatpush.bf16.msra.mxu1 %v17686_v24  ;;  %v17543_v6 = vld [vmem:[%s27866_s3 + $0x2440] sm:$0xf0]  ;;  %v17634_v24 = vor.u32 %v19067_v1, %v17631_v39  ;;  %v17526_v26 = vor.u32 %v19044_v55, %v17525_v31  ;;  %v17565_v39 = vld [vmem:[%s27866_s3 + $0x2458] sm:$0xf]  ;;  %v19079_v31 = vld [vmem:[%s27866_s3 + $0x253c] sm:$0xf] }
 0x56a   :  { %10883 = vmatpush.bf16.msra.mxu2 %v17610_v33  ;;  %10899 = vmatpush.bf16.msra.mxu0 %v17690_v46  ;;  %v17613_v33 = vld [vmem:[%s27866_s3 + $0x24b8] sm:$0xf]  ;;  %v17546_v46 = vor.u32 %v19046_v56, %v17543_v6  ;;  %v17679_v55 = vld [vmem:[%s27866_s3 + $0x2548] sm:$0xf0]  ;;  %v19073_v53 = vld [vmem:[%s27866_s3 + $0x2504] sm:$0xf0] }
 0x56b   :  { %v17614_v40 = vor.u32 %v19065_v41, %v17613_v33  ;;  %v9602_v52 = vpop.f32.mrf.mxu3  ;;  %v17698_v33 = vor.u32 %v19083_v36, %v17695_v13  ;;  %v17549_v41 = vld [vmem:[%s27866_s3 + $0x2438] sm:$0xf]  ;;  %v17682_v16 = vor.u32 %v19079_v31, %v17679_v55 }
 0x56d   :  { %10858 = vmatpush.bf16.msra.mxu3 %v17590_v3  ;;  %10874 = vmatpush.bf16.msra.mxu1 %v17670_v10  ;;  %v19042_v3 = vld [vmem:[%s27866_s3 + $0x2414] sm:$0xf]  ;;  %v17527_v10 = vld [vmem:[%s27866_s3 + $0x2420] sm:$0xf0] }
 0x56e   :  { %10884 = vmatpush.bf16.msra.mxu2 %v17594_v47  ;;  %10900 = vmatpush.bf16.msra.mxu0 %v17674_v38  ;;  %v17618_v47 = vor.u32 %v19063_v37, %v17615_v50  ;;  %v19059_v38 = vld [vmem:[%s27866_s3 + $0x249c] sm:$0xf]  ;;  %v17530_v27 = vor.u32 %v19042_v3, %v17527_v10  ;;  %v19081_v37 = vld [vmem:[%s27866_s3 + $0x2544] sm:$0xf0] }
 0x56f   :  { %v17602_v42 = vor.u32 %v19059_v38, %v17599_v34  ;;  %v19077_v38 = vld [vmem:[%s27866_s3 + $0x2524] sm:$0xf0] }
 0x571   :  { %10859 = vmatpush.bf16.msra.mxu3 %v17574_v63  ;;  %10875 = vmatpush.bf16.msra.mxu1 %v17654_v59  ;;  %v10794_v63 = vpack.c.b16 %v10742_v12, %v10742_v12  ;;  %v9616_v59 = vadd.f32 %v27438_v19, %v9602_v52  ;;  %v19057_v19 = vld [vmem:[%s27866_s3 + $0x2484] sm:$0xf0]  ;;  %v19047_v12 = vld [vmem:[%s27866_s3 + $0x243c] sm:$0xf] }
 0x572   :  { %10885 = vmatpush.bf16.msra.mxu2 %v17578_v32  ;;  %10901 = vmatpush.bf16.msra.mxu0 %v17658_v51  ;;  %v9628_v32 = vpop.f32.mrf.mxu2  ;;  %v17582_v1 = vor.u32 %v19057_v19, %v17581_v9  ;;  %v17554_v34 = vor.u32 %v19047_v12, %v17551_v57  ;;  %v19045_v52 = vld [vmem:[%s27866_s3 + $0x2424] sm:$0xf0]  ;;  %v19071_v9 = vld [vmem:[%s27866_s3 + $0x24fc] sm:$0xf]  ;;  %v17647_v19 = vld [vmem:[%s27866_s3 + $0x2508] sm:$0xf0] }
 0x573   :  { %v9642_v51 = vadd.f32 %v27440_v48, %v9628_v32  ;;  %v27578_v49 = vadd.f32 %v9616_v59, %v27250_v43  ;;  %v17583_v48 = vld [vmem:[%s27866_s3 + $0x2488] sm:$0xf0]  ;;  %v10854_v43 = vsel %vm1177_vm3, %v10795_v30, 0  ;;  %v9604_v56 = vpop.f32.mrf.mxu3  ;;  %v17534_v59 = vor.u32 %v19045_v52, %v17533_v54  ;;  %v19101_v52 = vld [vmem:[%s27868_s5 + $0x78] sm:$0xff] }
 0x575   :  { %10860 = vmatpush.bf16.msra.mxu3 %v17558_v44  ;;  %10876 = vmatpush.bf16.msra.mxu1 %v17638_v58  ;;  %v27587_v60 = vadd.f32 %v9642_v51, %v27259_v5  ;;  %v10851_v44 = vsel %vm1177_vm3, %v10794_v63, 0  ;;  %v19085_v5 = vld [vmem:[%s27866_s3 + $0x2564] sm:$0xf0]  ;;  %v17586_v58 = vor.u32 %v19055_v7, %v17583_v48  ;;  %v17535_v63 = vld [vmem:[%s27866_s3 + $0x2428] sm:$0xf0] }
 0x576   :  { %10886 = vmatpush.bf16.msra.mxu2 %v17562_v22  ;;  %10902 = vmatpush.bf16.msra.mxu0 %v17642_v62  ;;  %v19053_v22 = vld [vmem:[%s27866_s3 + $0x2464] sm:$0xf0]  ;;  %v19051_v62 = vld [vmem:[%s27866_s3 + $0x245c] sm:$0xf]  ;;  %v17694_v6 = vor.u32 %v19085_v5, %v17693_v28  ;;  %v17538_v51 = vor.u32 %v19043_v4, %v17535_v63  ;;  %v17519_v48 = vld [vmem:[%s27866_s3 + $0x2408] sm:$0xf0] }
 0x577   :  { %v19039_v7 = vld [vmem:[%s27866_s3 + $0x23fc] sm:$0xf] }
 0x578   :  { %17699 = vmatmul.msk.bf16.vlgmr.msra.gmra.mxu1 %vm1173_vm5, %v21617_v14  ;;  %v17522_v36 = vor.u32 %v19039_v7, %v17519_v48  ;;  %v19088_v7 = vld [vmem:[%s27868_s5 + $0x10] sm:$0xff] }
 0x579   :  { %10908 = vmatpush.bf16.msrb.mxu1 %v17630_v45  ;;  %10861 = vmatpush.bf16.msra.mxu3 %v17542_v23  ;;  %v17567_v45 = vld [vmem:[%s27866_s3 + $0x2468] sm:$0xf0]  ;;  %v17677_v23 = vld [vmem:[%s27866_s3 + $0x2538] sm:$0xf]  ;;  %v19096_v48 = vld [vmem:[%s27868_s5 + $0x50] sm:$0xff] }
 0x57a   :  { %10934 = vmatpush.bf16.msrb.mxu0 %v17634_v24  ;;  %10887 = vmatpush.bf16.msra.mxu2 %v17546_v46  ;;  %v9630_v8 = vpop.f32.mrf.mxu2  ;;  %v17566_v24 = vor.u32 %v19053_v22, %v17565_v39  ;;  %v17570_v50 = vor.u32 %v19051_v62, %v17567_v45  ;;  %v19049_v46 = vld [vmem:[%s27866_s3 + $0x2444] sm:$0xf0]  ;;  %v17678_v3 = vor.u32 %v19081_v37, %v17677_v23 }
 0x57b   :  { %17700 = vmatmul.msk.bf16.vlgmr.msra.gmra.mxu0 %vm1173_vm5, %v21617_v14 }
 0x57c   :  { %v9680_v10 = vpop.f32.mrf.mxu0 }
 0x57d   :  { %10909 = vmatpush.bf16.msrb.mxu1 %v17614_v40  ;;  %10862 = vmatpush.bf16.msra.mxu3 %v17526_v26  ;;  %v9654_v40 = vpop.f32.mrf.mxu1  ;;  %v17661_v26 = vld [vmem:[%s27866_s3 + $0x2518] sm:$0xf] }
 0x57e   :  { %10935 = vmatpush.bf16.msrb.mxu0 %v17618_v47  ;;  %10888 = vmatpush.bf16.msra.mxu2 %v17530_v27  ;;  %v17550_v47 = vor.u32 %v19049_v46, %v17549_v41  ;;  %v19075_v27 = vld [vmem:[%s27866_s3 + $0x251c] sm:$0xf]  ;;  %v17662_v30 = vor.u32 %v19077_v38, %v17661_v26 }
 0x57f   :  { %v17666_v32 = vor.u32 %v19075_v27, %v17663_v25  ;;  %v19092_v27 = vld [vmem:[%s27868_s5 + $0x30] sm:$0xff] }
 0x580   :  { %v19100_v25 = vld [vmem:[%s27868_s5 + $0x70] sm:$0xff] }
 0x581   :  { %10910 = vmatpush.bf16.msrb.mxu1 %v17598_v15  ;;  %10863 = vmatpush.bf16.msra.mxu3 %v17510_v17  ;;  %v17517_v15 = vld [vmem:[%s27866_s3 + $0x23f8] sm:$0xf]  ;;  %v9667_v17 = vpop.f32.mrf.mxu3 }
 0x582   :  { %10936 = vmatpush.bf16.msrb.mxu0 %v17602_v42  ;;  %10889 = vmatpush.bf16.msra.mxu2 %v17514_v20  ;;  %v19041_v42 = vld [vmem:[%s27866_s3 + $0x2404] sm:$0xf0]  ;;  %v9668_v20 = vadd.f32 %v9667_v17, %v9654_v40 }
 0x583   :  { %v17518_v5 = vor.u32 %v19041_v42, %v17517_v15  ;;  %v19098_v15 = vld [vmem:[%s27868_s5 + $0x60] sm:$0xff]  ;;  %v19089_v42 = vld [vmem:[%s27868_s5 + $0x18] sm:$0xff] }
 0x584   :  { %10864 = vmatmul.bf16.vlgmr.msra.gmra.mxu3 %v21701_v35  ;;  %v9682_v28 = vpop.f32.mrf.mxu0  ;;  %v9699_v22 = vadd.f32 %v9668_v20, %v27372_v11  ;;  %v19108_v20 = vld [vmem:[%s27868_s5 + $0xb0] sm:$0xff] }
 0x585   :  { %10924 = vmatpush.bf16.msrb.mxu3 %v10851_v44  ;;  %10911 = vmatpush.bf16.msrb.mxu1 %v17582_v1  ;;  %v9693_v44 = vpop.f32.mrf.mxu2  ;;  %v17646_v1 = vor.u32 %v19073_v53, %v17645_v61  ;;  %v19109_v53 = vld [vmem:[%s27868_s5 + $0xb8] sm:$0xff]  ;;  %v19087_v28 = vld [vmem:[%s27868_s5 + $0x8] sm:$0xff] }
 0x586   :  { %10950 = vmatpush.bf16.msrb.mxu2 %v10854_v43  ;;  %10937 = vmatpush.bf16.msrb.mxu0 %v17586_v58  ;;  %v9656_v43 = vpop.f32.mrf.mxu1  ;;  %v9694_v39 = vadd.f32 %v9693_v44, %v9680_v10  ;;  %v17650_v58 = vor.u32 %v19071_v9, %v17647_v19  ;;  %v19097_v9 = vld [vmem:[%s27868_s5 + $0x58] sm:$0xff] }
 0x587   :  { %10890 = vmatmul.bf16.vlgmr.msra.gmra.mxu2 %v21701_v35 }
 0x588   :  { %v9700_v13 = vadd.f32 %v9694_v39, %v27380_v2 }
 0x589   :  { %10925 = vmatpush.bf16.msrb.mxu3 %v17694_v6  ;;  %10912 = vmatpush.bf16.msrb.mxu1 %v17566_v24  ;;  %v9669_v62 = vpop.f32.mrf.mxu3 }
 0x58a   :  { %10951 = vmatpush.bf16.msrb.mxu2 %v17698_v33  ;;  %10938 = vmatpush.bf16.msrb.mxu0 %v17570_v50 }
 0x58d   :  { %10926 = vmatpush.bf16.msrb.mxu3 %v17678_v3  ;;  %10913 = vmatpush.bf16.msrb.mxu1 %v17550_v47  ;;  %v9695_v45 = vpop.f32.mrf.mxu2 }
 0x58e   :  { %10952 = vmatpush.bf16.msrb.mxu2 %v17682_v16  ;;  %10939 = vmatpush.bf16.msrb.mxu0 %v17554_v34  ;;  %v10036_v11 = vpop.f32.mrf.mxu1  ;;  %v19093_v34 = vld [vmem:[%s27868_s5 + $0x38] sm:$0xff] }
 0x590   :  { %v10062_v56 = vpop.f32.mrf.mxu0 }
 0x591   :  { %10927 = vmatpush.bf16.msrb.mxu3 %v17662_v30  ;;  %10914 = vmatpush.bf16.msrb.mxu1 %v17534_v59  ;;  %v19091_v30 = vld [vmem:[%s27868_s5 + $0x28] sm:$0xff] }
 0x592   :  { %10953 = vmatpush.bf16.msrb.mxu2 %v17666_v32  ;;  %10940 = vmatpush.bf16.msrb.mxu0 %v17538_v51  ;;  %v19099_v59 = vld [vmem:[%s27868_s5 + $0x68] sm:$0xff]  ;;  %v19090_v32 = vld [vmem:[%s27868_s5 + $0x20] sm:$0xff] }
 0x595   :  { %10928 = vmatpush.bf16.msrb.mxu3 %v17646_v1  ;;  %10915 = vmatpush.bf16.msrb.mxu1 %v17518_v5  ;;  %v19095_v5 = vld [vmem:[%s27868_s5 + $0x48] sm:$0xff] }
 0x596   :  { %10954 = vmatpush.bf16.msrb.mxu2 %v17650_v58  ;;  %10941 = vmatpush.bf16.msrb.mxu0 %v17522_v36  ;;  %v10038_v6 = vpop.f32.mrf.mxu1  ;;  %v19107_v58 = vld [vmem:[%s27868_s5 + $0xa8] sm:$0xff]  ;;  %v19094_v36 = vld [vmem:[%s27868_s5 + $0x40] sm:$0xff] }
 0x598   :  { %17701 = vmatmul.msk.bf16.vlgmr.msrb.gmra.mxu3 %vm1173_vm5, %v21617_v14  ;;  %10916 = vmatmul.bf16.vlgmr.msrb.gmra.mxu1 %v21701_v35  ;;  %v10064_v2 = vpop.f32.mrf.mxu0 }
 0x599   :  { %17702 = vmatmul.msk.bf16.vlgmr.msrb.gmra.mxu2 %vm1173_vm5, %v21617_v14  ;;  %10942 = vmatmul.bf16.vlgmr.msrb.gmra.mxu0 %v21701_v35  ;;  %v19104_v2 = vld [vmem:[%s27868_s5 + $0x90] sm:$0xff] }
 0x59a   :  { %11198 = vmatpush.bf16.msra.mxu3 %v19093_v34  ;;  %11211 = vmatpush.bf16.msra.mxu1 %v19101_v52 }
 0x59b   :  { %11224 = vmatpush.bf16.msra.mxu2 %v19109_v53 }
 0x59e   :  { %11199 = vmatpush.bf16.msra.mxu3 %v19092_v27  ;;  %11212 = vmatpush.bf16.msra.mxu1 %v19100_v25 }
 0x59f   :  { %v10023_v8 = vpop.f32.mrf.mxu3  ;;  %11225 = vmatpush.bf16.msra.mxu2 %v19108_v20 }
 0x5a0   :  { %v10037_v24 = vadd.f32 %v10036_v11, %v10023_v8  ;;  %v19105_v11 = vld [vmem:[%s27868_s5 + $0x98] sm:$0xff] }
 0x5a2   :  { %v10049_v33 = vpop.f32.mrf.mxu2  ;;  %v27698_v23 = vadd.f32 %v10037_v24, %v27578_v49  ;;  %11200 = vmatpush.bf16.msra.mxu3 %v19091_v30  ;;  %11213 = vmatpush.bf16.msra.mxu1 %v19099_v59  ;;  %v19103_v24 = vld [vmem:[%s27868_s5 + $0x88] sm:$0xff] }
 0x5a3   :  { %v10063_v41 = vadd.f32 %v10062_v56, %v10049_v33  ;;  %11226 = vmatpush.bf16.msra.mxu2 %v19107_v58 }
 0x5a5   :  { %v27701_v37 = vadd.f32 %v10063_v41, %v27587_v60  ;;  %v19110_v41 = vld [vmem:[%s27868_s5 + $0xc0] sm:$0xff] }
 0x5a6   :  { %11201 = vmatpush.bf16.msra.mxu3 %v19090_v32  ;;  %11214 = vmatpush.bf16.msra.mxu1 %v19098_v15 }
 0x5a7   :  { %v10025_v50 = vpop.f32.mrf.mxu3 }
 0x5a8   :  { %v19102_v50 = vld [vmem:[%s27868_s5 + $0x80] sm:$0xff] }
 0x5aa   :  { %v10051_v46 = vpop.f32.mrf.mxu2  ;;  %11202 = vmatpush.bf16.msra.mxu3 %v19089_v42  ;;  %11215 = vmatpush.bf16.msra.mxu1 %v19097_v9 }
 0x5ad   :  { %v10075_v14 = vpop.f32.mrf.mxu1 }
 0x5ae   :  { %11203 = vmatpush.bf16.msra.mxu3 %v19088_v7  ;;  %11216 = vmatpush.bf16.msra.mxu1 %v19096_v48 }
 0x5b0   :  { %v10101_v31 = vpop.f32.mrf.mxu0 }
 0x5b2   :  { %11204 = vmatpush.bf16.msra.mxu3 %v19087_v28  ;;  %11217 = vmatpush.bf16.msra.mxu1 %v19095_v5 }
 0x5b3   :  { %v10088_v55 = vpop.f32.mrf.mxu3 }
 0x5b4   :  { %v10089_v35 = vadd.f32 %v10088_v55, %v10075_v14  ;;  %v10968_v55 = vld [vmem:[%s27867_s4] sm:$0xf] }
 0x5b5   :  { %v10077_v57 = vpop.f32.mrf.mxu1  ;;  %v10972_v7 = vperm.slane %v10968_v55, 2 }
 0x5b6   :  { %v10114_v12 = vpop.f32.mrf.mxu2  ;;  %v27703_v10 = vadd.f32 %v10089_v35, %v9699_v22  ;;  %v19086_v22 = vld [vmem:[%s27868_s5] sm:$0xff]  ;;  %11218 = vmatpush.bf16.msra.mxu1 %v19094_v36  ;;  %v11266_v36 = vld [vmem:[%s27870_s7 + $0x38] sm:$0xf] }
 0x5b7   :  { %v10115_v40 = vadd.f32 %v10114_v12, %v10101_v31  ;;  %11205 = vmatpush.bf16.msra.mxu3 %v19086_v22 }
 0x5b8   :  { %v10103_v3 = vpop.f32.mrf.mxu0 }
 0x5b9   :  { %v27705_v47 = vadd.f32 %v10115_v40, %v9700_v13  ;;  %v19106_v13 = vld [vmem:[%s27868_s5 + $0xa0] sm:$0xff] }
 0x5ba   :  { %11227 = vmatpush.bf16.msra.mxu2 %v19106_v13  ;;  %11244 = vmatpush.bf16.msrb.mxu1 %v19110_v41  ;;  %v11300_v13 = vunpack.c.l.b16 %v11266_v36 }
 0x5bb   :  { %v10090_v16 = vpop.f32.mrf.mxu3 }
 0x5be   :  { %v10116_v49 = vpop.f32.mrf.mxu2  ;;  %11228 = vmatpush.bf16.msra.mxu2 %v19105_v11  ;;  %v19115_v11 = vld [vmem:[%s27870_s7 + $0x20] sm:$0xff] }
 0x5bf   :  { %v10970_v49 = vperm.slane %v10968_v55, 0 }
 0x5c1   :  { %v27707_v54 = vpop.f32.mrf.mxu1 }
 0x5c2   :  { %11229 = vmatpush.bf16.msra.mxu2 %v19104_v2  ;;  %v19112_v2 = vld [vmem:[%s27870_s7 + $0x8] sm:$0xff] }
 0x5c4   :  { %v27709_v60 = vpop.f32.mrf.mxu0 }
 0x5c6   :  { %11230 = vmatpush.bf16.msra.mxu2 %v19103_v24  ;;  %v11349_v24 = vld [vmem:[%s27872_s9 + $0x28] sm:$0x3] }
 0x5c7   :  { %v11375_v41 = vunpack.c.l.b16 %v11349_v24 }
 0x5c9   :  { %v10459_v26 = vpop.f32.mrf.mxu1 }
 0x5ca   :  { %11231 = vmatpush.bf16.msra.mxu2 %v19102_v50  ;;  %v11381_v50 = vpack.c.b16 %v11375_v41, %v11375_v41 }
 0x5cc   :  { %v10485_v38 = vpop.f32.mrf.mxu0 }
 0x5d3   :  { %v10444_v4 = vpop.f32.mrf.mxu3 }
 0x5d4   :  { %v10458_v46 = vadd.f32 %v27707_v54, %v10444_v4  ;;  %v10971_v54 = vperm.slane %v10968_v55, 1 }
 0x5d6   :  { %v10470_v63 = vpop.f32.mrf.mxu2  ;;  %v10539_v35 = vadd.f32 %v10458_v46, %v27698_v23  ;;  %v11392_v46 = vsel %vm1177_vm3, %v11381_v50, 0 }
 0x5d7   :  { %v10484_v14 = vadd.f32 %v27709_v60, %v10470_v63  ;;  %11396 = vmatpush.bf16.msra.mxu0 %v11392_v46 }
 0x5d9   :  { %v10540_v40 = vadd.f32 %v10484_v14, %v27701_v37 }
 0x5db   :  { %v10446_v61 = vpop.f32.mrf.mxu3 }
 0x5de   :  { %v10472_v51 = vpop.f32.mrf.mxu2 }
 0x5e1   :  { %v27744_v19 = vpop.f32.mrf.mxu1 }
 0x5e4   :  { %v27746_v17 = vpop.f32.mrf.mxu0 }
 0x5e7   :  { %v10509_v44 = vpop.f32.mrf.mxu3 }
 0x5e8   :  { %v10510_v37 = vadd.f32 %v10509_v44, %v27744_v19 }
 0x5e9   :  { %v10498_v1 = vpop.f32.mrf.mxu1 }
 0x5ea   :  { %v10535_v43 = vpop.f32.mrf.mxu2  ;;  %v10973_v1 = vperm.slane %v10968_v55, 3 }
 0x5eb   :  { %v10536_v15 = vadd.f32 %v10535_v43, %v27746_v17 }
 0x5ec   :  { %v10524_v39 = vpop.f32.mrf.mxu0 }
 0x5ed   :  { %v10542_v51 = vadd.f32 %v10536_v15, %v27705_v47  ;;  %v19129_v15 = vld [vmem:[%s27873_s10] ss:$0 sm:$0xff] }
 0x5ef   :  { %v10511_v62 = vpop.f32.mrf.mxu3 }
 0x5f0   :  { %v11308_v62 = vpack.c.b16 %v11300_v13, %v11300_v13 }
 0x5f2   :  { %v10537_v45 = vpop.f32.mrf.mxu2 }
 0x5f3   :  { %v19116_v45 = vld [vmem:[%s27870_s7 + $0x28] sm:$0xff] }
 0x5f5   :  { %v10878_v56 = vpop.f32.mrf.mxu1 }
 0x5f8   :  { %v10904_v6 = vpop.f32.mrf.mxu0 }
 0x5fd   :  { %v10880_v8 = vpop.f32.mrf.mxu1 }
 0x5fe   :  { %v19111_v8 = vld [vmem:[%s27870_s7] sm:$0xff] }
 0x600   :  { %v10906_v33 = vpop.f32.mrf.mxu0 }
 0x607   :  { %v10865_v31 = vpop.f32.mrf.mxu3 }
 0x608   :  { %v10879_v12 = vadd.f32 %v10878_v56, %v10865_v31  ;;  %v19114_v56 = vld [vmem:[%s27870_s7 + $0x18] sm:$0xff]  ;;  %v19122_v31 = vld [vmem:[%s27872_s9 + $0x20] sm:$0xff] }
 0x609   :  { %11397 = vmatpush.bf16.msra.mxu0 %v19122_v31 }
 0x60a   :  { %v10891_v57 = vpop.f32.mrf.mxu2  ;;  %v10960_v16 = vadd.f32 %v10879_v12, %v10539_v35  ;;  %v19121_v35 = vld [vmem:[%s27872_s9 + $0x18] sm:$0xff]  ;;  %v19127_v12 = vld [vmem:[%s27869_s6] ss:$0 sm:$0xff] }
 0x60b   :  { %v10905_v3 = vadd.f32 %v10904_v6, %v10891_v57  ;;  %v19113_v6 = vld [vmem:[%s27870_s7 + $0x10] sm:$0xff] }
 0x60c   :  { %v10964_v38 = vmax.f32 %v26598_v18, %v10960_v16  ;;  %v10541_v18 = vadd.f32 %v10510_v37, %v27703_v10 }
 0x60d   :  { %v10961_v26 = vadd.f32 %v10905_v3, %v10540_v40  ;;  %11398 = vmatpush.bf16.msra.mxu0 %v19121_v35  ;;  %v19120_v40 = vld [vmem:[%s27872_s9 + $0x10] sm:$0xff] }
 0x60e   :  { %v10978_v34 = vadd.f32 %v10970_v49, %v10964_v38 }
 0x60f   :  { %v10965_v60 = vmax.f32 %v26612_v0, %v10961_v26  ;;  %v10867_v27 = vpop.f32.mrf.mxu3 }
 0x610   :  { %v10982_v25 = vmax.f32 %v10978_v34, 0.0 }
 0x611   :  { %v10979_v52 = vadd.f32 %v10971_v54, %v10965_v60  ;;  %11399 = vmatpush.bf16.msra.mxu0 %v19120_v40 }
 0x612   :  { %v10893_v4 = vpop.f32.mrf.mxu2  ;;  %v10986_v23 = vpack.c.bf16 %v10982_v25, %v10982_v25  ;;  %v19119_v25 = vld [vmem:[%s27872_s9 + $0x8] sm:$0xff] }
 0x613   :  { %v10983_v63 = vmax.f32 %v10979_v52, 0.0  ;;  %v19118_v4 = vld [vmem:[%s27872_s9] sm:$0xff] }
 0x614   :  { %11206 = vmatmul.bf16.vlgmr.msra.gmra.mxu3 %v10986_v23 }
 0x615   :  { %v10987_v30 = vpack.c.bf16 %v10983_v63, %v10983_v63  ;;  %v10917_v59 = vpop.f32.mrf.mxu1  ;;  %11400 = vmatpush.bf16.msra.mxu0 %v19119_v25  ;;  %v19128_v63 = vld [vmem:[%s27871_s8] ss:$0 sm:$0xff]  ;;  %s19162_s8 = smov [#allocation2]  }
 0x616   :  { %v10943_v32 = vpop.f32.mrf.mxu0  ;;  %s11438_s9 = sshll.u32 %s19162_s8, 4  ;;  %s11439_s9 = int_to_ptr.vmem [resolvable:$true] %s11438_s9 }
 0x617   :  { %11219 = vmatmul.bf16.vlgmr.msra.gmra.mxu1 %v10987_v30 }
 0x619   :  { %11401 = vmatpush.bf16.msra.mxu0 %v19118_v4 }
 0x61b   :  { %v10930_v61 = vpop.f32.mrf.mxu3 }
 0x61c   :  { %v10931_v0 = vadd.f32 %v10930_v61, %v10917_v59  ;;  %v10956_v53 = vpop.f32.mrf.mxu2 }
 0x61d   :  { %v10957_v42 = vadd.f32 %v10956_v53, %v10943_v32  ;;  %v10919_v48 = vpop.f32.mrf.mxu1 }
 0x61e   :  { %v10962_v9 = vadd.f32 %v10931_v0, %v10541_v18  ;;  %v10945_v39 = vpop.f32.mrf.mxu0 }
 0x61f   :  { %v10963_v20 = vadd.f32 %v10957_v42, %v10542_v51 }
 0x620   :  { %v10966_v28 = vmax.f32 %v26733_v21, %v10962_v9  ;;  %v11322_v21 = vsel %vm11320_vm7, %v11308_v62, 0 }
 0x621   :  { %v10967_v19 = vmax.f32 %v26747_v29, %v10963_v20  ;;  %11324 = vmatpush.bf16.msrb.mxu3 %v11322_v21  ;;  %v19117_v29 = vld [vmem:[%s27870_s7 + $0x30] sm:$0xff] }
 0x622   :  { %v10980_v44 = vadd.f32 %v10972_v7, %v10966_v28 }
 0x623   :  { %v10981_v17 = vadd.f32 %v10973_v1, %v10967_v19  ;;  %v10932_v43 = vpop.f32.mrf.mxu3 }
 0x624   :  { %v10984_v5 = vmax.f32 %v10980_v44, 0.0  ;;  %v10958_v10 = vpop.f32.mrf.mxu2 }
 0x625   :  { %v10985_v58 = vmax.f32 %v10981_v17, 0.0  ;;  %11325 = vmatpush.bf16.msrb.mxu3 %v19117_v29 }
 0x626   :  { %v10988_v22 = vpack.c.bf16 %v10984_v5, %v10984_v5 }
 0x627   :  { %v10989_v47 = vpack.c.bf16 %v10985_v58, %v10985_v58 }
 0x628   :  { %11232 = vmatmul.bf16.vlgmr.msra.gmra.mxu2 %v10988_v22 }
 0x629   :  { %17803 = vmatmul.msk.bf16.vlgmr.msrb.gmra.mxu1 %vm11194_vm6, %v10989_v47  ;;  %11326 = vmatpush.bf16.msrb.mxu3 %v19116_v45 }
 0x62d   :  { %11327 = vmatpush.bf16.msrb.mxu3 %v19115_v11 }
 0x631   :  { %11328 = vmatpush.bf16.msrb.mxu3 %v19114_v56 }
 0x635   :  { %11329 = vmatpush.bf16.msrb.mxu3 %v19113_v6 }
 0x639   :  { %11330 = vmatpush.bf16.msrb.mxu3 %v19112_v2 }
 0x63d   :  { %11331 = vmatpush.bf16.msrb.mxu3 %v19111_v8 }
 0x694   :  { %v11220_v33 = vpop.f32.mrf.mxu1 }
 0x697   :  { %v11207_v14 = vpop.f32.mrf.mxu3 }
 0x698   :  { %v11208_v3 = vadd.f32 %v19127_v12, %v11207_v14 }
 0x69a   :  { %v11221_v49 = vadd.f32 %v11220_v33, %v11208_v3 }
 0x69c   :  { %v11222_v55 = vpop.f32.mrf.mxu1 }
 0x69f   :  { %v11209_v57 = vpop.f32.mrf.mxu3 }
 0x6a6   :  { %v11246_v16 = vpop.f32.mrf.mxu1 }
 0x6ab   :  { %v11233_v26 = vpop.f32.mrf.mxu2 }
 0x6ac   :  { %v11234_v54 = vadd.f32 %v11233_v26, %v11221_v49 }
 0x6ae   :  { %v11247_v38 = vadd.f32 %v11246_v16, %v11234_v54  ;;  %v11248_v60 = vpop.f32.mrf.mxu1 }
 0x6b0   :  { %v11250_v34 = vmax.f32 %v11247_v38, 0.0 }
 0x6b2   :  { %v11251_v52 = vpack.c.bf16 %v11250_v34, %v11250_v34 }
 0x6b3   :  { %v11235_v27 = vpop.f32.mrf.mxu2 }
 0x6b4   :  { %17832 = vmatmul.msk.bf16.vlgmr.msrb.gmra.mxu3 %vm11316_vm8, %v11251_v52 }
 0x737   :  { %v11333_v23 = vpop.f32.mrf.mxu3 }
 0x738   :  { %v11334_v30 = vadd.f32 %v19128_v63, %v11333_v23 }
 0x73a   :  { %v11337_v59 = vmax.f32 %v11334_v30, 0.0 }
 0x73c   :  { %v11338_v32 = vpack.c.bf16 %v11337_v59, %v11337_v59 }
 0x73e   :  { %17853 = vmatmul.msk.bf16.vlgmr.msra.gmra.mxu0 %vm11387_vm9, %v11338_v32 }
 0x73f   :  { %v11335_v37 = vpop.f32.mrf.mxu3 }
 0x7bb   :  { %v11403_v61 = vpop.f32.mrf.mxu0 }
 0x7bc   :  { %v11404_v18 = vadd.f32 %v19129_v15, %v11403_v61 }
 0x7be   :  { %v11408_v0 = vsel %vm11407_vm10, %v11404_v18, -inf }
 0x7bf   :  { %11409 = vmax.xlane.f32.xlu0 %v11408_v0 }
 0x7c3   :  { %v11405_v53 = vpop.f32.mrf.mxu0 }
 0x832   :  { %v11410_v51 = vpop.xlane.xlu0 %11409 }
 0x833   :  { %v11411_v42 = vsub.f32 %v11404_v18, %v11410_v51 }
 0x835   :  { %v11412_v9 = vmul.f32 1.442695, %v11411_v42 }
 0x837   :  { %19130 = vpow2.f32 %v11412_v9 }
 0x83d   :  { %v19131_v7 = vpop.eup %19130 }
 0x83e   :  { %v11414_v48 = vsel %vm11407_vm10, %v19131_v7, 0.0 }
 0x83f   :  { %11415 = vadd.xlane.f32.xlu1 %v11414_v48 }
 0x8b2   :  { %v11416_v20 = vpop.xlane.xlu1 %11415 }
 0x8b3   :  { %19132 = vrcp.f32 %v11416_v20  ;;  %v11428_v19 = vand.u32 2147483648, %v11416_v20  ;;  %v11426_v17 = vand.u32 2147483647, %v11416_v20  ;;  %vm11422_vm12 = vweird.f32 %v11416_v20 }
 0x8b5   :  { %v11429_v5 = vor.u32 1.1754944e-38, %v11428_v19  ;;  %vm11427_vm14 = vcmp.eq.f32.partialorder %v11426_v17, 8.507059e+37 }
 0x8b9   :  { %v19133_v1 = vpop.eup %19132 }
 0x8ba   :  { %v11418_v39 = vmul.f32 %v19133_v1, %v11416_v20  ;;  %vm11423_vm11 = vweird.f32 %v19133_v1 }
 0x8bb   :  { %vm11424_vm13 = vmor %vm11422_vm12, %vm11423_vm11 }
 0x8bc   :  { %v11419_v28 = vsub.f32 1.0, %v11418_v39 }
 0x8be   :  { %v11420_v44 = vmul.f32 %v19133_v1, %v11419_v28 }
 0x8c0   :  { %v11421_v43 = vadd.f32 %v19133_v1, %v11420_v44 }
 0x8c2   :  { %v11425_v10 = vsel %vm11424_vm13, %v19133_v1, %v11421_v43 }
 0x8c3   :  { %v11430_v58 = vsel %vm11427_vm14, %v11429_v5, %v11425_v10 }
 0x8c4   :  { %v11431_v22 = vmul.f32 %v19131_v7, %v11430_v58 }
 0x8c6   :  { %11432 = vst.msk [vmem:[#allocation2] sm:$0x3] %vm11407_vm10, %v11431_v22 }
 0x8c7   :  { %11443 = dma.vmem_to_hbm [thread:$0]  %s11439_s9, 32, %s11441_s29, [#allocation3]  }
 0x8c8   :  { %19158 = dma.done.wait [#allocation3], 32  }
 0x8c9   :  { %19159 = vsyncadd [#allocation3], 4294967264 }
 0x8ca   :  { %11448 = vsyncpa [#allocation3], 1 }

</bundles_post_ra>
